<compile_context>
chip_gen: v7x
topology: tpu7x:2x2x1
jax: 0.10.0
libtpu: 0.0.40
codegen_flags: <defaults>
</compile_context>

<pallas_src>
import functools

import jax
import jax.numpy as jnp
from jax.experimental import pallas as pl
from jax.experimental.pallas import tpu as pltpu


# ----------------------------------------------------------------------------
# Pallas kernel: tiled (x @ W + b) with optional fused ReLU.
# Grid = (N_tiles, K_tiles); K (reduction) is the last / "arbitrary" axis.
# f32 accumulation in a VMEM scratch that stays resident across the K axis
# (output BlockSpec returns the same block index for all k).
# ----------------------------------------------------------------------------
def _linear_kernel(x_ref, w_ref, b_ref, o_ref, acc_ref, *, apply_relu):
    k = pl.program_id(1)

    @pl.when(k == 0)
    def _():
        # Fold the bias into the accumulator init -> no epilogue add needed.
        acc_ref[...] = jnp.broadcast_to(b_ref[...], acc_ref.shape)

    # x_ref is (K_tiles, M, tk) and fully resident; pick this step's K chunk.
    acc_ref[...] += jnp.dot(
        x_ref[k], w_ref[...], preferred_element_type=jnp.float32
    )

    @pl.when(k == pl.num_programs(1) - 1)
    def _():
        out = acc_ref[...]
        if apply_relu:
            out = jnp.maximum(out, 0.0)
        o_ref[...] = out.astype(o_ref.dtype)


def pallas_linear(x, w, b, *, tn, tk, apply_relu, out_dtype=None):
    """y = relu?(x @ w + b). x:(M,K) bf16, w:(K,N) bf16, b:(N,) f32.

    Requires K % tk == 0 and N % tn == 0 (tiles are chosen per layer so the
    large weight matrices are never padded/copied at call time).
    """
    M, K = x.shape
    Kw, N = w.shape
    assert K == Kw and b.shape == (N,), (x.shape, w.shape, b.shape)
    assert K % tk == 0 and N % tn == 0, (K, tk, N, tn)
    if out_dtype is None:
        out_dtype = x.dtype
    kt = K // tk

    # Activations are tiny (a few hundred KB): keep the full K extent resident
    # in VMEM, chunked along a leading dim so the kernel indexes it dynamically.
    x3 = x.reshape(M, kt, tk).swapaxes(0, 1)  # (kt, M, tk)
    b2 = b.reshape(1, N)

    grid = (N // tn, kt)  # reduction axis last

    w_item = jnp.dtype(w.dtype).itemsize
    x_item = jnp.dtype(x.dtype).itemsize
    o_item = jnp.dtype(out_dtype).itemsize
    vmem_bytes = (
        2 * tk * tn * w_item          # double-buffered weight tile (dominant)
        + 2 * M * K * x_item          # resident activations
        + 2 * M * tn * o_item         # output tile
        + 2 * 1 * tn * 4              # bias tile
        + M * tn * 4                  # f32 accumulator scratch
        + (4 << 20)                   # headroom for compiler internals
    )
    # Raise above the v5e 16 MiB scoped default; stay well under v7x's 64 MiB.
    vmem_bytes = int(min(max(vmem_bytes, 32 << 20), 56 << 20))

    out = pl.pallas_call(
        functools.partial(_linear_kernel, apply_relu=apply_relu),
        out_shape=jax.ShapeDtypeStruct((M, N), out_dtype),
        grid_spec=pltpu.PrefetchScalarGridSpec(
            num_scalar_prefetch=0,
            grid=grid,
            in_specs=[
                pl.BlockSpec((kt, M, tk), lambda j, k: (0, 0, 0)),  # x: resident
                pl.BlockSpec((tk, tn), lambda j, k: (k, j)),        # weights
                pl.BlockSpec((1, tn), lambda j, k: (0, j)),         # bias
            ],
            out_specs=pl.BlockSpec((M, tn), lambda j, k: (0, j)),
            scratch_shapes=[pltpu.VMEM((M, tn), jnp.float32)],
        ),
        compiler_params=pltpu.CompilerParams(
            dimension_semantics=("parallel", "arbitrary"),
            vmem_limit_bytes=vmem_bytes,
        ),
    )(x3, w, b2)
    return out


# ----------------------------------------------------------------------------
# Parameter init (deterministic, synthetic) + forward wrapper.
# Weights are stored bf16 (streamed at half the HBM bytes); biases stay f32.
# The classifier head is padded once at init from num_classes to a multiple of
# 512 (1000 -> 1024) so no padding/copying happens per forward.
# ----------------------------------------------------------------------------
def init_vgg19_classifier_params(key, num_classes=1000):
    d_in = 512 * 7 * 7  # 25088, fixed by the module definition
    n3_pad = ((num_classes + 511) // 512) * 512  # 1000 -> 1024
    ks = jax.random.split(key, 6)
    scale = 0.01

    def _w(k, shape):
        return (jax.random.normal(k, shape, jnp.float32) * scale).astype(
            jnp.bfloat16
        )

    def _b(k, n):
        return jax.random.normal(k, (n,), jnp.float32) * scale

    w3 = _w(ks[4], (4096, num_classes))
    b3 = _b(ks[5], num_classes)
    params = {
        "w1": _w(ks[0], (d_in, 4096)),
        "b1": _b(ks[1], 4096),
        "w2": _w(ks[2], (4096, 4096)),
        "b2": _b(ks[3], 4096),
        "w3": jnp.pad(w3, ((0, 0), (0, n3_pad - num_classes))),
        "b3": jnp.pad(b3, ((0, n3_pad - num_classes),)),
    }
    return params


def vgg19_forward(x_nchw, params, num_classes=1000):
    """VGG19.forward with feature_mode=False: flatten + classifier."""
    B = x_nchw.shape[0]
    x = x_nchw.reshape(B, -1).astype(jnp.bfloat16)  # x.view(x.size(0), -1)

    # Linear(25088, 4096) + ReLU.  K=25088=14*1792, N=4096=2*2048.
    x = pallas_linear(x, params["w1"], params["b1"], tn=2048, tk=1792,
                      apply_relu=True)
    # TODO(synk): nn.Dropout() train-mode stochastic masking not implemented;
    # treated as inference-mode identity.
    # Linear(4096, 4096) + ReLU.
    x = pallas_linear(x, params["w2"], params["b2"], tn=2048, tk=2048,
                      apply_relu=True)
    # Linear(4096, num_classes); head pre-padded to 1024 outputs at init.
    x = pallas_linear(x, params["w3"], params["b3"], tn=512, tk=2048,
                      apply_relu=False, out_dtype=jnp.float32)
    return x[:, :num_classes]


if __name__ == "__main__":
    key = jax.random.PRNGKey(0)
    k_in, k_par = jax.random.split(key)

    # Input consistent with the classifier's expected 512*7*7 flattened size,
    # small batch of 2, NCHW like PyTorch.
    x = jax.random.normal(k_in, (2, 512, 7, 7), jnp.float32)
    params = init_vgg19_classifier_params(k_par, num_classes=1000)

    out = vgg19_forward(x, params, num_classes=1000)
    out = jax.block_until_ready(out)

    assert out.shape == (2, 1000), out.shape
    assert out.dtype == jnp.float32
    print("KERNEL_OK")
</pallas_src>

<mosaic_0001>
module attributes {stable_mosaic.version = 11 : i64} {
  func.func @_linear_kernel(%arg0: i32, %arg1: i32, %arg2: memref<14x2x1792xbf16, #tpu.memory_space<vmem>>, %arg3: memref<1792x2048xbf16, #tpu.memory_space<vmem>>, %arg4: memref<1x2048xf32, #tpu.memory_space<vmem>>, %arg5: memref<2x2048xbf16, #tpu.memory_space<vmem>>, %arg6: memref<2x2048xf32, #tpu.memory_space<vmem>>) attributes {dimension_semantics = [#tpu.dimension_semantics<parallel>, #tpu.dimension_semantics<arbitrary>], iteration_bounds = array<i64: 2, 14>, scalar_prefetch = 0 : i64, scratch_operands = 1 : i64, tpu.core_type = #tpu.core_type<tc>, window_params = [{pipeline_mode = #tpu.pipeline_mode<synchronous>, transform_indices = @transform_0, window_bounds = array<i64: 14, 2, 1792>}, {transform_indices = @transform_1, window_bounds = array<i64: 1792, 2048>}, {transform_indices = @transform_2, window_bounds = array<i64: 1, 2048>}, {transform_indices = @transform_3, window_bounds = array<i64: 2, 2048>}]} {
    %c0_i32 = arith.constant 0 : i32
    %0 = arith.cmpi eq, %arg1, %c0_i32 : i32
    %1 = arith.extui %0 : i1 to i32
    %c0_i32_0 = arith.constant 0 : i32
    %2 = arith.cmpi ne, %1, %c0_i32_0 : i32
    scf.if %2 {
      %c0_9 = arith.constant 0 : index
      %c0_10 = arith.constant 0 : index
      %14 = vector.load %arg4[%c0_9, %c0_10] : memref<1x2048xf32, #tpu.memory_space<vmem>>, vector<1x2048xf32>
      %15 = vector.shape_cast %14 : vector<1x2048xf32> to vector<1x2048xf32>
      %16 = vector.broadcast %15 : vector<1x2048xf32> to vector<2x2048xf32>
      %c0_11 = arith.constant 0 : index
      %c0_12 = arith.constant 0 : index
      %17 = vector.load %arg6[%c0_11, %c0_12] : memref<2x2048xf32, #tpu.memory_space<vmem>>, vector<2x2048xf32>
      tpu.vector_store %arg6[%c0_11, %c0_12], %16 {strides = array<i32>} : memref<2x2048xf32, #tpu.memory_space<vmem>>, vector<2x2048xf32>,
    } else {
    }
    %c0 = arith.constant 0 : index
    %c0_1 = arith.constant 0 : index
    %3 = vector.load %arg6[%c0, %c0_1] : memref<2x2048xf32, #tpu.memory_space<vmem>>, vector<2x2048xf32>
    %4 = arith.index_cast %arg1 : i32 to index
    %c0_2 = arith.constant 0 : index
    %c0_3 = arith.constant 0 : index
    %5 = vector.load %arg2[%4, %c0_2, %c0_3] : memref<14x2x1792xbf16, #tpu.memory_space<vmem>>, vector<1x2x1792xbf16>
    %6 = vector.shape_cast %5 : vector<1x2x1792xbf16> to vector<2x1792xbf16>
    %c0_4 = arith.constant 0 : index
    %c0_5 = arith.constant 0 : index
    %7 = vector.load %arg3[%c0_4, %c0_5] : memref<1792x2048xbf16, #tpu.memory_space<vmem>>, vector<1792x2048xbf16>
    %cst = arith.constant dense<0.000000e+00> : vector<2x2048xf32>
    %8 = tpu.matmul %6, %7, %cst {dimension_numbers = #tpu.dot_dimension_numbers<[1], [0], [0], [1], [0, 0, 1, 1], [], []>} : vector<2x1792xbf16>, vector<1792x2048xbf16>, vector<2x2048xf32> -> vector<2x2048xf32>
    %9 = arith.addf %3, %8 : vector<2x2048xf32>
    %c0_6 = arith.constant 0 : index
    %c0_7 = arith.constant 0 : index
    %10 = vector.load %arg6[%c0_6, %c0_7] : memref<2x2048xf32, #tpu.memory_space<vmem>>, vector<2x2048xf32>
    tpu.vector_store %arg6[%c0_6, %c0_7], %9 {strides = array<i32>} : memref<2x2048xf32, #tpu.memory_space<vmem>>, vector<2x2048xf32>,
    %c13_i32 = arith.constant 13 : i32
    %11 = arith.cmpi eq, %arg1, %c13_i32 : i32
    %12 = arith.extui %11 : i1 to i32
    %c0_i32_8 = arith.constant 0 : i32
    %13 = arith.cmpi ne, %12, %c0_i32_8 : i32
    scf.if %13 {
      %c0_9 = arith.constant 0 : index
      %c0_10 = arith.constant 0 : index
      %14 = vector.load %arg6[%c0_9, %c0_10] : memref<2x2048xf32, #tpu.memory_space<vmem>>, vector<2x2048xf32>
      %cst_11 = arith.constant 0.000000e+00 : f32
      %15 = vector.broadcast %cst_11 : f32 to vector<2x2048xf32>
      %16 = arith.maximumf %14, %15 : vector<2x2048xf32>
      %17 = arith.truncf %16 : vector<2x2048xf32> to vector<2x2048xbf16>
      %c0_12 = arith.constant 0 : index
      %c0_13 = arith.constant 0 : index
      %18 = vector.load %arg5[%c0_12, %c0_13] : memref<2x2048xbf16, #tpu.memory_space<vmem>>, vector<2x2048xbf16>
      tpu.vector_store %arg5[%c0_12, %c0_13], %17 {strides = array<i32>} : memref<2x2048xbf16, #tpu.memory_space<vmem>>, vector<2x2048xbf16>,
    } else {
    }
    return
  }
  func.func @transform_0(%arg0: i32, %arg1: i32) -> (i32, i32, i32) {
    %c0_i32 = arith.constant 0 : i32
    %c0_i32_0 = arith.constant 0 : i32
    %c0_i32_1 = arith.constant 0 : i32
    %c0_i32_2 = arith.constant 0 : i32
    return %c0_i32, %c0_i32_0, %c0_i32_1 : i32, i32, i32
  }
  func.func @transform_1(%arg0: i32, %arg1: i32) -> (i32, i32) {
    %c0_i32 = arith.constant 0 : i32
    return %arg1, %arg0 : i32, i32
  }
  func.func @transform_2(%arg0: i32, %arg1: i32) -> (i32, i32) {
    %c0_i32 = arith.constant 0 : i32
    %c0_i32_0 = arith.constant 0 : i32
    return %c0_i32, %arg0 : i32, i32
  }
  func.func @transform_3(%arg0: i32, %arg1: i32) -> (i32, i32) {
    %c0_i32 = arith.constant 0 : i32
    %c0_i32_0 = arith.constant 0 : i32
    return %c0_i32, %arg0 : i32, i32
  }
}

</mosaic_0001>

<bundles_post_ra>
// kernel: tpu_custom_call.1
= control target key start
LH: loop header
LB: loop body
LE: loop exit
PB: predicated region body
PF: predicated region fallthrough
CT: control target
= control target key end

     0   :  { %s18803_s0 = inlined_call_operand.hbm [shape: bf16[14,2,1792], index: 0, kind: input, shape index: {}]   ;;  %s18804_s1 = inlined_call_operand.hbm [shape: bf16[25088,4096], index: 1, kind: input, shape index: {}]   ;;  %s18805_s2 = inlined_call_operand.hbm [shape: f32[1,4096], index: 2, kind: input, shape index: {}]   ;;  %s18806_s3 = inlined_call_operand.hbm [shape: bf16[2,4096], index: 3, kind: output, shape index: {}]  }
   0x1   :  { %18816 = sst [smem:[#allocation16_spill]] %s18803_s0 }
   0x2   :  { %18817 = sst [smem:[#allocation17_spill]] %s18806_s3 }
   0x3   :  { %8 = vsyncpa [#allocation4], 0 }
   0x4   :  { %9 = vsyncpa [#allocation7], 0 }
   0x5   :  { %11 = vsyncpa [#allocation7 + $0x1], 0 }
   0x6   :  { %12 = vsyncpa [#allocation5], 0 }
   0x7   :  { %14 = vsyncpa [#allocation5 + $0x1], 0  ;;  %s16438_s12 = smov 0   ;;  %s16440_s13 = smov 0  }
   0x8   :  { %s16442_s14 = smov 0   ;;  %s16444_s15 = smov 0  }
   0x9   :  { %s16446_s16 = smov 0   ;;  %s16448_s17 = smov 0  }
   0xa   :  { %s16450_s18 = smov 0   ;;  %s16452_s19 = smov 0  }
   0xb   :  { %s16454_s20 = smov 0   ;;  %s16456_s21 = smov 0  }
   0xc   :  { %s16458_s22 = smov 0  }
   0xd LB: > { %s29_s23 = sadd.s32 1, %s16396_s20  ;;  %s32_s24 = sadd.s32 1, %s16400_s21  ;;  %s16404_s22 = sphi %s16458_s22, %s20_s22   ;;  %s16400_s21 = sphi %s16456_s21, %s18853_s21   ;;  %s16396_s20 = sphi %s16454_s20, %s18852_s20   ;;  %s16392_s19 = sphi %s16452_s19, %s18851_s19   ;;  %s16388_s18 = sphi %s16450_s18, %s18850_s18   ;;  %s16384_s17 = sphi %s16448_s17, %s18849_s17   ;;  %s16380_s16 = sphi %s16446_s16, %s18848_s16   ;;  %s16376_s15 = sphi %s16444_s15, %s18847_s15   ;;  %s16372_s14 = sphi %s16442_s14, %s18846_s14   ;;  %s16368_s13 = sphi %s16440_s13, %s18845_s13   ;;  %s16364_s12 = sphi %s16438_s12, %s18844_s12  }
   0xe   : > { %p30_p0 = scmp.ge.s32.totalorder %s29_s23, 14  ;;  %s62_s25 = sadd.s32 1, %s16384_s17 }
   0xf   : > { %p69_p1 = scmp.ne.s32.totalorder %s16384_s17, %s16380_s16  ;;  %p18812_p2 = scmp.eq.s32.totalorder %s16404_s22, 0 }
  0x10   : > { %s18855_s23 = smov (%p30_p0, %s29_s23), 0  ;;  %s18857_s24 = smov (!%p30_p0, %s32_s24), %s16400_s21 }
  0x11   : > { %18818 = sst [smem:[#allocation14_spill]] %s18855_s23  ;;  %s57_s26 = ssub.s32 %s16396_s20, %s18855_s23 }
  0x12   : > { %p16506_p3 = por %p18812_p2, %p69_p1  ;;  %p34_p4 = scmp.ge.s32.totalorder %s18857_s24, 2 }
  0x13   : > { %p18810_p5 = scmp.lt.s32.totalorder %s16404_s22, 28  ;;  %s164_s28 = sand.u32 1, %s16404_s22  }
  0x14   : > { %s18859_s24 = smov (%p34_p4, %s18857_s24), 0  ;;  %s166_s29 = sand.u32 1, %s16384_s17  }
  0x15   : > { %18820 = sst [smem:[#allocation15_spill]] %s18859_s24  ;;  %s16517_s30 = ssub.s32 %s16400_s21, %s18859_s24 }
  0x16   : > { %s16056_s4 = smul.u32 14336, %s166_s29  ;;  %s59_s5 = sor.u32 %s16517_s30, %s57_s26 }
  0x17   : > { %s14044_s6 = sshll.u32 %s16400_s21, 4  ;;  %p60_p6 = scmp.eq.s32.totalorder %s59_s5, 0 }
  0x18   : > { %s15861_s7 = smul.u32 7168, %s16396_s20  ;;  %s168_s8 = scalar_lea.vmem [#allocation6], %s16056_s4 }
  0x19   : > { %s178_s9 = sshll.u32 %s168_s8, 4  ;;  %p16531_p7 = pnand %p18810_p5, %p16506_p3  ;;  %s16525_s9 = int_to_ptr.vmem [resolvable:$true] %s178_s9 }
  0x1a   : > { %s16523_s10 = scalar_select %p60_p6, %s16384_s17, %s62_s25  }
  0x1b   : > { %s175_s11 = sadd.s32 %s15861_s7, %s14044_s6  ;;  %s16540_s25 = scalar_lea.sflag [#allocation7], %s164_s28 }
  0x1c   : > { %s14046_s23 = sshll.u32 %s175_s11, 6  ;;  %p16188_p9 = pneg %p16531_p7 }
  0x1d   : > { %s16538_s26 = scalar_lea.hbm %s18804_s1, %s14046_s23  ;;  %s16191_s5 = scalar_lea.hbm %s18804_s1, 6422528 }
  0x1e   : > { %s16186_s4 = scalar_lea.hbm %s16538_s26, 229376  ;;  %p16192_p12 = scmp.lt.u32.totalorder %s16538_s26, %s18804_s1 }
  0x1f   : > { %p16187_p8 = scmp.ne.s32.totalorder %s16538_s26, %s16186_s4  ;;  %p16193_p13 = scmp.lt.u32.totalorder %s16191_s5, %s16186_s4 }
  0x20   : > { %p16195_p1 = scmp.lt.u32.totalorder %s16186_s4, %s16538_s26 }
  0x21   : > { %p16189_p10 = pnand %p16188_p9, %p16187_p8  ;;  %p16194_p0 = por %p16193_p13, %p16192_p12 }
  0x23   : > { %p16190_p11 = pneg %p16189_p10  ;;  %p16196_p3 = por %p16195_p1, %p16194_p0 }
  0x25   : > { %p16197_p4 = pnand %p16196_p3, %p16190_p11 }
  0x27   : > { %16200 = shalt.err (!%p16197_p4)
}
  0x28   : > { %s16201_s28 = scalar_lea.vmem %s16525_s9, 229376  ;;  %s16406_s7 = smov [#allocation6]  }
  0x29   : > { %p16202_p6 = scmp.ne.s32.totalorder %s16525_s9, %s16201_s28  ;;  %s16206_s8 = sshll.u32 %s16406_s7, 4  ;;  %s16207_s8 = int_to_ptr.vmem [resolvable:$false] %s16206_s8 }
  0x2a   : > { %s16208_s11 = scalar_lea.vmem %s16207_s8, 458752  ;;  %p16209_p5 = scmp.lt.s32.totalorder %s16525_s9, %s16207_s8 }
  0x2b   : > { %p16204_p8 = pnand %p16202_p6, %p16188_p9  ;;  %p16210_p12 = scmp.lt.s32.totalorder %s16208_s11, %s16201_s28 }
  0x2d   : > { %p16205_p10 = pneg %p16204_p8  ;;  %p16211_p13 = por %p16210_p12, %p16209_p5 }
  0x2f   : > { %p16212_p0 = pnand %p16211_p13, %p16205_p10 }
  0x31   : > { %16215 = shalt.err (!%p16212_p0)
}
  0x32   : > { %s16407_s29 = smov 2048   ;;  %s16408_s4 = smov 1024  }
  0x33   : > { %s16409_s27 = smov 64   ;;  %s16569_s24 = sadd.s32 4294967295, %s16404_s22  }
  0x34   : > { %16075 = dma.hbm_to_vmem [thread:$0]  (!%p16531_p7), %s16538_s26, 229376, %s16525_s9, %s16540_s25, %s16407_s29, %s16408_s4, %s16409_s27  }
  0x35   : > { %p75_p5 = scmp.ne.s32.totalorder %s16380_s16, %s16376_s15  ;;  %p18811_p9 = scmp.eq.s32.totalorder %s16569_s24, 0 }
  0x36   : > { %p14041_p1 = scmp.ge.s32.totalorder %s16404_s22, 1  ;;  %p138_p4 = scmp.lt.s32.totalorder %s16404_s22, 29 }
  0x37   : > { %p16578_p3 = por %p18811_p9, %p75_p5  ;;  %s16410_s3 = smov [#allocation3]  }
  0x38   : > { %p16583_p6 = pnand %p14041_p1, %p138_p4  ;;  %s150_s9 = sshll.u32 %s16410_s3, 4  ;;  %s151_s9 = int_to_ptr.vmem [resolvable:$true] %s150_s9 }
  0x39   : > { %s18822_s5 = scalar_select %p16578_p3, 1, 0 }
  0x3a   : > { %s18823_s23 = scalar_select %p16583_p6, 1, 0 }
  0x3b   : > { %p16068_p7 = pneg %p16583_p6  ;;  %s18825_s0 = sld [smem:[#allocation16_spill]] }
  0x3d   : > { %p16591_p8 = pnand %p16068_p7, %p18811_p9 }
  0x3f   : > { %p16218_p12 = pneg %p16591_p8 }
  0x41   : > { %s16216_s28 = scalar_lea.hbm %s18825_s0, 3136 }
  0x42   : > { %p16217_p10 = scmp.ne.s32.totalorder %s18825_s0, %s16216_s28  ;;  %p16223_p5 = scmp.lt.u32.totalorder %s16216_s28, %s18825_s0 }
  0x44   : > { %p16219_p13 = pnand %p16218_p12, %p16217_p10 }
  0x46   : > { %p16220_p0 = pneg %p16219_p13 }
  0x48   : > { %p16225_p1 = pnand %p16223_p5, %p16220_p0 }
  0x4a   : > { %16228 = shalt.err (!%p16225_p1)
}
  0x4b   : > { %s16229_s4 = scalar_lea.vmem %s151_s9, 3136  ;;  %p16237_p11 = scmp.lt.s32.totalorder %s151_s9, %s151_s9 }
  0x4c   : > { %p16230_p4 = scmp.ne.s32.totalorder %s151_s9, %s16229_s4  ;;  %p16238_p2 = scmp.lt.s32.totalorder %s16229_s4, %s16229_s4 }
  0x4e   : > { %p16232_p7 = pnand %p16230_p4, %p16218_p12  ;;  %p16239_p3 = por %p16238_p2, %p16237_p11 }
  0x50   : > { %p16233_p9 = pneg %p16232_p7 }
  0x52   : > { %p16240_p6 = pnand %p16239_p3, %p16233_p9 }
  0x54   : > { %16243 = shalt.err (!%p16240_p6)
}
  0x55   : > { %s16411_s27 = smov 224   ;;  %s16412_s3 = smov 14  }
  0x56   : > { %16071 = dma.hbm_to_vmem [thread:$0]  (!%p16591_p8), %s18825_s0, 3136, %s151_s9, [#allocation4], %s16411_s27, %s16411_s27, %s16412_s3  }
  0x57   : > { %s14040_s28 = sadd.s32 4294967294, %s16404_s22   ;;  %p86_p2 = scmp.eq.s32.totalorder %s16517_s30, 0 }
  0x58   : > { %s88_s7 = sadd.s32 1, %s16372_s14  ;;  %p95_p9 = scmp.ne.s32.totalorder %s16372_s14, %s16368_s13 }
  0x59   : > { %s16617_s8 = scalar_select %p86_p2, %s16372_s14, %s88_s7  }
  0x5a   : > { %p18826_p11 = scmp.eq.s32.totalorder %s16404_s22, 0  ;;  %p101_p6 = scmp.ne.s32.totalorder %s16368_s13, %s16364_s12 }
  0x5b   : > { %p18828_p10 = scmp.eq.s32.totalorder %s16569_s24, 27  ;;  %p131_p8 = scmp.eq.s32.totalorder %s14040_s28, 27 }
  0x5c   : > { %p16621_p3 = por %p95_p9, %p18826_p11  ;;  %p18830_p13 = scmp.eq.s32.totalorder %s16569_s24, 0 }
  0x5d   : > { %p16629_p12 = por %p18828_p10, %p95_p9  ;;  %s190_s9 = sand.u32 1, %s16372_s14  }
  0x5e   : > { %p16635_p0 = por %p101_p6, %p18830_p13  ;;  %p16640_p5 = por %p131_p8, %p101_p6 }
  0x5f   : > { %s18829_s15 = scalar_select %p16629_p12, 1, 0 }
  0x60   : > { %s18832_s29 = scalar_select %p16640_p5, 1, 0 }
  0x61   : > { %s14047_s4 = sshll.u32 %s190_s9, 4  ;;  %s15862_s27 = sshll.u32 %s16400_s21, 8 }
  0x62   : > { %s16648_s6 = scalar_lea.hbm %s18805_s2, %s15862_s27  ;;  %s192_s28 = scalar_lea.vmem [#allocation8], %s14047_s4 }
  0x63   : > { %s200_s7 = sshll.u32 %s192_s28, 4  ;;  %p18833_p1 = scmp.lt.s32.totalorder %s16404_s22, 28  ;;  %s16650_s7 = int_to_ptr.vmem [resolvable:$true] %s200_s7 }
  0x64   : > { %s16244_s9 = scalar_lea.hbm %s16648_s6, 256  ;;  %s16249_s3 = scalar_lea.hbm %s18805_s2, 512 }
  0x65   : > { %p16656_p4 = pnand %p18833_p1, %p16621_p3  ;;  %p16245_p7 = scmp.ne.s32.totalorder %s16648_s6, %s16244_s9 }
  0x66   : > { %p16250_p3 = scmp.lt.u32.totalorder %s16648_s6, %s18805_s2  ;;  %p16251_p6 = scmp.lt.u32.totalorder %s16249_s3, %s16244_s9 }
  0x67   : > { %p16246_p2 = pneg %p16656_p4  ;;  %p16253_p8 = scmp.lt.u32.totalorder %s16244_s9, %s16648_s6 }
  0x68   : > { %p16252_p10 = por %p16251_p6, %p16250_p3 }
  0x69   : > { %p16247_p9 = pnand %p16246_p2, %p16245_p7 }
  0x6a   : > { %p16254_p13 = por %p16253_p8, %p16252_p10 }
  0x6b   : > { %p16248_p11 = pneg %p16247_p9 }
  0x6d   : > { %p16255_p1 = pnand %p16254_p13, %p16248_p11 }
  0x6f   : > { %16258 = shalt.err (!%p16255_p1)
}
  0x70   : > { %s16259_s28 = scalar_lea.vmem %s16650_s7, 256  ;;  %s16413_s4 = smov [#allocation8]  }
  0x71   : > { %p16260_p7 = scmp.ne.s32.totalorder %s16650_s7, %s16259_s28  ;;  %s16264_s27 = sshll.u32 %s16413_s4, 4  ;;  %s16265_s27 = int_to_ptr.vmem [resolvable:$false] %s16264_s27 }
  0x72   : > { %s16266_s11 = scalar_lea.vmem %s16265_s27, 512  ;;  %p16267_p12 = scmp.lt.s32.totalorder %s16650_s7, %s16265_s27 }
  0x73   : > { %p16262_p9 = pnand %p16260_p7, %p16246_p2  ;;  %p16268_p3 = scmp.lt.s32.totalorder %s16266_s11, %s16259_s28 }
  0x75   : > { %p16263_p5 = pneg %p16262_p9  ;;  %p16269_p6 = por %p16268_p3, %p16267_p12 }
  0x77   : > { %p16270_p10 = pnand %p16269_p6, %p16263_p5 }
  0x79   : > { %16273 = shalt.err (!%p16270_p10)
}
  0x7a   : > { %16078 = dma.hbm_to_vmem [thread:$0]  (!%p16656_p4), %s16648_s6, 256, %s16650_s7, %s16540_s25  }
  0x7b   : > { %p18835_p11 = scmp.ne.s32.totalorder %s18823_s23, 0 }
  0x7c   : > { %p18836_p2 = scmp.eq.s32.totalorder (!%p18835_p11), %s16569_s24, 0 }
  0x7d   : > { %209 = sbr.rel (%p18835_p11) target bundleno = 2234 (0x8ba), region = 32 }
  0x84   : > { %16347 = dma.done.wait (%p18836_p2), [#allocation4], 3136   ;;  %p18837_p8 = pmov %p18836_p2 }
  0x85   : > { %s215_s9 = sand.u32 1, %s16569_s24   ;;  %s217_s3 = sand.u32 1, %s16380_s16  }
  0x86   : > { %16349 = vsyncadd (%p18837_p8), [#allocation4], 4294964160  ;;  %s16057_s26 = smul.u32 14336, %s217_s3  ;;  %s216_s0 = scalar_lea.sflag [#allocation7], %s215_s9 }
  0x87   : > { %p18838_p12 = scmp.ne.s32.totalorder %s18822_s5, 0 }
  0x88   : > { %s16694_s28 = scalar_lea.vmem [#allocation6], %s16057_s26 }
  0x89   : > { %16351 = dma.done.wait (%p18838_p12), %s216_s0, 229376  }
  0x8a   : > { %16353 = vsyncadd (%p18838_p12), %s216_s0, 4294737920  ;;  %s226_s25 = sand.u32 1, %s16368_s13  }
  0x8b   : > { %s14052_s23 = sshll.u32 %s226_s25, 4 }
  0x8c   : > { %s228_s6 = scalar_lea.vmem [#allocation8], %s14052_s23 }
  0x8d   : > { %16355 = dma.done.wait (%p16635_p0), %s216_s0, 256  }
  0x8e   : > { %16357 = vsyncadd (%p16635_p0), %s216_s0, 4294967040  ;;  %s16707_s24 = scalar_lea.vmem [#allocation9], %s14052_s23  ;;  %p14054_p5 = scmp.ne.s32.totalorder %s16388_s18, 0 }
  0x8f   : > { %v268_v0 = vlaneseq (!%p14054_p5)  ;;  %v16414_v1 = vmov (!%p14054_p5), 1983009808   ;;  %v264_v4 = vld [vmem:[%s228_s6] sm:$0xff] (!%p14054_p5)  ;;  %v265_v14 = vld [vmem:[%s228_s6 + $0x8] sm:$0xff] (!%p14054_p5) }
  0x90   : > { %263 = sbr.rel (%p14054_p5) target bundleno = 164 (0xa4), region = 48  ;;  %v335_v2 = vunpack.c.l.s4 (!%p14054_p5), %v16414_v1 }
  0x91   : > { %v269_v3 = vshrl.u32 (!%p14054_p5), %v268_v0, 7 }
  0x92   : > { %v336_v5 = vunpack.c.0.s8 (!%p14054_p5), %v335_v2 }
  0x93   : > { %v270_v6 = vsub.s32 (!%p14054_p5), 0, %v269_v3  ;;  %v274_v7 = vsub.s32 (!%p14054_p5), 1, %v269_v3  ;;  %v278_v8 = vsub.s32 (!%p14054_p5), 2, %v269_v3  ;;  %v282_v9 = vsub.s32 (!%p14054_p5), 3, %v269_v3 }
  0x94   : > { %v339_v10 = vsub.s32 (!%p14054_p5), %v336_v5, %v269_v3  ;;  %v286_v11 = vsub.s32 (!%p14054_p5), 4, %v269_v3  ;;  %v290_v12 = vsub.s32 (!%p14054_p5), 5, %v269_v3  ;;  %v294_v13 = vsub.s32 (!%p14054_p5), 6, %v269_v3 }
  0x95   : > { %v271_v15 = vrot.slane (!%p14054_p5), %v264_v4, %v270_v6  ;;  %v275_v16 = vrot.slane (!%p14054_p5), %v264_v4, %v274_v7  ;;  %v279_v17 = vrot.slane (!%p14054_p5), %v264_v4, %v278_v8  ;;  %v283_v18 = vrot.slane (!%p14054_p5), %v264_v4, %v282_v9 }
  0x96   : > { %v287_v19 = vrot.slane (!%p14054_p5), %v264_v4, %v286_v11  ;;  %v291_v20 = vrot.slane (!%p14054_p5), %v264_v4, %v290_v12  ;;  %v295_v21 = vrot.slane (!%p14054_p5), %v264_v4, %v294_v13  ;;  %v298_v22 = vsub.s32 (!%p14054_p5), 7, %v269_v3 }
  0x97   : > { %v332_v23 = vcombine.low %v271_v15, %v275_v16  ;;  %v333_v24 = vcombine.low %v279_v17, %v283_v18  ;;  %v303_v25 = vrot.slane %v265_v14, %v270_v6  ;;  %v307_v26 = vrot.slane %v265_v14, %v274_v7 }
  0x98   : > { %v299_v27 = vrot.slane %v264_v4, %v298_v22  ;;  %v349_v28 = vcombine.low %v287_v19, %v291_v20  ;;  %v311_v29 = vrot.slane %v265_v14, %v278_v8  ;;  %v315_v30 = vrot.slane %v265_v14, %v282_v9 }
  0x99   : > { %v340_v31 = vrot.slane %v332_v23, %v339_v10  ;;  %v347_v32 = vrot.slane %v333_v24, %v339_v10  ;;  %v366_v33 = vcombine.low %v303_v25, %v307_v26  ;;  %v319_v34 = vrot.slane %v265_v14, %v286_v11 }
  0x9a   : > { %v350_v35 = vcombine.low %v295_v21, %v299_v27  ;;  %v357_v36 = vrot.slane %v349_v28, %v339_v10  ;;  %v367_v37 = vcombine.low %v311_v29, %v315_v30  ;;  %v323_v38 = vrot.slane %v265_v14, %v290_v12 }
  0x9b   : > { %v348_v39 = vcombine.low %v340_v31, %v347_v32  ;;  %v374_v40 = vrot.slane %v366_v33, %v339_v10  ;;  %v327_v41 = vrot.slane %v265_v14, %v294_v13  ;;  %v331_v42 = vrot.slane %v265_v14, %v298_v22 }
  0x9c   : > { %v364_v43 = vrot.slane %v350_v35, %v339_v10  ;;  %v381_v44 = vrot.slane %v367_v37, %v339_v10  ;;  %v383_v45 = vcombine.low %v319_v34, %v323_v38 }
  0x9d   : > { %404 = vst [vmem:[#allocation2] sm:$0xff] %v348_v39  ;;  %v384_v46 = vcombine.low %v327_v41, %v331_v42 }
  0x9e   : > { %v365_v47 = vcombine.low %v357_v36, %v364_v43  ;;  %v382_v48 = vcombine.low %v374_v40, %v381_v44  ;;  %v391_v49 = vrot.slane %v383_v45, %v339_v10 }
  0x9f   : > { %v398_v50 = vrot.slane %v384_v46, %v339_v10 }
  0xa0   : > { %405 = vst [vmem:[#allocation2 + $0x8] sm:$0xff] %v365_v47  ;;  %406 = vst [vmem:[#allocation2 + $0x10] sm:$0xff] %v382_v48 }
  0xa1   : > { %v399_v51 = vcombine.low %v391_v49, %v398_v50 }
  0xa3   : > { %407 = vst [vmem:[#allocation2 + $0x18] sm:$0xff] %v399_v51 }
  0xa4 PF: > { %v416_v52 = vld [vmem:[%s16694_s28] sm:$0xff]  ;;  %v417_v54 = vld [vmem:[%s16694_s28 + $0x8] sm:$0xff]  ;;  %v16415_v20 = vmov 1966171168   ;;  %v2214_v22 = vlaneseq  ;;  %s412_s5 = smul.u32 14, %s16388_s18  ;;  %p15847_p0 = scmp.ne.s32.totalorder %s16388_s18, 13 }
  0xa5   : > { %v424_v53 = vld [vmem:[%s16694_s28 + $0x40] sm:$0xff]  ;;  %v425_v56 = vld [vmem:[%s16694_s28 + $0x48] sm:$0xff]  ;;  %v2212_v21 = vunpack.c.l.s4 %v16415_v20 }
  0xa6   : > { %v14056_v55 = vcombine.high %v416_v52, %v424_v53  ;;  %v14055_v57 = vcombine.low %v416_v52, %v424_v53  ;;  %v432_v58 = vld [vmem:[%s16694_s28 + $0x80] sm:$0xff]  ;;  %v14058_v60 = vcombine.high %v417_v54, %v425_v56  ;;  %v14057_v61 = vcombine.low %v417_v54, %v425_v56  ;;  %v433_v63 = vld [vmem:[%s16694_s28 + $0x88] sm:$0xff]  ;;  %s16744_s30 = scalar_lea.vmem [#allocation3], %s412_s5 }
  0xa7   : > { %v440_v59 = vld [vmem:[%s16694_s28 + $0xc0] sm:$0xff]  ;;  %v441_v0 = vld [vmem:[%s16694_s28 + $0xc8] sm:$0xff]  ;;  %v2213_v31 = vunpack.c.0.s8 %v2212_v21  ;;  %v16733_v32 = vshrl.u32 %v2214_v22, 7 }
  0xa8   : > { %v14072_v62 = vcombine.high %v432_v58, %v440_v59  ;;  %v448_v1 = vld [vmem:[%s16694_s28 + $0x100] sm:$0xff]  ;;  %11280 = vmatprep.subr.bf16.mxu0 %v14056_v55  ;;  %v14074_v2 = vcombine.high %v433_v63, %v441_v0  ;;  %v449_v4 = vld [vmem:[%s16694_s28 + $0x108] sm:$0xff]  ;;  %11567 = vmatprep.subr.bf16.mxu1 %v14058_v60  ;;  %v14071_v6 = vcombine.low %v432_v58, %v440_v59 }
  0xa9   : > { %v456_v3 = vld [vmem:[%s16694_s28 + $0x140] sm:$0xff]  ;;  %v457_v5 = vld [vmem:[%s16694_s28 + $0x148] sm:$0xff]  ;;  %11281 = vmatpush1.bf16.msra.mxu0 %v14055_v57  ;;  %11568 = vmatpush1.bf16.msra.mxu1 %v14057_v61  ;;  %v14073_v7 = vcombine.low %v433_v63, %v441_v0  ;;  %v16740_v41 = vsub.s32 %v2213_v31, %v16733_v32 }
  0xaa   : > { %11282 = vmatprep.subr.bf16.mxu0 %v14072_v62  ;;  %v14088_v8 = vcombine.high %v448_v1, %v456_v3  ;;  %11569 = vmatprep.subr.bf16.mxu1 %v14074_v2  ;;  %v14090_v9 = vcombine.high %v449_v4, %v457_v5  ;;  %v464_v10 = vld [vmem:[%s16694_s28 + $0x180] sm:$0xff]  ;;  %v465_v12 = vld [vmem:[%s16694_s28 + $0x188] sm:$0xff]  ;;  %v14087_v14 = vcombine.low %v448_v1, %v456_v3 }
  0xab   : > { %v472_v11 = vld [vmem:[%s16694_s28 + $0x1c0] sm:$0xff]  ;;  %v473_v13 = vld [vmem:[%s16694_s28 + $0x1c8] sm:$0xff]  ;;  %v14089_v15 = vcombine.low %v449_v4, %v457_v5 }
  0xac   : > { %v14104_v16 = vcombine.high %v464_v10, %v472_v11  ;;  %v14106_v17 = vcombine.high %v465_v12, %v473_v13  ;;  %v480_v18 = vld [vmem:[%s16694_s28 + $0x200] sm:$0xff]  ;;  %v481_v23 = vld [vmem:[%s16694_s28 + $0x208] sm:$0xff]  ;;  %v14103_v25 = vcombine.low %v464_v10, %v472_v11  ;;  %v14105_v26 = vcombine.low %v465_v12, %v473_v13 }
  0xad   : > { %11283 = vmatpush1.bf16.msra.mxu0 %v14071_v6  ;;  %11570 = vmatpush1.bf16.msra.mxu1 %v14073_v7  ;;  %v488_v19 = vld [vmem:[%s16694_s28 + $0x240] sm:$0xff]  ;;  %v489_v24 = vld [vmem:[%s16694_s28 + $0x248] sm:$0xff] }
  0xae   : > { %11284 = vmatprep.subr.bf16.mxu0 %v14088_v8  ;;  %11571 = vmatprep.subr.bf16.mxu1 %v14090_v9  ;;  %v14120_v27 = vcombine.high %v480_v18, %v488_v19  ;;  %v14122_v28 = vcombine.high %v481_v23, %v489_v24  ;;  %v496_v29 = vld [vmem:[%s16694_s28 + $0x280] sm:$0xff]  ;;  %v497_v33 = vld [vmem:[%s16694_s28 + $0x288] sm:$0xff]  ;;  %v14119_v35 = vcombine.low %v480_v18, %v488_v19 }
  0xaf   : > { %v504_v30 = vld [vmem:[%s16694_s28 + $0x2c0] sm:$0xff]  ;;  %v505_v34 = vld [vmem:[%s16694_s28 + $0x2c8] sm:$0xff]  ;;  %v14121_v36 = vcombine.low %v481_v23, %v489_v24 }
  0xb0   : > { %v14136_v37 = vcombine.high %v496_v29, %v504_v30  ;;  %v14138_v38 = vcombine.high %v497_v33, %v505_v34  ;;  %v512_v39 = vld [vmem:[%s16694_s28 + $0x300] sm:$0xff]  ;;  %v513_v42 = vld [vmem:[%s16694_s28 + $0x308] sm:$0xff]  ;;  %v14135_v44 = vcombine.low %v496_v29, %v504_v30  ;;  %v14137_v45 = vcombine.low %v497_v33, %v505_v34 }
  0xb1   : > { %11285 = vmatpush1.bf16.msra.mxu0 %v14087_v14  ;;  %11572 = vmatpush1.bf16.msra.mxu1 %v14089_v15  ;;  %v520_v40 = vld [vmem:[%s16694_s28 + $0x340] sm:$0xff]  ;;  %v521_v43 = vld [vmem:[%s16694_s28 + $0x348] sm:$0xff] }
  0xb2   : > { %11286 = vmatprep.subr.bf16.mxu0 %v14104_v16  ;;  %11573 = vmatprep.subr.bf16.mxu1 %v14106_v17  ;;  %v14152_v46 = vcombine.high %v512_v39, %v520_v40  ;;  %v16747_v47 = vld [vmem:[%s16744_s30] sm:$0xff]  ;;  %v14154_v48 = vcombine.high %v513_v42, %v521_v43  ;;  %v529_v52 = vld [vmem:[%s16694_s28 + $0x388] sm:$0xff]  ;;  %v14151_v54 = vcombine.low %v512_v39, %v520_v40 }
  0xb3   : > { %v528_v49 = vld [vmem:[%s16694_s28 + $0x380] sm:$0xff]  ;;  %v16753_v51 = vrot.slane %v16747_v47, %v16740_v41  ;;  %v537_v53 = vld [vmem:[%s16694_s28 + $0x3c8] sm:$0xff]  ;;  %v14153_v56 = vcombine.low %v513_v42, %v521_v43 }
  0xb4   : > { %v536_v50 = vld [vmem:[%s16694_s28 + $0x3c0] sm:$0xff]  ;;  %v14170_v58 = vcombine.high %v529_v52, %v537_v53  ;;  %v545_v62 = vld [vmem:[%s16694_s28 + $0x408] sm:$0xff]  ;;  %v14169_v1 = vcombine.low %v529_v52, %v537_v53 }
  0xb5   : > { %11287 = vmatpush1.bf16.msra.mxu0 %v14103_v25  ;;  %11574 = vmatpush1.bf16.msra.mxu1 %v14105_v26  ;;  %v2225_v55 = vcombine.high %v16753_v51, %v16753_v51  ;;  %v14168_v57 = vcombine.high %v528_v49, %v536_v50  ;;  %v544_v59 = vld [vmem:[%s16694_s28 + $0x400] sm:$0xff]  ;;  %v553_v63 = vld [vmem:[%s16694_s28 + $0x448] sm:$0xff]  ;;  %v14167_v0 = vcombine.low %v528_v49, %v536_v50 }
  0xb6   : > { %11288 = vmatprep.subr.bf16.mxu0 %v14120_v27  ;;  %11575 = vmatprep.subr.bf16.mxu1 %v14122_v28  ;;  %v552_v60 = vld [vmem:[%s16694_s28 + $0x440] sm:$0xff]  ;;  %v14186_v3 = vcombine.high %v545_v62, %v553_v63  ;;  %v561_v6 = vld [vmem:[%s16694_s28 + $0x488] sm:$0xff]  ;;  %v14185_v9 = vcombine.low %v545_v62, %v553_v63 }
  0xb7   : > { %v16762_v61 = vrot.slane %v2225_v55, %v16740_v41  ;;  %v14184_v2 = vcombine.high %v544_v59, %v552_v60  ;;  %v560_v4 = vld [vmem:[%s16694_s28 + $0x480] sm:$0xff]  ;;  %v569_v7 = vld [vmem:[%s16694_s28 + $0x4c8] sm:$0xff]  ;;  %v14183_v8 = vcombine.low %v544_v59, %v552_v60 }
  0xb8   : > { %v568_v5 = vld [vmem:[%s16694_s28 + $0x4c0] sm:$0xff]  ;;  %v14202_v11 = vcombine.high %v561_v6, %v569_v7  ;;  %v577_v14 = vld [vmem:[%s16694_s28 + $0x508] sm:$0xff]  ;;  %v14201_v17 = vcombine.low %v561_v6, %v569_v7 }
  0xb9   : > { %11289 = vmatpush1.bf16.msra.mxu0 %v14119_v35  ;;  %11576 = vmatpush1.bf16.msra.mxu1 %v14121_v36  ;;  %v14200_v10 = vcombine.high %v560_v4, %v568_v5  ;;  %v576_v12 = vld [vmem:[%s16694_s28 + $0x500] sm:$0xff]  ;;  %v585_v15 = vld [vmem:[%s16694_s28 + $0x548] sm:$0xff]  ;;  %v14199_v16 = vcombine.low %v560_v4, %v568_v5 }
  0xba   : > { %11290 = vmatprep.subr.bf16.mxu0 %v14136_v37  ;;  %11577 = vmatprep.subr.bf16.mxu1 %v14138_v38  ;;  %v584_v13 = vld [vmem:[%s16694_s28 + $0x540] sm:$0xff]  ;;  %v14218_v19 = vcombine.high %v577_v14, %v585_v15  ;;  %v593_v22 = vld [vmem:[%s16694_s28 + $0x588] sm:$0xff]  ;;  %v14217_v25 = vcombine.low %v577_v14, %v585_v15 }
  0xbb   : > { %11312 = vmatprep.mubr.bf16.mxu0 %v16762_v61  ;;  %11599 = vmatprep.mubr.bf16.mxu1 %v16762_v61  ;;  %v14216_v18 = vcombine.high %v576_v12, %v584_v13  ;;  %v592_v20 = vld [vmem:[%s16694_s28 + $0x580] sm:$0xff]  ;;  %v601_v23 = vld [vmem:[%s16694_s28 + $0x5c8] sm:$0xff]  ;;  %v14215_v24 = vcombine.low %v576_v12, %v584_v13 }
  0xbc   : > { %v600_v21 = vld [vmem:[%s16694_s28 + $0x5c0] sm:$0xff]  ;;  %v14234_v27 = vcombine.high %v593_v22, %v601_v23  ;;  %v609_v30 = vld [vmem:[%s16694_s28 + $0x608] sm:$0xff]  ;;  %v14233_v34 = vcombine.low %v593_v22, %v601_v23 }
  0xbd   : > { %11291 = vmatpush1.bf16.msra.mxu0 %v14135_v44  ;;  %11578 = vmatpush1.bf16.msra.mxu1 %v14137_v45  ;;  %v14232_v26 = vcombine.high %v592_v20, %v600_v21  ;;  %v608_v28 = vld [vmem:[%s16694_s28 + $0x600] sm:$0xff]  ;;  %v617_v31 = vld [vmem:[%s16694_s28 + $0x648] sm:$0xff]  ;;  %v14231_v33 = vcombine.low %v592_v20, %v600_v21  ;;  %v16812_v20 = vcombine.high %v16762_v61, %v16762_v61 }
  0xbe   : > { %11292 = vmatprep.subr.bf16.mxu0 %v14152_v46  ;;  %11579 = vmatprep.subr.bf16.mxu1 %v14154_v48  ;;  %v616_v29 = vld [vmem:[%s16694_s28 + $0x640] sm:$0xff]  ;;  %v14250_v36 = vcombine.high %v609_v30, %v617_v31  ;;  %v625_v39 = vld [vmem:[%s16694_s28 + $0x688] sm:$0xff]  ;;  %v14249_v43 = vcombine.low %v609_v30, %v617_v31 }
  0xbf   : > { %v14248_v35 = vcombine.high %v608_v28, %v616_v29  ;;  %v624_v37 = vld [vmem:[%s16694_s28 + $0x680] sm:$0xff]  ;;  %v633_v40 = vld [vmem:[%s16694_s28 + $0x6c8] sm:$0xff]  ;;  %v14247_v42 = vcombine.low %v608_v28, %v616_v29 }
  0xc0   : > { %v632_v38 = vld [vmem:[%s16694_s28 + $0x6c0] sm:$0xff]  ;;  %v14266_v45 = vcombine.high %v625_v39, %v633_v40  ;;  %v641_v49 = vld [vmem:[%s16694_s28 + $0x708] sm:$0xff]  ;;  %v14265_v53 = vcombine.low %v625_v39, %v633_v40 }
  0xc1   : > { %11293 = vmatpush1.bf16.msra.mxu0 %v14151_v54  ;;  %11580 = vmatpush1.bf16.msra.mxu1 %v14153_v56  ;;  %v14264_v44 = vcombine.high %v624_v37, %v632_v38  ;;  %v640_v46 = vld [vmem:[%s16694_s28 + $0x700] sm:$0xff]  ;;  %v649_v50 = vld [vmem:[%s16694_s28 + $0x748] sm:$0xff]  ;;  %v14263_v52 = vcombine.low %v624_v37, %v632_v38 }
  0xc2   : > { %11294 = vmatprep.subr.bf16.mxu0 %v14168_v57  ;;  %11581 = vmatprep.subr.bf16.mxu1 %v14170_v58  ;;  %v648_v48 = vld [vmem:[%s16694_s28 + $0x740] sm:$0xff]  ;;  %v14282_v55 = vcombine.high %v641_v49, %v649_v50  ;;  %v657_v58 = vld [vmem:[%s16694_s28 + $0x788] sm:$0xff]  ;;  %v14281_v62 = vcombine.low %v641_v49, %v649_v50 }
  0xc3   : > { %v14280_v54 = vcombine.high %v640_v46, %v648_v48  ;;  %v656_v56 = vld [vmem:[%s16694_s28 + $0x780] sm:$0xff]  ;;  %v665_v59 = vld [vmem:[%s16694_s28 + $0x7c8] sm:$0xff]  ;;  %v14279_v60 = vcombine.low %v640_v46, %v648_v48 }
  0xc4   : > { %v664_v57 = vld [vmem:[%s16694_s28 + $0x7c0] sm:$0xff]  ;;  %v681_v4 = vld [vmem:[%s16694_s28 + $0x848] sm:$0xff]  ;;  %v14297_v6 = vcombine.low %v657_v58, %v665_v59 }
  0xc5   : > { %11295 = vmatpush1.bf16.msra.mxu0 %v14167_v0  ;;  %11582 = vmatpush1.bf16.msra.mxu1 %v14169_v1  ;;  %v14296_v63 = vcombine.high %v656_v56, %v664_v57  ;;  %v14298_v0 = vcombine.high %v657_v58, %v665_v59  ;;  %v672_v1 = vld [vmem:[%s16694_s28 + $0x800] sm:$0xff]  ;;  %v14295_v5 = vcombine.low %v656_v56, %v664_v57  ;;  %v689_v12 = vld [vmem:[%s16694_s28 + $0x888] sm:$0xff] }
  0xc6   : > { %11296 = vmatprep.subr.bf16.mxu0 %v14184_v2  ;;  %11583 = vmatprep.subr.bf16.mxu1 %v14186_v3  ;;  %v680_v2 = vld [vmem:[%s16694_s28 + $0x840] sm:$0xff]  ;;  %v673_v3 = vld [vmem:[%s16694_s28 + $0x808] sm:$0xff] }
  0xc7   : > { %v14312_v7 = vcombine.high %v672_v1, %v680_v2  ;;  %v697_v13 = vld [vmem:[%s16694_s28 + $0x8c8] sm:$0xff]  ;;  %v14311_v14 = vcombine.low %v672_v1, %v680_v2  ;;  %v14313_v15 = vcombine.low %v673_v3, %v681_v4 }
  0xc8   : > { %v713_v21 = vld [vmem:[%s16694_s28 + $0x948] sm:$0xff]  ;;  %v14329_v23 = vcombine.low %v689_v12, %v697_v13 }
  0xc9   : > { %11297 = vmatpush1.bf16.msra.mxu0 %v14183_v8  ;;  %11584 = vmatpush1.bf16.msra.mxu1 %v14185_v9  ;;  %v14314_v8 = vcombine.high %v673_v3, %v681_v4  ;;  %v688_v9 = vld [vmem:[%s16694_s28 + $0x880] sm:$0xff]  ;;  %v721_v28 = vld [vmem:[%s16694_s28 + $0x988] sm:$0xff] }
  0xca   : > { %11298 = vmatprep.subr.bf16.mxu0 %v14200_v10  ;;  %11585 = vmatprep.subr.bf16.mxu1 %v14202_v11  ;;  %v696_v10 = vld [vmem:[%s16694_s28 + $0x8c0] sm:$0xff]  ;;  %v16804_v11 = vrot.slane %v16753_v51, %v16740_v41  ;;  %v705_v51 = vld [vmem:[%s16694_s28 + $0x908] sm:$0xff] }
  0xcb   : > { %v14327_v22 = vcombine.low %v688_v9, %v696_v10  ;;  %v729_v29 = vld [vmem:[%s16694_s28 + $0x9c8] sm:$0xff]  ;;  %v14345_v31 = vcombine.low %v705_v51, %v713_v21 }
  0xcc   : > { %v737_v37 = vld [vmem:[%s16694_s28 + $0xa08] sm:$0xff]  ;;  %v14361_v40 = vcombine.low %v721_v28, %v729_v29 }
  0xcd   : > { %11299 = vmatpush1.bf16.msra.mxu0 %v14199_v16  ;;  %11586 = vmatpush1.bf16.msra.mxu1 %v14201_v17  ;;  %v14328_v16 = vcombine.high %v688_v9, %v696_v10  ;;  %v14330_v17 = vcombine.high %v689_v12, %v697_v13  ;;  %v745_v38 = vld [vmem:[%s16694_s28 + $0xa48] sm:$0xff] }
  0xce   : > { %11300 = vmatprep.subr.bf16.mxu0 %v14216_v18  ;;  %11587 = vmatprep.subr.bf16.mxu1 %v14218_v19  ;;  %v704_v18 = vld [vmem:[%s16694_s28 + $0x900] sm:$0xff]  ;;  %v753_v46 = vld [vmem:[%s16694_s28 + $0xa88] sm:$0xff]  ;;  %v14377_v50 = vcombine.low %v737_v37, %v745_v38 }
  0xcf   : > { %v712_v19 = vld [vmem:[%s16694_s28 + $0x940] sm:$0xff]  ;;  %v761_v48 = vld [vmem:[%s16694_s28 + $0xac8] sm:$0xff] }
  0xd0   : > { %v14343_v30 = vcombine.low %v704_v18, %v712_v19  ;;  %v769_v56 = vld [vmem:[%s16694_s28 + $0xb08] sm:$0xff]  ;;  %v14393_v59 = vcombine.low %v753_v46, %v761_v48 }
  0xd1   : > { %11301 = vmatpush1.bf16.msra.mxu0 %v14215_v24  ;;  %11588 = vmatpush1.bf16.msra.mxu1 %v14217_v25  ;;  %v14344_v24 = vcombine.high %v704_v18, %v712_v19  ;;  %v14346_v25 = vcombine.high %v705_v51, %v713_v21  ;;  %v777_v57 = vld [vmem:[%s16694_s28 + $0xb48] sm:$0xff] }
  0xd2   : > { %11302 = vmatprep.subr.bf16.mxu0 %v14232_v26  ;;  %11589 = vmatprep.subr.bf16.mxu1 %v14234_v27  ;;  %v720_v26 = vld [vmem:[%s16694_s28 + $0x980] sm:$0xff]  ;;  %v785_v1 = vld [vmem:[%s16694_s28 + $0xb88] sm:$0xff]  ;;  %v14409_v4 = vcombine.low %v769_v56, %v777_v57 }
  0xd3   : > { %v728_v27 = vld [vmem:[%s16694_s28 + $0x9c0] sm:$0xff]  ;;  %v793_v2 = vld [vmem:[%s16694_s28 + $0xbc8] sm:$0xff] }
  0xd4   : > { %v14359_v39 = vcombine.low %v720_v26, %v728_v27  ;;  %v801_v9 = vld [vmem:[%s16694_s28 + $0xc08] sm:$0xff]  ;;  %v14425_v13 = vcombine.low %v785_v1, %v793_v2 }
  0xd5   : > { %11303 = vmatpush1.bf16.msra.mxu0 %v14231_v33  ;;  %11590 = vmatpush1.bf16.msra.mxu1 %v14233_v34  ;;  %v14360_v33 = vcombine.high %v720_v26, %v728_v27  ;;  %v14362_v34 = vcombine.high %v721_v28, %v729_v29  ;;  %v809_v10 = vld [vmem:[%s16694_s28 + $0xc48] sm:$0xff] }
  0xd6   : > { %11304 = vmatprep.subr.bf16.mxu0 %v14248_v35  ;;  %11591 = vmatprep.subr.bf16.mxu1 %v14250_v36  ;;  %v736_v35 = vld [vmem:[%s16694_s28 + $0xa00] sm:$0xff]  ;;  %v817_v18 = vld [vmem:[%s16694_s28 + $0xc88] sm:$0xff]  ;;  %v14441_v21 = vcombine.low %v801_v9, %v809_v10 }
  0xd7   : > { %v744_v36 = vld [vmem:[%s16694_s28 + $0xa40] sm:$0xff]  ;;  %v825_v19 = vld [vmem:[%s16694_s28 + $0xcc8] sm:$0xff] }
  0xd8   : > { %v14375_v49 = vcombine.low %v736_v35, %v744_v36  ;;  %v833_v26 = vld [vmem:[%s16694_s28 + $0xd08] sm:$0xff]  ;;  %v14457_v29 = vcombine.low %v817_v18, %v825_v19 }
  0xd9   : > { %11305 = vmatpush1.bf16.msra.mxu0 %v14247_v42  ;;  %11592 = vmatpush1.bf16.msra.mxu1 %v14249_v43  ;;  %v14376_v42 = vcombine.high %v736_v35, %v744_v36  ;;  %v14378_v43 = vcombine.high %v737_v37, %v745_v38  ;;  %v841_v27 = vld [vmem:[%s16694_s28 + $0xd48] sm:$0xff] }
  0xda   : > { %11306 = vmatprep.subr.bf16.mxu0 %v14264_v44  ;;  %11593 = vmatprep.subr.bf16.mxu1 %v14266_v45  ;;  %v752_v44 = vld [vmem:[%s16694_s28 + $0xa80] sm:$0xff]  ;;  %v849_v35 = vld [vmem:[%s16694_s28 + $0xd88] sm:$0xff]  ;;  %v14473_v38 = vcombine.low %v833_v26, %v841_v27 }
  0xdb   : > { %v760_v45 = vld [vmem:[%s16694_s28 + $0xac0] sm:$0xff]  ;;  %v857_v36 = vld [vmem:[%s16694_s28 + $0xdc8] sm:$0xff] }
  0xdc   : > { %v14391_v58 = vcombine.low %v752_v44, %v760_v45 }
  0xdd   : > { %11307 = vmatpush1.bf16.msra.mxu0 %v14263_v52  ;;  %11594 = vmatpush1.bf16.msra.mxu1 %v14265_v53  ;;  %v14392_v52 = vcombine.high %v752_v44, %v760_v45  ;;  %v14394_v53 = vcombine.high %v753_v46, %v761_v48  ;;  %v865_v44 = vld [vmem:[%s16694_s28 + $0xe08] sm:$0xff]  ;;  %v14489_v48 = vcombine.low %v849_v35, %v857_v36 }
  0xde   : > { %11308 = vmatprep.subr.bf16.mxu0 %v14280_v54  ;;  %11595 = vmatprep.subr.bf16.mxu1 %v14282_v55  ;;  %v768_v54 = vld [vmem:[%s16694_s28 + $0xb00] sm:$0xff]  ;;  %v873_v45 = vld [vmem:[%s16694_s28 + $0xe48] sm:$0xff] }
  0xdf   : > { %v776_v55 = vld [vmem:[%s16694_s28 + $0xb40] sm:$0xff] }
  0xe0   : > { %v14407_v3 = vcombine.low %v768_v54, %v776_v55 }
  0xe1   : > { %11309 = vmatpush1.bf16.msra.mxu0 %v14279_v60  ;;  %11596 = vmatpush1.bf16.msra.mxu1 %v14281_v62  ;;  %v14408_v60 = vcombine.high %v768_v54, %v776_v55  ;;  %v14410_v62 = vcombine.high %v769_v56, %v777_v57  ;;  %v881_v54 = vld [vmem:[%s16694_s28 + $0xe88] sm:$0xff]  ;;  %v14505_v57 = vcombine.low %v865_v44, %v873_v45 }
  0xe2   : > { %11310 = vmatprep.subr.bf16.mxu0 %v14296_v63  ;;  %11597 = vmatprep.subr.bf16.mxu1 %v14298_v0  ;;  %v784_v63 = vld [vmem:[%s16694_s28 + $0xb80] sm:$0xff]  ;;  %v889_v55 = vld [vmem:[%s16694_s28 + $0xec8] sm:$0xff] }
  0xe3   : > { %v792_v0 = vld [vmem:[%s16694_s28 + $0xbc0] sm:$0xff] }
  0xe4   : > { %v14423_v12 = vcombine.low %v784_v63, %v792_v0 }
  0xe5   : > { %11311 = vmatpush1.bf16.msra.mxu0 %v14295_v5  ;;  %11598 = vmatpush1.bf16.msra.mxu1 %v14297_v6  ;;  %v14424_v5 = vcombine.high %v784_v63, %v792_v0  ;;  %v14426_v6 = vcombine.high %v785_v1, %v793_v2  ;;  %v897_v63 = vld [vmem:[%s16694_s28 + $0xf08] sm:$0xff]  ;;  %v14521_v2 = vcombine.low %v881_v54, %v889_v55 }
  0xe6   : > { %11321 = vmatprep.subr.bf16.mxu0 %v14312_v7  ;;  %11608 = vmatprep.subr.bf16.mxu1 %v14314_v8  ;;  %v800_v7 = vld [vmem:[%s16694_s28 + $0xc00] sm:$0xff]  ;;  %v905_v0 = vld [vmem:[%s16694_s28 + $0xf48] sm:$0xff] }
  0xe7   : > { %v808_v8 = vld [vmem:[%s16694_s28 + $0xc40] sm:$0xff] }
  0xe8   : > { %11313 = vmatmul.mubr.bf16.vlgmr.msra.gmra.mrb[0].mxu0 %v16804_v11  ;;  %11600 = vmatmul.mubr.bf16.vlgmr.msra.gmra.mrb[0].mxu1 %v16804_v11  ;;  %v14439_v51 = vcombine.low %v800_v7, %v808_v8 }
  0xe9   : > { %11322 = vmatpush1.bf16.msra.mxu0 %v14311_v14  ;;  %11609 = vmatpush1.bf16.msra.mxu1 %v14313_v15  ;;  %v14440_v14 = vcombine.high %v800_v7, %v808_v8  ;;  %v14442_v15 = vcombine.high %v801_v9, %v809_v10  ;;  %v2210_v7 = vcombine.high %v16747_v47, %v16747_v47  ;;  %v913_v8 = vld [vmem:[%s16694_s28 + $0xf88] sm:$0xff] }
  0xea   : > { %11323 = vmatprep.subr.bf16.mxu0 %v14328_v16  ;;  %11610 = vmatprep.subr.bf16.mxu1 %v14330_v17  ;;  %v816_v16 = vld [vmem:[%s16694_s28 + $0xc80] sm:$0xff]  ;;  %v921_v9 = vld [vmem:[%s16694_s28 + $0xfc8] sm:$0xff] }
  0xeb   : > { %11353 = vmatprep.mubr.bf16.mxu0 %v16812_v20  ;;  %11640 = vmatprep.mubr.bf16.mxu1 %v16812_v20  ;;  %v824_v17 = vld [vmem:[%s16694_s28 + $0xcc0] sm:$0xff]  ;;  %v929_v47 = vld [vmem:[%s16694_s28 + $0x1008] sm:$0xff] }
  0xec   : > { %v14455_v28 = vcombine.low %v816_v16, %v824_v17 }
  0xed   : > { %11324 = vmatpush1.bf16.msra.mxu0 %v14327_v22  ;;  %11611 = vmatpush1.bf16.msra.mxu1 %v14329_v23  ;;  %v14456_v22 = vcombine.high %v816_v16, %v824_v17  ;;  %v14458_v23 = vcombine.high %v817_v18, %v825_v19  ;;  %v936_v16 = vld [vmem:[%s16694_s28 + $0x1040] sm:$0xff]  ;;  %v16877_v17 = vrot.slane %v2210_v7, %v16740_v41  ;;  %v937_v18 = vld [vmem:[%s16694_s28 + $0x1048] sm:$0xff] }
  0xee   : > { %11325 = vmatprep.subr.bf16.mxu0 %v14344_v24  ;;  %11612 = vmatprep.subr.bf16.mxu1 %v14346_v25  ;;  %v832_v24 = vld [vmem:[%s16694_s28 + $0xd00] sm:$0xff] }
  0xef   : > { %v840_v25 = vld [vmem:[%s16694_s28 + $0xd40] sm:$0xff] }
  0xf0   : > { %v14471_v37 = vcombine.low %v832_v24, %v840_v25  ;;  %v1024_v7 = vld [vmem:[%s16694_s28 + $0x1300] sm:$0xff] }
  0xf1   : > { %11326 = vmatpush1.bf16.msra.mxu0 %v14343_v30  ;;  %11613 = vmatpush1.bf16.msra.mxu1 %v14345_v31  ;;  %v14472_v30 = vcombine.high %v832_v24, %v840_v25  ;;  %v14474_v31 = vcombine.high %v833_v26, %v841_v27  ;;  %v952_v24 = vld [vmem:[%s16694_s28 + $0x10c0] sm:$0xff]  ;;  %v2226_v25 = vcombine.high %v16877_v17, %v16877_v17  ;;  %v945_v27 = vld [vmem:[%s16694_s28 + $0x1088] sm:$0xff] }
  0xf2   : > { %11327 = vmatprep.subr.bf16.mxu0 %v14360_v33  ;;  %11614 = vmatprep.subr.bf16.mxu1 %v14362_v34  ;;  %v848_v33 = vld [vmem:[%s16694_s28 + $0xd80] sm:$0xff]  ;;  %v16887_v26 = vcombine.high %v16804_v11, %v16804_v11 }
  0xf3   : > { %v856_v34 = vld [vmem:[%s16694_s28 + $0xdc0] sm:$0xff] }
  0xf4   : > { %v14487_v46 = vcombine.low %v848_v33, %v856_v34 }
  0xf5   : > { %11328 = vmatpush1.bf16.msra.mxu0 %v14359_v39  ;;  %11615 = vmatpush1.bf16.msra.mxu1 %v14361_v40  ;;  %v14488_v39 = vcombine.high %v848_v33, %v856_v34  ;;  %v14490_v40 = vcombine.high %v849_v35, %v857_v36  ;;  %v960_v34 = vld [vmem:[%s16694_s28 + $0x1100] sm:$0xff]  ;;  %v16894_v36 = vrot.slane %v2226_v25, %v16740_v41 }
  0xf6   : > { %11329 = vmatprep.subr.bf16.mxu0 %v14376_v42  ;;  %11616 = vmatprep.subr.bf16.mxu1 %v14378_v43  ;;  %v864_v42 = vld [vmem:[%s16694_s28 + $0xe00] sm:$0xff] }
  0xf7   : > { %v872_v43 = vld [vmem:[%s16694_s28 + $0xe40] sm:$0xff] }
  0xf8   : > { %v14503_v56 = vcombine.low %v864_v42, %v872_v43  ;;  %v968_v35 = vld [vmem:[%s16694_s28 + $0x1140] sm:$0xff] }
  0xf9   : > { %11330 = vmatpush1.bf16.msra.mxu0 %v14375_v49  ;;  %11617 = vmatpush1.bf16.msra.mxu1 %v14377_v50  ;;  %v14504_v49 = vcombine.high %v864_v42, %v872_v43  ;;  %v14506_v50 = vcombine.high %v865_v44, %v873_v45  ;;  %v14600_v42 = vcombine.high %v960_v34, %v968_v35  ;;  %v976_v44 = vld [vmem:[%s16694_s28 + $0x1180] sm:$0xff] }
  0xfa   : > { %11331 = vmatprep.subr.bf16.mxu0 %v14392_v52  ;;  %11618 = vmatprep.subr.bf16.mxu1 %v14394_v53  ;;  %v880_v52 = vld [vmem:[%s16694_s28 + $0xe80] sm:$0xff] }
  0xfb   : > { %v888_v53 = vld [vmem:[%s16694_s28 + $0xec0] sm:$0xff] }
  0xfc   : > { %v14519_v1 = vcombine.low %v880_v52, %v888_v53  ;;  %v984_v45 = vld [vmem:[%s16694_s28 + $0x11c0] sm:$0xff] }
  0xfd   : > { %11332 = vmatpush1.bf16.msra.mxu0 %v14391_v58  ;;  %11619 = vmatpush1.bf16.msra.mxu1 %v14393_v59  ;;  %v14520_v58 = vcombine.high %v880_v52, %v888_v53  ;;  %v14522_v59 = vcombine.high %v881_v54, %v889_v55  ;;  %v14616_v52 = vcombine.high %v976_v44, %v984_v45  ;;  %v992_v54 = vld [vmem:[%s16694_s28 + $0x1200] sm:$0xff] }
  0xfe   : > { %11333 = vmatprep.subr.bf16.mxu0 %v14408_v60  ;;  %11620 = vmatprep.subr.bf16.mxu1 %v14410_v62  ;;  %v896_v60 = vld [vmem:[%s16694_s28 + $0xf00] sm:$0xff] }
  0xff   : > { %v904_v62 = vld [vmem:[%s16694_s28 + $0xf40] sm:$0xff] }
 0x100   : > { %v14535_v10 = vcombine.low %v896_v60, %v904_v62  ;;  %v1000_v55 = vld [vmem:[%s16694_s28 + $0x1240] sm:$0xff] }
 0x101   : > { %11334 = vmatpush1.bf16.msra.mxu0 %v14407_v3  ;;  %11621 = vmatpush1.bf16.msra.mxu1 %v14409_v4  ;;  %v14536_v3 = vcombine.high %v896_v60, %v904_v62  ;;  %v14538_v4 = vcombine.high %v897_v63, %v905_v0  ;;  %v14632_v60 = vcombine.high %v992_v54, %v1000_v55  ;;  %v1064_v25 = vld [vmem:[%s16694_s28 + $0x1440] sm:$0xff] }
 0x102   : > { %11335 = vmatprep.subr.bf16.mxu0 %v14424_v5  ;;  %11622 = vmatprep.subr.bf16.mxu1 %v14426_v6  ;;  %v912_v5 = vld [vmem:[%s16694_s28 + $0xf80] sm:$0xff] }
 0x103   : > { %v920_v6 = vld [vmem:[%s16694_s28 + $0xfc0] sm:$0xff] }
 0x104   : > { %v14551_v19 = vcombine.low %v912_v5, %v920_v6 }
 0x105   : > { %11336 = vmatpush1.bf16.msra.mxu0 %v14423_v12  ;;  %11623 = vmatpush1.bf16.msra.mxu1 %v14425_v13  ;;  %v14537_v12 = vcombine.low %v897_v63, %v905_v0  ;;  %v14552_v13 = vcombine.high %v912_v5, %v920_v6  ;;  %v1008_v63 = vld [vmem:[%s16694_s28 + $0x1280] sm:$0xff] }
 0x106   : > { %11337 = vmatprep.subr.bf16.mxu0 %v14440_v14  ;;  %11624 = vmatprep.subr.bf16.mxu1 %v14442_v15  ;;  %v14554_v14 = vcombine.high %v913_v8, %v921_v9  ;;  %v928_v15 = vld [vmem:[%s16694_s28 + $0x1000] sm:$0xff] }
 0x107   : > { %v1016_v0 = vld [vmem:[%s16694_s28 + $0x12c0] sm:$0xff] }
 0x108   : > { %v14648_v5 = vcombine.high %v1008_v63, %v1016_v0 }
 0x109   : > { %11338 = vmatpush1.bf16.msra.mxu0 %v14439_v51  ;;  %11625 = vmatpush1.bf16.msra.mxu1 %v14441_v21  ;;  %v14553_v51 = vcombine.low %v913_v8, %v921_v9  ;;  %v14568_v21 = vcombine.high %v928_v15, %v936_v16  ;;  %v1032_v8 = vld [vmem:[%s16694_s28 + $0x1340] sm:$0xff]  ;;  %v1025_v9 = vld [vmem:[%s16694_s28 + $0x1308] sm:$0xff] }
 0x10a   : > { %11339 = vmatprep.subr.bf16.mxu0 %v14456_v22  ;;  %11626 = vmatprep.subr.bf16.mxu1 %v14458_v23  ;;  %v14570_v22 = vcombine.high %v929_v47, %v937_v18  ;;  %v944_v23 = vld [vmem:[%s16694_s28 + $0x1080] sm:$0xff] }
 0x10d   : > { %11340 = vmatpush1.bf16.msra.mxu0 %v14455_v28  ;;  %11627 = vmatpush1.bf16.msra.mxu1 %v14457_v29  ;;  %v953_v28 = vld [vmem:[%s16694_s28 + $0x10c8] sm:$0xff]  ;;  %v14567_v29 = vcombine.low %v928_v15, %v936_v16  ;;  %v1040_v16 = vld [vmem:[%s16694_s28 + $0x1380] sm:$0xff] }
 0x10e   : > { %11341 = vmatprep.subr.bf16.mxu0 %v14472_v30  ;;  %11628 = vmatprep.subr.bf16.mxu1 %v14474_v31  ;;  %v14569_v30 = vcombine.low %v929_v47, %v937_v18  ;;  %v14584_v31 = vcombine.high %v944_v23, %v952_v24  ;;  %v14586_v33 = vcombine.high %v945_v27, %v953_v28  ;;  %v1048_v47 = vld [vmem:[%s16694_s28 + $0x13c0] sm:$0xff]  ;;  %v1041_v18 = vld [vmem:[%s16694_s28 + $0x1388] sm:$0xff] }
 0x111   : > { %11342 = vmatpush1.bf16.msra.mxu0 %v14471_v37  ;;  %11629 = vmatpush1.bf16.msra.mxu1 %v14473_v38  ;;  %v961_v37 = vld [vmem:[%s16694_s28 + $0x1108] sm:$0xff] }
 0x112   : > { %11343 = vmatprep.subr.bf16.mxu0 %v14488_v39  ;;  %11630 = vmatprep.subr.bf16.mxu1 %v14490_v40  ;;  %v969_v38 = vld [vmem:[%s16694_s28 + $0x1148] sm:$0xff]  ;;  %v14583_v39 = vcombine.low %v944_v23, %v952_v24  ;;  %v14585_v40 = vcombine.low %v945_v27, %v953_v28  ;;  %v1056_v24 = vld [vmem:[%s16694_s28 + $0x1400] sm:$0xff] }
 0x113   : > { %v14602_v43 = vcombine.high %v961_v37, %v969_v38  ;;  %v1057_v27 = vld [vmem:[%s16694_s28 + $0x1408] sm:$0xff] }
 0x114   : > { %v1065_v28 = vld [vmem:[%s16694_s28 + $0x1448] sm:$0xff] }
 0x115   : > { %11344 = vmatpush1.bf16.msra.mxu0 %v14487_v46  ;;  %11631 = vmatpush1.bf16.msra.mxu1 %v14489_v48  ;;  %v977_v46 = vld [vmem:[%s16694_s28 + $0x1188] sm:$0xff] }
 0x116   : > { %11345 = vmatprep.subr.bf16.mxu0 %v14504_v49  ;;  %11632 = vmatprep.subr.bf16.mxu1 %v14506_v50  ;;  %v985_v48 = vld [vmem:[%s16694_s28 + $0x11c8] sm:$0xff]  ;;  %v14599_v49 = vcombine.low %v960_v34, %v968_v35  ;;  %v14601_v50 = vcombine.low %v961_v37, %v969_v38  ;;  %v1072_v34 = vld [vmem:[%s16694_s28 + $0x1480] sm:$0xff] }
 0x117   : > { %v14618_v53 = vcombine.high %v977_v46, %v985_v48  ;;  %v1080_v35 = vld [vmem:[%s16694_s28 + $0x14c0] sm:$0xff]  ;;  %v1073_v37 = vld [vmem:[%s16694_s28 + $0x1488] sm:$0xff] }
 0x118   : > { %v1081_v38 = vld [vmem:[%s16694_s28 + $0x14c8] sm:$0xff] }
 0x119   : > { %11346 = vmatpush1.bf16.msra.mxu0 %v14503_v56  ;;  %11633 = vmatpush1.bf16.msra.mxu1 %v14505_v57  ;;  %v993_v56 = vld [vmem:[%s16694_s28 + $0x1208] sm:$0xff] }
 0x11a   : > { %11347 = vmatprep.subr.bf16.mxu0 %v14520_v58  ;;  %11634 = vmatprep.subr.bf16.mxu1 %v14522_v59  ;;  %v1001_v57 = vld [vmem:[%s16694_s28 + $0x1248] sm:$0xff]  ;;  %v14615_v58 = vcombine.low %v976_v44, %v984_v45  ;;  %v14617_v59 = vcombine.low %v977_v46, %v985_v48  ;;  %v1088_v44 = vld [vmem:[%s16694_s28 + $0x1500] sm:$0xff] }
 0x11b   : > { %v14634_v62 = vcombine.high %v993_v56, %v1001_v57  ;;  %v1096_v45 = vld [vmem:[%s16694_s28 + $0x1540] sm:$0xff]  ;;  %v1089_v46 = vld [vmem:[%s16694_s28 + $0x1508] sm:$0xff] }
 0x11c   : > { %v1097_v48 = vld [vmem:[%s16694_s28 + $0x1548] sm:$0xff] }
 0x11d   : > { %11348 = vmatpush1.bf16.msra.mxu0 %v14519_v1  ;;  %11635 = vmatpush1.bf16.msra.mxu1 %v14521_v2  ;;  %v1009_v1 = vld [vmem:[%s16694_s28 + $0x1288] sm:$0xff] }
 0x11e   : > { %11349 = vmatprep.subr.bf16.mxu0 %v14536_v3  ;;  %11636 = vmatprep.subr.bf16.mxu1 %v14538_v4  ;;  %v1017_v2 = vld [vmem:[%s16694_s28 + $0x12c8] sm:$0xff]  ;;  %v14631_v3 = vcombine.low %v992_v54, %v1000_v55  ;;  %v14633_v4 = vcombine.low %v993_v56, %v1001_v57  ;;  %v1104_v54 = vld [vmem:[%s16694_s28 + $0x1580] sm:$0xff] }
 0x11f   : > { %v14650_v6 = vcombine.high %v1009_v1, %v1017_v2  ;;  %v1112_v55 = vld [vmem:[%s16694_s28 + $0x15c0] sm:$0xff]  ;;  %v1105_v56 = vld [vmem:[%s16694_s28 + $0x1588] sm:$0xff] }
 0x120   : > { %v1113_v57 = vld [vmem:[%s16694_s28 + $0x15c8] sm:$0xff] }
 0x121   : > { %11350 = vmatpush1.bf16.msra.mxu0 %v14535_v10  ;;  %11637 = vmatpush1.bf16.msra.mxu1 %v14537_v12  ;;  %v1033_v10 = vld [vmem:[%s16694_s28 + $0x1348] sm:$0xff]  ;;  %v14647_v12 = vcombine.low %v1008_v63, %v1016_v0  ;;  %v1120_v63 = vld [vmem:[%s16694_s28 + $0x1600] sm:$0xff] }
 0x122   : > { %11351 = vmatprep.subr.bf16.mxu0 %v14552_v13  ;;  %11638 = vmatprep.subr.bf16.mxu1 %v14554_v14  ;;  %v14649_v13 = vcombine.low %v1009_v1, %v1017_v2  ;;  %v14664_v14 = vcombine.high %v1024_v7, %v1032_v8  ;;  %v14666_v15 = vcombine.high %v1025_v9, %v1033_v10  ;;  %v1128_v0 = vld [vmem:[%s16694_s28 + $0x1640] sm:$0xff]  ;;  %v1121_v1 = vld [vmem:[%s16694_s28 + $0x1608] sm:$0xff] }
 0x123   : > { %v1129_v2 = vld [vmem:[%s16694_s28 + $0x1648] sm:$0xff] }
 0x125   : > { %11352 = vmatpush1.bf16.msra.mxu0 %v14551_v19  ;;  %11639 = vmatpush1.bf16.msra.mxu1 %v14553_v51  ;;  %v1049_v19 = vld [vmem:[%s16694_s28 + $0x13c8] sm:$0xff]  ;;  %v14663_v51 = vcombine.low %v1024_v7, %v1032_v8  ;;  %v1136_v7 = vld [vmem:[%s16694_s28 + $0x1680] sm:$0xff] }
 0x126   : > { %11362 = vmatprep.subr.bf16.mxu0 %v14568_v21  ;;  %11649 = vmatprep.subr.bf16.mxu1 %v14570_v22  ;;  %v14665_v21 = vcombine.low %v1025_v9, %v1033_v10  ;;  %v14680_v22 = vcombine.high %v1040_v16, %v1048_v47  ;;  %v14682_v23 = vcombine.high %v1041_v18, %v1049_v19  ;;  %v1144_v8 = vld [vmem:[%s16694_s28 + $0x16c0] sm:$0xff]  ;;  %v1137_v9 = vld [vmem:[%s16694_s28 + $0x1688] sm:$0xff] }
 0x127   : > { %v1145_v10 = vld [vmem:[%s16694_s28 + $0x16c8] sm:$0xff] }
 0x128   : > { %11354 = vmatmul.mubr.bf16.vlgmr.msra.gmra.mrb[0].mxu0 %v16887_v26  ;;  %11641 = vmatmul.mubr.bf16.vlgmr.msra.gmra.mrb[0].mxu1 %v16887_v26 }
 0x129   : > { %11363 = vmatpush1.bf16.msra.mxu0 %v14567_v29  ;;  %11650 = vmatpush1.bf16.msra.mxu1 %v14569_v30  ;;  %v14679_v29 = vcombine.low %v1040_v16, %v1048_v47  ;;  %v14681_v30 = vcombine.low %v1041_v18, %v1049_v19  ;;  %v1152_v16 = vld [vmem:[%s16694_s28 + $0x1700] sm:$0xff]  ;;  %v1153_v18 = vld [vmem:[%s16694_s28 + $0x1708] sm:$0xff] }
 0x12a   : > { %11364 = vmatprep.subr.bf16.mxu0 %v14584_v31  ;;  %11651 = vmatprep.subr.bf16.mxu1 %v14586_v33  ;;  %v14696_v31 = vcombine.high %v1056_v24, %v1064_v25  ;;  %v14698_v33 = vcombine.high %v1057_v27, %v1065_v28  ;;  %v1160_v47 = vld [vmem:[%s16694_s28 + $0x1740] sm:$0xff]  ;;  %v1161_v19 = vld [vmem:[%s16694_s28 + $0x1748] sm:$0xff] }
 0x12b   : > { %11394 = vmatprep.mubr.bf16.mxu0 %v16894_v36  ;;  %11681 = vmatprep.mubr.bf16.mxu1 %v16894_v36 }
 0x12d   : > { %11365 = vmatpush1.bf16.msra.mxu0 %v14583_v39  ;;  %11652 = vmatpush1.bf16.msra.mxu1 %v14585_v40  ;;  %v14695_v39 = vcombine.low %v1056_v24, %v1064_v25  ;;  %v14697_v40 = vcombine.low %v1057_v27, %v1065_v28  ;;  %v1168_v24 = vld [vmem:[%s16694_s28 + $0x1780] sm:$0xff]  ;;  %v1169_v27 = vld [vmem:[%s16694_s28 + $0x1788] sm:$0xff] }
 0x12e   : > { %11366 = vmatprep.subr.bf16.mxu0 %v14600_v42  ;;  %11653 = vmatprep.subr.bf16.mxu1 %v14602_v43  ;;  %v14712_v42 = vcombine.high %v1072_v34, %v1080_v35  ;;  %v14714_v43 = vcombine.high %v1073_v37, %v1081_v38  ;;  %v1176_v25 = vld [vmem:[%s16694_s28 + $0x17c0] sm:$0xff]  ;;  %v1177_v28 = vld [vmem:[%s16694_s28 + $0x17c8] sm:$0xff] }
 0x131   : > { %11367 = vmatpush1.bf16.msra.mxu0 %v14599_v49  ;;  %11654 = vmatpush1.bf16.msra.mxu1 %v14601_v50  ;;  %v14711_v49 = vcombine.low %v1072_v34, %v1080_v35  ;;  %v14713_v50 = vcombine.low %v1073_v37, %v1081_v38  ;;  %v1184_v34 = vld [vmem:[%s16694_s28 + $0x1800] sm:$0xff]  ;;  %v1185_v37 = vld [vmem:[%s16694_s28 + $0x1808] sm:$0xff] }
 0x132   : > { %11368 = vmatprep.subr.bf16.mxu0 %v14616_v52  ;;  %11655 = vmatprep.subr.bf16.mxu1 %v14618_v53  ;;  %v14728_v52 = vcombine.high %v1088_v44, %v1096_v45  ;;  %v14730_v53 = vcombine.high %v1089_v46, %v1097_v48  ;;  %v1192_v35 = vld [vmem:[%s16694_s28 + $0x1840] sm:$0xff]  ;;  %v1193_v38 = vld [vmem:[%s16694_s28 + $0x1848] sm:$0xff] }
 0x135   : > { %11369 = vmatpush1.bf16.msra.mxu0 %v14615_v58  ;;  %11656 = vmatpush1.bf16.msra.mxu1 %v14617_v59  ;;  %v14727_v58 = vcombine.low %v1088_v44, %v1096_v45  ;;  %v14729_v59 = vcombine.low %v1089_v46, %v1097_v48  ;;  %v1200_v44 = vld [vmem:[%s16694_s28 + $0x1880] sm:$0xff]  ;;  %v16962_v46 = vrot.slane %v16877_v17, %v16740_v41  ;;  %v1201_v48 = vld [vmem:[%s16694_s28 + $0x1888] sm:$0xff] }
 0x136   : > { %11370 = vmatprep.subr.bf16.mxu0 %v14632_v60  ;;  %11657 = vmatprep.subr.bf16.mxu1 %v14634_v62  ;;  %v14744_v60 = vcombine.high %v1104_v54, %v1112_v55  ;;  %v14746_v62 = vcombine.high %v1105_v56, %v1113_v57  ;;  %v1208_v45 = vld [vmem:[%s16694_s28 + $0x18c0] sm:$0xff]  ;;  %v1217_v17 = vld [vmem:[%s16694_s28 + $0x1908] sm:$0xff] }
 0x139   : > { %11371 = vmatpush1.bf16.msra.mxu0 %v14631_v3  ;;  %11658 = vmatpush1.bf16.msra.mxu1 %v14633_v4  ;;  %v14743_v3 = vcombine.low %v1104_v54, %v1112_v55  ;;  %v14745_v4 = vcombine.low %v1105_v56, %v1113_v57  ;;  %v1216_v55 = vld [vmem:[%s16694_s28 + $0x1900] sm:$0xff]  ;;  %v16970_v57 = vcombine.high %v16894_v36, %v16894_v36 }
 0x13a   : > { %11372 = vmatprep.subr.bf16.mxu0 %v14648_v5  ;;  %11659 = vmatprep.subr.bf16.mxu1 %v14650_v6  ;;  %v14760_v5 = vcombine.high %v1120_v63, %v1128_v0  ;;  %v14762_v6 = vcombine.high %v1121_v1, %v1129_v2  ;;  %v1224_v56 = vld [vmem:[%s16694_s28 + $0x1940] sm:$0xff] }
 0x13d   : > { %11373 = vmatpush1.bf16.msra.mxu0 %v14647_v12  ;;  %11660 = vmatpush1.bf16.msra.mxu1 %v14649_v13  ;;  %v14759_v12 = vcombine.low %v1120_v63, %v1128_v0  ;;  %v14761_v13 = vcombine.low %v1121_v1, %v1129_v2  ;;  %v1232_v0 = vld [vmem:[%s16694_s28 + $0x1980] sm:$0xff]  ;;  %v1233_v2 = vld [vmem:[%s16694_s28 + $0x1988] sm:$0xff] }
 0x13e   : > { %11374 = vmatprep.subr.bf16.mxu0 %v14664_v14  ;;  %11661 = vmatprep.subr.bf16.mxu1 %v14666_v15  ;;  %v14776_v14 = vcombine.high %v1136_v7, %v1144_v8  ;;  %v14778_v15 = vcombine.high %v1137_v9, %v1145_v10  ;;  %v1240_v1 = vld [vmem:[%s16694_s28 + $0x19c0] sm:$0xff] }
 0x141   : > { %11375 = vmatpush1.bf16.msra.mxu0 %v14663_v51  ;;  %11662 = vmatpush1.bf16.msra.mxu1 %v14665_v21  ;;  %v14775_v51 = vcombine.low %v1136_v7, %v1144_v8  ;;  %v14777_v21 = vcombine.low %v1137_v9, %v1145_v10  ;;  %v1248_v8 = vld [vmem:[%s16694_s28 + $0x1a00] sm:$0xff]  ;;  %v1249_v10 = vld [vmem:[%s16694_s28 + $0x1a08] sm:$0xff] }
 0x142   : > { %11376 = vmatprep.subr.bf16.mxu0 %v14680_v22  ;;  %11663 = vmatprep.subr.bf16.mxu1 %v14682_v23  ;;  %v14792_v22 = vcombine.high %v1152_v16, %v1160_v47  ;;  %v14794_v23 = vcombine.high %v1153_v18, %v1161_v19  ;;  %v1256_v9 = vld [vmem:[%s16694_s28 + $0x1a40] sm:$0xff] }
 0x145   : > { %11377 = vmatpush1.bf16.msra.mxu0 %v14679_v29  ;;  %11664 = vmatpush1.bf16.msra.mxu1 %v14681_v30  ;;  %v14791_v29 = vcombine.low %v1152_v16, %v1160_v47  ;;  %v14793_v30 = vcombine.low %v1153_v18, %v1161_v19  ;;  %v1264_v47 = vld [vmem:[%s16694_s28 + $0x1a80] sm:$0xff]  ;;  %v1265_v19 = vld [vmem:[%s16694_s28 + $0x1a88] sm:$0xff] }
 0x146   : > { %11378 = vmatprep.subr.bf16.mxu0 %v14696_v31  ;;  %11665 = vmatprep.subr.bf16.mxu1 %v14698_v33  ;;  %v14808_v31 = vcombine.high %v1168_v24, %v1176_v25  ;;  %v14810_v33 = vcombine.high %v1169_v27, %v1177_v28  ;;  %v1272_v18 = vld [vmem:[%s16694_s28 + $0x1ac0] sm:$0xff] }
 0x149   : > { %11379 = vmatpush1.bf16.msra.mxu0 %v14695_v39  ;;  %11666 = vmatpush1.bf16.msra.mxu1 %v14697_v40  ;;  %v14807_v39 = vcombine.low %v1168_v24, %v1176_v25  ;;  %v14809_v40 = vcombine.low %v1169_v27, %v1177_v28  ;;  %v1280_v25 = vld [vmem:[%s16694_s28 + $0x1b00] sm:$0xff]  ;;  %v1281_v28 = vld [vmem:[%s16694_s28 + $0x1b08] sm:$0xff] }
 0x14a   : > { %11380 = vmatprep.subr.bf16.mxu0 %v14712_v42  ;;  %11667 = vmatprep.subr.bf16.mxu1 %v14714_v43  ;;  %v14824_v42 = vcombine.high %v1184_v34, %v1192_v35  ;;  %v14826_v43 = vcombine.high %v1185_v37, %v1193_v38  ;;  %v1288_v27 = vld [vmem:[%s16694_s28 + $0x1b40] sm:$0xff] }
 0x14d   : > { %11381 = vmatpush1.bf16.msra.mxu0 %v14711_v49  ;;  %11668 = vmatpush1.bf16.msra.mxu1 %v14713_v50  ;;  %v1209_v49 = vld [vmem:[%s16694_s28 + $0x18c8] sm:$0xff]  ;;  %v14823_v50 = vcombine.low %v1184_v34, %v1192_v35  ;;  %v1296_v35 = vld [vmem:[%s16694_s28 + $0x1b80] sm:$0xff] }
 0x14e   : > { %11382 = vmatprep.subr.bf16.mxu0 %v14728_v52  ;;  %11669 = vmatprep.subr.bf16.mxu1 %v14730_v53  ;;  %v14825_v52 = vcombine.low %v1185_v37, %v1193_v38  ;;  %v14840_v53 = vcombine.high %v1200_v44, %v1208_v45  ;;  %v14842_v54 = vcombine.high %v1201_v48, %v1209_v49  ;;  %v1304_v37 = vld [vmem:[%s16694_s28 + $0x1bc0] sm:$0xff]  ;;  %v1297_v38 = vld [vmem:[%s16694_s28 + $0x1b88] sm:$0xff] }
 0x151   : > { %11383 = vmatpush1.bf16.msra.mxu0 %v14727_v58  ;;  %11670 = vmatpush1.bf16.msra.mxu1 %v14729_v59  ;;  %v1225_v58 = vld [vmem:[%s16694_s28 + $0x1948] sm:$0xff]  ;;  %v14839_v59 = vcombine.low %v1200_v44, %v1208_v45  ;;  %v1312_v45 = vld [vmem:[%s16694_s28 + $0x1c00] sm:$0xff] }
 0x152   : > { %11384 = vmatprep.subr.bf16.mxu0 %v14744_v60  ;;  %11671 = vmatprep.subr.bf16.mxu1 %v14746_v62  ;;  %v14841_v60 = vcombine.low %v1201_v48, %v1209_v49  ;;  %v14856_v62 = vcombine.high %v1216_v55, %v1224_v56  ;;  %v14858_v63 = vcombine.high %v1217_v17, %v1225_v58  ;;  %v1320_v48 = vld [vmem:[%s16694_s28 + $0x1c40] sm:$0xff]  ;;  %v1313_v49 = vld [vmem:[%s16694_s28 + $0x1c08] sm:$0xff] }
 0x155   : > { %11385 = vmatpush1.bf16.msra.mxu0 %v14743_v3  ;;  %11672 = vmatpush1.bf16.msra.mxu1 %v14745_v4  ;;  %v1241_v3 = vld [vmem:[%s16694_s28 + $0x19c8] sm:$0xff]  ;;  %v14855_v4 = vcombine.low %v1216_v55, %v1224_v56  ;;  %v1328_v56 = vld [vmem:[%s16694_s28 + $0x1c80] sm:$0xff] }
 0x156   : > { %11386 = vmatprep.subr.bf16.mxu0 %v14760_v5  ;;  %11673 = vmatprep.subr.bf16.mxu1 %v14762_v6  ;;  %v14857_v5 = vcombine.low %v1217_v17, %v1225_v58  ;;  %v14872_v6 = vcombine.high %v1232_v0, %v1240_v1  ;;  %v14874_v7 = vcombine.high %v1233_v2, %v1241_v3  ;;  %v1336_v17 = vld [vmem:[%s16694_s28 + $0x1cc0] sm:$0xff]  ;;  %v1329_v58 = vld [vmem:[%s16694_s28 + $0x1c88] sm:$0xff] }
 0x159   : > { %11387 = vmatpush1.bf16.msra.mxu0 %v14759_v12  ;;  %11674 = vmatpush1.bf16.msra.mxu1 %v14761_v13  ;;  %v1257_v12 = vld [vmem:[%s16694_s28 + $0x1a48] sm:$0xff]  ;;  %v14871_v13 = vcombine.low %v1232_v0, %v1240_v1  ;;  %v1344_v1 = vld [vmem:[%s16694_s28 + $0x1d00] sm:$0xff] }
 0x15a   : > { %11388 = vmatprep.subr.bf16.mxu0 %v14776_v14  ;;  %11675 = vmatprep.subr.bf16.mxu1 %v14778_v15  ;;  %v14873_v14 = vcombine.low %v1233_v2, %v1241_v3  ;;  %v14888_v15 = vcombine.high %v1248_v8, %v1256_v9  ;;  %v14890_v16 = vcombine.high %v1249_v10, %v1257_v12  ;;  %v1352_v2 = vld [vmem:[%s16694_s28 + $0x1d40] sm:$0xff]  ;;  %v1345_v3 = vld [vmem:[%s16694_s28 + $0x1d08] sm:$0xff] }
 0x15d   : > { %11389 = vmatpush1.bf16.msra.mxu0 %v14775_v51  ;;  %11676 = vmatpush1.bf16.msra.mxu1 %v14777_v21  ;;  %v1273_v51 = vld [vmem:[%s16694_s28 + $0x1ac8] sm:$0xff]  ;;  %v14887_v21 = vcombine.low %v1248_v8, %v1256_v9  ;;  %v1360_v9 = vld [vmem:[%s16694_s28 + $0x1d80] sm:$0xff] }
 0x15e   : > { %11390 = vmatprep.subr.bf16.mxu0 %v14792_v22  ;;  %11677 = vmatprep.subr.bf16.mxu1 %v14794_v23  ;;  %v14889_v22 = vcombine.low %v1249_v10, %v1257_v12  ;;  %v14904_v23 = vcombine.high %v1264_v47, %v1272_v18  ;;  %v14906_v24 = vcombine.high %v1265_v19, %v1273_v51  ;;  %v1368_v10 = vld [vmem:[%s16694_s28 + $0x1dc0] sm:$0xff]  ;;  %v1361_v12 = vld [vmem:[%s16694_s28 + $0x1d88] sm:$0xff] }
 0x161   : > { %11391 = vmatpush1.bf16.msra.mxu0 %v14791_v29  ;;  %11678 = vmatpush1.bf16.msra.mxu1 %v14793_v30  ;;  %v1289_v29 = vld [vmem:[%s16694_s28 + $0x1b48] sm:$0xff]  ;;  %v14903_v30 = vcombine.low %v1264_v47, %v1272_v18  ;;  %v1376_v18 = vld [vmem:[%s16694_s28 + $0x1e00] sm:$0xff] }
 0x162   : > { %11392 = vmatprep.subr.bf16.mxu0 %v14808_v31  ;;  %11679 = vmatprep.subr.bf16.mxu1 %v14810_v33  ;;  %v14905_v31 = vcombine.low %v1265_v19, %v1273_v51  ;;  %v14920_v33 = vcombine.high %v1280_v25, %v1288_v27  ;;  %v14922_v34 = vcombine.high %v1281_v28, %v1289_v29  ;;  %v1384_v19 = vld [vmem:[%s16694_s28 + $0x1e40] sm:$0xff]  ;;  %v1377_v51 = vld [vmem:[%s16694_s28 + $0x1e08] sm:$0xff] }
 0x165   : > { %11393 = vmatpush1.bf16.msra.mxu0 %v14807_v39  ;;  %11680 = vmatpush1.bf16.msra.mxu1 %v14809_v40  ;;  %v1305_v39 = vld [vmem:[%s16694_s28 + $0x1bc8] sm:$0xff]  ;;  %v14919_v40 = vcombine.low %v1280_v25, %v1288_v27  ;;  %v1392_v27 = vld [vmem:[%s16694_s28 + $0x1e80] sm:$0xff] }
 0x166   : > { %11403 = vmatprep.subr.bf16.mxu0 %v14824_v42  ;;  %11690 = vmatprep.subr.bf16.mxu1 %v14826_v43  ;;  %v14921_v42 = vcombine.low %v1281_v28, %v1289_v29  ;;  %v14936_v43 = vcombine.high %v1296_v35, %v1304_v37  ;;  %v14938_v44 = vcombine.high %v1297_v38, %v1305_v39  ;;  %v1400_v28 = vld [vmem:[%s16694_s28 + $0x1ec0] sm:$0xff]  ;;  %v1393_v29 = vld [vmem:[%s16694_s28 + $0x1e88] sm:$0xff] }
 0x168   : > { %11395 = vmatmul.mubr.bf16.vlgmr.msra.gmra.mrb[0].mxu0 %v16962_v46  ;;  %11682 = vmatmul.mubr.bf16.vlgmr.msra.gmra.mrb[0].mxu1 %v16962_v46 }
 0x169   : > { %11404 = vmatpush1.bf16.msra.mxu0 %v14823_v50  ;;  %11691 = vmatpush1.bf16.msra.mxu1 %v14825_v52  ;;  %v1321_v50 = vld [vmem:[%s16694_s28 + $0x1c48] sm:$0xff]  ;;  %v14935_v52 = vcombine.low %v1296_v35, %v1304_v37  ;;  %v1408_v37 = vld [vmem:[%s16694_s28 + $0x1f00] sm:$0xff] }
 0x16a   : > { %11405 = vmatprep.subr.bf16.mxu0 %v14840_v53  ;;  %11692 = vmatprep.subr.bf16.mxu1 %v14842_v54  ;;  %v14937_v53 = vcombine.low %v1297_v38, %v1305_v39  ;;  %v14952_v54 = vcombine.high %v1312_v45, %v1320_v48  ;;  %v14954_v55 = vcombine.high %v1313_v49, %v1321_v50  ;;  %v1416_v38 = vld [vmem:[%s16694_s28 + $0x1f40] sm:$0xff]  ;;  %v1409_v39 = vld [vmem:[%s16694_s28 + $0x1f08] sm:$0xff] }
 0x16b   : > { %11435 = vmatprep.mubr.bf16.mxu0 %v16970_v57  ;;  %11722 = vmatprep.mubr.bf16.mxu1 %v16970_v57 }
 0x16d   : > { %11406 = vmatpush1.bf16.msra.mxu0 %v14839_v59  ;;  %11693 = vmatpush1.bf16.msra.mxu1 %v14841_v60  ;;  %v1337_v59 = vld [vmem:[%s16694_s28 + $0x1cc8] sm:$0xff]  ;;  %v14951_v60 = vcombine.low %v1312_v45, %v1320_v48  ;;  %v1424_v48 = vld [vmem:[%s16694_s28 + $0x1f80] sm:$0xff] }
 0x16e   : > { %11407 = vmatprep.subr.bf16.mxu0 %v14856_v62  ;;  %11694 = vmatprep.subr.bf16.mxu1 %v14858_v63  ;;  %v14953_v62 = vcombine.low %v1313_v49, %v1321_v50  ;;  %v14968_v63 = vcombine.high %v1328_v56, %v1336_v17  ;;  %v14970_v0 = vcombine.high %v1329_v58, %v1337_v59  ;;  %v1432_v49 = vld [vmem:[%s16694_s28 + $0x1fc0] sm:$0xff]  ;;  %v1425_v50 = vld [vmem:[%s16694_s28 + $0x1f88] sm:$0xff] }
 0x171   : > { %11408 = vmatpush1.bf16.msra.mxu0 %v14855_v4  ;;  %11695 = vmatpush1.bf16.msra.mxu1 %v14857_v5  ;;  %v1353_v4 = vld [vmem:[%s16694_s28 + $0x1d48] sm:$0xff]  ;;  %v14967_v5 = vcombine.low %v1328_v56, %v1336_v17  ;;  %v15064_v56 = vcombine.high %v1424_v48, %v1432_v49 }
 0x172   : > { %11409 = vmatprep.subr.bf16.mxu0 %v14872_v6  ;;  %11696 = vmatprep.subr.bf16.mxu1 %v14874_v7  ;;  %v14969_v6 = vcombine.low %v1329_v58, %v1337_v59  ;;  %v14984_v7 = vcombine.high %v1344_v1, %v1352_v2  ;;  %v14986_v8 = vcombine.high %v1345_v3, %v1353_v4  ;;  %v1440_v58 = vld [vmem:[%s16694_s28 + $0x2000] sm:$0xff] }
 0x173   : > { %v1448_v59 = vld [vmem:[%s16694_s28 + $0x2040] sm:$0xff] }
 0x175   : > { %11410 = vmatpush1.bf16.msra.mxu0 %v14871_v13  ;;  %11697 = vmatpush1.bf16.msra.mxu1 %v14873_v14  ;;  %v1369_v13 = vld [vmem:[%s16694_s28 + $0x1dc8] sm:$0xff]  ;;  %v14983_v14 = vcombine.low %v1344_v1, %v1352_v2  ;;  %v15080_v2 = vcombine.high %v1440_v58, %v1448_v59 }
 0x176   : > { %11411 = vmatprep.subr.bf16.mxu0 %v14888_v15  ;;  %11698 = vmatprep.subr.bf16.mxu1 %v14890_v16  ;;  %v14985_v15 = vcombine.low %v1345_v3, %v1353_v4  ;;  %v15000_v16 = vcombine.high %v1360_v9, %v1368_v10  ;;  %v15002_v47 = vcombine.high %v1361_v12, %v1369_v13  ;;  %v1456_v4 = vld [vmem:[%s16694_s28 + $0x2080] sm:$0xff] }
 0x179   : > { %11412 = vmatpush1.bf16.msra.mxu0 %v14887_v21  ;;  %11699 = vmatpush1.bf16.msra.mxu1 %v14889_v22  ;;  %v1385_v21 = vld [vmem:[%s16694_s28 + $0x1e48] sm:$0xff]  ;;  %v14999_v22 = vcombine.low %v1360_v9, %v1368_v10  ;;  %v15079_v10 = vcombine.low %v1440_v58, %v1448_v59 }
 0x17a   : > { %11413 = vmatprep.subr.bf16.mxu0 %v14904_v23  ;;  %11700 = vmatprep.subr.bf16.mxu1 %v14906_v24  ;;  %v15001_v23 = vcombine.low %v1361_v12, %v1369_v13  ;;  %v15016_v24 = vcombine.high %v1376_v18, %v1384_v19  ;;  %v15018_v25 = vcombine.high %v1377_v51, %v1385_v21  ;;  %v1465_v9 = vld [vmem:[%s16694_s28 + $0x20c8] sm:$0xff] }
 0x17b   : > { %v1537_v58 = vld [vmem:[%s16694_s28 + $0x2308] sm:$0xff] }
 0x17c   : > { %v1545_v59 = vld [vmem:[%s16694_s28 + $0x2348] sm:$0xff] }
 0x17d   : > { %11414 = vmatpush1.bf16.msra.mxu0 %v14903_v30  ;;  %11701 = vmatpush1.bf16.msra.mxu1 %v14905_v31  ;;  %v1401_v30 = vld [vmem:[%s16694_s28 + $0x1ec8] sm:$0xff]  ;;  %v15015_v31 = vcombine.low %v1376_v18, %v1384_v19 }
 0x17e   : > { %11415 = vmatprep.subr.bf16.mxu0 %v14920_v33  ;;  %11702 = vmatprep.subr.bf16.mxu1 %v14922_v34  ;;  %v15017_v33 = vcombine.low %v1377_v51, %v1385_v21  ;;  %v15032_v34 = vcombine.high %v1392_v27, %v1400_v28  ;;  %v15034_v35 = vcombine.high %v1393_v29, %v1401_v30  ;;  %v1473_v18 = vld [vmem:[%s16694_s28 + $0x2108] sm:$0xff] }
 0x17f   : > { %v1481_v19 = vld [vmem:[%s16694_s28 + $0x2148] sm:$0xff] }
 0x181   : > { %11416 = vmatpush1.bf16.msra.mxu0 %v14919_v40  ;;  %11703 = vmatpush1.bf16.msra.mxu1 %v14921_v42  ;;  %v1417_v40 = vld [vmem:[%s16694_s28 + $0x1f48] sm:$0xff]  ;;  %v15031_v42 = vcombine.low %v1392_v27, %v1400_v28 }
 0x182   : > { %11417 = vmatprep.subr.bf16.mxu0 %v14936_v43  ;;  %11704 = vmatprep.subr.bf16.mxu1 %v14938_v44  ;;  %v15033_v43 = vcombine.low %v1393_v29, %v1401_v30  ;;  %v15048_v44 = vcombine.high %v1408_v37, %v1416_v38  ;;  %v15050_v45 = vcombine.high %v1409_v39, %v1417_v40  ;;  %v1489_v27 = vld [vmem:[%s16694_s28 + $0x2188] sm:$0xff] }
 0x183   : > { %v1497_v28 = vld [vmem:[%s16694_s28 + $0x21c8] sm:$0xff]  ;;  %v15113_v30 = vcombine.low %v1473_v18, %v1481_v19 }
 0x185   : > { %11418 = vmatpush1.bf16.msra.mxu0 %v14935_v52  ;;  %11705 = vmatpush1.bf16.msra.mxu1 %v14937_v53  ;;  %v1433_v52 = vld [vmem:[%s16694_s28 + $0x1fc8] sm:$0xff] }
 0x186   : > { %11419 = vmatprep.subr.bf16.mxu0 %v14952_v54  ;;  %11706 = vmatprep.subr.bf16.mxu1 %v14954_v55  ;;  %v17031_v53 = vld [vmem:[%s16744_s30 + $0x8] sm:$0x3f]  ;;  %v15047_v54 = vcombine.low %v1408_v37, %v1416_v38  ;;  %v15049_v55 = vcombine.low %v1409_v39, %v1417_v40  ;;  %v15066_v17 = vcombine.high %v1425_v50, %v1433_v52 }
 0x187   : > { %v15065_v1 = vcombine.low %v1425_v50, %v1433_v52  ;;  %v1505_v37 = vld [vmem:[%s16694_s28 + $0x2208] sm:$0xff]  ;;  %v15129_v40 = vcombine.low %v1489_v27, %v1497_v28 }
 0x188   : > { %v1513_v38 = vld [vmem:[%s16694_s28 + $0x2248] sm:$0xff] }
 0x189   : > { %11420 = vmatpush1.bf16.msra.mxu0 %v14951_v60  ;;  %11707 = vmatpush1.bf16.msra.mxu1 %v14953_v62  ;;  %v17037_v60 = vrot.slane %v17031_v53, %v16740_v41  ;;  %v1441_v62 = vld [vmem:[%s16694_s28 + $0x2008] sm:$0xff]  ;;  %v15145_v52 = vcombine.low %v1505_v37, %v1513_v38 }
 0x18a   : > { %11421 = vmatprep.subr.bf16.mxu0 %v14968_v63  ;;  %11708 = vmatprep.subr.bf16.mxu1 %v14970_v0  ;;  %v1449_v63 = vld [vmem:[%s16694_s28 + $0x2048] sm:$0xff]  ;;  %v15063_v0 = vcombine.low %v1424_v48, %v1432_v49 }
 0x18b   : > { %v15082_v3 = vcombine.high %v1441_v62, %v1449_v63  ;;  %v15081_v12 = vcombine.low %v1441_v62, %v1449_v63  ;;  %v1521_v48 = vld [vmem:[%s16694_s28 + $0x2288] sm:$0xff] }
 0x18c   : > { %v1529_v49 = vld [vmem:[%s16694_s28 + $0x22c8] sm:$0xff] }
 0x18d   : > { %11422 = vmatpush1.bf16.msra.mxu0 %v14967_v5  ;;  %11709 = vmatpush1.bf16.msra.mxu1 %v14969_v6  ;;  %v1464_v5 = vld [vmem:[%s16694_s28 + $0x20c0] sm:$0xff]  ;;  %v2274_v6 = vcombine.high %v17037_v60, %v17037_v60  ;;  %v15161_v63 = vcombine.low %v1521_v48, %v1529_v49 }
 0x18e   : > { %11423 = vmatprep.subr.bf16.mxu0 %v14984_v7  ;;  %11710 = vmatprep.subr.bf16.mxu1 %v14986_v8  ;;  %v17047_v7 = vcombine.high %v16962_v46, %v16962_v46  ;;  %v1457_v8 = vld [vmem:[%s16694_s28 + $0x2088] sm:$0xff]  ;;  %v15096_v13 = vcombine.high %v1456_v4, %v1464_v5  ;;  %v15095_v51 = vcombine.low %v1456_v4, %v1464_v5 }
 0x18f   : > { %v15097_v21 = vcombine.low %v1457_v8, %v1465_v9  ;;  %v1553_v4 = vld [vmem:[%s16694_s28 + $0x2388] sm:$0xff] }
 0x190   : > { %v1561_v5 = vld [vmem:[%s16694_s28 + $0x23c8] sm:$0xff] }
 0x191   : > { %11424 = vmatpush1.bf16.msra.mxu0 %v14983_v14  ;;  %11711 = vmatpush1.bf16.msra.mxu1 %v14985_v15  ;;  %v15098_v14 = vcombine.high %v1457_v8, %v1465_v9  ;;  %v1472_v15 = vld [vmem:[%s16694_s28 + $0x2100] sm:$0xff]  ;;  %v15177_v8 = vcombine.low %v1537_v58, %v1545_v59 }
 0x192   : > { %11425 = vmatprep.subr.bf16.mxu0 %v15000_v16  ;;  %11712 = vmatprep.subr.bf16.mxu1 %v15002_v47  ;;  %v1480_v16 = vld [vmem:[%s16694_s28 + $0x2140] sm:$0xff]  ;;  %v17054_v47 = vrot.slane %v2274_v6, %v16740_v41 }
 0x193   : > { %v15111_v29 = vcombine.low %v1472_v15, %v1480_v16 }
 0x195   : > { %11426 = vmatpush1.bf16.msra.mxu0 %v14999_v22  ;;  %11713 = vmatpush1.bf16.msra.mxu1 %v15001_v23  ;;  %v15112_v22 = vcombine.high %v1472_v15, %v1480_v16  ;;  %v15114_v23 = vcombine.high %v1473_v18, %v1481_v19  ;;  %v1577_v15 = vld [vmem:[%s16694_s28 + $0x2448] sm:$0xff]  ;;  %v15193_v18 = vcombine.low %v1553_v4, %v1561_v5 }
 0x196   : > { %11427 = vmatprep.subr.bf16.mxu0 %v15016_v24  ;;  %11714 = vmatprep.subr.bf16.mxu1 %v15018_v25  ;;  %v1488_v24 = vld [vmem:[%s16694_s28 + $0x2180] sm:$0xff] }
 0x197   : > { %v1496_v25 = vld [vmem:[%s16694_s28 + $0x21c0] sm:$0xff] }
 0x198   : > { %v15127_v39 = vcombine.low %v1488_v24, %v1496_v25 }
 0x199   : > { %11428 = vmatpush1.bf16.msra.mxu0 %v15015_v31  ;;  %11715 = vmatpush1.bf16.msra.mxu1 %v15017_v33  ;;  %v15128_v31 = vcombine.high %v1488_v24, %v1496_v25  ;;  %v15130_v33 = vcombine.high %v1489_v27, %v1497_v28  ;;  %v1593_v24 = vld [vmem:[%s16694_s28 + $0x24c8] sm:$0xff] }
 0x19a   : > { %11429 = vmatprep.subr.bf16.mxu0 %v15032_v34  ;;  %11716 = vmatprep.subr.bf16.mxu1 %v15034_v35  ;;  %v1504_v34 = vld [vmem:[%s16694_s28 + $0x2200] sm:$0xff] }
 0x19b   : > { %v1512_v35 = vld [vmem:[%s16694_s28 + $0x2240] sm:$0xff] }
 0x19c   : > { %v15143_v50 = vcombine.low %v1504_v34, %v1512_v35 }
 0x19d   : > { %11430 = vmatpush1.bf16.msra.mxu0 %v15031_v42  ;;  %11717 = vmatpush1.bf16.msra.mxu1 %v15033_v43  ;;  %v15144_v42 = vcombine.high %v1504_v34, %v1512_v35  ;;  %v15146_v43 = vcombine.high %v1505_v37, %v1513_v38  ;;  %v1609_v34 = vld [vmem:[%s16694_s28 + $0x2548] sm:$0xff] }
 0x19e   : > { %11431 = vmatprep.subr.bf16.mxu0 %v15048_v44  ;;  %11718 = vmatprep.subr.bf16.mxu1 %v15050_v45  ;;  %v1520_v44 = vld [vmem:[%s16694_s28 + $0x2280] sm:$0xff] }
 0x19f   : > { %v1528_v45 = vld [vmem:[%s16694_s28 + $0x22c0] sm:$0xff] }
 0x1a0   : > { %v15159_v62 = vcombine.low %v1520_v44, %v1528_v45 }
 0x1a1   : > { %11432 = vmatpush1.bf16.msra.mxu0 %v15047_v54  ;;  %11719 = vmatpush1.bf16.msra.mxu1 %v15049_v55  ;;  %v15160_v54 = vcombine.high %v1520_v44, %v1528_v45  ;;  %v15162_v55 = vcombine.high %v1521_v48, %v1529_v49  ;;  %v1625_v44 = vld [vmem:[%s16694_s28 + $0x25c8] sm:$0xff] }
 0x1a2   : > { %11433 = vmatprep.subr.bf16.mxu0 %v15064_v56  ;;  %11720 = vmatprep.subr.bf16.mxu1 %v15066_v17  ;;  %v1536_v56 = vld [vmem:[%s16694_s28 + $0x2300] sm:$0xff] }
 0x1a3   : > { %v1544_v17 = vld [vmem:[%s16694_s28 + $0x2340] sm:$0xff] }
 0x1a4   : > { %v15175_v6 = vcombine.low %v1536_v56, %v1544_v17 }
 0x1a5   : > { %11434 = vmatpush1.bf16.msra.mxu0 %v15063_v0  ;;  %11721 = vmatpush1.bf16.msra.mxu1 %v15065_v1  ;;  %v15176_v0 = vcombine.high %v1536_v56, %v1544_v17  ;;  %v15178_v1 = vcombine.high %v1537_v58, %v1545_v59  ;;  %v1641_v56 = vld [vmem:[%s16694_s28 + $0x2648] sm:$0xff] }
 0x1a6   : > { %11444 = vmatprep.subr.bf16.mxu0 %v15080_v2  ;;  %11731 = vmatprep.subr.bf16.mxu1 %v15082_v3  ;;  %v1552_v2 = vld [vmem:[%s16694_s28 + $0x2380] sm:$0xff] }
 0x1a7   : > { %v1560_v3 = vld [vmem:[%s16694_s28 + $0x23c0] sm:$0xff] }
 0x1a8   : > { %11436 = vmatmul.mubr.bf16.vlgmr.msra.gmra.mrb[0].mxu0 %v17047_v7  ;;  %11723 = vmatmul.mubr.bf16.vlgmr.msra.gmra.mrb[0].mxu1 %v17047_v7  ;;  %v15192_v9 = vcombine.high %v1552_v2, %v1560_v3  ;;  %v15191_v16 = vcombine.low %v1552_v2, %v1560_v3  ;;  %v1657_v2 = vld [vmem:[%s16694_s28 + $0x26c8] sm:$0xff] }
 0x1a9   : > { %11445 = vmatpush1.bf16.msra.mxu0 %v15079_v10  ;;  %11732 = vmatpush1.bf16.msra.mxu1 %v15081_v12  ;;  %v15194_v10 = vcombine.high %v1553_v4, %v1561_v5  ;;  %v1568_v12 = vld [vmem:[%s16694_s28 + $0x2400] sm:$0xff] }
 0x1aa   : > { %11446 = vmatprep.subr.bf16.mxu0 %v15096_v13  ;;  %11733 = vmatprep.subr.bf16.mxu1 %v15098_v14  ;;  %v1576_v13 = vld [vmem:[%s16694_s28 + $0x2440] sm:$0xff]  ;;  %v1569_v14 = vld [vmem:[%s16694_s28 + $0x2408] sm:$0xff] }
 0x1ab   : > { %11476 = vmatprep.mubr.bf16.mxu0 %v17054_v47  ;;  %11763 = vmatprep.mubr.bf16.mxu1 %v17054_v47  ;;  %v15208_v19 = vcombine.high %v1568_v12, %v1576_v13  ;;  %v15207_v25 = vcombine.low %v1568_v12, %v1576_v13  ;;  %v15209_v27 = vcombine.low %v1569_v14, %v1577_v15  ;;  %v1673_v12 = vld [vmem:[%s16694_s28 + $0x2748] sm:$0xff] }
 0x1ad   : > { %11447 = vmatpush1.bf16.msra.mxu0 %v15095_v51  ;;  %11734 = vmatpush1.bf16.msra.mxu1 %v15097_v21  ;;  %v15210_v51 = vcombine.high %v1569_v14, %v1577_v15  ;;  %v1584_v21 = vld [vmem:[%s16694_s28 + $0x2480] sm:$0xff] }
 0x1ae   : > { %11448 = vmatprep.subr.bf16.mxu0 %v15112_v22  ;;  %11735 = vmatprep.subr.bf16.mxu1 %v15114_v23  ;;  %v1592_v22 = vld [vmem:[%s16694_s28 + $0x24c0] sm:$0xff]  ;;  %v1585_v23 = vld [vmem:[%s16694_s28 + $0x2488] sm:$0xff] }
 0x1af   : > { %v15224_v28 = vcombine.high %v1584_v21, %v1592_v22  ;;  %v15223_v35 = vcombine.low %v1584_v21, %v1592_v22  ;;  %v15225_v37 = vcombine.low %v1585_v23, %v1593_v24  ;;  %v1689_v21 = vld [vmem:[%s16694_s28 + $0x27c8] sm:$0xff] }
 0x1b1   : > { %11449 = vmatpush1.bf16.msra.mxu0 %v15111_v29  ;;  %11736 = vmatpush1.bf16.msra.mxu1 %v15113_v30  ;;  %v15226_v29 = vcombine.high %v1585_v23, %v1593_v24  ;;  %v1600_v30 = vld [vmem:[%s16694_s28 + $0x2500] sm:$0xff] }
 0x1b2   : > { %11450 = vmatprep.subr.bf16.mxu0 %v15128_v31  ;;  %11737 = vmatprep.subr.bf16.mxu1 %v15130_v33  ;;  %v1608_v31 = vld [vmem:[%s16694_s28 + $0x2540] sm:$0xff]  ;;  %v1601_v33 = vld [vmem:[%s16694_s28 + $0x2508] sm:$0xff] }
 0x1b3   : > { %v15240_v38 = vcombine.high %v1600_v30, %v1608_v31  ;;  %v15239_v45 = vcombine.low %v1600_v30, %v1608_v31  ;;  %v15241_v48 = vcombine.low %v1601_v33, %v1609_v34  ;;  %v1705_v30 = vld [vmem:[%s16694_s28 + $0x2848] sm:$0xff] }
 0x1b5   : > { %11451 = vmatpush1.bf16.msra.mxu0 %v15127_v39  ;;  %11738 = vmatpush1.bf16.msra.mxu1 %v15129_v40  ;;  %v15242_v39 = vcombine.high %v1601_v33, %v1609_v34  ;;  %v1616_v40 = vld [vmem:[%s16694_s28 + $0x2580] sm:$0xff] }
 0x1b6   : > { %11452 = vmatprep.subr.bf16.mxu0 %v15144_v42  ;;  %11739 = vmatprep.subr.bf16.mxu1 %v15146_v43  ;;  %v1624_v42 = vld [vmem:[%s16694_s28 + $0x25c0] sm:$0xff]  ;;  %v1617_v43 = vld [vmem:[%s16694_s28 + $0x2588] sm:$0xff] }
 0x1b7   : > { %v15256_v49 = vcombine.high %v1616_v40, %v1624_v42  ;;  %v15255_v17 = vcombine.low %v1616_v40, %v1624_v42  ;;  %v15257_v58 = vcombine.low %v1617_v43, %v1625_v44  ;;  %v1713_v40 = vld [vmem:[%s16694_s28 + $0x2888] sm:$0xff] }
 0x1b8   : > { %v1721_v42 = vld [vmem:[%s16694_s28 + $0x28c8] sm:$0xff] }
 0x1b9   : > { %11453 = vmatpush1.bf16.msra.mxu0 %v15143_v50  ;;  %11740 = vmatpush1.bf16.msra.mxu1 %v15145_v52  ;;  %v15258_v50 = vcombine.high %v1617_v43, %v1625_v44  ;;  %v1632_v52 = vld [vmem:[%s16694_s28 + $0x2600] sm:$0xff] }
 0x1ba   : > { %11454 = vmatprep.subr.bf16.mxu0 %v15160_v54  ;;  %11741 = vmatprep.subr.bf16.mxu1 %v15162_v55  ;;  %v1640_v54 = vld [vmem:[%s16694_s28 + $0x2640] sm:$0xff]  ;;  %v1633_v55 = vld [vmem:[%s16694_s28 + $0x2608] sm:$0xff] }
 0x1bb   : > { %v15272_v59 = vcombine.high %v1632_v52, %v1640_v54  ;;  %v15271_v3 = vcombine.low %v1632_v52, %v1640_v54  ;;  %v15273_v4 = vcombine.low %v1633_v55, %v1641_v56  ;;  %v17130_v52 = vcombine.high %v17054_v47, %v17054_v47  ;;  %v1737_v54 = vld [vmem:[%s16694_s28 + $0x2948] sm:$0xff] }
 0x1bd   : > { %11455 = vmatpush1.bf16.msra.mxu0 %v15159_v62  ;;  %11742 = vmatpush1.bf16.msra.mxu1 %v15161_v63  ;;  %v15274_v62 = vcombine.high %v1633_v55, %v1641_v56  ;;  %v1648_v63 = vld [vmem:[%s16694_s28 + $0x2680] sm:$0xff]  ;;  %v15353_v56 = vcombine.low %v1713_v40, %v1721_v42 }
 0x1be   : > { %11456 = vmatprep.subr.bf16.mxu0 %v15176_v0  ;;  %11743 = vmatprep.subr.bf16.mxu1 %v15178_v1  ;;  %v1656_v0 = vld [vmem:[%s16694_s28 + $0x26c0] sm:$0xff]  ;;  %v1649_v1 = vld [vmem:[%s16694_s28 + $0x2688] sm:$0xff] }
 0x1bf   : > { %v15288_v5 = vcombine.high %v1648_v63, %v1656_v0  ;;  %v15287_v13 = vcombine.low %v1648_v63, %v1656_v0  ;;  %v15289_v14 = vcombine.low %v1649_v1, %v1657_v2  ;;  %v1745_v63 = vld [vmem:[%s16694_s28 + $0x2988] sm:$0xff] }
 0x1c0   : > { %v1753_v0 = vld [vmem:[%s16694_s28 + $0x29c8] sm:$0xff] }
 0x1c1   : > { %11457 = vmatpush1.bf16.msra.mxu0 %v15175_v6  ;;  %11744 = vmatpush1.bf16.msra.mxu1 %v15177_v8  ;;  %v15290_v6 = vcombine.high %v1649_v1, %v1657_v2  ;;  %v1664_v8 = vld [vmem:[%s16694_s28 + $0x2700] sm:$0xff] }
 0x1c2   : > { %11458 = vmatprep.subr.bf16.mxu0 %v15192_v9  ;;  %11745 = vmatprep.subr.bf16.mxu1 %v15194_v10  ;;  %v1672_v9 = vld [vmem:[%s16694_s28 + $0x2740] sm:$0xff]  ;;  %v1665_v10 = vld [vmem:[%s16694_s28 + $0x2708] sm:$0xff] }
 0x1c3   : > { %v15304_v15 = vcombine.high %v1664_v8, %v1672_v9  ;;  %v15303_v22 = vcombine.low %v1664_v8, %v1672_v9  ;;  %v15305_v23 = vcombine.low %v1665_v10, %v1673_v12  ;;  %v1761_v8 = vld [vmem:[%s16694_s28 + $0x2a08] sm:$0xff] }
 0x1c4   : > { %v1769_v9 = vld [vmem:[%s16694_s28 + $0x2a48] sm:$0xff] }
 0x1c5   : > { %11459 = vmatpush1.bf16.msra.mxu0 %v15191_v16  ;;  %11746 = vmatpush1.bf16.msra.mxu1 %v15193_v18  ;;  %v15306_v16 = vcombine.high %v1665_v10, %v1673_v12  ;;  %v1680_v18 = vld [vmem:[%s16694_s28 + $0x2780] sm:$0xff]  ;;  %v15385_v12 = vcombine.low %v1745_v63, %v1753_v0 }
 0x1c6   : > { %11460 = vmatprep.subr.bf16.mxu0 %v15208_v19  ;;  %11747 = vmatprep.subr.bf16.mxu1 %v15210_v51  ;;  %v1688_v19 = vld [vmem:[%s16694_s28 + $0x27c0] sm:$0xff]  ;;  %v1681_v51 = vld [vmem:[%s16694_s28 + $0x2788] sm:$0xff] }
 0x1c7   : > { %v15320_v24 = vcombine.high %v1680_v18, %v1688_v19  ;;  %v15319_v31 = vcombine.low %v1680_v18, %v1688_v19  ;;  %v15321_v33 = vcombine.low %v1681_v51, %v1689_v21  ;;  %v1777_v18 = vld [vmem:[%s16694_s28 + $0x2a88] sm:$0xff] }
 0x1c8   : > { %v1785_v19 = vld [vmem:[%s16694_s28 + $0x2ac8] sm:$0xff] }
 0x1c9   : > { %11461 = vmatpush1.bf16.msra.mxu0 %v15207_v25  ;;  %11748 = vmatpush1.bf16.msra.mxu1 %v15209_v27  ;;  %v15322_v25 = vcombine.high %v1681_v51, %v1689_v21  ;;  %v1696_v27 = vld [vmem:[%s16694_s28 + $0x2800] sm:$0xff]  ;;  %v15401_v21 = vcombine.low %v1761_v8, %v1769_v9 }
 0x1ca   : > { %11462 = vmatprep.subr.bf16.mxu0 %v15224_v28  ;;  %11749 = vmatprep.subr.bf16.mxu1 %v15226_v29  ;;  %v1704_v28 = vld [vmem:[%s16694_s28 + $0x2840] sm:$0xff]  ;;  %v1697_v29 = vld [vmem:[%s16694_s28 + $0x2808] sm:$0xff] }
 0x1cb   : > { %v15336_v34 = vcombine.high %v1696_v27, %v1704_v28  ;;  %v15335_v43 = vcombine.low %v1696_v27, %v1704_v28  ;;  %v15337_v44 = vcombine.low %v1697_v29, %v1705_v30  ;;  %v1793_v27 = vld [vmem:[%s16694_s28 + $0x2b08] sm:$0xff] }
 0x1cc   : > { %v1801_v28 = vld [vmem:[%s16694_s28 + $0x2b48] sm:$0xff] }
 0x1cd   : > { %11463 = vmatpush1.bf16.msra.mxu0 %v15223_v35  ;;  %11750 = vmatpush1.bf16.msra.mxu1 %v15225_v37  ;;  %v15338_v35 = vcombine.high %v1697_v29, %v1705_v30  ;;  %v1712_v37 = vld [vmem:[%s16694_s28 + $0x2880] sm:$0xff]  ;;  %v15417_v30 = vcombine.low %v1777_v18, %v1785_v19 }
 0x1ce   : > { %11464 = vmatprep.subr.bf16.mxu0 %v15240_v38  ;;  %11751 = vmatprep.subr.bf16.mxu1 %v15242_v39  ;;  %v1720_v38 = vld [vmem:[%s16694_s28 + $0x28c0] sm:$0xff]  ;;  %v17122_v39 = vrot.slane %v17037_v60, %v16740_v41  ;;  %v1729_v60 = vld [vmem:[%s16694_s28 + $0x2908] sm:$0xff] }
 0x1cf   : > { %v15351_v55 = vcombine.low %v1712_v37, %v1720_v38  ;;  %v15369_v2 = vcombine.low %v1729_v60, %v1737_v54 }
 0x1d1   : > { %11465 = vmatpush1.bf16.msra.mxu0 %v15239_v45  ;;  %11752 = vmatpush1.bf16.msra.mxu1 %v15241_v48  ;;  %v15352_v45 = vcombine.high %v1712_v37, %v1720_v38  ;;  %v15354_v48 = vcombine.high %v1713_v40, %v1721_v42  ;;  %v1809_v37 = vld [vmem:[%s16694_s28 + $0x2b88] sm:$0xff]  ;;  %v15433_v42 = vcombine.low %v1793_v27, %v1801_v28 }
 0x1d2   : > { %11466 = vmatprep.subr.bf16.mxu0 %v15256_v49  ;;  %11753 = vmatprep.subr.bf16.mxu1 %v15258_v50  ;;  %v1728_v49 = vld [vmem:[%s16694_s28 + $0x2900] sm:$0xff]  ;;  %v1817_v38 = vld [vmem:[%s16694_s28 + $0x2bc8] sm:$0xff] }
 0x1d3   : > { %v1736_v50 = vld [vmem:[%s16694_s28 + $0x2940] sm:$0xff] }
 0x1d4   : > { %v15367_v1 = vcombine.low %v1728_v49, %v1736_v50 }
 0x1d5   : > { %11467 = vmatpush1.bf16.msra.mxu0 %v15255_v17  ;;  %11754 = vmatpush1.bf16.msra.mxu1 %v15257_v58  ;;  %v15368_v17 = vcombine.high %v1728_v49, %v1736_v50  ;;  %v15370_v58 = vcombine.high %v1729_v60, %v1737_v54  ;;  %v1825_v49 = vld [vmem:[%s16694_s28 + $0x2c08] sm:$0xff]  ;;  %v15449_v54 = vcombine.low %v1809_v37, %v1817_v38 }
 0x1d6   : > { %11468 = vmatprep.subr.bf16.mxu0 %v15272_v59  ;;  %11755 = vmatprep.subr.bf16.mxu1 %v15274_v62  ;;  %v1744_v59 = vld [vmem:[%s16694_s28 + $0x2980] sm:$0xff]  ;;  %v1833_v50 = vld [vmem:[%s16694_s28 + $0x2c48] sm:$0xff] }
 0x1d7   : > { %v1752_v62 = vld [vmem:[%s16694_s28 + $0x29c0] sm:$0xff] }
 0x1d8   : > { %v15383_v10 = vcombine.low %v1744_v59, %v1752_v62 }
 0x1d9   : > { %11469 = vmatpush1.bf16.msra.mxu0 %v15271_v3  ;;  %11756 = vmatpush1.bf16.msra.mxu1 %v15273_v4  ;;  %v15384_v3 = vcombine.high %v1744_v59, %v1752_v62  ;;  %v15386_v4 = vcombine.high %v1745_v63, %v1753_v0  ;;  %v1841_v59 = vld [vmem:[%s16694_s28 + $0x2c88] sm:$0xff]  ;;  %v15465_v0 = vcombine.low %v1825_v49, %v1833_v50 }
 0x1da   : > { %11470 = vmatprep.subr.bf16.mxu0 %v15288_v5  ;;  %11757 = vmatprep.subr.bf16.mxu1 %v15290_v6  ;;  %v1760_v5 = vld [vmem:[%s16694_s28 + $0x2a00] sm:$0xff]  ;;  %v1849_v62 = vld [vmem:[%s16694_s28 + $0x2cc8] sm:$0xff] }
 0x1db   : > { %v1768_v6 = vld [vmem:[%s16694_s28 + $0x2a40] sm:$0xff] }
 0x1dc   : > { %v15399_v51 = vcombine.low %v1760_v5, %v1768_v6 }
 0x1dd   : > { %11471 = vmatpush1.bf16.msra.mxu0 %v15287_v13  ;;  %11758 = vmatpush1.bf16.msra.mxu1 %v15289_v14  ;;  %v15400_v13 = vcombine.high %v1760_v5, %v1768_v6  ;;  %v15402_v14 = vcombine.high %v1761_v8, %v1769_v9  ;;  %v1857_v5 = vld [vmem:[%s16694_s28 + $0x2d08] sm:$0xff]  ;;  %v15481_v9 = vcombine.low %v1841_v59, %v1849_v62 }
 0x1de   : > { %11472 = vmatprep.subr.bf16.mxu0 %v15304_v15  ;;  %11759 = vmatprep.subr.bf16.mxu1 %v15306_v16  ;;  %v1776_v15 = vld [vmem:[%s16694_s28 + $0x2a80] sm:$0xff]  ;;  %v1865_v6 = vld [vmem:[%s16694_s28 + $0x2d48] sm:$0xff] }
 0x1df   : > { %v1784_v16 = vld [vmem:[%s16694_s28 + $0x2ac0] sm:$0xff] }
 0x1e0   : > { %v15415_v29 = vcombine.low %v1776_v15, %v1784_v16 }
 0x1e1   : > { %11473 = vmatpush1.bf16.msra.mxu0 %v15303_v22  ;;  %11760 = vmatpush1.bf16.msra.mxu1 %v15305_v23  ;;  %v15416_v22 = vcombine.high %v1776_v15, %v1784_v16  ;;  %v15418_v23 = vcombine.high %v1777_v18, %v1785_v19  ;;  %v1873_v15 = vld [vmem:[%s16694_s28 + $0x2d88] sm:$0xff]  ;;  %v15497_v19 = vcombine.low %v1857_v5, %v1865_v6 }
 0x1e2   : > { %11474 = vmatprep.subr.bf16.mxu0 %v15320_v24  ;;  %11761 = vmatprep.subr.bf16.mxu1 %v15322_v25  ;;  %v1792_v24 = vld [vmem:[%s16694_s28 + $0x2b00] sm:$0xff]  ;;  %v1881_v16 = vld [vmem:[%s16694_s28 + $0x2dc8] sm:$0xff] }
 0x1e3   : > { %v1800_v25 = vld [vmem:[%s16694_s28 + $0x2b40] sm:$0xff] }
 0x1e4   : > { %v15431_v40 = vcombine.low %v1792_v24, %v1800_v25 }
 0x1e5   : > { %11475 = vmatpush1.bf16.msra.mxu0 %v15319_v31  ;;  %11762 = vmatpush1.bf16.msra.mxu1 %v15321_v33  ;;  %v15432_v31 = vcombine.high %v1792_v24, %v1800_v25  ;;  %v15434_v33 = vcombine.high %v1793_v27, %v1801_v28  ;;  %v1889_v24 = vld [vmem:[%s16694_s28 + $0x2e08] sm:$0xff]  ;;  %v15513_v28 = vcombine.low %v1873_v15, %v1881_v16 }
 0x1e6   : > { %11485 = vmatprep.subr.bf16.mxu0 %v15336_v34  ;;  %11772 = vmatprep.subr.bf16.mxu1 %v15338_v35  ;;  %v1808_v34 = vld [vmem:[%s16694_s28 + $0x2b80] sm:$0xff]  ;;  %v1897_v25 = vld [vmem:[%s16694_s28 + $0x2e48] sm:$0xff] }
 0x1e7   : > { %v1816_v35 = vld [vmem:[%s16694_s28 + $0x2bc0] sm:$0xff] }
 0x1e8   : > { %11477 = vmatmul.mubr.bf16.vlgmr.msra.gmra.mrb[0].mxu0 %v17122_v39  ;;  %11764 = vmatmul.mubr.bf16.vlgmr.msra.gmra.mrb[0].mxu1 %v17122_v39  ;;  %v15447_v60 = vcombine.low %v1808_v34, %v1816_v35 }
 0x1e9   : > { %11486 = vmatpush1.bf16.msra.mxu0 %v15335_v43  ;;  %11773 = vmatpush1.bf16.msra.mxu1 %v15337_v44  ;;  %v15448_v43 = vcombine.high %v1808_v34, %v1816_v35  ;;  %v15450_v44 = vcombine.high %v1809_v37, %v1817_v38  ;;  %v1905_v34 = vld [vmem:[%s16694_s28 + $0x2e88] sm:$0xff]  ;;  %v15529_v38 = vcombine.low %v1889_v24, %v1897_v25 }
 0x1ea   : > { %11487 = vmatprep.subr.bf16.mxu0 %v15352_v45  ;;  %11774 = vmatprep.subr.bf16.mxu1 %v15354_v48  ;;  %v1824_v45 = vld [vmem:[%s16694_s28 + $0x2c00] sm:$0xff]  ;;  %v1913_v35 = vld [vmem:[%s16694_s28 + $0x2ec8] sm:$0xff] }
 0x1eb   : > { %11517 = vmatprep.mubr.bf16.mxu0 %v17130_v52  ;;  %11804 = vmatprep.mubr.bf16.mxu1 %v17130_v52  ;;  %v1832_v48 = vld [vmem:[%s16694_s28 + $0x2c40] sm:$0xff] }
 0x1ec   : > { %v15463_v63 = vcombine.low %v1824_v45, %v1832_v48 }
 0x1ed   : > { %11488 = vmatpush1.bf16.msra.mxu0 %v15351_v55  ;;  %11775 = vmatpush1.bf16.msra.mxu1 %v15353_v56  ;;  %v15464_v55 = vcombine.high %v1824_v45, %v1832_v48  ;;  %v15466_v56 = vcombine.high %v1825_v49, %v1833_v50  ;;  %v1921_v45 = vld [vmem:[%s16694_s28 + $0x2f08] sm:$0xff]  ;;  %v15545_v50 = vcombine.low %v1905_v34, %v1913_v35 }
 0x1ee   : > { %11489 = vmatprep.subr.bf16.mxu0 %v15368_v17  ;;  %11776 = vmatprep.subr.bf16.mxu1 %v15370_v58  ;;  %v1840_v17 = vld [vmem:[%s16694_s28 + $0x2c80] sm:$0xff]  ;;  %v1929_v48 = vld [vmem:[%s16694_s28 + $0x2f48] sm:$0xff] }
 0x1ef   : > { %v1848_v58 = vld [vmem:[%s16694_s28 + $0x2cc0] sm:$0xff] }
 0x1f0   : > { %v15479_v8 = vcombine.low %v1840_v17, %v1848_v58 }
 0x1f1   : > { %11490 = vmatpush1.bf16.msra.mxu0 %v15367_v1  ;;  %11777 = vmatpush1.bf16.msra.mxu1 %v15369_v2  ;;  %v15480_v1 = vcombine.high %v1840_v17, %v1848_v58  ;;  %v15482_v2 = vcombine.high %v1841_v59, %v1849_v62  ;;  %v2259_v17 = vcombine.high %v17031_v53, %v17031_v53  ;;  %v1937_v58 = vld [vmem:[%s16694_s28 + $0x2f88] sm:$0xff] }
 0x1f2   : > { %11491 = vmatprep.subr.bf16.mxu0 %v15384_v3  ;;  %11778 = vmatprep.subr.bf16.mxu1 %v15386_v4  ;;  %v1856_v3 = vld [vmem:[%s16694_s28 + $0x2d00] sm:$0xff]  ;;  %v1945_v59 = vld [vmem:[%s16694_s28 + $0x2fc8] sm:$0xff] }
 0x1f3   : > { %v1864_v4 = vld [vmem:[%s16694_s28 + $0x2d40] sm:$0xff]  ;;  %v1953_v53 = vld [vmem:[%s16694_s28 + $0x3008] sm:$0xff] }
 0x1f4   : > { %v15495_v18 = vcombine.low %v1856_v3, %v1864_v4 }
 0x1f5   : > { %11492 = vmatpush1.bf16.msra.mxu0 %v15383_v10  ;;  %11779 = vmatpush1.bf16.msra.mxu1 %v15385_v12  ;;  %v15496_v10 = vcombine.high %v1856_v3, %v1864_v4  ;;  %v15498_v12 = vcombine.high %v1857_v5, %v1865_v6  ;;  %v1960_v3 = vld [vmem:[%s16694_s28 + $0x3040] sm:$0xff]  ;;  %v17195_v4 = vrot.slane %v2259_v17, %v16740_v41  ;;  %v1961_v5 = vld [vmem:[%s16694_s28 + $0x3048] sm:$0xff] }
 0x1f6   : > { %11493 = vmatprep.subr.bf16.mxu0 %v15400_v13  ;;  %11780 = vmatprep.subr.bf16.mxu1 %v15402_v14  ;;  %v1872_v13 = vld [vmem:[%s16694_s28 + $0x2d80] sm:$0xff] }
 0x1f7   : > { %v1880_v14 = vld [vmem:[%s16694_s28 + $0x2dc0] sm:$0xff] }
 0x1f8   : > { %v15511_v27 = vcombine.low %v1872_v13, %v1880_v14  ;;  %v2032_v17 = vld [vmem:[%s16694_s28 + $0x3280] sm:$0xff] }
 0x1f9   : > { %11494 = vmatpush1.bf16.msra.mxu0 %v15399_v51  ;;  %11781 = vmatpush1.bf16.msra.mxu1 %v15401_v21  ;;  %v15512_v51 = vcombine.high %v1872_v13, %v1880_v14  ;;  %v15514_v21 = vcombine.high %v1873_v15, %v1881_v16  ;;  %v1976_v13 = vld [vmem:[%s16694_s28 + $0x30c0] sm:$0xff]  ;;  %v2275_v14 = vcombine.high %v17195_v4, %v17195_v4  ;;  %v1969_v16 = vld [vmem:[%s16694_s28 + $0x3088] sm:$0xff] }
 0x1fa   : > { %11495 = vmatprep.subr.bf16.mxu0 %v15416_v22  ;;  %11782 = vmatprep.subr.bf16.mxu1 %v15418_v23  ;;  %v1888_v22 = vld [vmem:[%s16694_s28 + $0x2e00] sm:$0xff]  ;;  %v17205_v15 = vcombine.high %v17122_v39, %v17122_v39 }
 0x1fb   : > { %v1896_v23 = vld [vmem:[%s16694_s28 + $0x2e40] sm:$0xff] }
 0x1fc   : > { %v15527_v37 = vcombine.low %v1888_v22, %v1896_v23 }
 0x1fd   : > { %11496 = vmatpush1.bf16.msra.mxu0 %v15415_v29  ;;  %11783 = vmatpush1.bf16.msra.mxu1 %v15417_v30  ;;  %v15528_v29 = vcombine.high %v1888_v22, %v1896_v23  ;;  %v15530_v30 = vcombine.high %v1889_v24, %v1897_v25  ;;  %v1984_v23 = vld [vmem:[%s16694_s28 + $0x3100] sm:$0xff]  ;;  %v17212_v25 = vrot.slane %v2275_v14, %v16740_v41 }
 0x1fe   : > { %11497 = vmatprep.subr.bf16.mxu0 %v15432_v31  ;;  %11784 = vmatprep.subr.bf16.mxu1 %v15434_v33  ;;  %v1904_v31 = vld [vmem:[%s16694_s28 + $0x2e80] sm:$0xff] }
 0x1ff   : > { %v1912_v33 = vld [vmem:[%s16694_s28 + $0x2ec0] sm:$0xff] }
 0x200   : > { %v15543_v49 = vcombine.low %v1904_v31, %v1912_v33  ;;  %v1992_v24 = vld [vmem:[%s16694_s28 + $0x3140] sm:$0xff] }
 0x201   : > { %11498 = vmatpush1.bf16.msra.mxu0 %v15431_v40  ;;  %11785 = vmatpush1.bf16.msra.mxu1 %v15433_v42  ;;  %v15544_v40 = vcombine.high %v1904_v31, %v1912_v33  ;;  %v15546_v42 = vcombine.high %v1905_v34, %v1913_v35  ;;  %v15624_v31 = vcombine.high %v1984_v23, %v1992_v24  ;;  %v2000_v34 = vld [vmem:[%s16694_s28 + $0x3180] sm:$0xff] }
 0x202   : > { %11499 = vmatprep.subr.bf16.mxu0 %v15448_v43  ;;  %11786 = vmatprep.subr.bf16.mxu1 %v15450_v44  ;;  %v1920_v43 = vld [vmem:[%s16694_s28 + $0x2f00] sm:$0xff] }
 0x203   : > { %v1928_v44 = vld [vmem:[%s16694_s28 + $0x2f40] sm:$0xff] }
 0x204   : > { %v15559_v62 = vcombine.low %v1920_v43, %v1928_v44  ;;  %v2008_v35 = vld [vmem:[%s16694_s28 + $0x31c0] sm:$0xff] }
 0x205   : > { %11500 = vmatpush1.bf16.msra.mxu0 %v15447_v60  ;;  %11787 = vmatpush1.bf16.msra.mxu1 %v15449_v54  ;;  %v15560_v60 = vcombine.high %v1920_v43, %v1928_v44  ;;  %v15562_v54 = vcombine.high %v1921_v45, %v1929_v48  ;;  %v15640_v43 = vcombine.high %v2000_v34, %v2008_v35  ;;  %v2072_v14 = vld [vmem:[%s16694_s28 + $0x33c0] sm:$0xff] }
 0x206   : > { %11501 = vmatprep.subr.bf16.mxu0 %v15464_v55  ;;  %11788 = vmatprep.subr.bf16.mxu1 %v15466_v56  ;;  %v1936_v55 = vld [vmem:[%s16694_s28 + $0x2f80] sm:$0xff] }
 0x207   : > { %v1944_v56 = vld [vmem:[%s16694_s28 + $0x2fc0] sm:$0xff] }
 0x208   : > { %v15575_v6 = vcombine.low %v1936_v55, %v1944_v56 }
 0x209   : > { %11502 = vmatpush1.bf16.msra.mxu0 %v15463_v63  ;;  %11789 = vmatpush1.bf16.msra.mxu1 %v15465_v0  ;;  %v15561_v63 = vcombine.low %v1921_v45, %v1929_v48  ;;  %v15576_v0 = vcombine.high %v1936_v55, %v1944_v56  ;;  %v2016_v45 = vld [vmem:[%s16694_s28 + $0x3200] sm:$0xff] }
 0x20a   : > { %11503 = vmatprep.subr.bf16.mxu0 %v15480_v1  ;;  %11790 = vmatprep.subr.bf16.mxu1 %v15482_v2  ;;  %v15578_v1 = vcombine.high %v1937_v58, %v1945_v59  ;;  %v1952_v2 = vld [vmem:[%s16694_s28 + $0x3000] sm:$0xff] }
 0x20b   : > { %v2024_v48 = vld [vmem:[%s16694_s28 + $0x3240] sm:$0xff] }
 0x20c   : > { %v15656_v55 = vcombine.high %v2016_v45, %v2024_v48 }
 0x20d   : > { %11504 = vmatpush1.bf16.msra.mxu0 %v15479_v8  ;;  %11791 = vmatpush1.bf16.msra.mxu1 %v15481_v9  ;;  %v15577_v8 = vcombine.low %v1937_v58, %v1945_v59  ;;  %v15592_v9 = vcombine.high %v1952_v2, %v1960_v3  ;;  %v2040_v58 = vld [vmem:[%s16694_s28 + $0x32c0] sm:$0xff]  ;;  %v2033_v59 = vld [vmem:[%s16694_s28 + $0x3288] sm:$0xff] }
 0x20e   : > { %11505 = vmatprep.subr.bf16.mxu0 %v15496_v10  ;;  %11792 = vmatprep.subr.bf16.mxu1 %v15498_v12  ;;  %v15594_v10 = vcombine.high %v1953_v53, %v1961_v5  ;;  %v1968_v12 = vld [vmem:[%s16694_s28 + $0x3080] sm:$0xff] }
 0x211   : > { %11506 = vmatpush1.bf16.msra.mxu0 %v15495_v18  ;;  %11793 = vmatpush1.bf16.msra.mxu1 %v15497_v19  ;;  %v1977_v18 = vld [vmem:[%s16694_s28 + $0x30c8] sm:$0xff]  ;;  %v15591_v19 = vcombine.low %v1952_v2, %v1960_v3  ;;  %v2048_v3 = vld [vmem:[%s16694_s28 + $0x3300] sm:$0xff] }
 0x212   : > { %11507 = vmatprep.subr.bf16.mxu0 %v15512_v51  ;;  %11794 = vmatprep.subr.bf16.mxu1 %v15514_v21  ;;  %v15593_v51 = vcombine.low %v1953_v53, %v1961_v5  ;;  %v15608_v21 = vcombine.high %v1968_v12, %v1976_v13  ;;  %v15610_v22 = vcombine.high %v1969_v16, %v1977_v18  ;;  %v2056_v53 = vld [vmem:[%s16694_s28 + $0x3340] sm:$0xff]  ;;  %v2049_v5 = vld [vmem:[%s16694_s28 + $0x3308] sm:$0xff] }
 0x215   : > { %11508 = vmatpush1.bf16.msra.mxu0 %v15511_v27  ;;  %11795 = vmatpush1.bf16.msra.mxu1 %v15513_v28  ;;  %v1985_v27 = vld [vmem:[%s16694_s28 + $0x3108] sm:$0xff] }
 0x216   : > { %11509 = vmatprep.subr.bf16.mxu0 %v15528_v29  ;;  %11796 = vmatprep.subr.bf16.mxu1 %v15530_v30  ;;  %v1993_v28 = vld [vmem:[%s16694_s28 + $0x3148] sm:$0xff]  ;;  %v15607_v29 = vcombine.low %v1968_v12, %v1976_v13  ;;  %v15609_v30 = vcombine.low %v1969_v16, %v1977_v18  ;;  %v2064_v13 = vld [vmem:[%s16694_s28 + $0x3380] sm:$0xff] }
 0x217   : > { %v15626_v33 = vcombine.high %v1985_v27, %v1993_v28  ;;  %v2065_v16 = vld [vmem:[%s16694_s28 + $0x3388] sm:$0xff] }
 0x218   : > { %v2073_v18 = vld [vmem:[%s16694_s28 + $0x33c8] sm:$0xff] }
 0x219   : > { %11510 = vmatpush1.bf16.msra.mxu0 %v15527_v37  ;;  %11797 = vmatpush1.bf16.msra.mxu1 %v15529_v38  ;;  %v2001_v37 = vld [vmem:[%s16694_s28 + $0x3188] sm:$0xff] }
 0x21a   : > { %11511 = vmatprep.subr.bf16.mxu0 %v15544_v40  ;;  %11798 = vmatprep.subr.bf16.mxu1 %v15546_v42  ;;  %v2009_v38 = vld [vmem:[%s16694_s28 + $0x31c8] sm:$0xff]  ;;  %v15623_v40 = vcombine.low %v1984_v23, %v1992_v24  ;;  %v15625_v42 = vcombine.low %v1985_v27, %v1993_v28  ;;  %v2080_v23 = vld [vmem:[%s16694_s28 + $0x3400] sm:$0xff] }
 0x21b   : > { %v15642_v44 = vcombine.high %v2001_v37, %v2009_v38  ;;  %v2088_v24 = vld [vmem:[%s16694_s28 + $0x3440] sm:$0xff]  ;;  %v2081_v27 = vld [vmem:[%s16694_s28 + $0x3408] sm:$0xff] }
 0x21c   : > { %v2089_v28 = vld [vmem:[%s16694_s28 + $0x3448] sm:$0xff] }
 0x21d   : > { %11512 = vmatpush1.bf16.msra.mxu0 %v15543_v49  ;;  %11799 = vmatpush1.bf16.msra.mxu1 %v15545_v50  ;;  %v2017_v49 = vld [vmem:[%s16694_s28 + $0x3208] sm:$0xff] }
 0x21e   : > { %11513 = vmatprep.subr.bf16.mxu0 %v15560_v60  ;;  %11800 = vmatprep.subr.bf16.mxu1 %v15562_v54  ;;  %v2025_v50 = vld [vmem:[%s16694_s28 + $0x3248] sm:$0xff]  ;;  %v15639_v60 = vcombine.low %v2000_v34, %v2008_v35  ;;  %v15641_v54 = vcombine.low %v2001_v37, %v2009_v38  ;;  %v2096_v34 = vld [vmem:[%s16694_s28 + $0x3480] sm:$0xff] }
 0x21f   : > { %v15658_v56 = vcombine.high %v2017_v49, %v2025_v50  ;;  %v2104_v35 = vld [vmem:[%s16694_s28 + $0x34c0] sm:$0xff]  ;;  %v2097_v37 = vld [vmem:[%s16694_s28 + $0x3488] sm:$0xff] }
 0x220   : > { %v2105_v38 = vld [vmem:[%s16694_s28 + $0x34c8] sm:$0xff] }
 0x221   : > { %11514 = vmatpush1.bf16.msra.mxu0 %v15559_v62  ;;  %11801 = vmatpush1.bf16.msra.mxu1 %v15561_v63  ;;  %v2041_v62 = vld [vmem:[%s16694_s28 + $0x32c8] sm:$0xff]  ;;  %v15655_v63 = vcombine.low %v2016_v45, %v2024_v48  ;;  %v2112_v45 = vld [vmem:[%s16694_s28 + $0x3500] sm:$0xff] }
 0x222   : > { %11515 = vmatprep.subr.bf16.mxu0 %v15576_v0  ;;  %11802 = vmatprep.subr.bf16.mxu1 %v15578_v1  ;;  %v15657_v0 = vcombine.low %v2017_v49, %v2025_v50  ;;  %v15672_v1 = vcombine.high %v2032_v17, %v2040_v58  ;;  %v15674_v2 = vcombine.high %v2033_v59, %v2041_v62  ;;  %v2120_v48 = vld [vmem:[%s16694_s28 + $0x3540] sm:$0xff]  ;;  %v2113_v49 = vld [vmem:[%s16694_s28 + $0x3508] sm:$0xff] }
 0x223   : > { %v2121_v50 = vld [vmem:[%s16694_s28 + $0x3548] sm:$0xff] }
 0x225   : > { %11516 = vmatpush1.bf16.msra.mxu0 %v15575_v6  ;;  %11803 = vmatpush1.bf16.msra.mxu1 %v15577_v8  ;;  %v2057_v6 = vld [vmem:[%s16694_s28 + $0x3348] sm:$0xff]  ;;  %v15671_v8 = vcombine.low %v2032_v17, %v2040_v58  ;;  %v2128_v17 = vld [vmem:[%s16694_s28 + $0x3580] sm:$0xff] }
 0x226   : > { %11526 = vmatprep.subr.bf16.mxu0 %v15592_v9  ;;  %11813 = vmatprep.subr.bf16.mxu1 %v15594_v10  ;;  %v15673_v9 = vcombine.low %v2033_v59, %v2041_v62  ;;  %v15688_v10 = vcombine.high %v2048_v3, %v2056_v53  ;;  %v15690_v12 = vcombine.high %v2049_v5, %v2057_v6  ;;  %v2136_v58 = vld [vmem:[%s16694_s28 + $0x35c0] sm:$0xff]  ;;  %v2129_v59 = vld [vmem:[%s16694_s28 + $0x3588] sm:$0xff] }
 0x227   : > { %v2137_v62 = vld [vmem:[%s16694_s28 + $0x35c8] sm:$0xff] }
 0x228   : > { %11518 = vmatmul.mubr.bf16.vlgmr.msra.gmra.mrb[0].mxu0 %v17205_v15  ;;  %11805 = vmatmul.mubr.bf16.vlgmr.msra.gmra.mrb[0].mxu1 %v17205_v15 }
 0x229   : > { %11527 = vmatpush1.bf16.msra.mxu0 %v15591_v19  ;;  %11814 = vmatpush1.bf16.msra.mxu1 %v15593_v51  ;;  %v15687_v19 = vcombine.low %v2048_v3, %v2056_v53  ;;  %v15689_v51 = vcombine.low %v2049_v5, %v2057_v6  ;;  %v2144_v3 = vld [vmem:[%s16694_s28 + $0x3600] sm:$0xff]  ;;  %v2145_v5 = vld [vmem:[%s16694_s28 + $0x3608] sm:$0xff] }
 0x22a   : > { %11528 = vmatprep.subr.bf16.mxu0 %v15608_v21  ;;  %11815 = vmatprep.subr.bf16.mxu1 %v15610_v22  ;;  %v15704_v21 = vcombine.high %v2064_v13, %v2072_v14  ;;  %v15706_v22 = vcombine.high %v2065_v16, %v2073_v18  ;;  %v2152_v53 = vld [vmem:[%s16694_s28 + $0x3640] sm:$0xff]  ;;  %v2153_v6 = vld [vmem:[%s16694_s28 + $0x3648] sm:$0xff] }
 0x22b   : > { %11558 = vmatprep.mubr.bf16.mxu0 %v17212_v25  ;;  %11845 = vmatprep.mubr.bf16.mxu1 %v17212_v25 }
 0x22d   : > { %11529 = vmatpush1.bf16.msra.mxu0 %v15607_v29  ;;  %11816 = vmatpush1.bf16.msra.mxu1 %v15609_v30  ;;  %v15703_v29 = vcombine.low %v2064_v13, %v2072_v14  ;;  %v15705_v30 = vcombine.low %v2065_v16, %v2073_v18  ;;  %v2160_v13 = vld [vmem:[%s16694_s28 + $0x3680] sm:$0xff]  ;;  %v2161_v16 = vld [vmem:[%s16694_s28 + $0x3688] sm:$0xff] }
 0x22e   : > { %11530 = vmatprep.subr.bf16.mxu0 %v15624_v31  ;;  %11817 = vmatprep.subr.bf16.mxu1 %v15626_v33  ;;  %v15720_v31 = vcombine.high %v2080_v23, %v2088_v24  ;;  %v15722_v33 = vcombine.high %v2081_v27, %v2089_v28  ;;  %v2168_v14 = vld [vmem:[%s16694_s28 + $0x36c0] sm:$0xff]  ;;  %v2169_v18 = vld [vmem:[%s16694_s28 + $0x36c8] sm:$0xff] }
 0x231   : > { %11531 = vmatpush1.bf16.msra.mxu0 %v15623_v40  ;;  %11818 = vmatpush1.bf16.msra.mxu1 %v15625_v42  ;;  %v15719_v40 = vcombine.low %v2080_v23, %v2088_v24  ;;  %v15721_v42 = vcombine.low %v2081_v27, %v2089_v28  ;;  %v2176_v23 = vld [vmem:[%s16694_s28 + $0x3700] sm:$0xff]  ;;  %v2177_v27 = vld [vmem:[%s16694_s28 + $0x3708] sm:$0xff] }
 0x232   : > { %11532 = vmatprep.subr.bf16.mxu0 %v15640_v43  ;;  %11819 = vmatprep.subr.bf16.mxu1 %v15642_v44  ;;  %v15736_v43 = vcombine.high %v2096_v34, %v2104_v35  ;;  %v15738_v44 = vcombine.high %v2097_v37, %v2105_v38  ;;  %v2184_v24 = vld [vmem:[%s16694_s28 + $0x3740] sm:$0xff]  ;;  %v2185_v28 = vld [vmem:[%s16694_s28 + $0x3748] sm:$0xff] }
 0x235   : > { %11533 = vmatpush1.bf16.msra.mxu0 %v15639_v60  ;;  %11820 = vmatpush1.bf16.msra.mxu1 %v15641_v54  ;;  %v15735_v60 = vcombine.low %v2096_v34, %v2104_v35  ;;  %v15737_v54 = vcombine.low %v2097_v37, %v2105_v38  ;;  %v2192_v34 = vld [vmem:[%s16694_s28 + $0x3780] sm:$0xff]  ;;  %v2193_v37 = vld [vmem:[%s16694_s28 + $0x3788] sm:$0xff] }
 0x236   : > { %11534 = vmatprep.subr.bf16.mxu0 %v15656_v55  ;;  %11821 = vmatprep.subr.bf16.mxu1 %v15658_v56  ;;  %v15752_v55 = vcombine.high %v2112_v45, %v2120_v48  ;;  %v15754_v56 = vcombine.high %v2113_v49, %v2121_v50  ;;  %v2200_v35 = vld [vmem:[%s16694_s28 + $0x37c0] sm:$0xff]  ;;  %v2201_v38 = vld [vmem:[%s16694_s28 + $0x37c8] sm:$0xff] }
 0x239   : > { %11535 = vmatpush1.bf16.msra.mxu0 %v15655_v63  ;;  %11822 = vmatpush1.bf16.msra.mxu1 %v15657_v0  ;;  %v15751_v63 = vcombine.low %v2112_v45, %v2120_v48  ;;  %v15753_v0 = vcombine.low %v2113_v49, %v2121_v50  ;;  %v418_v45 = vld [vmem:[%s16694_s28 + $0x10] sm:$0xff]  ;;  %v419_v49 = vld [vmem:[%s16694_s28 + $0x18] sm:$0xff] }
 0x23a   : > { %11536 = vmatprep.subr.bf16.mxu0 %v15672_v1  ;;  %11823 = vmatprep.subr.bf16.mxu1 %v15674_v2  ;;  %v15768_v1 = vcombine.high %v2128_v17, %v2136_v58  ;;  %v15770_v2 = vcombine.high %v2129_v59, %v2137_v62  ;;  %v426_v48 = vld [vmem:[%s16694_s28 + $0x50] sm:$0xff]  ;;  %v427_v50 = vld [vmem:[%s16694_s28 + $0x58] sm:$0xff] }
 0x23d   : > { %11537 = vmatpush1.bf16.msra.mxu0 %v15671_v8  ;;  %11824 = vmatpush1.bf16.msra.mxu1 %v15673_v9  ;;  %v15767_v8 = vcombine.low %v2128_v17, %v2136_v58  ;;  %v15769_v9 = vcombine.low %v2129_v59, %v2137_v62  ;;  %v434_v17 = vld [vmem:[%s16694_s28 + $0x90] sm:$0xff]  ;;  %v17280_v59 = vrot.slane %v17195_v4, %v16740_v41  ;;  %v435_v62 = vld [vmem:[%s16694_s28 + $0x98] sm:$0xff] }
 0x23e   : > { %11538 = vmatprep.subr.bf16.mxu0 %v15688_v10  ;;  %11825 = vmatprep.subr.bf16.mxu1 %v15690_v12  ;;  %v15784_v10 = vcombine.high %v2144_v3, %v2152_v53  ;;  %v15786_v12 = vcombine.high %v2145_v5, %v2153_v6  ;;  %v442_v58 = vld [vmem:[%s16694_s28 + $0xd0] sm:$0xff]  ;;  %v451_v4 = vld [vmem:[%s16694_s28 + $0x118] sm:$0xff] }
 0x241   : > { %11539 = vmatpush1.bf16.msra.mxu0 %v15687_v19  ;;  %11826 = vmatpush1.bf16.msra.mxu1 %v15689_v51  ;;  %v15783_v19 = vcombine.low %v2144_v3, %v2152_v53  ;;  %v15785_v51 = vcombine.low %v2145_v5, %v2153_v6  ;;  %v450_v53 = vld [vmem:[%s16694_s28 + $0x110] sm:$0xff]  ;;  %v459_v6 = vld [vmem:[%s16694_s28 + $0x158] sm:$0xff] }
 0x242   : > { %11540 = vmatprep.subr.bf16.mxu0 %v15704_v21  ;;  %11827 = vmatprep.subr.bf16.mxu1 %v15706_v22  ;;  %v15800_v21 = vcombine.high %v2160_v13, %v2168_v14  ;;  %v15802_v22 = vcombine.high %v2161_v16, %v2169_v18  ;;  %v458_v5 = vld [vmem:[%s16694_s28 + $0x150] sm:$0xff] }
 0x245   : > { %11541 = vmatpush1.bf16.msra.mxu0 %v15703_v29  ;;  %11828 = vmatpush1.bf16.msra.mxu1 %v15705_v30  ;;  %v15799_v29 = vcombine.low %v2160_v13, %v2168_v14  ;;  %v15801_v30 = vcombine.low %v2161_v16, %v2169_v18  ;;  %v466_v13 = vld [vmem:[%s16694_s28 + $0x190] sm:$0xff]  ;;  %v467_v16 = vld [vmem:[%s16694_s28 + $0x198] sm:$0xff] }
 0x246   : > { %11542 = vmatprep.subr.bf16.mxu0 %v15720_v31  ;;  %11829 = vmatprep.subr.bf16.mxu1 %v15722_v33  ;;  %v15816_v31 = vcombine.high %v2176_v23, %v2184_v24  ;;  %v15818_v33 = vcombine.high %v2177_v27, %v2185_v28  ;;  %v474_v14 = vld [vmem:[%s16694_s28 + $0x1d0] sm:$0xff]  ;;  %v475_v18 = vld [vmem:[%s16694_s28 + $0x1d8] sm:$0xff] }
 0x249   : > { %11543 = vmatpush1.bf16.msra.mxu0 %v15719_v40  ;;  %11830 = vmatpush1.bf16.msra.mxu1 %v15721_v42  ;;  %v15815_v40 = vcombine.low %v2176_v23, %v2184_v24  ;;  %v15817_v42 = vcombine.low %v2177_v27, %v2185_v28  ;;  %v482_v23 = vld [vmem:[%s16694_s28 + $0x210] sm:$0xff]  ;;  %v483_v27 = vld [vmem:[%s16694_s28 + $0x218] sm:$0xff] }
 0x24a   : > { %11544 = vmatprep.subr.bf16.mxu0 %v15736_v43  ;;  %11831 = vmatprep.subr.bf16.mxu1 %v15738_v44  ;;  %v15832_v43 = vcombine.high %v2192_v34, %v2200_v35  ;;  %v15834_v44 = vcombine.high %v2193_v37, %v2201_v38  ;;  %v490_v24 = vld [vmem:[%s16694_s28 + $0x250] sm:$0xff]  ;;  %v491_v28 = vld [vmem:[%s16694_s28 + $0x258] sm:$0xff] }
 0x24d   : > { %11545 = vmatpush1.bf16.msra.mxu0 %v15735_v60  ;;  %11832 = vmatpush1.bf16.msra.mxu1 %v15737_v54  ;;  %v15831_v60 = vcombine.low %v2192_v34, %v2200_v35  ;;  %v15833_v54 = vcombine.low %v2193_v37, %v2201_v38  ;;  %v498_v34 = vld [vmem:[%s16694_s28 + $0x290] sm:$0xff]  ;;  %v499_v37 = vld [vmem:[%s16694_s28 + $0x298] sm:$0xff] }
 0x24e   : > { %11546 = vmatprep.subr.bf16.mxu0 %v15752_v55  ;;  %11833 = vmatprep.subr.bf16.mxu1 %v15754_v56  ;;  %v14060_v55 = vcombine.high %v418_v45, %v426_v48  ;;  %v14062_v56 = vcombine.high %v419_v49, %v427_v50  ;;  %v506_v35 = vld [vmem:[%s16694_s28 + $0x2d0] sm:$0xff]  ;;  %v507_v38 = vld [vmem:[%s16694_s28 + $0x2d8] sm:$0xff] }
 0x251   : > { %11547 = vmatpush1.bf16.msra.mxu0 %v15751_v63  ;;  %11834 = vmatpush1.bf16.msra.mxu1 %v15753_v0  ;;  %v443_v63 = vld [vmem:[%s16694_s28 + $0xd8] sm:$0xff]  ;;  %v14059_v0 = vcombine.low %v418_v45, %v426_v48  ;;  %v514_v45 = vld [vmem:[%s16694_s28 + $0x310] sm:$0xff] }
 0x252   : > { %11548 = vmatprep.subr.bf16.mxu0 %v15768_v1  ;;  %11835 = vmatprep.subr.bf16.mxu1 %v15770_v2  ;;  %v14061_v1 = vcombine.low %v419_v49, %v427_v50  ;;  %v14076_v2 = vcombine.high %v434_v17, %v442_v58  ;;  %v14078_v3 = vcombine.high %v435_v62, %v443_v63  ;;  %v522_v48 = vld [vmem:[%s16694_s28 + $0x350] sm:$0xff]  ;;  %v515_v49 = vld [vmem:[%s16694_s28 + $0x318] sm:$0xff] }
 0x253   : > { %v523_v50 = vld [vmem:[%s16694_s28 + $0x358] sm:$0xff] }
 0x255   : > { %11549 = vmatpush1.bf16.msra.mxu0 %v15767_v8  ;;  %11836 = vmatpush1.bf16.msra.mxu1 %v15769_v9  ;;  %v14075_v8 = vcombine.low %v434_v17, %v442_v58  ;;  %v14077_v9 = vcombine.low %v435_v62, %v443_v63  ;;  %v530_v17 = vld [vmem:[%s16694_s28 + $0x390] sm:$0xff]  ;;  %v531_v62 = vld [vmem:[%s16694_s28 + $0x398] sm:$0xff] }
 0x256   : > { %11550 = vmatprep.subr.bf16.mxu0 %v15784_v10  ;;  %11837 = vmatprep.subr.bf16.mxu1 %v15786_v12  ;;  %v14092_v10 = vcombine.high %v450_v53, %v458_v5  ;;  %v14094_v12 = vcombine.high %v451_v4, %v459_v6  ;;  %v538_v58 = vld [vmem:[%s16694_s28 + $0x3d0] sm:$0xff]  ;;  %v539_v63 = vld [vmem:[%s16694_s28 + $0x3d8] sm:$0xff] }
 0x259   : > { %11551 = vmatpush1.bf16.msra.mxu0 %v15783_v19  ;;  %11838 = vmatpush1.bf16.msra.mxu1 %v15785_v51  ;;  %v14091_v19 = vcombine.low %v450_v53, %v458_v5  ;;  %v14093_v51 = vcombine.low %v451_v4, %v459_v6  ;;  %v546_v53 = vld [vmem:[%s16694_s28 + $0x410] sm:$0xff]  ;;  %v547_v4 = vld [vmem:[%s16694_s28 + $0x418] sm:$0xff] }
 0x25a   : > { %11552 = vmatprep.subr.bf16.mxu0 %v15800_v21  ;;  %11839 = vmatprep.subr.bf16.mxu1 %v15802_v22  ;;  %v14108_v21 = vcombine.high %v466_v13, %v474_v14  ;;  %v14110_v22 = vcombine.high %v467_v16, %v475_v18  ;;  %v554_v5 = vld [vmem:[%s16694_s28 + $0x450] sm:$0xff]  ;;  %v555_v6 = vld [vmem:[%s16694_s28 + $0x458] sm:$0xff] }
 0x25d   : > { %11553 = vmatpush1.bf16.msra.mxu0 %v15799_v29  ;;  %11840 = vmatpush1.bf16.msra.mxu1 %v15801_v30  ;;  %v14107_v29 = vcombine.low %v466_v13, %v474_v14  ;;  %v14109_v30 = vcombine.low %v467_v16, %v475_v18  ;;  %v562_v13 = vld [vmem:[%s16694_s28 + $0x490] sm:$0xff]  ;;  %v563_v16 = vld [vmem:[%s16694_s28 + $0x498] sm:$0xff] }
 0x25e   : > { %11554 = vmatprep.subr.bf16.mxu0 %v15816_v31  ;;  %11841 = vmatprep.subr.bf16.mxu1 %v15818_v33  ;;  %v14124_v31 = vcombine.high %v482_v23, %v490_v24  ;;  %v14126_v33 = vcombine.high %v483_v27, %v491_v28  ;;  %v570_v14 = vld [vmem:[%s16694_s28 + $0x4d0] sm:$0xff]  ;;  %v571_v18 = vld [vmem:[%s16694_s28 + $0x4d8] sm:$0xff] }
 0x261   : > { %11555 = vmatpush1.bf16.msra.mxu0 %v15815_v40  ;;  %11842 = vmatpush1.bf16.msra.mxu1 %v15817_v42  ;;  %v14123_v40 = vcombine.low %v482_v23, %v490_v24  ;;  %v14125_v42 = vcombine.low %v483_v27, %v491_v28  ;;  %v578_v23 = vld [vmem:[%s16694_s28 + $0x510] sm:$0xff]  ;;  %v579_v27 = vld [vmem:[%s16694_s28 + $0x518] sm:$0xff] }
 0x262   : > { %11556 = vmatprep.subr.bf16.mxu0 %v15832_v43  ;;  %11843 = vmatprep.subr.bf16.mxu1 %v15834_v44  ;;  %v14140_v43 = vcombine.high %v498_v34, %v506_v35  ;;  %v14142_v44 = vcombine.high %v499_v37, %v507_v38  ;;  %v586_v24 = vld [vmem:[%s16694_s28 + $0x550] sm:$0xff]  ;;  %v587_v28 = vld [vmem:[%s16694_s28 + $0x558] sm:$0xff] }
 0x265   : > { %11557 = vmatpush1.bf16.msra.mxu0 %v15831_v60  ;;  %11844 = vmatpush1.bf16.msra.mxu1 %v15833_v54  ;;  %v14139_v60 = vcombine.low %v498_v34, %v506_v35  ;;  %v14141_v54 = vcombine.low %v499_v37, %v507_v38  ;;  %v594_v34 = vld [vmem:[%s16694_s28 + $0x590] sm:$0xff]  ;;  %v595_v37 = vld [vmem:[%s16694_s28 + $0x598] sm:$0xff] }
 0x266   : > { %11854 = vmatprep.subr.bf16.mxu0 %v14060_v55  ;;  %12141 = vmatprep.subr.bf16.mxu1 %v14062_v56  ;;  %v14156_v55 = vcombine.high %v514_v45, %v522_v48  ;;  %v14158_v56 = vcombine.high %v515_v49, %v523_v50  ;;  %v602_v35 = vld [vmem:[%s16694_s28 + $0x5d0] sm:$0xff]  ;;  %v603_v38 = vld [vmem:[%s16694_s28 + $0x5d8] sm:$0xff] }
 0x268   : > { %11559 = vmatmul.mubr.bf16.vlgmr.msra.gmra.mrb[0].mxu0 %v17280_v59  ;;  %11846 = vmatmul.mubr.bf16.vlgmr.msra.gmra.mrb[0].mxu1 %v17280_v59 }
 0x269   : > { %11855 = vmatpush1.bf16.msra.mxu0 %v14059_v0  ;;  %12142 = vmatpush1.bf16.msra.mxu1 %v14061_v1  ;;  %v14155_v0 = vcombine.low %v514_v45, %v522_v48  ;;  %v14157_v1 = vcombine.low %v515_v49, %v523_v50  ;;  %v610_v45 = vld [vmem:[%s16694_s28 + $0x610] sm:$0xff]  ;;  %v611_v49 = vld [vmem:[%s16694_s28 + $0x618] sm:$0xff] }
 0x26a   : > { %11856 = vmatprep.subr.bf16.mxu0 %v14076_v2  ;;  %12143 = vmatprep.subr.bf16.mxu1 %v14078_v3  ;;  %v14172_v2 = vcombine.high %v530_v17, %v538_v58  ;;  %v14174_v3 = vcombine.high %v531_v62, %v539_v63  ;;  %v618_v48 = vld [vmem:[%s16694_s28 + $0x650] sm:$0xff]  ;;  %v619_v50 = vld [vmem:[%s16694_s28 + $0x658] sm:$0xff] }
 0x26b   : > { %11886 = vmatprep.mubr.bf16.mxu0 %v16762_v61  ;;  %12173 = vmatprep.mubr.bf16.mxu1 %v16762_v61 }
 0x26d   : > { %11857 = vmatpush1.bf16.msra.mxu0 %v14075_v8  ;;  %12144 = vmatpush1.bf16.msra.mxu1 %v14077_v9  ;;  %v14171_v8 = vcombine.low %v530_v17, %v538_v58  ;;  %v14173_v9 = vcombine.low %v531_v62, %v539_v63  ;;  %v626_v17 = vld [vmem:[%s16694_s28 + $0x690] sm:$0xff]  ;;  %v627_v62 = vld [vmem:[%s16694_s28 + $0x698] sm:$0xff] }
 0x26e   : > { %11858 = vmatprep.subr.bf16.mxu0 %v14092_v10  ;;  %12145 = vmatprep.subr.bf16.mxu1 %v14094_v12  ;;  %v14188_v10 = vcombine.high %v546_v53, %v554_v5  ;;  %v14190_v12 = vcombine.high %v547_v4, %v555_v6  ;;  %v634_v58 = vld [vmem:[%s16694_s28 + $0x6d0] sm:$0xff]  ;;  %v635_v63 = vld [vmem:[%s16694_s28 + $0x6d8] sm:$0xff] }
 0x271   : > { %11859 = vmatpush1.bf16.msra.mxu0 %v14091_v19  ;;  %12146 = vmatpush1.bf16.msra.mxu1 %v14093_v51  ;;  %v14187_v19 = vcombine.low %v546_v53, %v554_v5  ;;  %v14189_v51 = vcombine.low %v547_v4, %v555_v6  ;;  %v642_v53 = vld [vmem:[%s16694_s28 + $0x710] sm:$0xff]  ;;  %v643_v4 = vld [vmem:[%s16694_s28 + $0x718] sm:$0xff] }
 0x272   : > { %11860 = vmatprep.subr.bf16.mxu0 %v14108_v21  ;;  %12147 = vmatprep.subr.bf16.mxu1 %v14110_v22  ;;  %v14204_v21 = vcombine.high %v562_v13, %v570_v14  ;;  %v14206_v22 = vcombine.high %v563_v16, %v571_v18  ;;  %v650_v5 = vld [vmem:[%s16694_s28 + $0x750] sm:$0xff]  ;;  %v651_v6 = vld [vmem:[%s16694_s28 + $0x758] sm:$0xff] }
 0x275   : > { %11861 = vmatpush1.bf16.msra.mxu0 %v14107_v29  ;;  %12148 = vmatpush1.bf16.msra.mxu1 %v14109_v30  ;;  %v14203_v29 = vcombine.low %v562_v13, %v570_v14  ;;  %v14205_v30 = vcombine.low %v563_v16, %v571_v18  ;;  %v658_v13 = vld [vmem:[%s16694_s28 + $0x790] sm:$0xff]  ;;  %v659_v16 = vld [vmem:[%s16694_s28 + $0x798] sm:$0xff] }
 0x276   : > { %11862 = vmatprep.subr.bf16.mxu0 %v14124_v31  ;;  %12149 = vmatprep.subr.bf16.mxu1 %v14126_v33  ;;  %v14220_v31 = vcombine.high %v578_v23, %v586_v24  ;;  %v14222_v33 = vcombine.high %v579_v27, %v587_v28  ;;  %v666_v14 = vld [vmem:[%s16694_s28 + $0x7d0] sm:$0xff]  ;;  %v667_v18 = vld [vmem:[%s16694_s28 + $0x7d8] sm:$0xff] }
 0x279   : > { %11863 = vmatpush1.bf16.msra.mxu0 %v14123_v40  ;;  %12150 = vmatpush1.bf16.msra.mxu1 %v14125_v42  ;;  %v14219_v40 = vcombine.low %v578_v23, %v586_v24  ;;  %v14221_v42 = vcombine.low %v579_v27, %v587_v28  ;;  %v674_v23 = vld [vmem:[%s16694_s28 + $0x810] sm:$0xff]  ;;  %v675_v27 = vld [vmem:[%s16694_s28 + $0x818] sm:$0xff] }
 0x27a   : > { %11864 = vmatprep.subr.bf16.mxu0 %v14140_v43  ;;  %12151 = vmatprep.subr.bf16.mxu1 %v14142_v44  ;;  %v14236_v43 = vcombine.high %v594_v34, %v602_v35  ;;  %v14238_v44 = vcombine.high %v595_v37, %v603_v38  ;;  %v682_v24 = vld [vmem:[%s16694_s28 + $0x850] sm:$0xff]  ;;  %v683_v28 = vld [vmem:[%s16694_s28 + $0x858] sm:$0xff] }
 0x27d   : > { %11865 = vmatpush1.bf16.msra.mxu0 %v14139_v60  ;;  %12152 = vmatpush1.bf16.msra.mxu1 %v14141_v54  ;;  %v14235_v60 = vcombine.low %v594_v34, %v602_v35  ;;  %v14237_v54 = vcombine.low %v595_v37, %v603_v38  ;;  %v690_v34 = vld [vmem:[%s16694_s28 + $0x890] sm:$0xff]  ;;  %v691_v37 = vld [vmem:[%s16694_s28 + $0x898] sm:$0xff] }
 0x27e   : > { %11866 = vmatprep.subr.bf16.mxu0 %v14156_v55  ;;  %12153 = vmatprep.subr.bf16.mxu1 %v14158_v56  ;;  %v14252_v55 = vcombine.high %v610_v45, %v618_v48  ;;  %v14254_v56 = vcombine.high %v611_v49, %v619_v50  ;;  %v698_v35 = vld [vmem:[%s16694_s28 + $0x8d0] sm:$0xff]  ;;  %v699_v38 = vld [vmem:[%s16694_s28 + $0x8d8] sm:$0xff] }
 0x281   : > { %11867 = vmatpush1.bf16.msra.mxu0 %v14155_v0  ;;  %12154 = vmatpush1.bf16.msra.mxu1 %v14157_v1  ;;  %v14251_v0 = vcombine.low %v610_v45, %v618_v48  ;;  %v14253_v1 = vcombine.low %v611_v49, %v619_v50  ;;  %v706_v45 = vld [vmem:[%s16694_s28 + $0x910] sm:$0xff]  ;;  %v707_v49 = vld [vmem:[%s16694_s28 + $0x918] sm:$0xff] }
 0x282   : > { %11868 = vmatprep.subr.bf16.mxu0 %v14172_v2  ;;  %12155 = vmatprep.subr.bf16.mxu1 %v14174_v3  ;;  %v14268_v2 = vcombine.high %v626_v17, %v634_v58  ;;  %v14270_v3 = vcombine.high %v627_v62, %v635_v63  ;;  %v714_v48 = vld [vmem:[%s16694_s28 + $0x950] sm:$0xff]  ;;  %v715_v50 = vld [vmem:[%s16694_s28 + $0x958] sm:$0xff] }
 0x285   : > { %11869 = vmatpush1.bf16.msra.mxu0 %v14171_v8  ;;  %12156 = vmatpush1.bf16.msra.mxu1 %v14173_v9  ;;  %v14267_v8 = vcombine.low %v626_v17, %v634_v58  ;;  %v14269_v9 = vcombine.low %v627_v62, %v635_v63  ;;  %v722_v17 = vld [vmem:[%s16694_s28 + $0x990] sm:$0xff]  ;;  %v723_v62 = vld [vmem:[%s16694_s28 + $0x998] sm:$0xff] }
 0x286   : > { %11870 = vmatprep.subr.bf16.mxu0 %v14188_v10  ;;  %12157 = vmatprep.subr.bf16.mxu1 %v14190_v12  ;;  %v14284_v10 = vcombine.high %v642_v53, %v650_v5  ;;  %v14286_v12 = vcombine.high %v643_v4, %v651_v6  ;;  %v730_v58 = vld [vmem:[%s16694_s28 + $0x9d0] sm:$0xff]  ;;  %v731_v63 = vld [vmem:[%s16694_s28 + $0x9d8] sm:$0xff] }
 0x289   : > { %11871 = vmatpush1.bf16.msra.mxu0 %v14187_v19  ;;  %12158 = vmatpush1.bf16.msra.mxu1 %v14189_v51  ;;  %v14283_v19 = vcombine.low %v642_v53, %v650_v5  ;;  %v14285_v51 = vcombine.low %v643_v4, %v651_v6  ;;  %v738_v53 = vld [vmem:[%s16694_s28 + $0xa10] sm:$0xff]  ;;  %v739_v4 = vld [vmem:[%s16694_s28 + $0xa18] sm:$0xff] }
 0x28a   : > { %11872 = vmatprep.subr.bf16.mxu0 %v14204_v21  ;;  %12159 = vmatprep.subr.bf16.mxu1 %v14206_v22  ;;  %v14300_v21 = vcombine.high %v658_v13, %v666_v14  ;;  %v14302_v22 = vcombine.high %v659_v16, %v667_v18  ;;  %v746_v5 = vld [vmem:[%s16694_s28 + $0xa50] sm:$0xff]  ;;  %v747_v6 = vld [vmem:[%s16694_s28 + $0xa58] sm:$0xff] }
 0x28d   : > { %11873 = vmatpush1.bf16.msra.mxu0 %v14203_v29  ;;  %12160 = vmatpush1.bf16.msra.mxu1 %v14205_v30  ;;  %v14299_v29 = vcombine.low %v658_v13, %v666_v14  ;;  %v14301_v30 = vcombine.low %v659_v16, %v667_v18  ;;  %v754_v13 = vld [vmem:[%s16694_s28 + $0xa90] sm:$0xff]  ;;  %v755_v16 = vld [vmem:[%s16694_s28 + $0xa98] sm:$0xff] }
 0x28e   : > { %11874 = vmatprep.subr.bf16.mxu0 %v14220_v31  ;;  %12161 = vmatprep.subr.bf16.mxu1 %v14222_v33  ;;  %v14316_v31 = vcombine.high %v674_v23, %v682_v24  ;;  %v14318_v33 = vcombine.high %v675_v27, %v683_v28  ;;  %v762_v14 = vld [vmem:[%s16694_s28 + $0xad0] sm:$0xff]  ;;  %v763_v18 = vld [vmem:[%s16694_s28 + $0xad8] sm:$0xff] }
 0x291   : > { %11875 = vmatpush1.bf16.msra.mxu0 %v14219_v40  ;;  %12162 = vmatpush1.bf16.msra.mxu1 %v14221_v42  ;;  %v14315_v40 = vcombine.low %v674_v23, %v682_v24  ;;  %v14317_v42 = vcombine.low %v675_v27, %v683_v28  ;;  %v770_v23 = vld [vmem:[%s16694_s28 + $0xb10] sm:$0xff]  ;;  %v771_v27 = vld [vmem:[%s16694_s28 + $0xb18] sm:$0xff] }
 0x292   : > { %11876 = vmatprep.subr.bf16.mxu0 %v14236_v43  ;;  %12163 = vmatprep.subr.bf16.mxu1 %v14238_v44  ;;  %v14332_v43 = vcombine.high %v690_v34, %v698_v35  ;;  %v14334_v44 = vcombine.high %v691_v37, %v699_v38  ;;  %v778_v24 = vld [vmem:[%s16694_s28 + $0xb50] sm:$0xff]  ;;  %v779_v28 = vld [vmem:[%s16694_s28 + $0xb58] sm:$0xff] }
 0x295   : > { %11877 = vmatpush1.bf16.msra.mxu0 %v14235_v60  ;;  %12164 = vmatpush1.bf16.msra.mxu1 %v14237_v54  ;;  %v14331_v60 = vcombine.low %v690_v34, %v698_v35  ;;  %v14333_v54 = vcombine.low %v691_v37, %v699_v38  ;;  %v786_v34 = vld [vmem:[%s16694_s28 + $0xb90] sm:$0xff]  ;;  %v787_v37 = vld [vmem:[%s16694_s28 + $0xb98] sm:$0xff] }
 0x296   : > { %11878 = vmatprep.subr.bf16.mxu0 %v14252_v55  ;;  %12165 = vmatprep.subr.bf16.mxu1 %v14254_v56  ;;  %v14348_v55 = vcombine.high %v706_v45, %v714_v48  ;;  %v14350_v56 = vcombine.high %v707_v49, %v715_v50  ;;  %v794_v35 = vld [vmem:[%s16694_s28 + $0xbd0] sm:$0xff]  ;;  %v795_v38 = vld [vmem:[%s16694_s28 + $0xbd8] sm:$0xff] }
 0x299   : > { %11879 = vmatpush1.bf16.msra.mxu0 %v14251_v0  ;;  %12166 = vmatpush1.bf16.msra.mxu1 %v14253_v1  ;;  %v14347_v0 = vcombine.low %v706_v45, %v714_v48  ;;  %v14349_v1 = vcombine.low %v707_v49, %v715_v50  ;;  %v802_v45 = vld [vmem:[%s16694_s28 + $0xc10] sm:$0xff]  ;;  %v803_v49 = vld [vmem:[%s16694_s28 + $0xc18] sm:$0xff] }
 0x29a   : > { %11880 = vmatprep.subr.bf16.mxu0 %v14268_v2  ;;  %12167 = vmatprep.subr.bf16.mxu1 %v14270_v3  ;;  %v14364_v2 = vcombine.high %v722_v17, %v730_v58  ;;  %v14366_v3 = vcombine.high %v723_v62, %v731_v63  ;;  %v810_v48 = vld [vmem:[%s16694_s28 + $0xc50] sm:$0xff]  ;;  %v811_v50 = vld [vmem:[%s16694_s28 + $0xc58] sm:$0xff] }
 0x29d   : > { %11881 = vmatpush1.bf16.msra.mxu0 %v14267_v8  ;;  %12168 = vmatpush1.bf16.msra.mxu1 %v14269_v9  ;;  %v14363_v8 = vcombine.low %v722_v17, %v730_v58  ;;  %v14365_v9 = vcombine.low %v723_v62, %v731_v63  ;;  %v818_v17 = vld [vmem:[%s16694_s28 + $0xc90] sm:$0xff]  ;;  %v819_v62 = vld [vmem:[%s16694_s28 + $0xc98] sm:$0xff] }
 0x29e   : > { %11882 = vmatprep.subr.bf16.mxu0 %v14284_v10  ;;  %12169 = vmatprep.subr.bf16.mxu1 %v14286_v12  ;;  %v14380_v10 = vcombine.high %v738_v53, %v746_v5  ;;  %v14382_v12 = vcombine.high %v739_v4, %v747_v6  ;;  %v826_v58 = vld [vmem:[%s16694_s28 + $0xcd0] sm:$0xff]  ;;  %v827_v63 = vld [vmem:[%s16694_s28 + $0xcd8] sm:$0xff] }
 0x2a1   : > { %11883 = vmatpush1.bf16.msra.mxu0 %v14283_v19  ;;  %12170 = vmatpush1.bf16.msra.mxu1 %v14285_v51  ;;  %v14379_v19 = vcombine.low %v738_v53, %v746_v5  ;;  %v14381_v51 = vcombine.low %v739_v4, %v747_v6  ;;  %v834_v53 = vld [vmem:[%s16694_s28 + $0xd10] sm:$0xff]  ;;  %v835_v4 = vld [vmem:[%s16694_s28 + $0xd18] sm:$0xff] }
 0x2a2   : > { %11884 = vmatprep.subr.bf16.mxu0 %v14300_v21  ;;  %12171 = vmatprep.subr.bf16.mxu1 %v14302_v22  ;;  %v14396_v21 = vcombine.high %v754_v13, %v762_v14  ;;  %v14398_v22 = vcombine.high %v755_v16, %v763_v18  ;;  %v842_v5 = vld [vmem:[%s16694_s28 + $0xd50] sm:$0xff]  ;;  %v843_v6 = vld [vmem:[%s16694_s28 + $0xd58] sm:$0xff] }
 0x2a5   : > { %11885 = vmatpush1.bf16.msra.mxu0 %v14299_v29  ;;  %12172 = vmatpush1.bf16.msra.mxu1 %v14301_v30  ;;  %v14395_v29 = vcombine.low %v754_v13, %v762_v14  ;;  %v14397_v30 = vcombine.low %v755_v16, %v763_v18  ;;  %v850_v13 = vld [vmem:[%s16694_s28 + $0xd90] sm:$0xff]  ;;  %v851_v16 = vld [vmem:[%s16694_s28 + $0xd98] sm:$0xff] }
 0x2a6   : > { %11895 = vmatprep.subr.bf16.mxu0 %v14316_v31  ;;  %12182 = vmatprep.subr.bf16.mxu1 %v14318_v33  ;;  %v14412_v31 = vcombine.high %v770_v23, %v778_v24  ;;  %v14414_v33 = vcombine.high %v771_v27, %v779_v28  ;;  %v858_v14 = vld [vmem:[%s16694_s28 + $0xdd0] sm:$0xff]  ;;  %v859_v18 = vld [vmem:[%s16694_s28 + $0xdd8] sm:$0xff] }
 0x2a8   : > { %11887 = vmatmul.mubr.bf16.vlgmr.msra.gmra.mrb[4].mxu0 %v16804_v11  ;;  %12174 = vmatmul.mubr.bf16.vlgmr.msra.gmra.mrb[4].mxu1 %v16804_v11 }
 0x2a9   : > { %11896 = vmatpush1.bf16.msra.mxu0 %v14315_v40  ;;  %12183 = vmatpush1.bf16.msra.mxu1 %v14317_v42  ;;  %v14411_v40 = vcombine.low %v770_v23, %v778_v24  ;;  %v14413_v42 = vcombine.low %v771_v27, %v779_v28  ;;  %v866_v23 = vld [vmem:[%s16694_s28 + $0xe10] sm:$0xff]  ;;  %v867_v27 = vld [vmem:[%s16694_s28 + $0xe18] sm:$0xff] }
 0x2aa   : > { %11897 = vmatprep.subr.bf16.mxu0 %v14332_v43  ;;  %12184 = vmatprep.subr.bf16.mxu1 %v14334_v44  ;;  %v14428_v43 = vcombine.high %v786_v34, %v794_v35  ;;  %v14430_v44 = vcombine.high %v787_v37, %v795_v38  ;;  %v874_v24 = vld [vmem:[%s16694_s28 + $0xe50] sm:$0xff]  ;;  %v875_v28 = vld [vmem:[%s16694_s28 + $0xe58] sm:$0xff] }
 0x2ab   : > { %11927 = vmatprep.mubr.bf16.mxu0 %v16812_v20  ;;  %12214 = vmatprep.mubr.bf16.mxu1 %v16812_v20 }
 0x2ad   : > { %11898 = vmatpush1.bf16.msra.mxu0 %v14331_v60  ;;  %12185 = vmatpush1.bf16.msra.mxu1 %v14333_v54  ;;  %v14427_v60 = vcombine.low %v786_v34, %v794_v35  ;;  %v14429_v54 = vcombine.low %v787_v37, %v795_v38  ;;  %v882_v34 = vld [vmem:[%s16694_s28 + $0xe90] sm:$0xff]  ;;  %v883_v37 = vld [vmem:[%s16694_s28 + $0xe98] sm:$0xff] }
 0x2ae   : > { %11899 = vmatprep.subr.bf16.mxu0 %v14348_v55  ;;  %12186 = vmatprep.subr.bf16.mxu1 %v14350_v56  ;;  %v14444_v55 = vcombine.high %v802_v45, %v810_v48  ;;  %v14446_v56 = vcombine.high %v803_v49, %v811_v50  ;;  %v890_v35 = vld [vmem:[%s16694_s28 + $0xed0] sm:$0xff]  ;;  %v891_v38 = vld [vmem:[%s16694_s28 + $0xed8] sm:$0xff] }
 0x2b1   : > { %11900 = vmatpush1.bf16.msra.mxu0 %v14347_v0  ;;  %12187 = vmatpush1.bf16.msra.mxu1 %v14349_v1  ;;  %v14443_v0 = vcombine.low %v802_v45, %v810_v48  ;;  %v14445_v1 = vcombine.low %v803_v49, %v811_v50  ;;  %v898_v45 = vld [vmem:[%s16694_s28 + $0xf10] sm:$0xff]  ;;  %v899_v49 = vld [vmem:[%s16694_s28 + $0xf18] sm:$0xff] }
 0x2b2   : > { %11901 = vmatprep.subr.bf16.mxu0 %v14364_v2  ;;  %12188 = vmatprep.subr.bf16.mxu1 %v14366_v3  ;;  %v14460_v2 = vcombine.high %v818_v17, %v826_v58  ;;  %v14462_v3 = vcombine.high %v819_v62, %v827_v63  ;;  %v906_v48 = vld [vmem:[%s16694_s28 + $0xf50] sm:$0xff]  ;;  %v907_v50 = vld [vmem:[%s16694_s28 + $0xf58] sm:$0xff] }
 0x2b5   : > { %11902 = vmatpush1.bf16.msra.mxu0 %v14363_v8  ;;  %12189 = vmatpush1.bf16.msra.mxu1 %v14365_v9  ;;  %v14459_v8 = vcombine.low %v818_v17, %v826_v58  ;;  %v14461_v9 = vcombine.low %v819_v62, %v827_v63  ;;  %v914_v17 = vld [vmem:[%s16694_s28 + $0xf90] sm:$0xff]  ;;  %v915_v62 = vld [vmem:[%s16694_s28 + $0xf98] sm:$0xff] }
 0x2b6   : > { %11903 = vmatprep.subr.bf16.mxu0 %v14380_v10  ;;  %12190 = vmatprep.subr.bf16.mxu1 %v14382_v12  ;;  %v14476_v10 = vcombine.high %v834_v53, %v842_v5  ;;  %v14478_v12 = vcombine.high %v835_v4, %v843_v6  ;;  %v922_v58 = vld [vmem:[%s16694_s28 + $0xfd0] sm:$0xff]  ;;  %v923_v63 = vld [vmem:[%s16694_s28 + $0xfd8] sm:$0xff] }
 0x2b9   : > { %11904 = vmatpush1.bf16.msra.mxu0 %v14379_v19  ;;  %12191 = vmatpush1.bf16.msra.mxu1 %v14381_v51  ;;  %v14475_v19 = vcombine.low %v834_v53, %v842_v5  ;;  %v14477_v51 = vcombine.low %v835_v4, %v843_v6  ;;  %v930_v53 = vld [vmem:[%s16694_s28 + $0x1010] sm:$0xff]  ;;  %v931_v4 = vld [vmem:[%s16694_s28 + $0x1018] sm:$0xff] }
 0x2ba   : > { %11905 = vmatprep.subr.bf16.mxu0 %v14396_v21  ;;  %12192 = vmatprep.subr.bf16.mxu1 %v14398_v22  ;;  %v14492_v21 = vcombine.high %v850_v13, %v858_v14  ;;  %v14494_v22 = vcombine.high %v851_v16, %v859_v18  ;;  %v938_v5 = vld [vmem:[%s16694_s28 + $0x1050] sm:$0xff]  ;;  %v939_v6 = vld [vmem:[%s16694_s28 + $0x1058] sm:$0xff] }
 0x2bd   : > { %11906 = vmatpush1.bf16.msra.mxu0 %v14395_v29  ;;  %12193 = vmatpush1.bf16.msra.mxu1 %v14397_v30  ;;  %v14491_v29 = vcombine.low %v850_v13, %v858_v14  ;;  %v14493_v30 = vcombine.low %v851_v16, %v859_v18  ;;  %v946_v13 = vld [vmem:[%s16694_s28 + $0x1090] sm:$0xff]  ;;  %v947_v16 = vld [vmem:[%s16694_s28 + $0x1098] sm:$0xff] }
 0x2be   : > { %11907 = vmatprep.subr.bf16.mxu0 %v14412_v31  ;;  %12194 = vmatprep.subr.bf16.mxu1 %v14414_v33  ;;  %v14508_v31 = vcombine.high %v866_v23, %v874_v24  ;;  %v14510_v33 = vcombine.high %v867_v27, %v875_v28  ;;  %v954_v14 = vld [vmem:[%s16694_s28 + $0x10d0] sm:$0xff]  ;;  %v955_v18 = vld [vmem:[%s16694_s28 + $0x10d8] sm:$0xff] }
 0x2c1   : > { %11908 = vmatpush1.bf16.msra.mxu0 %v14411_v40  ;;  %12195 = vmatpush1.bf16.msra.mxu1 %v14413_v42  ;;  %v14507_v40 = vcombine.low %v866_v23, %v874_v24  ;;  %v14509_v42 = vcombine.low %v867_v27, %v875_v28  ;;  %v962_v23 = vld [vmem:[%s16694_s28 + $0x1110] sm:$0xff]  ;;  %v963_v27 = vld [vmem:[%s16694_s28 + $0x1118] sm:$0xff] }
 0x2c2   : > { %11909 = vmatprep.subr.bf16.mxu0 %v14428_v43  ;;  %12196 = vmatprep.subr.bf16.mxu1 %v14430_v44  ;;  %v14524_v43 = vcombine.high %v882_v34, %v890_v35  ;;  %v14526_v44 = vcombine.high %v883_v37, %v891_v38  ;;  %v970_v24 = vld [vmem:[%s16694_s28 + $0x1150] sm:$0xff]  ;;  %v971_v28 = vld [vmem:[%s16694_s28 + $0x1158] sm:$0xff] }
 0x2c5   : > { %11910 = vmatpush1.bf16.msra.mxu0 %v14427_v60  ;;  %12197 = vmatpush1.bf16.msra.mxu1 %v14429_v54  ;;  %v14523_v60 = vcombine.low %v882_v34, %v890_v35  ;;  %v14525_v54 = vcombine.low %v883_v37, %v891_v38  ;;  %v978_v34 = vld [vmem:[%s16694_s28 + $0x1190] sm:$0xff]  ;;  %v979_v37 = vld [vmem:[%s16694_s28 + $0x1198] sm:$0xff] }
 0x2c6   : > { %11911 = vmatprep.subr.bf16.mxu0 %v14444_v55  ;;  %12198 = vmatprep.subr.bf16.mxu1 %v14446_v56  ;;  %v14540_v55 = vcombine.high %v898_v45, %v906_v48  ;;  %v14542_v56 = vcombine.high %v899_v49, %v907_v50  ;;  %v986_v35 = vld [vmem:[%s16694_s28 + $0x11d0] sm:$0xff]  ;;  %v987_v38 = vld [vmem:[%s16694_s28 + $0x11d8] sm:$0xff] }
 0x2c9   : > { %11912 = vmatpush1.bf16.msra.mxu0 %v14443_v0  ;;  %12199 = vmatpush1.bf16.msra.mxu1 %v14445_v1  ;;  %v14539_v0 = vcombine.low %v898_v45, %v906_v48  ;;  %v14541_v1 = vcombine.low %v899_v49, %v907_v50  ;;  %v994_v45 = vld [vmem:[%s16694_s28 + $0x1210] sm:$0xff]  ;;  %v995_v49 = vld [vmem:[%s16694_s28 + $0x1218] sm:$0xff] }
 0x2ca   : > { %11913 = vmatprep.subr.bf16.mxu0 %v14460_v2  ;;  %12200 = vmatprep.subr.bf16.mxu1 %v14462_v3  ;;  %v14556_v2 = vcombine.high %v914_v17, %v922_v58  ;;  %v14558_v3 = vcombine.high %v915_v62, %v923_v63  ;;  %v1002_v48 = vld [vmem:[%s16694_s28 + $0x1250] sm:$0xff]  ;;  %v1003_v50 = vld [vmem:[%s16694_s28 + $0x1258] sm:$0xff] }
 0x2cd   : > { %11914 = vmatpush1.bf16.msra.mxu0 %v14459_v8  ;;  %12201 = vmatpush1.bf16.msra.mxu1 %v14461_v9  ;;  %v14555_v8 = vcombine.low %v914_v17, %v922_v58  ;;  %v14557_v9 = vcombine.low %v915_v62, %v923_v63  ;;  %v1010_v17 = vld [vmem:[%s16694_s28 + $0x1290] sm:$0xff]  ;;  %v1011_v62 = vld [vmem:[%s16694_s28 + $0x1298] sm:$0xff] }
 0x2ce   : > { %11915 = vmatprep.subr.bf16.mxu0 %v14476_v10  ;;  %12202 = vmatprep.subr.bf16.mxu1 %v14478_v12  ;;  %v14572_v10 = vcombine.high %v930_v53, %v938_v5  ;;  %v14574_v12 = vcombine.high %v931_v4, %v939_v6  ;;  %v1018_v58 = vld [vmem:[%s16694_s28 + $0x12d0] sm:$0xff]  ;;  %v1019_v63 = vld [vmem:[%s16694_s28 + $0x12d8] sm:$0xff] }
 0x2d1   : > { %11916 = vmatpush1.bf16.msra.mxu0 %v14475_v19  ;;  %12203 = vmatpush1.bf16.msra.mxu1 %v14477_v51  ;;  %v14571_v19 = vcombine.low %v930_v53, %v938_v5  ;;  %v14573_v51 = vcombine.low %v931_v4, %v939_v6  ;;  %v1026_v53 = vld [vmem:[%s16694_s28 + $0x1310] sm:$0xff]  ;;  %v1027_v4 = vld [vmem:[%s16694_s28 + $0x1318] sm:$0xff] }
 0x2d2   : > { %11917 = vmatprep.subr.bf16.mxu0 %v14492_v21  ;;  %12204 = vmatprep.subr.bf16.mxu1 %v14494_v22  ;;  %v14588_v21 = vcombine.high %v946_v13, %v954_v14  ;;  %v14590_v22 = vcombine.high %v947_v16, %v955_v18  ;;  %v1034_v5 = vld [vmem:[%s16694_s28 + $0x1350] sm:$0xff]  ;;  %v1035_v6 = vld [vmem:[%s16694_s28 + $0x1358] sm:$0xff] }
 0x2d5   : > { %11918 = vmatpush1.bf16.msra.mxu0 %v14491_v29  ;;  %12205 = vmatpush1.bf16.msra.mxu1 %v14493_v30  ;;  %v14587_v29 = vcombine.low %v946_v13, %v954_v14  ;;  %v14589_v30 = vcombine.low %v947_v16, %v955_v18  ;;  %v1042_v13 = vld [vmem:[%s16694_s28 + $0x1390] sm:$0xff]  ;;  %v1043_v16 = vld [vmem:[%s16694_s28 + $0x1398] sm:$0xff] }
 0x2d6   : > { %11919 = vmatprep.subr.bf16.mxu0 %v14508_v31  ;;  %12206 = vmatprep.subr.bf16.mxu1 %v14510_v33  ;;  %v14604_v31 = vcombine.high %v962_v23, %v970_v24  ;;  %v14606_v33 = vcombine.high %v963_v27, %v971_v28  ;;  %v1050_v14 = vld [vmem:[%s16694_s28 + $0x13d0] sm:$0xff]  ;;  %v1051_v18 = vld [vmem:[%s16694_s28 + $0x13d8] sm:$0xff] }
 0x2d9   : > { %11920 = vmatpush1.bf16.msra.mxu0 %v14507_v40  ;;  %12207 = vmatpush1.bf16.msra.mxu1 %v14509_v42  ;;  %v14603_v40 = vcombine.low %v962_v23, %v970_v24  ;;  %v14605_v42 = vcombine.low %v963_v27, %v971_v28  ;;  %v1058_v23 = vld [vmem:[%s16694_s28 + $0x1410] sm:$0xff]  ;;  %v1059_v27 = vld [vmem:[%s16694_s28 + $0x1418] sm:$0xff] }
 0x2da   : > { %11921 = vmatprep.subr.bf16.mxu0 %v14524_v43  ;;  %12208 = vmatprep.subr.bf16.mxu1 %v14526_v44  ;;  %v14620_v43 = vcombine.high %v978_v34, %v986_v35  ;;  %v14622_v44 = vcombine.high %v979_v37, %v987_v38  ;;  %v1066_v24 = vld [vmem:[%s16694_s28 + $0x1450] sm:$0xff]  ;;  %v1067_v28 = vld [vmem:[%s16694_s28 + $0x1458] sm:$0xff] }
 0x2dd   : > { %11922 = vmatpush1.bf16.msra.mxu0 %v14523_v60  ;;  %12209 = vmatpush1.bf16.msra.mxu1 %v14525_v54  ;;  %v14619_v60 = vcombine.low %v978_v34, %v986_v35  ;;  %v14621_v54 = vcombine.low %v979_v37, %v987_v38  ;;  %v1074_v34 = vld [vmem:[%s16694_s28 + $0x1490] sm:$0xff]  ;;  %v1075_v37 = vld [vmem:[%s16694_s28 + $0x1498] sm:$0xff] }
 0x2de   : > { %11923 = vmatprep.subr.bf16.mxu0 %v14540_v55  ;;  %12210 = vmatprep.subr.bf16.mxu1 %v14542_v56  ;;  %v14636_v55 = vcombine.high %v994_v45, %v1002_v48  ;;  %v14638_v56 = vcombine.high %v995_v49, %v1003_v50  ;;  %v1082_v35 = vld [vmem:[%s16694_s28 + $0x14d0] sm:$0xff]  ;;  %v1083_v38 = vld [vmem:[%s16694_s28 + $0x14d8] sm:$0xff] }
 0x2e1   : > { %11924 = vmatpush1.bf16.msra.mxu0 %v14539_v0  ;;  %12211 = vmatpush1.bf16.msra.mxu1 %v14541_v1  ;;  %v14635_v0 = vcombine.low %v994_v45, %v1002_v48  ;;  %v14637_v1 = vcombine.low %v995_v49, %v1003_v50  ;;  %v1090_v45 = vld [vmem:[%s16694_s28 + $0x1510] sm:$0xff]  ;;  %v1091_v49 = vld [vmem:[%s16694_s28 + $0x1518] sm:$0xff] }
 0x2e2   : > { %11925 = vmatprep.subr.bf16.mxu0 %v14556_v2  ;;  %12212 = vmatprep.subr.bf16.mxu1 %v14558_v3  ;;  %v14652_v2 = vcombine.high %v1010_v17, %v1018_v58  ;;  %v14654_v3 = vcombine.high %v1011_v62, %v1019_v63  ;;  %v1098_v48 = vld [vmem:[%s16694_s28 + $0x1550] sm:$0xff]  ;;  %v1099_v50 = vld [vmem:[%s16694_s28 + $0x1558] sm:$0xff] }
 0x2e5   : > { %11926 = vmatpush1.bf16.msra.mxu0 %v14555_v8  ;;  %12213 = vmatpush1.bf16.msra.mxu1 %v14557_v9  ;;  %v14651_v8 = vcombine.low %v1010_v17, %v1018_v58  ;;  %v14653_v9 = vcombine.low %v1011_v62, %v1019_v63  ;;  %v1106_v17 = vld [vmem:[%s16694_s28 + $0x1590] sm:$0xff]  ;;  %v1107_v62 = vld [vmem:[%s16694_s28 + $0x1598] sm:$0xff] }
 0x2e6   : > { %11936 = vmatprep.subr.bf16.mxu0 %v14572_v10  ;;  %12223 = vmatprep.subr.bf16.mxu1 %v14574_v12  ;;  %v14668_v10 = vcombine.high %v1026_v53, %v1034_v5  ;;  %v14670_v12 = vcombine.high %v1027_v4, %v1035_v6  ;;  %v1114_v58 = vld [vmem:[%s16694_s28 + $0x15d0] sm:$0xff]  ;;  %v1115_v63 = vld [vmem:[%s16694_s28 + $0x15d8] sm:$0xff] }
 0x2e8   : > { %11928 = vmatmul.mubr.bf16.vlgmr.msra.gmra.mrb[4].mxu0 %v16887_v26  ;;  %12215 = vmatmul.mubr.bf16.vlgmr.msra.gmra.mrb[4].mxu1 %v16887_v26 }
 0x2e9   : > { %11937 = vmatpush1.bf16.msra.mxu0 %v14571_v19  ;;  %12224 = vmatpush1.bf16.msra.mxu1 %v14573_v51  ;;  %v14667_v19 = vcombine.low %v1026_v53, %v1034_v5  ;;  %v14669_v51 = vcombine.low %v1027_v4, %v1035_v6  ;;  %v1122_v53 = vld [vmem:[%s16694_s28 + $0x1610] sm:$0xff]  ;;  %v1123_v4 = vld [vmem:[%s16694_s28 + $0x1618] sm:$0xff] }
 0x2ea   : > { %11938 = vmatprep.subr.bf16.mxu0 %v14588_v21  ;;  %12225 = vmatprep.subr.bf16.mxu1 %v14590_v22  ;;  %v14684_v21 = vcombine.high %v1042_v13, %v1050_v14  ;;  %v14686_v22 = vcombine.high %v1043_v16, %v1051_v18  ;;  %v1130_v5 = vld [vmem:[%s16694_s28 + $0x1650] sm:$0xff]  ;;  %v1131_v6 = vld [vmem:[%s16694_s28 + $0x1658] sm:$0xff] }
 0x2eb   : > { %11968 = vmatprep.mubr.bf16.mxu0 %v16894_v36  ;;  %12255 = vmatprep.mubr.bf16.mxu1 %v16894_v36 }
 0x2ed   : > { %11939 = vmatpush1.bf16.msra.mxu0 %v14587_v29  ;;  %12226 = vmatpush1.bf16.msra.mxu1 %v14589_v30  ;;  %v14683_v29 = vcombine.low %v1042_v13, %v1050_v14  ;;  %v14685_v30 = vcombine.low %v1043_v16, %v1051_v18  ;;  %v1138_v13 = vld [vmem:[%s16694_s28 + $0x1690] sm:$0xff]  ;;  %v1139_v16 = vld [vmem:[%s16694_s28 + $0x1698] sm:$0xff] }
 0x2ee   : > { %11940 = vmatprep.subr.bf16.mxu0 %v14604_v31  ;;  %12227 = vmatprep.subr.bf16.mxu1 %v14606_v33  ;;  %v14700_v31 = vcombine.high %v1058_v23, %v1066_v24  ;;  %v14702_v33 = vcombine.high %v1059_v27, %v1067_v28  ;;  %v1146_v14 = vld [vmem:[%s16694_s28 + $0x16d0] sm:$0xff]  ;;  %v1147_v18 = vld [vmem:[%s16694_s28 + $0x16d8] sm:$0xff] }
 0x2f1   : > { %11941 = vmatpush1.bf16.msra.mxu0 %v14603_v40  ;;  %12228 = vmatpush1.bf16.msra.mxu1 %v14605_v42  ;;  %v14699_v40 = vcombine.low %v1058_v23, %v1066_v24  ;;  %v14701_v42 = vcombine.low %v1059_v27, %v1067_v28  ;;  %v1154_v23 = vld [vmem:[%s16694_s28 + $0x1710] sm:$0xff]  ;;  %v1155_v27 = vld [vmem:[%s16694_s28 + $0x1718] sm:$0xff] }
 0x2f2   : > { %11942 = vmatprep.subr.bf16.mxu0 %v14620_v43  ;;  %12229 = vmatprep.subr.bf16.mxu1 %v14622_v44  ;;  %v14716_v43 = vcombine.high %v1074_v34, %v1082_v35  ;;  %v14718_v44 = vcombine.high %v1075_v37, %v1083_v38  ;;  %v1162_v24 = vld [vmem:[%s16694_s28 + $0x1750] sm:$0xff]  ;;  %v1163_v28 = vld [vmem:[%s16694_s28 + $0x1758] sm:$0xff] }
 0x2f5   : > { %11943 = vmatpush1.bf16.msra.mxu0 %v14619_v60  ;;  %12230 = vmatpush1.bf16.msra.mxu1 %v14621_v54  ;;  %v14715_v60 = vcombine.low %v1074_v34, %v1082_v35  ;;  %v14717_v54 = vcombine.low %v1075_v37, %v1083_v38  ;;  %v1170_v34 = vld [vmem:[%s16694_s28 + $0x1790] sm:$0xff]  ;;  %v1171_v37 = vld [vmem:[%s16694_s28 + $0x1798] sm:$0xff] }
 0x2f6   : > { %11944 = vmatprep.subr.bf16.mxu0 %v14636_v55  ;;  %12231 = vmatprep.subr.bf16.mxu1 %v14638_v56  ;;  %v14732_v55 = vcombine.high %v1090_v45, %v1098_v48  ;;  %v14734_v56 = vcombine.high %v1091_v49, %v1099_v50  ;;  %v1178_v35 = vld [vmem:[%s16694_s28 + $0x17d0] sm:$0xff]  ;;  %v1179_v38 = vld [vmem:[%s16694_s28 + $0x17d8] sm:$0xff] }
 0x2f9   : > { %11945 = vmatpush1.bf16.msra.mxu0 %v14635_v0  ;;  %12232 = vmatpush1.bf16.msra.mxu1 %v14637_v1  ;;  %v14731_v0 = vcombine.low %v1090_v45, %v1098_v48  ;;  %v14733_v1 = vcombine.low %v1091_v49, %v1099_v50  ;;  %v1186_v45 = vld [vmem:[%s16694_s28 + $0x1810] sm:$0xff]  ;;  %v1187_v49 = vld [vmem:[%s16694_s28 + $0x1818] sm:$0xff] }
 0x2fa   : > { %11946 = vmatprep.subr.bf16.mxu0 %v14652_v2  ;;  %12233 = vmatprep.subr.bf16.mxu1 %v14654_v3  ;;  %v14748_v2 = vcombine.high %v1106_v17, %v1114_v58  ;;  %v14750_v3 = vcombine.high %v1107_v62, %v1115_v63  ;;  %v1194_v48 = vld [vmem:[%s16694_s28 + $0x1850] sm:$0xff]  ;;  %v1195_v50 = vld [vmem:[%s16694_s28 + $0x1858] sm:$0xff] }
 0x2fd   : > { %11947 = vmatpush1.bf16.msra.mxu0 %v14651_v8  ;;  %12234 = vmatpush1.bf16.msra.mxu1 %v14653_v9  ;;  %v14747_v8 = vcombine.low %v1106_v17, %v1114_v58  ;;  %v14749_v9 = vcombine.low %v1107_v62, %v1115_v63  ;;  %v1202_v17 = vld [vmem:[%s16694_s28 + $0x1890] sm:$0xff]  ;;  %v1203_v62 = vld [vmem:[%s16694_s28 + $0x1898] sm:$0xff] }
 0x2fe   : > { %11948 = vmatprep.subr.bf16.mxu0 %v14668_v10  ;;  %12235 = vmatprep.subr.bf16.mxu1 %v14670_v12  ;;  %v14764_v10 = vcombine.high %v1122_v53, %v1130_v5  ;;  %v14766_v12 = vcombine.high %v1123_v4, %v1131_v6  ;;  %v1210_v58 = vld [vmem:[%s16694_s28 + $0x18d0] sm:$0xff]  ;;  %v1211_v63 = vld [vmem:[%s16694_s28 + $0x18d8] sm:$0xff] }
 0x301   : > { %11949 = vmatpush1.bf16.msra.mxu0 %v14667_v19  ;;  %12236 = vmatpush1.bf16.msra.mxu1 %v14669_v51  ;;  %v14763_v19 = vcombine.low %v1122_v53, %v1130_v5  ;;  %v14765_v51 = vcombine.low %v1123_v4, %v1131_v6  ;;  %v1218_v53 = vld [vmem:[%s16694_s28 + $0x1910] sm:$0xff]  ;;  %v1219_v4 = vld [vmem:[%s16694_s28 + $0x1918] sm:$0xff] }
 0x302   : > { %11950 = vmatprep.subr.bf16.mxu0 %v14684_v21  ;;  %12237 = vmatprep.subr.bf16.mxu1 %v14686_v22  ;;  %v14780_v21 = vcombine.high %v1138_v13, %v1146_v14  ;;  %v14782_v22 = vcombine.high %v1139_v16, %v1147_v18  ;;  %v1226_v5 = vld [vmem:[%s16694_s28 + $0x1950] sm:$0xff]  ;;  %v1227_v6 = vld [vmem:[%s16694_s28 + $0x1958] sm:$0xff] }
 0x305   : > { %11951 = vmatpush1.bf16.msra.mxu0 %v14683_v29  ;;  %12238 = vmatpush1.bf16.msra.mxu1 %v14685_v30  ;;  %v14779_v29 = vcombine.low %v1138_v13, %v1146_v14  ;;  %v14781_v30 = vcombine.low %v1139_v16, %v1147_v18  ;;  %v1234_v13 = vld [vmem:[%s16694_s28 + $0x1990] sm:$0xff]  ;;  %v1235_v16 = vld [vmem:[%s16694_s28 + $0x1998] sm:$0xff] }
 0x306   : > { %11952 = vmatprep.subr.bf16.mxu0 %v14700_v31  ;;  %12239 = vmatprep.subr.bf16.mxu1 %v14702_v33  ;;  %v14796_v31 = vcombine.high %v1154_v23, %v1162_v24  ;;  %v14798_v33 = vcombine.high %v1155_v27, %v1163_v28  ;;  %v1242_v14 = vld [vmem:[%s16694_s28 + $0x19d0] sm:$0xff]  ;;  %v1243_v18 = vld [vmem:[%s16694_s28 + $0x19d8] sm:$0xff] }
 0x309   : > { %11953 = vmatpush1.bf16.msra.mxu0 %v14699_v40  ;;  %12240 = vmatpush1.bf16.msra.mxu1 %v14701_v42  ;;  %v14795_v40 = vcombine.low %v1154_v23, %v1162_v24  ;;  %v14797_v42 = vcombine.low %v1155_v27, %v1163_v28  ;;  %v1250_v23 = vld [vmem:[%s16694_s28 + $0x1a10] sm:$0xff]  ;;  %v1251_v27 = vld [vmem:[%s16694_s28 + $0x1a18] sm:$0xff] }
 0x30a   : > { %11954 = vmatprep.subr.bf16.mxu0 %v14716_v43  ;;  %12241 = vmatprep.subr.bf16.mxu1 %v14718_v44  ;;  %v14812_v43 = vcombine.high %v1170_v34, %v1178_v35  ;;  %v14814_v44 = vcombine.high %v1171_v37, %v1179_v38  ;;  %v1258_v24 = vld [vmem:[%s16694_s28 + $0x1a50] sm:$0xff]  ;;  %v1259_v28 = vld [vmem:[%s16694_s28 + $0x1a58] sm:$0xff] }
 0x30d   : > { %11955 = vmatpush1.bf16.msra.mxu0 %v14715_v60  ;;  %12242 = vmatpush1.bf16.msra.mxu1 %v14717_v54  ;;  %v14811_v60 = vcombine.low %v1170_v34, %v1178_v35  ;;  %v14813_v54 = vcombine.low %v1171_v37, %v1179_v38  ;;  %v16416_v34 = vmov 1983009808   ;;  %v1266_v37 = vld [vmem:[%s16694_s28 + $0x1a90] sm:$0xff] }
 0x30e   : > { %11956 = vmatprep.subr.bf16.mxu0 %v14732_v55  ;;  %12243 = vmatprep.subr.bf16.mxu1 %v14734_v56  ;;  %v14828_v55 = vcombine.high %v1186_v45, %v1194_v48  ;;  %v14830_v56 = vcombine.high %v1187_v49, %v1195_v50  ;;  %v13595_v35 = vunpack.c.l.s4 %v16416_v34  ;;  %v1274_v38 = vld [vmem:[%s16694_s28 + $0x1ad0] sm:$0xff] }
 0x311   : > { %11957 = vmatpush1.bf16.msra.mxu0 %v14731_v0  ;;  %12244 = vmatpush1.bf16.msra.mxu1 %v14733_v1  ;;  %v14827_v0 = vcombine.low %v1186_v45, %v1194_v48  ;;  %v14829_v1 = vcombine.low %v1187_v49, %v1195_v50  ;;  %v14908_v45 = vcombine.high %v1266_v37, %v1274_v38  ;;  %v13596_v48 = vunpack.c.0.s8 %v13595_v35  ;;  %v1282_v50 = vld [vmem:[%s16694_s28 + $0x1b10] sm:$0xff] }
 0x312   : > { %11958 = vmatprep.subr.bf16.mxu0 %v14748_v2  ;;  %12245 = vmatprep.subr.bf16.mxu1 %v14750_v3  ;;  %v14844_v2 = vcombine.high %v1202_v17, %v1210_v58  ;;  %v14846_v3 = vcombine.high %v1203_v62, %v1211_v63  ;;  %v1330_v35 = vld [vmem:[%s16694_s28 + $0x1c90] sm:$0xff] }
 0x315   : > { %11959 = vmatpush1.bf16.msra.mxu0 %v14747_v8  ;;  %12246 = vmatpush1.bf16.msra.mxu1 %v14749_v9  ;;  %v14843_v8 = vcombine.low %v1202_v17, %v1210_v58  ;;  %v14845_v9 = vcombine.low %v1203_v62, %v1211_v63  ;;  %v17513_v63 = vsub.s32 %v13596_v48, %v16733_v32 }
 0x316   : > { %11960 = vmatprep.subr.bf16.mxu0 %v14764_v10  ;;  %12247 = vmatprep.subr.bf16.mxu1 %v14766_v12  ;;  %v14860_v10 = vcombine.high %v1218_v53, %v1226_v5  ;;  %v14862_v12 = vcombine.high %v1219_v4, %v1227_v6 }
 0x319   : > { %11961 = vmatpush1.bf16.msra.mxu0 %v14763_v19  ;;  %12248 = vmatpush1.bf16.msra.mxu1 %v14765_v51  ;;  %v14859_v19 = vcombine.low %v1218_v53, %v1226_v5  ;;  %v14861_v51 = vcombine.low %v1219_v4, %v1227_v6  ;;  %v1299_v5 = vld [vmem:[%s16694_s28 + $0x1b98] sm:$0xff] }
 0x31a   : > { %11962 = vmatprep.subr.bf16.mxu0 %v14780_v21  ;;  %12249 = vmatprep.subr.bf16.mxu1 %v14782_v22  ;;  %v14876_v21 = vcombine.high %v1234_v13, %v1242_v14  ;;  %v14878_v22 = vcombine.high %v1235_v16, %v1243_v18  ;;  %v1307_v4 = vld [vmem:[%s16694_s28 + $0x1bd8] sm:$0xff] }
 0x31d   : > { %11963 = vmatpush1.bf16.msra.mxu0 %v14779_v29  ;;  %12250 = vmatpush1.bf16.msra.mxu1 %v14781_v30  ;;  %v14875_v29 = vcombine.low %v1234_v13, %v1242_v14  ;;  %v14877_v30 = vcombine.low %v1235_v16, %v1243_v18 }
 0x31e   : > { %11964 = vmatprep.subr.bf16.mxu0 %v14796_v31  ;;  %12251 = vmatprep.subr.bf16.mxu1 %v14798_v33  ;;  %v14892_v31 = vcombine.high %v1250_v23, %v1258_v24  ;;  %v14894_v33 = vcombine.high %v1251_v27, %v1259_v28 }
 0x321   : > { %11965 = vmatpush1.bf16.msra.mxu0 %v14795_v40  ;;  %12252 = vmatpush1.bf16.msra.mxu1 %v14797_v42  ;;  %v1267_v40 = vld [vmem:[%s16694_s28 + $0x1a98] sm:$0xff] }
 0x322   : > { %11966 = vmatprep.subr.bf16.mxu0 %v14812_v43  ;;  %12253 = vmatprep.subr.bf16.mxu1 %v14814_v44  ;;  %v1275_v42 = vld [vmem:[%s16694_s28 + $0x1ad8] sm:$0xff]  ;;  %v14891_v43 = vcombine.low %v1250_v23, %v1258_v24  ;;  %v14893_v44 = vcombine.low %v1251_v27, %v1259_v28 }
 0x323   : > { %v14910_v49 = vcombine.high %v1267_v40, %v1275_v42  ;;  %v14909_v17 = vcombine.low %v1267_v40, %v1275_v42  ;;  %v1315_v24 = vld [vmem:[%s16694_s28 + $0x1c18] sm:$0xff] }
 0x324   : > { %v1323_v27 = vld [vmem:[%s16694_s28 + $0x1c58] sm:$0xff] }
 0x325   : > { %11967 = vmatpush1.bf16.msra.mxu0 %v14811_v60  ;;  %12254 = vmatpush1.bf16.msra.mxu1 %v14813_v54  ;;  %v1290_v60 = vld [vmem:[%s16694_s28 + $0x1b50] sm:$0xff]  ;;  %v1283_v54 = vld [vmem:[%s16694_s28 + $0x1b18] sm:$0xff]  ;;  %v14958_v34 = vcombine.high %v1315_v24, %v1323_v27 }
 0x326   : > { %11977 = vmatprep.subr.bf16.mxu0 %v14828_v55  ;;  %12264 = vmatprep.subr.bf16.mxu1 %v14830_v56  ;;  %v1291_v55 = vld [vmem:[%s16694_s28 + $0x1b58] sm:$0xff]  ;;  %v14907_v56 = vcombine.low %v1266_v37, %v1274_v38  ;;  %v14924_v58 = vcombine.high %v1282_v50, %v1290_v60  ;;  %v1338_v37 = vld [vmem:[%s16694_s28 + $0x1cd0] sm:$0xff] }
 0x327   : > { %v14925_v14 = vcombine.low %v1283_v54, %v1291_v55  ;;  %v408_v28 = vld [vmem:[#allocation2] sm:$0xff] }
 0x328   : > { %11969 = vmatmul.mubr.bf16.vlgmr.msra.gmra.mrb[4].mxu0 %v16962_v46  ;;  %12256 = vmatmul.mubr.bf16.vlgmr.msra.gmra.mrb[4].mxu1 %v16962_v46  ;;  %v1331_v40 = vld [vmem:[%s16694_s28 + $0x1c98] sm:$0xff] }
 0x329   : > { %11978 = vmatpush1.bf16.msra.mxu0 %v14827_v0  ;;  %12265 = vmatpush1.bf16.msra.mxu1 %v14829_v1  ;;  %v14926_v0 = vcombine.high %v1283_v54, %v1291_v55  ;;  %v1298_v1 = vld [vmem:[%s16694_s28 + $0x1b90] sm:$0xff]  ;;  %v1339_v42 = vld [vmem:[%s16694_s28 + $0x1cd8] sm:$0xff]  ;;  %v14971_v55 = vcombine.low %v1330_v35, %v1338_v37 }
 0x32a   : > { %11979 = vmatprep.subr.bf16.mxu0 %v14844_v2  ;;  %12266 = vmatprep.subr.bf16.mxu1 %v14846_v3  ;;  %v1306_v2 = vld [vmem:[%s16694_s28 + $0x1bd0] sm:$0xff]  ;;  %v14974_v48 = vcombine.high %v1331_v40, %v1339_v42  ;;  %v1355_v54 = vld [vmem:[%s16694_s28 + $0x1d58] sm:$0xff] }
 0x32b   : > { %12009 = vmatprep.mubr.bf16.mxu0 %v16970_v57  ;;  %12296 = vmatprep.mubr.bf16.mxu1 %v16970_v57  ;;  %v14940_v16 = vcombine.high %v1298_v1, %v1306_v2 }
 0x32d   : > { %11980 = vmatpush1.bf16.msra.mxu0 %v14843_v8  ;;  %12267 = vmatpush1.bf16.msra.mxu1 %v14845_v9 }
 0x32e   : > { %11981 = vmatprep.subr.bf16.mxu0 %v14860_v10  ;;  %12268 = vmatprep.subr.bf16.mxu1 %v14862_v12  ;;  %v14923_v10 = vcombine.low %v1282_v50, %v1290_v60  ;;  %v1354_v50 = vld [vmem:[%s16694_s28 + $0x1d50] sm:$0xff]  ;;  %v1347_v60 = vld [vmem:[%s16694_s28 + $0x1d18] sm:$0xff] }
 0x331   : > { %11982 = vmatpush1.bf16.msra.mxu0 %v14859_v19  ;;  %12269 = vmatpush1.bf16.msra.mxu1 %v14861_v51  ;;  %v14942_v51 = vcombine.high %v1299_v5, %v1307_v4 }
 0x332   : > { %11983 = vmatprep.subr.bf16.mxu0 %v14876_v21  ;;  %12270 = vmatprep.subr.bf16.mxu1 %v14878_v22  ;;  %v1314_v21 = vld [vmem:[%s16694_s28 + $0x1c10] sm:$0xff] }
 0x333   : > { %v1322_v22 = vld [vmem:[%s16694_s28 + $0x1c50] sm:$0xff] }
 0x335   : > { %11984 = vmatpush1.bf16.msra.mxu0 %v14875_v29  ;;  %12271 = vmatpush1.bf16.msra.mxu1 %v14877_v30  ;;  %v14939_v29 = vcombine.low %v1298_v1, %v1306_v2  ;;  %v1363_v1 = vld [vmem:[%s16694_s28 + $0x1d98] sm:$0xff] }
 0x336   : > { %11985 = vmatprep.subr.bf16.mxu0 %v14892_v31  ;;  %12272 = vmatprep.subr.bf16.mxu1 %v14894_v33  ;;  %v14941_v31 = vcombine.low %v1299_v5, %v1307_v4  ;;  %v14956_v33 = vcombine.high %v1314_v21, %v1322_v22  ;;  %v1371_v2 = vld [vmem:[%s16694_s28 + $0x1dd8] sm:$0xff] }
 0x337   : > { %v15006_v4 = vcombine.high %v1363_v1, %v1371_v2 }
 0x339   : > { %11986 = vmatpush1.bf16.msra.mxu0 %v14891_v43  ;;  %12273 = vmatpush1.bf16.msra.mxu1 %v14893_v44  ;;  %v14955_v43 = vcombine.low %v1314_v21, %v1322_v22  ;;  %v14957_v44 = vcombine.low %v1315_v24, %v1323_v27  ;;  %v1410_v27 = vld [vmem:[%s16694_s28 + $0x1f10] sm:$0xff] }
 0x33a   : > { %11987 = vmatprep.subr.bf16.mxu0 %v14908_v45  ;;  %12274 = vmatprep.subr.bf16.mxu1 %v14910_v49  ;;  %v14972_v45 = vcombine.high %v1330_v35, %v1338_v37  ;;  %v1346_v49 = vld [vmem:[%s16694_s28 + $0x1d10] sm:$0xff] }
 0x33b   : > { %v11560_v62 = vpop.f32.mrb[0].mxu0  ;;  %v11847_v3 = vpop.f32.mrb[0].mxu1  ;;  %v1426_v37 = vld [vmem:[%s16694_s28 + $0x1f90] sm:$0xff] }
 0x33c   : > { %v11562_v53 = vpop.f32.mrb[1].mxu0  ;;  %v11849_v8 = vpop.f32.mrb[1].mxu1 }
 0x33d   : > { %v13592_v6 = vcombine.low %v11560_v62, %v11562_v53  ;;  %v11564_v9 = vpop.f32.mrb[2].mxu0  ;;  %11988 = vmatpush1.bf16.msra.mxu0 %v14907_v56  ;;  %v13593_v12 = vcombine.low %v11847_v3, %v11849_v8  ;;  %v11851_v32 = vpop.f32.mrb[2].mxu1  ;;  %12275 = vmatpush1.bf16.msra.mxu1 %v14909_v17  ;;  %v14973_v56 = vcombine.low %v1331_v40, %v1339_v42  ;;  %v1362_v62 = vld [vmem:[%s16694_s28 + $0x1d90] sm:$0xff]  ;;  %v1427_v40 = vld [vmem:[%s16694_s28 + $0x1f98] sm:$0xff] }
 0x33e   : > { %v11565_v13 = vpop.f32.mrb[3].mxu0  ;;  %11989 = vmatprep.subr.bf16.mxu0 %v14924_v58  ;;  %v11852_v19 = vpop.f32.mrb[3].mxu1  ;;  %12276 = vmatprep.subr.bf16.mxu1 %v14926_v0  ;;  %v14988_v17 = vcombine.high %v1346_v49, %v1354_v50  ;;  %v14990_v58 = vcombine.high %v1347_v60, %v1355_v54  ;;  %v1370_v0 = vld [vmem:[%s16694_s28 + $0x1dd0] sm:$0xff]  ;;  %v14987_v3 = vcombine.low %v1346_v49, %v1354_v50  ;;  %v1379_v9 = vld [vmem:[%s16694_s28 + $0x1e18] sm:$0xff] }
 0x33f   : > { %v13600_v18 = vrot.slane %v13592_v6, %v17513_v63  ;;  %v13607_v23 = vrot.slane %v13593_v12, %v17513_v63  ;;  %v14989_v53 = vcombine.low %v1347_v60, %v1355_v54  ;;  %v15004_v5 = vcombine.high %v1362_v62, %v1370_v0  ;;  %v1378_v6 = vld [vmem:[%s16694_s28 + $0x1e10] sm:$0xff]  ;;  %v1395_v19 = vld [vmem:[%s16694_s28 + $0x1e98] sm:$0xff] }
 0x340   : > { %v1386_v8 = vld [vmem:[%s16694_s28 + $0x1e50] sm:$0xff]  ;;  %v15003_v12 = vcombine.low %v1362_v62, %v1370_v0  ;;  %v15005_v32 = vcombine.low %v1363_v1, %v1371_v2  ;;  %v1435_v42 = vld [vmem:[%s16694_s28 + $0x1fd8] sm:$0xff] }
 0x341   : > { %11990 = vmatpush1.bf16.msra.mxu0 %v14923_v10  ;;  %v13608_v30 = vcombine.low %v13600_v18, %v13607_v23  ;;  %12277 = vmatpush1.bf16.msra.mxu1 %v14925_v14  ;;  %v1387_v10 = vld [vmem:[%s16694_s28 + $0x1e58] sm:$0xff]  ;;  %v15020_v13 = vcombine.high %v1378_v6, %v1386_v8  ;;  %v1402_v18 = vld [vmem:[%s16694_s28 + $0x1ed0] sm:$0xff]  ;;  %v15019_v21 = vcombine.low %v1378_v6, %v1386_v8 }
 0x342   : > { %11991 = vmatprep.subr.bf16.mxu0 %v14940_v16  ;;  %12278 = vmatprep.subr.bf16.mxu1 %v14942_v51  ;;  %v15022_v14 = vcombine.high %v1379_v9, %v1387_v10  ;;  %v1394_v16 = vld [vmem:[%s16694_s28 + $0x1e90] sm:$0xff]  ;;  %v1403_v51 = vld [vmem:[%s16694_s28 + $0x1ed8] sm:$0xff]  ;;  %v15021_v22 = vcombine.low %v1379_v9, %v1387_v10 }
 0x343   : > { %v13664_v38 = vadd.f32 %v13608_v30, %v408_v28  ;;  %v15036_v23 = vcombine.high %v1394_v16, %v1402_v18  ;;  %v15038_v24 = vcombine.high %v1395_v19, %v1403_v51  ;;  %v1418_v28 = vld [vmem:[%s16694_s28 + $0x1f50] sm:$0xff]  ;;  %v1419_v30 = vld [vmem:[%s16694_s28 + $0x1f58] sm:$0xff] }
 0x344   : > { %v1442_v49 = vld [vmem:[%s16694_s28 + $0x2010] sm:$0xff]  ;;  %v1443_v60 = vld [vmem:[%s16694_s28 + $0x2018] sm:$0xff] }
 0x345   : > { %11992 = vmatpush1.bf16.msra.mxu0 %v14939_v29  ;;  %13668 = vst [vmem:[#allocation2] sm:$0xff] %v13664_v38  ;;  %12279 = vmatpush1.bf16.msra.mxu1 %v14941_v31  ;;  %v1411_v29 = vld [vmem:[%s16694_s28 + $0x1f18] sm:$0xff]  ;;  %v15035_v31 = vcombine.low %v1394_v16, %v1402_v18  ;;  %v1434_v38 = vld [vmem:[%s16694_s28 + $0x1fd0] sm:$0xff] }
 0x346   : > { %11993 = vmatprep.subr.bf16.mxu0 %v14956_v33  ;;  %12280 = vmatprep.subr.bf16.mxu1 %v14958_v34  ;;  %v15037_v33 = vcombine.low %v1395_v19, %v1403_v51  ;;  %v15052_v34 = vcombine.high %v1410_v27, %v1418_v28  ;;  %v15054_v35 = vcombine.high %v1411_v29, %v1419_v30  ;;  %v1450_v50 = vld [vmem:[%s16694_s28 + $0x2050] sm:$0xff]  ;;  %v1451_v54 = vld [vmem:[%s16694_s28 + $0x2058] sm:$0xff] }
 0x347   : > { %v1458_v62 = vld [vmem:[%s16694_s28 + $0x2090] sm:$0xff]  ;;  %v1459_v1 = vld [vmem:[%s16694_s28 + $0x2098] sm:$0xff] }
 0x348   : > { %v1466_v0 = vld [vmem:[%s16694_s28 + $0x20d0] sm:$0xff]  ;;  %v1467_v2 = vld [vmem:[%s16694_s28 + $0x20d8] sm:$0xff] }
 0x349   : > { %11994 = vmatpush1.bf16.msra.mxu0 %v14955_v43  ;;  %12281 = vmatpush1.bf16.msra.mxu1 %v14957_v44  ;;  %v15051_v43 = vcombine.low %v1410_v27, %v1418_v28  ;;  %v15053_v44 = vcombine.low %v1411_v29, %v1419_v30  ;;  %v1474_v6 = vld [vmem:[%s16694_s28 + $0x2110] sm:$0xff]  ;;  %v1475_v9 = vld [vmem:[%s16694_s28 + $0x2118] sm:$0xff] }
 0x34a   : > { %11995 = vmatprep.subr.bf16.mxu0 %v14972_v45  ;;  %12282 = vmatprep.subr.bf16.mxu1 %v14974_v48  ;;  %v15068_v45 = vcombine.high %v1426_v37, %v1434_v38  ;;  %v15070_v48 = vcombine.high %v1427_v40, %v1435_v42  ;;  %v1482_v8 = vld [vmem:[%s16694_s28 + $0x2150] sm:$0xff]  ;;  %v1483_v10 = vld [vmem:[%s16694_s28 + $0x2158] sm:$0xff] }
 0x34b   : > { %v1490_v16 = vld [vmem:[%s16694_s28 + $0x2190] sm:$0xff]  ;;  %v1491_v19 = vld [vmem:[%s16694_s28 + $0x2198] sm:$0xff] }
 0x34c   : > { %v1498_v18 = vld [vmem:[%s16694_s28 + $0x21d0] sm:$0xff]  ;;  %v1499_v51 = vld [vmem:[%s16694_s28 + $0x21d8] sm:$0xff] }
 0x34d   : > { %11996 = vmatpush1.bf16.msra.mxu0 %v14971_v55  ;;  %12283 = vmatpush1.bf16.msra.mxu1 %v14973_v56  ;;  %v15067_v55 = vcombine.low %v1426_v37, %v1434_v38  ;;  %v15069_v56 = vcombine.low %v1427_v40, %v1435_v42  ;;  %v1506_v27 = vld [vmem:[%s16694_s28 + $0x2210] sm:$0xff]  ;;  %v1507_v29 = vld [vmem:[%s16694_s28 + $0x2218] sm:$0xff] }
 0x34e   : > { %11997 = vmatprep.subr.bf16.mxu0 %v14988_v17  ;;  %12284 = vmatprep.subr.bf16.mxu1 %v14990_v58  ;;  %v15084_v17 = vcombine.high %v1442_v49, %v1450_v50  ;;  %v15086_v58 = vcombine.high %v1443_v60, %v1451_v54  ;;  %v1514_v28 = vld [vmem:[%s16694_s28 + $0x2250] sm:$0xff]  ;;  %v1515_v30 = vld [vmem:[%s16694_s28 + $0x2258] sm:$0xff] }
 0x34f   : > { %v1522_v37 = vld [vmem:[%s16694_s28 + $0x2290] sm:$0xff]  ;;  %v1523_v40 = vld [vmem:[%s16694_s28 + $0x2298] sm:$0xff] }
 0x350   : > { %v1530_v38 = vld [vmem:[%s16694_s28 + $0x22d0] sm:$0xff]  ;;  %v1531_v42 = vld [vmem:[%s16694_s28 + $0x22d8] sm:$0xff] }
 0x351   : > { %11998 = vmatpush1.bf16.msra.mxu0 %v14987_v3  ;;  %12285 = vmatpush1.bf16.msra.mxu1 %v14989_v53  ;;  %v15083_v3 = vcombine.low %v1442_v49, %v1450_v50  ;;  %v15085_v53 = vcombine.low %v1443_v60, %v1451_v54  ;;  %v1538_v49 = vld [vmem:[%s16694_s28 + $0x2310] sm:$0xff]  ;;  %v1539_v60 = vld [vmem:[%s16694_s28 + $0x2318] sm:$0xff] }
 0x352   : > { %11999 = vmatprep.subr.bf16.mxu0 %v15004_v5  ;;  %12286 = vmatprep.subr.bf16.mxu1 %v15006_v4  ;;  %v15100_v5 = vcombine.high %v1458_v62, %v1466_v0  ;;  %v15102_v4 = vcombine.high %v1459_v1, %v1467_v2  ;;  %v1546_v50 = vld [vmem:[%s16694_s28 + $0x2350] sm:$0xff]  ;;  %v1547_v54 = vld [vmem:[%s16694_s28 + $0x2358] sm:$0xff] }
 0x355   : > { %12000 = vmatpush1.bf16.msra.mxu0 %v15003_v12  ;;  %12287 = vmatpush1.bf16.msra.mxu1 %v15005_v32  ;;  %v15099_v12 = vcombine.low %v1458_v62, %v1466_v0  ;;  %v15101_v32 = vcombine.low %v1459_v1, %v1467_v2  ;;  %v1554_v62 = vld [vmem:[%s16694_s28 + $0x2390] sm:$0xff]  ;;  %v1555_v1 = vld [vmem:[%s16694_s28 + $0x2398] sm:$0xff] }
 0x356   : > { %12001 = vmatprep.subr.bf16.mxu0 %v15020_v13  ;;  %12288 = vmatprep.subr.bf16.mxu1 %v15022_v14  ;;  %v15116_v13 = vcombine.high %v1474_v6, %v1482_v8  ;;  %v15118_v14 = vcombine.high %v1475_v9, %v1483_v10  ;;  %v1562_v0 = vld [vmem:[%s16694_s28 + $0x23d0] sm:$0xff]  ;;  %v1563_v2 = vld [vmem:[%s16694_s28 + $0x23d8] sm:$0xff] }
 0x359   : > { %12002 = vmatpush1.bf16.msra.mxu0 %v15019_v21  ;;  %12289 = vmatpush1.bf16.msra.mxu1 %v15021_v22  ;;  %v15115_v21 = vcombine.low %v1474_v6, %v1482_v8  ;;  %v15117_v22 = vcombine.low %v1475_v9, %v1483_v10  ;;  %v1570_v6 = vld [vmem:[%s16694_s28 + $0x2410] sm:$0xff]  ;;  %v1571_v9 = vld [vmem:[%s16694_s28 + $0x2418] sm:$0xff] }
 0x35a   : > { %12003 = vmatprep.subr.bf16.mxu0 %v15036_v23  ;;  %12290 = vmatprep.subr.bf16.mxu1 %v15038_v24  ;;  %v15132_v23 = vcombine.high %v1490_v16, %v1498_v18  ;;  %v15134_v24 = vcombine.high %v1491_v19, %v1499_v51  ;;  %v1578_v8 = vld [vmem:[%s16694_s28 + $0x2450] sm:$0xff]  ;;  %v1579_v10 = vld [vmem:[%s16694_s28 + $0x2458] sm:$0xff] }
 0x35d   : > { %12004 = vmatpush1.bf16.msra.mxu0 %v15035_v31  ;;  %12291 = vmatpush1.bf16.msra.mxu1 %v15037_v33  ;;  %v15131_v31 = vcombine.low %v1490_v16, %v1498_v18  ;;  %v15133_v33 = vcombine.low %v1491_v19, %v1499_v51  ;;  %v1586_v16 = vld [vmem:[%s16694_s28 + $0x2490] sm:$0xff]  ;;  %v1587_v19 = vld [vmem:[%s16694_s28 + $0x2498] sm:$0xff] }
 0x35e   : > { %12005 = vmatprep.subr.bf16.mxu0 %v15052_v34  ;;  %12292 = vmatprep.subr.bf16.mxu1 %v15054_v35  ;;  %v15148_v34 = vcombine.high %v1506_v27, %v1514_v28  ;;  %v15150_v35 = vcombine.high %v1507_v29, %v1515_v30  ;;  %v1594_v18 = vld [vmem:[%s16694_s28 + $0x24d0] sm:$0xff]  ;;  %v1595_v51 = vld [vmem:[%s16694_s28 + $0x24d8] sm:$0xff] }
 0x361   : > { %12006 = vmatpush1.bf16.msra.mxu0 %v15051_v43  ;;  %12293 = vmatpush1.bf16.msra.mxu1 %v15053_v44  ;;  %v15147_v43 = vcombine.low %v1506_v27, %v1514_v28  ;;  %v15149_v44 = vcombine.low %v1507_v29, %v1515_v30  ;;  %v1602_v27 = vld [vmem:[%s16694_s28 + $0x2510] sm:$0xff]  ;;  %v1603_v29 = vld [vmem:[%s16694_s28 + $0x2518] sm:$0xff] }
 0x362   : > { %12007 = vmatprep.subr.bf16.mxu0 %v15068_v45  ;;  %12294 = vmatprep.subr.bf16.mxu1 %v15070_v48  ;;  %v15164_v45 = vcombine.high %v1522_v37, %v1530_v38  ;;  %v15166_v48 = vcombine.high %v1523_v40, %v1531_v42  ;;  %v1610_v28 = vld [vmem:[%s16694_s28 + $0x2550] sm:$0xff]  ;;  %v1611_v30 = vld [vmem:[%s16694_s28 + $0x2558] sm:$0xff] }
 0x365   : > { %12008 = vmatpush1.bf16.msra.mxu0 %v15067_v55  ;;  %12295 = vmatpush1.bf16.msra.mxu1 %v15069_v56  ;;  %v15163_v55 = vcombine.low %v1522_v37, %v1530_v38  ;;  %v15165_v56 = vcombine.low %v1523_v40, %v1531_v42  ;;  %v1618_v37 = vld [vmem:[%s16694_s28 + $0x2590] sm:$0xff]  ;;  %v1619_v40 = vld [vmem:[%s16694_s28 + $0x2598] sm:$0xff] }
 0x366   : > { %12018 = vmatprep.subr.bf16.mxu0 %v15084_v17  ;;  %12305 = vmatprep.subr.bf16.mxu1 %v15086_v58  ;;  %v15180_v17 = vcombine.high %v1538_v49, %v1546_v50  ;;  %v15182_v58 = vcombine.high %v1539_v60, %v1547_v54  ;;  %v1626_v38 = vld [vmem:[%s16694_s28 + $0x25d0] sm:$0xff]  ;;  %v1627_v42 = vld [vmem:[%s16694_s28 + $0x25d8] sm:$0xff] }
 0x368   : > { %12010 = vmatmul.mubr.bf16.vlgmr.msra.gmra.mrb[4].mxu0 %v17047_v7  ;;  %12297 = vmatmul.mubr.bf16.vlgmr.msra.gmra.mrb[4].mxu1 %v17047_v7 }
 0x369   : > { %12019 = vmatpush1.bf16.msra.mxu0 %v15083_v3  ;;  %12306 = vmatpush1.bf16.msra.mxu1 %v15085_v53  ;;  %v15179_v3 = vcombine.low %v1538_v49, %v1546_v50  ;;  %v15181_v53 = vcombine.low %v1539_v60, %v1547_v54  ;;  %v1634_v49 = vld [vmem:[%s16694_s28 + $0x2610] sm:$0xff]  ;;  %v1635_v60 = vld [vmem:[%s16694_s28 + $0x2618] sm:$0xff] }
 0x36a   : > { %12020 = vmatprep.subr.bf16.mxu0 %v15100_v5  ;;  %12307 = vmatprep.subr.bf16.mxu1 %v15102_v4  ;;  %v15196_v5 = vcombine.high %v1554_v62, %v1562_v0  ;;  %v15198_v4 = vcombine.high %v1555_v1, %v1563_v2  ;;  %v1642_v50 = vld [vmem:[%s16694_s28 + $0x2650] sm:$0xff]  ;;  %v1643_v54 = vld [vmem:[%s16694_s28 + $0x2658] sm:$0xff] }
 0x36b   : > { %12050 = vmatprep.mubr.bf16.mxu0 %v17054_v47  ;;  %12337 = vmatprep.mubr.bf16.mxu1 %v17054_v47 }
 0x36d   : > { %12021 = vmatpush1.bf16.msra.mxu0 %v15099_v12  ;;  %12308 = vmatpush1.bf16.msra.mxu1 %v15101_v32  ;;  %v15195_v12 = vcombine.low %v1554_v62, %v1562_v0  ;;  %v15197_v32 = vcombine.low %v1555_v1, %v1563_v2  ;;  %v1650_v62 = vld [vmem:[%s16694_s28 + $0x2690] sm:$0xff]  ;;  %v1651_v1 = vld [vmem:[%s16694_s28 + $0x2698] sm:$0xff] }
 0x36e   : > { %12022 = vmatprep.subr.bf16.mxu0 %v15116_v13  ;;  %12309 = vmatprep.subr.bf16.mxu1 %v15118_v14  ;;  %v15212_v13 = vcombine.high %v1570_v6, %v1578_v8  ;;  %v15214_v14 = vcombine.high %v1571_v9, %v1579_v10  ;;  %v1658_v0 = vld [vmem:[%s16694_s28 + $0x26d0] sm:$0xff]  ;;  %v1659_v2 = vld [vmem:[%s16694_s28 + $0x26d8] sm:$0xff] }
 0x371   : > { %12023 = vmatpush1.bf16.msra.mxu0 %v15115_v21  ;;  %12310 = vmatpush1.bf16.msra.mxu1 %v15117_v22  ;;  %v15211_v21 = vcombine.low %v1570_v6, %v1578_v8  ;;  %v15213_v22 = vcombine.low %v1571_v9, %v1579_v10  ;;  %v1666_v6 = vld [vmem:[%s16694_s28 + $0x2710] sm:$0xff]  ;;  %v1667_v9 = vld [vmem:[%s16694_s28 + $0x2718] sm:$0xff] }
 0x372   : > { %12024 = vmatprep.subr.bf16.mxu0 %v15132_v23  ;;  %12311 = vmatprep.subr.bf16.mxu1 %v15134_v24  ;;  %v15228_v23 = vcombine.high %v1586_v16, %v1594_v18  ;;  %v15230_v24 = vcombine.high %v1587_v19, %v1595_v51  ;;  %v1674_v8 = vld [vmem:[%s16694_s28 + $0x2750] sm:$0xff]  ;;  %v1675_v10 = vld [vmem:[%s16694_s28 + $0x2758] sm:$0xff] }
 0x375   : > { %12025 = vmatpush1.bf16.msra.mxu0 %v15131_v31  ;;  %12312 = vmatpush1.bf16.msra.mxu1 %v15133_v33  ;;  %v15227_v31 = vcombine.low %v1586_v16, %v1594_v18  ;;  %v15229_v33 = vcombine.low %v1587_v19, %v1595_v51  ;;  %v1682_v16 = vld [vmem:[%s16694_s28 + $0x2790] sm:$0xff]  ;;  %v1683_v19 = vld [vmem:[%s16694_s28 + $0x2798] sm:$0xff] }
 0x376   : > { %12026 = vmatprep.subr.bf16.mxu0 %v15148_v34  ;;  %12313 = vmatprep.subr.bf16.mxu1 %v15150_v35  ;;  %v15244_v34 = vcombine.high %v1602_v27, %v1610_v28  ;;  %v15246_v35 = vcombine.high %v1603_v29, %v1611_v30  ;;  %v1690_v18 = vld [vmem:[%s16694_s28 + $0x27d0] sm:$0xff]  ;;  %v1691_v51 = vld [vmem:[%s16694_s28 + $0x27d8] sm:$0xff] }
 0x379   : > { %12027 = vmatpush1.bf16.msra.mxu0 %v15147_v43  ;;  %12314 = vmatpush1.bf16.msra.mxu1 %v15149_v44  ;;  %v15243_v43 = vcombine.low %v1602_v27, %v1610_v28  ;;  %v15245_v44 = vcombine.low %v1603_v29, %v1611_v30  ;;  %v1698_v27 = vld [vmem:[%s16694_s28 + $0x2810] sm:$0xff]  ;;  %v1699_v29 = vld [vmem:[%s16694_s28 + $0x2818] sm:$0xff] }
 0x37a   : > { %12028 = vmatprep.subr.bf16.mxu0 %v15164_v45  ;;  %12315 = vmatprep.subr.bf16.mxu1 %v15166_v48  ;;  %v15260_v45 = vcombine.high %v1618_v37, %v1626_v38  ;;  %v15262_v48 = vcombine.high %v1619_v40, %v1627_v42  ;;  %v1706_v28 = vld [vmem:[%s16694_s28 + $0x2850] sm:$0xff]  ;;  %v1707_v30 = vld [vmem:[%s16694_s28 + $0x2858] sm:$0xff] }
 0x37d   : > { %12029 = vmatpush1.bf16.msra.mxu0 %v15163_v55  ;;  %12316 = vmatpush1.bf16.msra.mxu1 %v15165_v56  ;;  %v15259_v55 = vcombine.low %v1618_v37, %v1626_v38  ;;  %v15261_v56 = vcombine.low %v1619_v40, %v1627_v42  ;;  %v1714_v37 = vld [vmem:[%s16694_s28 + $0x2890] sm:$0xff]  ;;  %v1715_v40 = vld [vmem:[%s16694_s28 + $0x2898] sm:$0xff] }
 0x37e   : > { %12030 = vmatprep.subr.bf16.mxu0 %v15180_v17  ;;  %12317 = vmatprep.subr.bf16.mxu1 %v15182_v58  ;;  %v15276_v17 = vcombine.high %v1634_v49, %v1642_v50  ;;  %v15278_v58 = vcombine.high %v1635_v60, %v1643_v54  ;;  %v1722_v38 = vld [vmem:[%s16694_s28 + $0x28d0] sm:$0xff]  ;;  %v1723_v42 = vld [vmem:[%s16694_s28 + $0x28d8] sm:$0xff] }
 0x381   : > { %12031 = vmatpush1.bf16.msra.mxu0 %v15179_v3  ;;  %12318 = vmatpush1.bf16.msra.mxu1 %v15181_v53  ;;  %v15275_v3 = vcombine.low %v1634_v49, %v1642_v50  ;;  %v15277_v53 = vcombine.low %v1635_v60, %v1643_v54  ;;  %v1730_v49 = vld [vmem:[%s16694_s28 + $0x2910] sm:$0xff]  ;;  %v1731_v60 = vld [vmem:[%s16694_s28 + $0x2918] sm:$0xff] }
 0x382   : > { %12032 = vmatprep.subr.bf16.mxu0 %v15196_v5  ;;  %12319 = vmatprep.subr.bf16.mxu1 %v15198_v4  ;;  %v15292_v5 = vcombine.high %v1650_v62, %v1658_v0  ;;  %v15294_v4 = vcombine.high %v1651_v1, %v1659_v2  ;;  %v1738_v50 = vld [vmem:[%s16694_s28 + $0x2950] sm:$0xff]  ;;  %v1739_v54 = vld [vmem:[%s16694_s28 + $0x2958] sm:$0xff] }
 0x385   : > { %12033 = vmatpush1.bf16.msra.mxu0 %v15195_v12  ;;  %12320 = vmatpush1.bf16.msra.mxu1 %v15197_v32  ;;  %v15291_v12 = vcombine.low %v1650_v62, %v1658_v0  ;;  %v15293_v32 = vcombine.low %v1651_v1, %v1659_v2  ;;  %v1746_v62 = vld [vmem:[%s16694_s28 + $0x2990] sm:$0xff]  ;;  %v1747_v1 = vld [vmem:[%s16694_s28 + $0x2998] sm:$0xff] }
 0x386   : > { %12034 = vmatprep.subr.bf16.mxu0 %v15212_v13  ;;  %12321 = vmatprep.subr.bf16.mxu1 %v15214_v14  ;;  %v15308_v13 = vcombine.high %v1666_v6, %v1674_v8  ;;  %v15310_v14 = vcombine.high %v1667_v9, %v1675_v10  ;;  %v1754_v0 = vld [vmem:[%s16694_s28 + $0x29d0] sm:$0xff]  ;;  %v1755_v2 = vld [vmem:[%s16694_s28 + $0x29d8] sm:$0xff] }
 0x389   : > { %12035 = vmatpush1.bf16.msra.mxu0 %v15211_v21  ;;  %12322 = vmatpush1.bf16.msra.mxu1 %v15213_v22  ;;  %v15307_v21 = vcombine.low %v1666_v6, %v1674_v8  ;;  %v15309_v22 = vcombine.low %v1667_v9, %v1675_v10  ;;  %v1762_v6 = vld [vmem:[%s16694_s28 + $0x2a10] sm:$0xff]  ;;  %v1763_v9 = vld [vmem:[%s16694_s28 + $0x2a18] sm:$0xff] }
 0x38a   : > { %12036 = vmatprep.subr.bf16.mxu0 %v15228_v23  ;;  %12323 = vmatprep.subr.bf16.mxu1 %v15230_v24  ;;  %v15324_v23 = vcombine.high %v1682_v16, %v1690_v18  ;;  %v15326_v24 = vcombine.high %v1683_v19, %v1691_v51  ;;  %v1770_v8 = vld [vmem:[%s16694_s28 + $0x2a50] sm:$0xff]  ;;  %v1771_v10 = vld [vmem:[%s16694_s28 + $0x2a58] sm:$0xff] }
 0x38d   : > { %12037 = vmatpush1.bf16.msra.mxu0 %v15227_v31  ;;  %12324 = vmatpush1.bf16.msra.mxu1 %v15229_v33  ;;  %v15323_v31 = vcombine.low %v1682_v16, %v1690_v18  ;;  %v15325_v33 = vcombine.low %v1683_v19, %v1691_v51  ;;  %v1778_v16 = vld [vmem:[%s16694_s28 + $0x2a90] sm:$0xff]  ;;  %v1779_v19 = vld [vmem:[%s16694_s28 + $0x2a98] sm:$0xff] }
 0x38e   : > { %12038 = vmatprep.subr.bf16.mxu0 %v15244_v34  ;;  %12325 = vmatprep.subr.bf16.mxu1 %v15246_v35  ;;  %v15340_v34 = vcombine.high %v1698_v27, %v1706_v28  ;;  %v15342_v35 = vcombine.high %v1699_v29, %v1707_v30  ;;  %v1786_v18 = vld [vmem:[%s16694_s28 + $0x2ad0] sm:$0xff]  ;;  %v1787_v51 = vld [vmem:[%s16694_s28 + $0x2ad8] sm:$0xff] }
 0x391   : > { %12039 = vmatpush1.bf16.msra.mxu0 %v15243_v43  ;;  %12326 = vmatpush1.bf16.msra.mxu1 %v15245_v44  ;;  %v15339_v43 = vcombine.low %v1698_v27, %v1706_v28  ;;  %v15341_v44 = vcombine.low %v1699_v29, %v1707_v30  ;;  %v1794_v27 = vld [vmem:[%s16694_s28 + $0x2b10] sm:$0xff]  ;;  %v1795_v29 = vld [vmem:[%s16694_s28 + $0x2b18] sm:$0xff] }
 0x392   : > { %12040 = vmatprep.subr.bf16.mxu0 %v15260_v45  ;;  %12327 = vmatprep.subr.bf16.mxu1 %v15262_v48  ;;  %v15356_v45 = vcombine.high %v1714_v37, %v1722_v38  ;;  %v15358_v48 = vcombine.high %v1715_v40, %v1723_v42  ;;  %v1802_v28 = vld [vmem:[%s16694_s28 + $0x2b50] sm:$0xff]  ;;  %v1803_v30 = vld [vmem:[%s16694_s28 + $0x2b58] sm:$0xff] }
 0x395   : > { %12041 = vmatpush1.bf16.msra.mxu0 %v15259_v55  ;;  %12328 = vmatpush1.bf16.msra.mxu1 %v15261_v56  ;;  %v15355_v55 = vcombine.low %v1714_v37, %v1722_v38  ;;  %v15357_v56 = vcombine.low %v1715_v40, %v1723_v42  ;;  %v1810_v37 = vld [vmem:[%s16694_s28 + $0x2b90] sm:$0xff]  ;;  %v1811_v40 = vld [vmem:[%s16694_s28 + $0x2b98] sm:$0xff] }
 0x396   : > { %12042 = vmatprep.subr.bf16.mxu0 %v15276_v17  ;;  %12329 = vmatprep.subr.bf16.mxu1 %v15278_v58  ;;  %v15372_v17 = vcombine.high %v1730_v49, %v1738_v50  ;;  %v15374_v58 = vcombine.high %v1731_v60, %v1739_v54  ;;  %v1818_v38 = vld [vmem:[%s16694_s28 + $0x2bd0] sm:$0xff]  ;;  %v1819_v42 = vld [vmem:[%s16694_s28 + $0x2bd8] sm:$0xff] }
 0x399   : > { %12043 = vmatpush1.bf16.msra.mxu0 %v15275_v3  ;;  %12330 = vmatpush1.bf16.msra.mxu1 %v15277_v53  ;;  %v15371_v3 = vcombine.low %v1730_v49, %v1738_v50  ;;  %v15373_v53 = vcombine.low %v1731_v60, %v1739_v54  ;;  %v1826_v49 = vld [vmem:[%s16694_s28 + $0x2c10] sm:$0xff]  ;;  %v1827_v60 = vld [vmem:[%s16694_s28 + $0x2c18] sm:$0xff] }
 0x39a   : > { %12044 = vmatprep.subr.bf16.mxu0 %v15292_v5  ;;  %12331 = vmatprep.subr.bf16.mxu1 %v15294_v4  ;;  %v15388_v5 = vcombine.high %v1746_v62, %v1754_v0  ;;  %v15390_v4 = vcombine.high %v1747_v1, %v1755_v2  ;;  %v1834_v50 = vld [vmem:[%s16694_s28 + $0x2c50] sm:$0xff]  ;;  %v1835_v54 = vld [vmem:[%s16694_s28 + $0x2c58] sm:$0xff] }
 0x39d   : > { %12045 = vmatpush1.bf16.msra.mxu0 %v15291_v12  ;;  %12332 = vmatpush1.bf16.msra.mxu1 %v15293_v32  ;;  %v15387_v12 = vcombine.low %v1746_v62, %v1754_v0  ;;  %v15389_v32 = vcombine.low %v1747_v1, %v1755_v2  ;;  %v1842_v62 = vld [vmem:[%s16694_s28 + $0x2c90] sm:$0xff]  ;;  %v1843_v1 = vld [vmem:[%s16694_s28 + $0x2c98] sm:$0xff] }
 0x39e   : > { %12046 = vmatprep.subr.bf16.mxu0 %v15308_v13  ;;  %12333 = vmatprep.subr.bf16.mxu1 %v15310_v14  ;;  %v15404_v13 = vcombine.high %v1762_v6, %v1770_v8  ;;  %v15406_v14 = vcombine.high %v1763_v9, %v1771_v10  ;;  %v1850_v0 = vld [vmem:[%s16694_s28 + $0x2cd0] sm:$0xff]  ;;  %v1851_v2 = vld [vmem:[%s16694_s28 + $0x2cd8] sm:$0xff] }
 0x3a1   : > { %12047 = vmatpush1.bf16.msra.mxu0 %v15307_v21  ;;  %12334 = vmatpush1.bf16.msra.mxu1 %v15309_v22  ;;  %v15403_v21 = vcombine.low %v1762_v6, %v1770_v8  ;;  %v15405_v22 = vcombine.low %v1763_v9, %v1771_v10  ;;  %v1858_v6 = vld [vmem:[%s16694_s28 + $0x2d10] sm:$0xff]  ;;  %v1859_v9 = vld [vmem:[%s16694_s28 + $0x2d18] sm:$0xff] }
 0x3a2   : > { %12048 = vmatprep.subr.bf16.mxu0 %v15324_v23  ;;  %12335 = vmatprep.subr.bf16.mxu1 %v15326_v24  ;;  %v15420_v23 = vcombine.high %v1778_v16, %v1786_v18  ;;  %v15422_v24 = vcombine.high %v1779_v19, %v1787_v51  ;;  %v1866_v8 = vld [vmem:[%s16694_s28 + $0x2d50] sm:$0xff]  ;;  %v1867_v10 = vld [vmem:[%s16694_s28 + $0x2d58] sm:$0xff] }
 0x3a5   : > { %12049 = vmatpush1.bf16.msra.mxu0 %v15323_v31  ;;  %12336 = vmatpush1.bf16.msra.mxu1 %v15325_v33  ;;  %v15419_v31 = vcombine.low %v1778_v16, %v1786_v18  ;;  %v15421_v33 = vcombine.low %v1779_v19, %v1787_v51  ;;  %v1874_v16 = vld [vmem:[%s16694_s28 + $0x2d90] sm:$0xff]  ;;  %v1875_v19 = vld [vmem:[%s16694_s28 + $0x2d98] sm:$0xff] }
 0x3a6   : > { %12059 = vmatprep.subr.bf16.mxu0 %v15340_v34  ;;  %12346 = vmatprep.subr.bf16.mxu1 %v15342_v35  ;;  %v15436_v34 = vcombine.high %v1794_v27, %v1802_v28  ;;  %v15438_v35 = vcombine.high %v1795_v29, %v1803_v30  ;;  %v1882_v18 = vld [vmem:[%s16694_s28 + $0x2dd0] sm:$0xff]  ;;  %v1883_v51 = vld [vmem:[%s16694_s28 + $0x2dd8] sm:$0xff] }
 0x3a8   : > { %12051 = vmatmul.mubr.bf16.vlgmr.msra.gmra.mrb[4].mxu0 %v17122_v39  ;;  %12338 = vmatmul.mubr.bf16.vlgmr.msra.gmra.mrb[4].mxu1 %v17122_v39 }
 0x3a9   : > { %12060 = vmatpush1.bf16.msra.mxu0 %v15339_v43  ;;  %12347 = vmatpush1.bf16.msra.mxu1 %v15341_v44  ;;  %v15435_v43 = vcombine.low %v1794_v27, %v1802_v28  ;;  %v15437_v44 = vcombine.low %v1795_v29, %v1803_v30  ;;  %v1890_v27 = vld [vmem:[%s16694_s28 + $0x2e10] sm:$0xff]  ;;  %v1891_v29 = vld [vmem:[%s16694_s28 + $0x2e18] sm:$0xff] }
 0x3aa   : > { %12061 = vmatprep.subr.bf16.mxu0 %v15356_v45  ;;  %12348 = vmatprep.subr.bf16.mxu1 %v15358_v48  ;;  %v15452_v45 = vcombine.high %v1810_v37, %v1818_v38  ;;  %v15454_v48 = vcombine.high %v1811_v40, %v1819_v42  ;;  %v1898_v28 = vld [vmem:[%s16694_s28 + $0x2e50] sm:$0xff]  ;;  %v1899_v30 = vld [vmem:[%s16694_s28 + $0x2e58] sm:$0xff] }
 0x3ab   : > { %12091 = vmatprep.mubr.bf16.mxu0 %v17130_v52  ;;  %12378 = vmatprep.mubr.bf16.mxu1 %v17130_v52 }
 0x3ad   : > { %12062 = vmatpush1.bf16.msra.mxu0 %v15355_v55  ;;  %12349 = vmatpush1.bf16.msra.mxu1 %v15357_v56  ;;  %v15451_v55 = vcombine.low %v1810_v37, %v1818_v38  ;;  %v15453_v56 = vcombine.low %v1811_v40, %v1819_v42  ;;  %v1906_v37 = vld [vmem:[%s16694_s28 + $0x2e90] sm:$0xff]  ;;  %v1907_v40 = vld [vmem:[%s16694_s28 + $0x2e98] sm:$0xff] }
 0x3ae   : > { %12063 = vmatprep.subr.bf16.mxu0 %v15372_v17  ;;  %12350 = vmatprep.subr.bf16.mxu1 %v15374_v58  ;;  %v15468_v17 = vcombine.high %v1826_v49, %v1834_v50  ;;  %v15470_v58 = vcombine.high %v1827_v60, %v1835_v54  ;;  %v1914_v38 = vld [vmem:[%s16694_s28 + $0x2ed0] sm:$0xff]  ;;  %v1915_v42 = vld [vmem:[%s16694_s28 + $0x2ed8] sm:$0xff] }
 0x3b1   : > { %12064 = vmatpush1.bf16.msra.mxu0 %v15371_v3  ;;  %12351 = vmatpush1.bf16.msra.mxu1 %v15373_v53  ;;  %v15467_v3 = vcombine.low %v1826_v49, %v1834_v50  ;;  %v15469_v53 = vcombine.low %v1827_v60, %v1835_v54  ;;  %v1922_v49 = vld [vmem:[%s16694_s28 + $0x2f10] sm:$0xff]  ;;  %v1923_v60 = vld [vmem:[%s16694_s28 + $0x2f18] sm:$0xff] }
 0x3b2   : > { %12065 = vmatprep.subr.bf16.mxu0 %v15388_v5  ;;  %12352 = vmatprep.subr.bf16.mxu1 %v15390_v4  ;;  %v15484_v5 = vcombine.high %v1842_v62, %v1850_v0  ;;  %v15486_v4 = vcombine.high %v1843_v1, %v1851_v2  ;;  %v1930_v50 = vld [vmem:[%s16694_s28 + $0x2f50] sm:$0xff]  ;;  %v1931_v54 = vld [vmem:[%s16694_s28 + $0x2f58] sm:$0xff] }
 0x3b5   : > { %12066 = vmatpush1.bf16.msra.mxu0 %v15387_v12  ;;  %12353 = vmatpush1.bf16.msra.mxu1 %v15389_v32  ;;  %v15483_v12 = vcombine.low %v1842_v62, %v1850_v0  ;;  %v15485_v32 = vcombine.low %v1843_v1, %v1851_v2  ;;  %v1938_v62 = vld [vmem:[%s16694_s28 + $0x2f90] sm:$0xff]  ;;  %v1939_v1 = vld [vmem:[%s16694_s28 + $0x2f98] sm:$0xff] }
 0x3b6   : > { %12067 = vmatprep.subr.bf16.mxu0 %v15404_v13  ;;  %12354 = vmatprep.subr.bf16.mxu1 %v15406_v14  ;;  %v15500_v13 = vcombine.high %v1858_v6, %v1866_v8  ;;  %v15502_v14 = vcombine.high %v1859_v9, %v1867_v10  ;;  %v1946_v0 = vld [vmem:[%s16694_s28 + $0x2fd0] sm:$0xff]  ;;  %v1947_v2 = vld [vmem:[%s16694_s28 + $0x2fd8] sm:$0xff] }
 0x3b9   : > { %12068 = vmatpush1.bf16.msra.mxu0 %v15403_v21  ;;  %12355 = vmatpush1.bf16.msra.mxu1 %v15405_v22  ;;  %v15499_v21 = vcombine.low %v1858_v6, %v1866_v8  ;;  %v15501_v22 = vcombine.low %v1859_v9, %v1867_v10  ;;  %v1954_v6 = vld [vmem:[%s16694_s28 + $0x3010] sm:$0xff]  ;;  %v1955_v9 = vld [vmem:[%s16694_s28 + $0x3018] sm:$0xff] }
 0x3ba   : > { %12069 = vmatprep.subr.bf16.mxu0 %v15420_v23  ;;  %12356 = vmatprep.subr.bf16.mxu1 %v15422_v24  ;;  %v15516_v23 = vcombine.high %v1874_v16, %v1882_v18  ;;  %v15518_v24 = vcombine.high %v1875_v19, %v1883_v51  ;;  %v1962_v8 = vld [vmem:[%s16694_s28 + $0x3050] sm:$0xff]  ;;  %v1963_v10 = vld [vmem:[%s16694_s28 + $0x3058] sm:$0xff] }
 0x3bd   : > { %12070 = vmatpush1.bf16.msra.mxu0 %v15419_v31  ;;  %12357 = vmatpush1.bf16.msra.mxu1 %v15421_v33  ;;  %v15515_v31 = vcombine.low %v1874_v16, %v1882_v18  ;;  %v15517_v33 = vcombine.low %v1875_v19, %v1883_v51  ;;  %v1970_v16 = vld [vmem:[%s16694_s28 + $0x3090] sm:$0xff]  ;;  %v1971_v19 = vld [vmem:[%s16694_s28 + $0x3098] sm:$0xff] }
 0x3be   : > { %12071 = vmatprep.subr.bf16.mxu0 %v15436_v34  ;;  %12358 = vmatprep.subr.bf16.mxu1 %v15438_v35  ;;  %v15532_v34 = vcombine.high %v1890_v27, %v1898_v28  ;;  %v15534_v35 = vcombine.high %v1891_v29, %v1899_v30  ;;  %v1978_v18 = vld [vmem:[%s16694_s28 + $0x30d0] sm:$0xff]  ;;  %v1979_v51 = vld [vmem:[%s16694_s28 + $0x30d8] sm:$0xff] }
 0x3c1   : > { %12072 = vmatpush1.bf16.msra.mxu0 %v15435_v43  ;;  %12359 = vmatpush1.bf16.msra.mxu1 %v15437_v44  ;;  %v15531_v43 = vcombine.low %v1890_v27, %v1898_v28  ;;  %v15533_v44 = vcombine.low %v1891_v29, %v1899_v30  ;;  %v1986_v27 = vld [vmem:[%s16694_s28 + $0x3110] sm:$0xff]  ;;  %v1987_v29 = vld [vmem:[%s16694_s28 + $0x3118] sm:$0xff] }
 0x3c2   : > { %12073 = vmatprep.subr.bf16.mxu0 %v15452_v45  ;;  %12360 = vmatprep.subr.bf16.mxu1 %v15454_v48  ;;  %v15548_v45 = vcombine.high %v1906_v37, %v1914_v38  ;;  %v15550_v48 = vcombine.high %v1907_v40, %v1915_v42  ;;  %v1994_v28 = vld [vmem:[%s16694_s28 + $0x3150] sm:$0xff]  ;;  %v1995_v30 = vld [vmem:[%s16694_s28 + $0x3158] sm:$0xff] }
 0x3c5   : > { %12074 = vmatpush1.bf16.msra.mxu0 %v15451_v55  ;;  %12361 = vmatpush1.bf16.msra.mxu1 %v15453_v56  ;;  %v15547_v55 = vcombine.low %v1906_v37, %v1914_v38  ;;  %v15549_v56 = vcombine.low %v1907_v40, %v1915_v42  ;;  %v2002_v37 = vld [vmem:[%s16694_s28 + $0x3190] sm:$0xff]  ;;  %v2003_v40 = vld [vmem:[%s16694_s28 + $0x3198] sm:$0xff] }
 0x3c6   : > { %12075 = vmatprep.subr.bf16.mxu0 %v15468_v17  ;;  %12362 = vmatprep.subr.bf16.mxu1 %v15470_v58  ;;  %v15564_v17 = vcombine.high %v1922_v49, %v1930_v50  ;;  %v15566_v58 = vcombine.high %v1923_v60, %v1931_v54  ;;  %v2010_v38 = vld [vmem:[%s16694_s28 + $0x31d0] sm:$0xff]  ;;  %v2011_v42 = vld [vmem:[%s16694_s28 + $0x31d8] sm:$0xff] }
 0x3c9   : > { %12076 = vmatpush1.bf16.msra.mxu0 %v15467_v3  ;;  %12363 = vmatpush1.bf16.msra.mxu1 %v15469_v53  ;;  %v15563_v3 = vcombine.low %v1922_v49, %v1930_v50  ;;  %v15565_v53 = vcombine.low %v1923_v60, %v1931_v54  ;;  %v2018_v49 = vld [vmem:[%s16694_s28 + $0x3210] sm:$0xff]  ;;  %v2019_v60 = vld [vmem:[%s16694_s28 + $0x3218] sm:$0xff] }
 0x3ca   : > { %12077 = vmatprep.subr.bf16.mxu0 %v15484_v5  ;;  %12364 = vmatprep.subr.bf16.mxu1 %v15486_v4  ;;  %v15580_v5 = vcombine.high %v1938_v62, %v1946_v0  ;;  %v15582_v4 = vcombine.high %v1939_v1, %v1947_v2  ;;  %v2026_v50 = vld [vmem:[%s16694_s28 + $0x3250] sm:$0xff]  ;;  %v2027_v54 = vld [vmem:[%s16694_s28 + $0x3258] sm:$0xff] }
 0x3cd   : > { %12078 = vmatpush1.bf16.msra.mxu0 %v15483_v12  ;;  %12365 = vmatpush1.bf16.msra.mxu1 %v15485_v32  ;;  %v15579_v12 = vcombine.low %v1938_v62, %v1946_v0  ;;  %v15581_v32 = vcombine.low %v1939_v1, %v1947_v2  ;;  %v2034_v62 = vld [vmem:[%s16694_s28 + $0x3290] sm:$0xff]  ;;  %v2035_v1 = vld [vmem:[%s16694_s28 + $0x3298] sm:$0xff] }
 0x3ce   : > { %12079 = vmatprep.subr.bf16.mxu0 %v15500_v13  ;;  %12366 = vmatprep.subr.bf16.mxu1 %v15502_v14  ;;  %v15596_v13 = vcombine.high %v1954_v6, %v1962_v8  ;;  %v15598_v14 = vcombine.high %v1955_v9, %v1963_v10  ;;  %v2042_v0 = vld [vmem:[%s16694_s28 + $0x32d0] sm:$0xff]  ;;  %v2043_v2 = vld [vmem:[%s16694_s28 + $0x32d8] sm:$0xff] }
 0x3d1   : > { %12080 = vmatpush1.bf16.msra.mxu0 %v15499_v21  ;;  %12367 = vmatpush1.bf16.msra.mxu1 %v15501_v22  ;;  %v15595_v21 = vcombine.low %v1954_v6, %v1962_v8  ;;  %v15597_v22 = vcombine.low %v1955_v9, %v1963_v10  ;;  %v2050_v6 = vld [vmem:[%s16694_s28 + $0x3310] sm:$0xff]  ;;  %v2051_v9 = vld [vmem:[%s16694_s28 + $0x3318] sm:$0xff] }
 0x3d2   : > { %12081 = vmatprep.subr.bf16.mxu0 %v15516_v23  ;;  %12368 = vmatprep.subr.bf16.mxu1 %v15518_v24  ;;  %v15612_v23 = vcombine.high %v1970_v16, %v1978_v18  ;;  %v15614_v24 = vcombine.high %v1971_v19, %v1979_v51  ;;  %v2058_v8 = vld [vmem:[%s16694_s28 + $0x3350] sm:$0xff]  ;;  %v2059_v10 = vld [vmem:[%s16694_s28 + $0x3358] sm:$0xff] }
 0x3d5   : > { %12082 = vmatpush1.bf16.msra.mxu0 %v15515_v31  ;;  %12369 = vmatpush1.bf16.msra.mxu1 %v15517_v33  ;;  %v15611_v31 = vcombine.low %v1970_v16, %v1978_v18  ;;  %v15613_v33 = vcombine.low %v1971_v19, %v1979_v51  ;;  %v2066_v16 = vld [vmem:[%s16694_s28 + $0x3390] sm:$0xff]  ;;  %v2067_v19 = vld [vmem:[%s16694_s28 + $0x3398] sm:$0xff] }
 0x3d6   : > { %12083 = vmatprep.subr.bf16.mxu0 %v15532_v34  ;;  %12370 = vmatprep.subr.bf16.mxu1 %v15534_v35  ;;  %v15628_v34 = vcombine.high %v1986_v27, %v1994_v28  ;;  %v15630_v35 = vcombine.high %v1987_v29, %v1995_v30  ;;  %v2074_v18 = vld [vmem:[%s16694_s28 + $0x33d0] sm:$0xff]  ;;  %v2075_v51 = vld [vmem:[%s16694_s28 + $0x33d8] sm:$0xff] }
 0x3d9   : > { %12084 = vmatpush1.bf16.msra.mxu0 %v15531_v43  ;;  %12371 = vmatpush1.bf16.msra.mxu1 %v15533_v44  ;;  %v15627_v43 = vcombine.low %v1986_v27, %v1994_v28  ;;  %v15629_v44 = vcombine.low %v1987_v29, %v1995_v30  ;;  %v2082_v27 = vld [vmem:[%s16694_s28 + $0x3410] sm:$0xff]  ;;  %v2083_v29 = vld [vmem:[%s16694_s28 + $0x3418] sm:$0xff] }
 0x3da   : > { %12085 = vmatprep.subr.bf16.mxu0 %v15548_v45  ;;  %12372 = vmatprep.subr.bf16.mxu1 %v15550_v48  ;;  %v15644_v45 = vcombine.high %v2002_v37, %v2010_v38  ;;  %v15646_v48 = vcombine.high %v2003_v40, %v2011_v42  ;;  %v2090_v28 = vld [vmem:[%s16694_s28 + $0x3450] sm:$0xff]  ;;  %v2091_v30 = vld [vmem:[%s16694_s28 + $0x3458] sm:$0xff] }
 0x3dd   : > { %12086 = vmatpush1.bf16.msra.mxu0 %v15547_v55  ;;  %12373 = vmatpush1.bf16.msra.mxu1 %v15549_v56  ;;  %v15643_v55 = vcombine.low %v2002_v37, %v2010_v38  ;;  %v15645_v56 = vcombine.low %v2003_v40, %v2011_v42  ;;  %v2098_v37 = vld [vmem:[%s16694_s28 + $0x3490] sm:$0xff]  ;;  %v2099_v40 = vld [vmem:[%s16694_s28 + $0x3498] sm:$0xff] }
 0x3de   : > { %12087 = vmatprep.subr.bf16.mxu0 %v15564_v17  ;;  %12374 = vmatprep.subr.bf16.mxu1 %v15566_v58  ;;  %v15660_v17 = vcombine.high %v2018_v49, %v2026_v50  ;;  %v15662_v58 = vcombine.high %v2019_v60, %v2027_v54  ;;  %v2106_v38 = vld [vmem:[%s16694_s28 + $0x34d0] sm:$0xff]  ;;  %v2107_v42 = vld [vmem:[%s16694_s28 + $0x34d8] sm:$0xff] }
 0x3e1   : > { %12088 = vmatpush1.bf16.msra.mxu0 %v15563_v3  ;;  %12375 = vmatpush1.bf16.msra.mxu1 %v15565_v53  ;;  %v15659_v3 = vcombine.low %v2018_v49, %v2026_v50  ;;  %v15661_v53 = vcombine.low %v2019_v60, %v2027_v54  ;;  %v2114_v49 = vld [vmem:[%s16694_s28 + $0x3510] sm:$0xff]  ;;  %v2115_v60 = vld [vmem:[%s16694_s28 + $0x3518] sm:$0xff] }
 0x3e2   : > { %12089 = vmatprep.subr.bf16.mxu0 %v15580_v5  ;;  %12376 = vmatprep.subr.bf16.mxu1 %v15582_v4  ;;  %v15676_v5 = vcombine.high %v2034_v62, %v2042_v0  ;;  %v15678_v4 = vcombine.high %v2035_v1, %v2043_v2  ;;  %v2122_v50 = vld [vmem:[%s16694_s28 + $0x3550] sm:$0xff]  ;;  %v2123_v54 = vld [vmem:[%s16694_s28 + $0x3558] sm:$0xff] }
 0x3e5   : > { %12090 = vmatpush1.bf16.msra.mxu0 %v15579_v12  ;;  %12377 = vmatpush1.bf16.msra.mxu1 %v15581_v32  ;;  %v15675_v12 = vcombine.low %v2034_v62, %v2042_v0  ;;  %v15677_v32 = vcombine.low %v2035_v1, %v2043_v2  ;;  %v2130_v62 = vld [vmem:[%s16694_s28 + $0x3590] sm:$0xff]  ;;  %v2131_v1 = vld [vmem:[%s16694_s28 + $0x3598] sm:$0xff] }
 0x3e6   : > { %12100 = vmatprep.subr.bf16.mxu0 %v15596_v13  ;;  %12387 = vmatprep.subr.bf16.mxu1 %v15598_v14  ;;  %v15692_v13 = vcombine.high %v2050_v6, %v2058_v8  ;;  %v15694_v14 = vcombine.high %v2051_v9, %v2059_v10  ;;  %v2138_v0 = vld [vmem:[%s16694_s28 + $0x35d0] sm:$0xff]  ;;  %v2139_v2 = vld [vmem:[%s16694_s28 + $0x35d8] sm:$0xff] }
 0x3e8   : > { %12092 = vmatmul.mubr.bf16.vlgmr.msra.gmra.mrb[4].mxu0 %v17205_v15  ;;  %12379 = vmatmul.mubr.bf16.vlgmr.msra.gmra.mrb[4].mxu1 %v17205_v15 }
 0x3e9   : > { %12101 = vmatpush1.bf16.msra.mxu0 %v15595_v21  ;;  %12388 = vmatpush1.bf16.msra.mxu1 %v15597_v22  ;;  %v15691_v21 = vcombine.low %v2050_v6, %v2058_v8  ;;  %v15693_v22 = vcombine.low %v2051_v9, %v2059_v10  ;;  %v2146_v6 = vld [vmem:[%s16694_s28 + $0x3610] sm:$0xff]  ;;  %v2147_v9 = vld [vmem:[%s16694_s28 + $0x3618] sm:$0xff] }
 0x3ea   : > { %12102 = vmatprep.subr.bf16.mxu0 %v15612_v23  ;;  %12389 = vmatprep.subr.bf16.mxu1 %v15614_v24  ;;  %v15708_v23 = vcombine.high %v2066_v16, %v2074_v18  ;;  %v15710_v24 = vcombine.high %v2067_v19, %v2075_v51  ;;  %v2154_v8 = vld [vmem:[%s16694_s28 + $0x3650] sm:$0xff]  ;;  %v2155_v10 = vld [vmem:[%s16694_s28 + $0x3658] sm:$0xff] }
 0x3eb   : > { %12132 = vmatprep.mubr.bf16.mxu0 %v17212_v25  ;;  %12419 = vmatprep.mubr.bf16.mxu1 %v17212_v25 }
 0x3ed   : > { %12103 = vmatpush1.bf16.msra.mxu0 %v15611_v31  ;;  %12390 = vmatpush1.bf16.msra.mxu1 %v15613_v33  ;;  %v15707_v31 = vcombine.low %v2066_v16, %v2074_v18  ;;  %v15709_v33 = vcombine.low %v2067_v19, %v2075_v51  ;;  %v2162_v16 = vld [vmem:[%s16694_s28 + $0x3690] sm:$0xff]  ;;  %v2163_v19 = vld [vmem:[%s16694_s28 + $0x3698] sm:$0xff] }
 0x3ee   : > { %12104 = vmatprep.subr.bf16.mxu0 %v15628_v34  ;;  %12391 = vmatprep.subr.bf16.mxu1 %v15630_v35  ;;  %v15724_v34 = vcombine.high %v2082_v27, %v2090_v28  ;;  %v15726_v35 = vcombine.high %v2083_v29, %v2091_v30  ;;  %v2170_v18 = vld [vmem:[%s16694_s28 + $0x36d0] sm:$0xff]  ;;  %v2171_v51 = vld [vmem:[%s16694_s28 + $0x36d8] sm:$0xff] }
 0x3f1   : > { %12105 = vmatpush1.bf16.msra.mxu0 %v15627_v43  ;;  %12392 = vmatpush1.bf16.msra.mxu1 %v15629_v44  ;;  %v15723_v43 = vcombine.low %v2082_v27, %v2090_v28  ;;  %v15725_v44 = vcombine.low %v2083_v29, %v2091_v30  ;;  %v2178_v27 = vld [vmem:[%s16694_s28 + $0x3710] sm:$0xff]  ;;  %v2179_v29 = vld [vmem:[%s16694_s28 + $0x3718] sm:$0xff] }
 0x3f2   : > { %12106 = vmatprep.subr.bf16.mxu0 %v15644_v45  ;;  %12393 = vmatprep.subr.bf16.mxu1 %v15646_v48  ;;  %v15740_v45 = vcombine.high %v2098_v37, %v2106_v38  ;;  %v15742_v48 = vcombine.high %v2099_v40, %v2107_v42  ;;  %v2186_v28 = vld [vmem:[%s16694_s28 + $0x3750] sm:$0xff]  ;;  %v2187_v30 = vld [vmem:[%s16694_s28 + $0x3758] sm:$0xff] }
 0x3f5   : > { %12107 = vmatpush1.bf16.msra.mxu0 %v15643_v55  ;;  %12394 = vmatpush1.bf16.msra.mxu1 %v15645_v56  ;;  %v15739_v55 = vcombine.low %v2098_v37, %v2106_v38  ;;  %v15741_v56 = vcombine.low %v2099_v40, %v2107_v42  ;;  %v2194_v37 = vld [vmem:[%s16694_s28 + $0x3790] sm:$0xff]  ;;  %v2195_v40 = vld [vmem:[%s16694_s28 + $0x3798] sm:$0xff] }
 0x3f6   : > { %12108 = vmatprep.subr.bf16.mxu0 %v15660_v17  ;;  %12395 = vmatprep.subr.bf16.mxu1 %v15662_v58  ;;  %v15756_v17 = vcombine.high %v2114_v49, %v2122_v50  ;;  %v15758_v58 = vcombine.high %v2115_v60, %v2123_v54  ;;  %v2202_v38 = vld [vmem:[%s16694_s28 + $0x37d0] sm:$0xff]  ;;  %v2203_v42 = vld [vmem:[%s16694_s28 + $0x37d8] sm:$0xff] }
 0x3f9   : > { %12109 = vmatpush1.bf16.msra.mxu0 %v15659_v3  ;;  %12396 = vmatpush1.bf16.msra.mxu1 %v15661_v53  ;;  %v15755_v3 = vcombine.low %v2114_v49, %v2122_v50  ;;  %v15757_v53 = vcombine.low %v2115_v60, %v2123_v54  ;;  %v420_v49 = vld [vmem:[%s16694_s28 + $0x20] sm:$0xff]  ;;  %v421_v60 = vld [vmem:[%s16694_s28 + $0x28] sm:$0xff] }
 0x3fa   : > { %12110 = vmatprep.subr.bf16.mxu0 %v15676_v5  ;;  %12397 = vmatprep.subr.bf16.mxu1 %v15678_v4  ;;  %v15772_v5 = vcombine.high %v2130_v62, %v2138_v0  ;;  %v15774_v4 = vcombine.high %v2131_v1, %v2139_v2  ;;  %v428_v50 = vld [vmem:[%s16694_s28 + $0x60] sm:$0xff]  ;;  %v429_v54 = vld [vmem:[%s16694_s28 + $0x68] sm:$0xff] }
 0x3fd   : > { %12111 = vmatpush1.bf16.msra.mxu0 %v15675_v12  ;;  %12398 = vmatpush1.bf16.msra.mxu1 %v15677_v32  ;;  %v15771_v12 = vcombine.low %v2130_v62, %v2138_v0  ;;  %v15773_v32 = vcombine.low %v2131_v1, %v2139_v2  ;;  %v436_v62 = vld [vmem:[%s16694_s28 + $0xa0] sm:$0xff]  ;;  %v437_v1 = vld [vmem:[%s16694_s28 + $0xa8] sm:$0xff] }
 0x3fe   : > { %12112 = vmatprep.subr.bf16.mxu0 %v15692_v13  ;;  %12399 = vmatprep.subr.bf16.mxu1 %v15694_v14  ;;  %v15788_v13 = vcombine.high %v2146_v6, %v2154_v8  ;;  %v15790_v14 = vcombine.high %v2147_v9, %v2155_v10  ;;  %v444_v0 = vld [vmem:[%s16694_s28 + $0xe0] sm:$0xff]  ;;  %v445_v2 = vld [vmem:[%s16694_s28 + $0xe8] sm:$0xff] }
 0x401   : > { %12113 = vmatpush1.bf16.msra.mxu0 %v15691_v21  ;;  %12400 = vmatpush1.bf16.msra.mxu1 %v15693_v22  ;;  %v15787_v21 = vcombine.low %v2146_v6, %v2154_v8  ;;  %v15789_v22 = vcombine.low %v2147_v9, %v2155_v10  ;;  %v452_v6 = vld [vmem:[%s16694_s28 + $0x120] sm:$0xff]  ;;  %v453_v9 = vld [vmem:[%s16694_s28 + $0x128] sm:$0xff] }
 0x402   : > { %12114 = vmatprep.subr.bf16.mxu0 %v15708_v23  ;;  %12401 = vmatprep.subr.bf16.mxu1 %v15710_v24  ;;  %v15804_v23 = vcombine.high %v2162_v16, %v2170_v18  ;;  %v15806_v24 = vcombine.high %v2163_v19, %v2171_v51  ;;  %v460_v8 = vld [vmem:[%s16694_s28 + $0x160] sm:$0xff]  ;;  %v461_v10 = vld [vmem:[%s16694_s28 + $0x168] sm:$0xff] }
 0x405   : > { %12115 = vmatpush1.bf16.msra.mxu0 %v15707_v31  ;;  %12402 = vmatpush1.bf16.msra.mxu1 %v15709_v33  ;;  %v15803_v31 = vcombine.low %v2162_v16, %v2170_v18  ;;  %v15805_v33 = vcombine.low %v2163_v19, %v2171_v51  ;;  %v468_v16 = vld [vmem:[%s16694_s28 + $0x1a0] sm:$0xff]  ;;  %v469_v19 = vld [vmem:[%s16694_s28 + $0x1a8] sm:$0xff] }
 0x406   : > { %12116 = vmatprep.subr.bf16.mxu0 %v15724_v34  ;;  %12403 = vmatprep.subr.bf16.mxu1 %v15726_v35  ;;  %v15820_v34 = vcombine.high %v2178_v27, %v2186_v28  ;;  %v15822_v35 = vcombine.high %v2179_v29, %v2187_v30  ;;  %v476_v18 = vld [vmem:[%s16694_s28 + $0x1e0] sm:$0xff]  ;;  %v477_v51 = vld [vmem:[%s16694_s28 + $0x1e8] sm:$0xff] }
 0x409   : > { %12117 = vmatpush1.bf16.msra.mxu0 %v15723_v43  ;;  %12404 = vmatpush1.bf16.msra.mxu1 %v15725_v44  ;;  %v15819_v43 = vcombine.low %v2178_v27, %v2186_v28  ;;  %v15821_v44 = vcombine.low %v2179_v29, %v2187_v30  ;;  %v484_v27 = vld [vmem:[%s16694_s28 + $0x220] sm:$0xff]  ;;  %v485_v29 = vld [vmem:[%s16694_s28 + $0x228] sm:$0xff] }
 0x40a   : > { %12118 = vmatprep.subr.bf16.mxu0 %v15740_v45  ;;  %12405 = vmatprep.subr.bf16.mxu1 %v15742_v48  ;;  %v15836_v45 = vcombine.high %v2194_v37, %v2202_v38  ;;  %v15838_v48 = vcombine.high %v2195_v40, %v2203_v42  ;;  %v492_v28 = vld [vmem:[%s16694_s28 + $0x260] sm:$0xff]  ;;  %v493_v30 = vld [vmem:[%s16694_s28 + $0x268] sm:$0xff] }
 0x40d   : > { %12119 = vmatpush1.bf16.msra.mxu0 %v15739_v55  ;;  %12406 = vmatpush1.bf16.msra.mxu1 %v15741_v56  ;;  %v15835_v55 = vcombine.low %v2194_v37, %v2202_v38  ;;  %v15837_v56 = vcombine.low %v2195_v40, %v2203_v42  ;;  %v500_v37 = vld [vmem:[%s16694_s28 + $0x2a0] sm:$0xff]  ;;  %v501_v40 = vld [vmem:[%s16694_s28 + $0x2a8] sm:$0xff] }
 0x40e   : > { %12120 = vmatprep.subr.bf16.mxu0 %v15756_v17  ;;  %12407 = vmatprep.subr.bf16.mxu1 %v15758_v58  ;;  %v14064_v17 = vcombine.high %v420_v49, %v428_v50  ;;  %v14066_v58 = vcombine.high %v421_v60, %v429_v54  ;;  %v508_v38 = vld [vmem:[%s16694_s28 + $0x2e0] sm:$0xff]  ;;  %v509_v42 = vld [vmem:[%s16694_s28 + $0x2e8] sm:$0xff] }
 0x411   : > { %12121 = vmatpush1.bf16.msra.mxu0 %v15755_v3  ;;  %12408 = vmatpush1.bf16.msra.mxu1 %v15757_v53  ;;  %v14063_v3 = vcombine.low %v420_v49, %v428_v50  ;;  %v14065_v53 = vcombine.low %v421_v60, %v429_v54  ;;  %v516_v49 = vld [vmem:[%s16694_s28 + $0x320] sm:$0xff]  ;;  %v517_v60 = vld [vmem:[%s16694_s28 + $0x328] sm:$0xff] }
 0x412   : > { %12122 = vmatprep.subr.bf16.mxu0 %v15772_v5  ;;  %12409 = vmatprep.subr.bf16.mxu1 %v15774_v4  ;;  %v14080_v5 = vcombine.high %v436_v62, %v444_v0  ;;  %v14082_v4 = vcombine.high %v437_v1, %v445_v2  ;;  %v524_v50 = vld [vmem:[%s16694_s28 + $0x360] sm:$0xff]  ;;  %v525_v54 = vld [vmem:[%s16694_s28 + $0x368] sm:$0xff] }
 0x415   : > { %12123 = vmatpush1.bf16.msra.mxu0 %v15771_v12  ;;  %12410 = vmatpush1.bf16.msra.mxu1 %v15773_v32  ;;  %v14079_v12 = vcombine.low %v436_v62, %v444_v0  ;;  %v14081_v32 = vcombine.low %v437_v1, %v445_v2  ;;  %v532_v62 = vld [vmem:[%s16694_s28 + $0x3a0] sm:$0xff]  ;;  %v533_v1 = vld [vmem:[%s16694_s28 + $0x3a8] sm:$0xff] }
 0x416   : > { %12124 = vmatprep.subr.bf16.mxu0 %v15788_v13  ;;  %12411 = vmatprep.subr.bf16.mxu1 %v15790_v14  ;;  %v14096_v13 = vcombine.high %v452_v6, %v460_v8  ;;  %v14098_v14 = vcombine.high %v453_v9, %v461_v10  ;;  %v540_v0 = vld [vmem:[%s16694_s28 + $0x3e0] sm:$0xff]  ;;  %v541_v2 = vld [vmem:[%s16694_s28 + $0x3e8] sm:$0xff] }
 0x419   : > { %12125 = vmatpush1.bf16.msra.mxu0 %v15787_v21  ;;  %12412 = vmatpush1.bf16.msra.mxu1 %v15789_v22  ;;  %v14095_v21 = vcombine.low %v452_v6, %v460_v8  ;;  %v14097_v22 = vcombine.low %v453_v9, %v461_v10  ;;  %v548_v6 = vld [vmem:[%s16694_s28 + $0x420] sm:$0xff]  ;;  %v549_v9 = vld [vmem:[%s16694_s28 + $0x428] sm:$0xff] }
 0x41a   : > { %12126 = vmatprep.subr.bf16.mxu0 %v15804_v23  ;;  %12413 = vmatprep.subr.bf16.mxu1 %v15806_v24  ;;  %v14112_v23 = vcombine.high %v468_v16, %v476_v18  ;;  %v14114_v24 = vcombine.high %v469_v19, %v477_v51  ;;  %v556_v8 = vld [vmem:[%s16694_s28 + $0x460] sm:$0xff]  ;;  %v557_v10 = vld [vmem:[%s16694_s28 + $0x468] sm:$0xff] }
 0x41d   : > { %12127 = vmatpush1.bf16.msra.mxu0 %v15803_v31  ;;  %12414 = vmatpush1.bf16.msra.mxu1 %v15805_v33  ;;  %v14111_v31 = vcombine.low %v468_v16, %v476_v18  ;;  %v14113_v33 = vcombine.low %v469_v19, %v477_v51  ;;  %v564_v16 = vld [vmem:[%s16694_s28 + $0x4a0] sm:$0xff]  ;;  %v565_v19 = vld [vmem:[%s16694_s28 + $0x4a8] sm:$0xff] }
 0x41e   : > { %12128 = vmatprep.subr.bf16.mxu0 %v15820_v34  ;;  %12415 = vmatprep.subr.bf16.mxu1 %v15822_v35  ;;  %v14128_v34 = vcombine.high %v484_v27, %v492_v28  ;;  %v14130_v35 = vcombine.high %v485_v29, %v493_v30  ;;  %v572_v18 = vld [vmem:[%s16694_s28 + $0x4e0] sm:$0xff]  ;;  %v573_v51 = vld [vmem:[%s16694_s28 + $0x4e8] sm:$0xff] }
 0x421   : > { %12129 = vmatpush1.bf16.msra.mxu0 %v15819_v43  ;;  %12416 = vmatpush1.bf16.msra.mxu1 %v15821_v44  ;;  %v14127_v43 = vcombine.low %v484_v27, %v492_v28  ;;  %v14129_v44 = vcombine.low %v485_v29, %v493_v30  ;;  %v580_v27 = vld [vmem:[%s16694_s28 + $0x520] sm:$0xff]  ;;  %v581_v29 = vld [vmem:[%s16694_s28 + $0x528] sm:$0xff] }
 0x422   : > { %12130 = vmatprep.subr.bf16.mxu0 %v15836_v45  ;;  %12417 = vmatprep.subr.bf16.mxu1 %v15838_v48  ;;  %v14144_v45 = vcombine.high %v500_v37, %v508_v38  ;;  %v14146_v48 = vcombine.high %v501_v40, %v509_v42  ;;  %v588_v28 = vld [vmem:[%s16694_s28 + $0x560] sm:$0xff]  ;;  %v589_v30 = vld [vmem:[%s16694_s28 + $0x568] sm:$0xff] }
 0x425   : > { %12131 = vmatpush1.bf16.msra.mxu0 %v15835_v55  ;;  %12418 = vmatpush1.bf16.msra.mxu1 %v15837_v56  ;;  %v14143_v55 = vcombine.low %v500_v37, %v508_v38  ;;  %v14145_v56 = vcombine.low %v501_v40, %v509_v42  ;;  %v596_v37 = vld [vmem:[%s16694_s28 + $0x5a0] sm:$0xff]  ;;  %v597_v40 = vld [vmem:[%s16694_s28 + $0x5a8] sm:$0xff] }
 0x426   : > { %12428 = vmatprep.subr.bf16.mxu0 %v14064_v17  ;;  %12715 = vmatprep.subr.bf16.mxu1 %v14066_v58  ;;  %v14160_v17 = vcombine.high %v516_v49, %v524_v50  ;;  %v14162_v58 = vcombine.high %v517_v60, %v525_v54  ;;  %v604_v38 = vld [vmem:[%s16694_s28 + $0x5e0] sm:$0xff]  ;;  %v605_v42 = vld [vmem:[%s16694_s28 + $0x5e8] sm:$0xff] }
 0x428   : > { %12133 = vmatmul.mubr.bf16.vlgmr.msra.gmra.mrb[4].mxu0 %v17280_v59  ;;  %12420 = vmatmul.mubr.bf16.vlgmr.msra.gmra.mrb[4].mxu1 %v17280_v59 }
 0x429   : > { %12429 = vmatpush1.bf16.msra.mxu0 %v14063_v3  ;;  %12716 = vmatpush1.bf16.msra.mxu1 %v14065_v53  ;;  %v14159_v3 = vcombine.low %v516_v49, %v524_v50  ;;  %v14161_v53 = vcombine.low %v517_v60, %v525_v54  ;;  %v612_v49 = vld [vmem:[%s16694_s28 + $0x620] sm:$0xff]  ;;  %v613_v60 = vld [vmem:[%s16694_s28 + $0x628] sm:$0xff] }
 0x42a   : > { %12430 = vmatprep.subr.bf16.mxu0 %v14080_v5  ;;  %12717 = vmatprep.subr.bf16.mxu1 %v14082_v4  ;;  %v14176_v5 = vcombine.high %v532_v62, %v540_v0  ;;  %v14178_v4 = vcombine.high %v533_v1, %v541_v2  ;;  %v620_v50 = vld [vmem:[%s16694_s28 + $0x660] sm:$0xff]  ;;  %v621_v54 = vld [vmem:[%s16694_s28 + $0x668] sm:$0xff] }
 0x42b   : > { %12460 = vmatprep.mubr.bf16.mxu0 %v16762_v61  ;;  %12747 = vmatprep.mubr.bf16.mxu1 %v16762_v61 }
 0x42d   : > { %12431 = vmatpush1.bf16.msra.mxu0 %v14079_v12  ;;  %12718 = vmatpush1.bf16.msra.mxu1 %v14081_v32  ;;  %v14175_v12 = vcombine.low %v532_v62, %v540_v0  ;;  %v14177_v32 = vcombine.low %v533_v1, %v541_v2  ;;  %v628_v62 = vld [vmem:[%s16694_s28 + $0x6a0] sm:$0xff]  ;;  %v629_v1 = vld [vmem:[%s16694_s28 + $0x6a8] sm:$0xff] }
 0x42e   : > { %12432 = vmatprep.subr.bf16.mxu0 %v14096_v13  ;;  %12719 = vmatprep.subr.bf16.mxu1 %v14098_v14  ;;  %v14192_v13 = vcombine.high %v548_v6, %v556_v8  ;;  %v14194_v14 = vcombine.high %v549_v9, %v557_v10  ;;  %v636_v0 = vld [vmem:[%s16694_s28 + $0x6e0] sm:$0xff]  ;;  %v637_v2 = vld [vmem:[%s16694_s28 + $0x6e8] sm:$0xff] }
 0x431   : > { %12433 = vmatpush1.bf16.msra.mxu0 %v14095_v21  ;;  %12720 = vmatpush1.bf16.msra.mxu1 %v14097_v22  ;;  %v14191_v21 = vcombine.low %v548_v6, %v556_v8  ;;  %v14193_v22 = vcombine.low %v549_v9, %v557_v10  ;;  %v644_v6 = vld [vmem:[%s16694_s28 + $0x720] sm:$0xff]  ;;  %v645_v9 = vld [vmem:[%s16694_s28 + $0x728] sm:$0xff] }
 0x432   : > { %12434 = vmatprep.subr.bf16.mxu0 %v14112_v23  ;;  %12721 = vmatprep.subr.bf16.mxu1 %v14114_v24  ;;  %v14208_v23 = vcombine.high %v564_v16, %v572_v18  ;;  %v14210_v24 = vcombine.high %v565_v19, %v573_v51  ;;  %v652_v8 = vld [vmem:[%s16694_s28 + $0x760] sm:$0xff]  ;;  %v653_v10 = vld [vmem:[%s16694_s28 + $0x768] sm:$0xff] }
 0x435   : > { %12435 = vmatpush1.bf16.msra.mxu0 %v14111_v31  ;;  %12722 = vmatpush1.bf16.msra.mxu1 %v14113_v33  ;;  %v14207_v31 = vcombine.low %v564_v16, %v572_v18  ;;  %v14209_v33 = vcombine.low %v565_v19, %v573_v51  ;;  %v660_v16 = vld [vmem:[%s16694_s28 + $0x7a0] sm:$0xff]  ;;  %v661_v19 = vld [vmem:[%s16694_s28 + $0x7a8] sm:$0xff] }
 0x436   : > { %12436 = vmatprep.subr.bf16.mxu0 %v14128_v34  ;;  %12723 = vmatprep.subr.bf16.mxu1 %v14130_v35  ;;  %v14224_v34 = vcombine.high %v580_v27, %v588_v28  ;;  %v14226_v35 = vcombine.high %v581_v29, %v589_v30  ;;  %v668_v18 = vld [vmem:[%s16694_s28 + $0x7e0] sm:$0xff]  ;;  %v669_v51 = vld [vmem:[%s16694_s28 + $0x7e8] sm:$0xff] }
 0x439   : > { %12437 = vmatpush1.bf16.msra.mxu0 %v14127_v43  ;;  %12724 = vmatpush1.bf16.msra.mxu1 %v14129_v44  ;;  %v14223_v43 = vcombine.low %v580_v27, %v588_v28  ;;  %v14225_v44 = vcombine.low %v581_v29, %v589_v30  ;;  %v676_v27 = vld [vmem:[%s16694_s28 + $0x820] sm:$0xff]  ;;  %v677_v29 = vld [vmem:[%s16694_s28 + $0x828] sm:$0xff] }
 0x43a   : > { %12438 = vmatprep.subr.bf16.mxu0 %v14144_v45  ;;  %12725 = vmatprep.subr.bf16.mxu1 %v14146_v48  ;;  %v14240_v45 = vcombine.high %v596_v37, %v604_v38  ;;  %v14242_v48 = vcombine.high %v597_v40, %v605_v42  ;;  %v684_v28 = vld [vmem:[%s16694_s28 + $0x860] sm:$0xff]  ;;  %v685_v30 = vld [vmem:[%s16694_s28 + $0x868] sm:$0xff] }
 0x43d   : > { %12439 = vmatpush1.bf16.msra.mxu0 %v14143_v55  ;;  %12726 = vmatpush1.bf16.msra.mxu1 %v14145_v56  ;;  %v14239_v55 = vcombine.low %v596_v37, %v604_v38  ;;  %v14241_v56 = vcombine.low %v597_v40, %v605_v42  ;;  %v692_v37 = vld [vmem:[%s16694_s28 + $0x8a0] sm:$0xff]  ;;  %v693_v40 = vld [vmem:[%s16694_s28 + $0x8a8] sm:$0xff] }
 0x43e   : > { %12440 = vmatprep.subr.bf16.mxu0 %v14160_v17  ;;  %12727 = vmatprep.subr.bf16.mxu1 %v14162_v58  ;;  %v14256_v17 = vcombine.high %v612_v49, %v620_v50  ;;  %v14258_v58 = vcombine.high %v613_v60, %v621_v54  ;;  %v700_v38 = vld [vmem:[%s16694_s28 + $0x8e0] sm:$0xff]  ;;  %v701_v42 = vld [vmem:[%s16694_s28 + $0x8e8] sm:$0xff] }
 0x441   : > { %12441 = vmatpush1.bf16.msra.mxu0 %v14159_v3  ;;  %12728 = vmatpush1.bf16.msra.mxu1 %v14161_v53  ;;  %v14255_v3 = vcombine.low %v612_v49, %v620_v50  ;;  %v14257_v53 = vcombine.low %v613_v60, %v621_v54  ;;  %v708_v49 = vld [vmem:[%s16694_s28 + $0x920] sm:$0xff]  ;;  %v709_v60 = vld [vmem:[%s16694_s28 + $0x928] sm:$0xff] }
 0x442   : > { %12442 = vmatprep.subr.bf16.mxu0 %v14176_v5  ;;  %12729 = vmatprep.subr.bf16.mxu1 %v14178_v4  ;;  %v14272_v5 = vcombine.high %v628_v62, %v636_v0  ;;  %v14274_v4 = vcombine.high %v629_v1, %v637_v2  ;;  %v716_v50 = vld [vmem:[%s16694_s28 + $0x960] sm:$0xff]  ;;  %v717_v54 = vld [vmem:[%s16694_s28 + $0x968] sm:$0xff] }
 0x445   : > { %12443 = vmatpush1.bf16.msra.mxu0 %v14175_v12  ;;  %12730 = vmatpush1.bf16.msra.mxu1 %v14177_v32  ;;  %v14271_v12 = vcombine.low %v628_v62, %v636_v0  ;;  %v14273_v32 = vcombine.low %v629_v1, %v637_v2  ;;  %v724_v62 = vld [vmem:[%s16694_s28 + $0x9a0] sm:$0xff]  ;;  %v725_v1 = vld [vmem:[%s16694_s28 + $0x9a8] sm:$0xff] }
 0x446   : > { %12444 = vmatprep.subr.bf16.mxu0 %v14192_v13  ;;  %12731 = vmatprep.subr.bf16.mxu1 %v14194_v14  ;;  %v14288_v13 = vcombine.high %v644_v6, %v652_v8  ;;  %v14290_v14 = vcombine.high %v645_v9, %v653_v10  ;;  %v732_v0 = vld [vmem:[%s16694_s28 + $0x9e0] sm:$0xff]  ;;  %v733_v2 = vld [vmem:[%s16694_s28 + $0x9e8] sm:$0xff] }
 0x449   : > { %12445 = vmatpush1.bf16.msra.mxu0 %v14191_v21  ;;  %12732 = vmatpush1.bf16.msra.mxu1 %v14193_v22  ;;  %v14287_v21 = vcombine.low %v644_v6, %v652_v8  ;;  %v14289_v22 = vcombine.low %v645_v9, %v653_v10  ;;  %v740_v6 = vld [vmem:[%s16694_s28 + $0xa20] sm:$0xff]  ;;  %v741_v9 = vld [vmem:[%s16694_s28 + $0xa28] sm:$0xff] }
 0x44a   : > { %12446 = vmatprep.subr.bf16.mxu0 %v14208_v23  ;;  %12733 = vmatprep.subr.bf16.mxu1 %v14210_v24  ;;  %v14304_v23 = vcombine.high %v660_v16, %v668_v18  ;;  %v14306_v24 = vcombine.high %v661_v19, %v669_v51  ;;  %v748_v8 = vld [vmem:[%s16694_s28 + $0xa60] sm:$0xff]  ;;  %v749_v10 = vld [vmem:[%s16694_s28 + $0xa68] sm:$0xff] }
 0x44d   : > { %12447 = vmatpush1.bf16.msra.mxu0 %v14207_v31  ;;  %12734 = vmatpush1.bf16.msra.mxu1 %v14209_v33  ;;  %v14303_v31 = vcombine.low %v660_v16, %v668_v18  ;;  %v14305_v33 = vcombine.low %v661_v19, %v669_v51  ;;  %v756_v16 = vld [vmem:[%s16694_s28 + $0xaa0] sm:$0xff]  ;;  %v757_v19 = vld [vmem:[%s16694_s28 + $0xaa8] sm:$0xff] }
 0x44e   : > { %12448 = vmatprep.subr.bf16.mxu0 %v14224_v34  ;;  %12735 = vmatprep.subr.bf16.mxu1 %v14226_v35  ;;  %v14320_v34 = vcombine.high %v676_v27, %v684_v28  ;;  %v14322_v35 = vcombine.high %v677_v29, %v685_v30  ;;  %v764_v18 = vld [vmem:[%s16694_s28 + $0xae0] sm:$0xff]  ;;  %v765_v51 = vld [vmem:[%s16694_s28 + $0xae8] sm:$0xff] }
 0x451   : > { %12449 = vmatpush1.bf16.msra.mxu0 %v14223_v43  ;;  %12736 = vmatpush1.bf16.msra.mxu1 %v14225_v44  ;;  %v14319_v43 = vcombine.low %v676_v27, %v684_v28  ;;  %v14321_v44 = vcombine.low %v677_v29, %v685_v30  ;;  %v772_v27 = vld [vmem:[%s16694_s28 + $0xb20] sm:$0xff]  ;;  %v773_v29 = vld [vmem:[%s16694_s28 + $0xb28] sm:$0xff] }
 0x452   : > { %12450 = vmatprep.subr.bf16.mxu0 %v14240_v45  ;;  %12737 = vmatprep.subr.bf16.mxu1 %v14242_v48  ;;  %v14336_v45 = vcombine.high %v692_v37, %v700_v38  ;;  %v14338_v48 = vcombine.high %v693_v40, %v701_v42  ;;  %v780_v28 = vld [vmem:[%s16694_s28 + $0xb60] sm:$0xff]  ;;  %v781_v30 = vld [vmem:[%s16694_s28 + $0xb68] sm:$0xff] }
 0x455   : > { %12451 = vmatpush1.bf16.msra.mxu0 %v14239_v55  ;;  %12738 = vmatpush1.bf16.msra.mxu1 %v14241_v56  ;;  %v14335_v55 = vcombine.low %v692_v37, %v700_v38  ;;  %v14337_v56 = vcombine.low %v693_v40, %v701_v42  ;;  %v788_v37 = vld [vmem:[%s16694_s28 + $0xba0] sm:$0xff]  ;;  %v789_v40 = vld [vmem:[%s16694_s28 + $0xba8] sm:$0xff] }
 0x456   : > { %12452 = vmatprep.subr.bf16.mxu0 %v14256_v17  ;;  %12739 = vmatprep.subr.bf16.mxu1 %v14258_v58  ;;  %v14352_v17 = vcombine.high %v708_v49, %v716_v50  ;;  %v14354_v58 = vcombine.high %v709_v60, %v717_v54  ;;  %v796_v38 = vld [vmem:[%s16694_s28 + $0xbe0] sm:$0xff]  ;;  %v797_v42 = vld [vmem:[%s16694_s28 + $0xbe8] sm:$0xff] }
 0x459   : > { %12453 = vmatpush1.bf16.msra.mxu0 %v14255_v3  ;;  %12740 = vmatpush1.bf16.msra.mxu1 %v14257_v53  ;;  %v14351_v3 = vcombine.low %v708_v49, %v716_v50  ;;  %v14353_v53 = vcombine.low %v709_v60, %v717_v54  ;;  %v804_v49 = vld [vmem:[%s16694_s28 + $0xc20] sm:$0xff]  ;;  %v805_v60 = vld [vmem:[%s16694_s28 + $0xc28] sm:$0xff] }
 0x45a   : > { %12454 = vmatprep.subr.bf16.mxu0 %v14272_v5  ;;  %12741 = vmatprep.subr.bf16.mxu1 %v14274_v4  ;;  %v14368_v5 = vcombine.high %v724_v62, %v732_v0  ;;  %v14370_v4 = vcombine.high %v725_v1, %v733_v2  ;;  %v812_v50 = vld [vmem:[%s16694_s28 + $0xc60] sm:$0xff]  ;;  %v813_v54 = vld [vmem:[%s16694_s28 + $0xc68] sm:$0xff] }
 0x45d   : > { %12455 = vmatpush1.bf16.msra.mxu0 %v14271_v12  ;;  %12742 = vmatpush1.bf16.msra.mxu1 %v14273_v32  ;;  %v14367_v12 = vcombine.low %v724_v62, %v732_v0  ;;  %v14369_v32 = vcombine.low %v725_v1, %v733_v2  ;;  %v820_v62 = vld [vmem:[%s16694_s28 + $0xca0] sm:$0xff]  ;;  %v821_v1 = vld [vmem:[%s16694_s28 + $0xca8] sm:$0xff] }
 0x45e   : > { %12456 = vmatprep.subr.bf16.mxu0 %v14288_v13  ;;  %12743 = vmatprep.subr.bf16.mxu1 %v14290_v14  ;;  %v14384_v13 = vcombine.high %v740_v6, %v748_v8  ;;  %v14386_v14 = vcombine.high %v741_v9, %v749_v10  ;;  %v828_v0 = vld [vmem:[%s16694_s28 + $0xce0] sm:$0xff]  ;;  %v829_v2 = vld [vmem:[%s16694_s28 + $0xce8] sm:$0xff] }
 0x461   : > { %12457 = vmatpush1.bf16.msra.mxu0 %v14287_v21  ;;  %12744 = vmatpush1.bf16.msra.mxu1 %v14289_v22  ;;  %v14383_v21 = vcombine.low %v740_v6, %v748_v8  ;;  %v14385_v22 = vcombine.low %v741_v9, %v749_v10  ;;  %v836_v6 = vld [vmem:[%s16694_s28 + $0xd20] sm:$0xff]  ;;  %v837_v9 = vld [vmem:[%s16694_s28 + $0xd28] sm:$0xff] }
 0x462   : > { %12458 = vmatprep.subr.bf16.mxu0 %v14304_v23  ;;  %12745 = vmatprep.subr.bf16.mxu1 %v14306_v24  ;;  %v14400_v23 = vcombine.high %v756_v16, %v764_v18  ;;  %v14402_v24 = vcombine.high %v757_v19, %v765_v51  ;;  %v844_v8 = vld [vmem:[%s16694_s28 + $0xd60] sm:$0xff]  ;;  %v845_v10 = vld [vmem:[%s16694_s28 + $0xd68] sm:$0xff] }
 0x465   : > { %12459 = vmatpush1.bf16.msra.mxu0 %v14303_v31  ;;  %12746 = vmatpush1.bf16.msra.mxu1 %v14305_v33  ;;  %v14399_v31 = vcombine.low %v756_v16, %v764_v18  ;;  %v14401_v33 = vcombine.low %v757_v19, %v765_v51  ;;  %v852_v16 = vld [vmem:[%s16694_s28 + $0xda0] sm:$0xff]  ;;  %v853_v19 = vld [vmem:[%s16694_s28 + $0xda8] sm:$0xff] }
 0x466   : > { %12469 = vmatprep.subr.bf16.mxu0 %v14320_v34  ;;  %12756 = vmatprep.subr.bf16.mxu1 %v14322_v35  ;;  %v14416_v34 = vcombine.high %v772_v27, %v780_v28  ;;  %v14418_v35 = vcombine.high %v773_v29, %v781_v30  ;;  %v860_v18 = vld [vmem:[%s16694_s28 + $0xde0] sm:$0xff]  ;;  %v861_v51 = vld [vmem:[%s16694_s28 + $0xde8] sm:$0xff] }
 0x468   : > { %12461 = vmatmul.mubr.bf16.vlgmr.msra.gmra.mrb[8].mxu0 %v16804_v11  ;;  %12748 = vmatmul.mubr.bf16.vlgmr.msra.gmra.mrb[8].mxu1 %v16804_v11 }
 0x469   : > { %12470 = vmatpush1.bf16.msra.mxu0 %v14319_v43  ;;  %12757 = vmatpush1.bf16.msra.mxu1 %v14321_v44  ;;  %v14415_v43 = vcombine.low %v772_v27, %v780_v28  ;;  %v14417_v44 = vcombine.low %v773_v29, %v781_v30  ;;  %v868_v27 = vld [vmem:[%s16694_s28 + $0xe20] sm:$0xff]  ;;  %v869_v29 = vld [vmem:[%s16694_s28 + $0xe28] sm:$0xff] }
 0x46a   : > { %12471 = vmatprep.subr.bf16.mxu0 %v14336_v45  ;;  %12758 = vmatprep.subr.bf16.mxu1 %v14338_v48  ;;  %v14432_v45 = vcombine.high %v788_v37, %v796_v38  ;;  %v14434_v48 = vcombine.high %v789_v40, %v797_v42  ;;  %v876_v28 = vld [vmem:[%s16694_s28 + $0xe60] sm:$0xff]  ;;  %v877_v30 = vld [vmem:[%s16694_s28 + $0xe68] sm:$0xff] }
 0x46b   : > { %12501 = vmatprep.mubr.bf16.mxu0 %v16812_v20  ;;  %12788 = vmatprep.mubr.bf16.mxu1 %v16812_v20 }
 0x46d   : > { %12472 = vmatpush1.bf16.msra.mxu0 %v14335_v55  ;;  %12759 = vmatpush1.bf16.msra.mxu1 %v14337_v56  ;;  %v14431_v55 = vcombine.low %v788_v37, %v796_v38  ;;  %v14433_v56 = vcombine.low %v789_v40, %v797_v42  ;;  %v884_v37 = vld [vmem:[%s16694_s28 + $0xea0] sm:$0xff]  ;;  %v885_v40 = vld [vmem:[%s16694_s28 + $0xea8] sm:$0xff] }
 0x46e   : > { %12473 = vmatprep.subr.bf16.mxu0 %v14352_v17  ;;  %12760 = vmatprep.subr.bf16.mxu1 %v14354_v58  ;;  %v14448_v17 = vcombine.high %v804_v49, %v812_v50  ;;  %v14450_v58 = vcombine.high %v805_v60, %v813_v54  ;;  %v892_v38 = vld [vmem:[%s16694_s28 + $0xee0] sm:$0xff]  ;;  %v893_v42 = vld [vmem:[%s16694_s28 + $0xee8] sm:$0xff] }
 0x471   : > { %12474 = vmatpush1.bf16.msra.mxu0 %v14351_v3  ;;  %12761 = vmatpush1.bf16.msra.mxu1 %v14353_v53  ;;  %v14447_v3 = vcombine.low %v804_v49, %v812_v50  ;;  %v14449_v53 = vcombine.low %v805_v60, %v813_v54  ;;  %v900_v49 = vld [vmem:[%s16694_s28 + $0xf20] sm:$0xff]  ;;  %v901_v60 = vld [vmem:[%s16694_s28 + $0xf28] sm:$0xff] }
 0x472   : > { %12475 = vmatprep.subr.bf16.mxu0 %v14368_v5  ;;  %12762 = vmatprep.subr.bf16.mxu1 %v14370_v4  ;;  %v14464_v5 = vcombine.high %v820_v62, %v828_v0  ;;  %v14466_v4 = vcombine.high %v821_v1, %v829_v2  ;;  %v908_v50 = vld [vmem:[%s16694_s28 + $0xf60] sm:$0xff]  ;;  %v909_v54 = vld [vmem:[%s16694_s28 + $0xf68] sm:$0xff] }
 0x475   : > { %12476 = vmatpush1.bf16.msra.mxu0 %v14367_v12  ;;  %12763 = vmatpush1.bf16.msra.mxu1 %v14369_v32  ;;  %v14463_v12 = vcombine.low %v820_v62, %v828_v0  ;;  %v14465_v32 = vcombine.low %v821_v1, %v829_v2  ;;  %v916_v62 = vld [vmem:[%s16694_s28 + $0xfa0] sm:$0xff]  ;;  %v917_v1 = vld [vmem:[%s16694_s28 + $0xfa8] sm:$0xff] }
 0x476   : > { %12477 = vmatprep.subr.bf16.mxu0 %v14384_v13  ;;  %12764 = vmatprep.subr.bf16.mxu1 %v14386_v14  ;;  %v14480_v13 = vcombine.high %v836_v6, %v844_v8  ;;  %v14482_v14 = vcombine.high %v837_v9, %v845_v10  ;;  %v924_v0 = vld [vmem:[%s16694_s28 + $0xfe0] sm:$0xff]  ;;  %v925_v2 = vld [vmem:[%s16694_s28 + $0xfe8] sm:$0xff] }
 0x479   : > { %12478 = vmatpush1.bf16.msra.mxu0 %v14383_v21  ;;  %12765 = vmatpush1.bf16.msra.mxu1 %v14385_v22  ;;  %v14479_v21 = vcombine.low %v836_v6, %v844_v8  ;;  %v14481_v22 = vcombine.low %v837_v9, %v845_v10  ;;  %v932_v6 = vld [vmem:[%s16694_s28 + $0x1020] sm:$0xff]  ;;  %v933_v9 = vld [vmem:[%s16694_s28 + $0x1028] sm:$0xff] }
 0x47a   : > { %12479 = vmatprep.subr.bf16.mxu0 %v14400_v23  ;;  %12766 = vmatprep.subr.bf16.mxu1 %v14402_v24  ;;  %v14496_v23 = vcombine.high %v852_v16, %v860_v18  ;;  %v14498_v24 = vcombine.high %v853_v19, %v861_v51  ;;  %v940_v8 = vld [vmem:[%s16694_s28 + $0x1060] sm:$0xff]  ;;  %v941_v10 = vld [vmem:[%s16694_s28 + $0x1068] sm:$0xff] }
 0x47d   : > { %12480 = vmatpush1.bf16.msra.mxu0 %v14399_v31  ;;  %12767 = vmatpush1.bf16.msra.mxu1 %v14401_v33  ;;  %v14495_v31 = vcombine.low %v852_v16, %v860_v18  ;;  %v14497_v33 = vcombine.low %v853_v19, %v861_v51  ;;  %v948_v16 = vld [vmem:[%s16694_s28 + $0x10a0] sm:$0xff]  ;;  %v949_v19 = vld [vmem:[%s16694_s28 + $0x10a8] sm:$0xff] }
 0x47e   : > { %12481 = vmatprep.subr.bf16.mxu0 %v14416_v34  ;;  %12768 = vmatprep.subr.bf16.mxu1 %v14418_v35  ;;  %v14512_v34 = vcombine.high %v868_v27, %v876_v28  ;;  %v14514_v35 = vcombine.high %v869_v29, %v877_v30  ;;  %v956_v18 = vld [vmem:[%s16694_s28 + $0x10e0] sm:$0xff]  ;;  %v957_v51 = vld [vmem:[%s16694_s28 + $0x10e8] sm:$0xff] }
 0x481   : > { %12482 = vmatpush1.bf16.msra.mxu0 %v14415_v43  ;;  %12769 = vmatpush1.bf16.msra.mxu1 %v14417_v44  ;;  %v14511_v43 = vcombine.low %v868_v27, %v876_v28  ;;  %v14513_v44 = vcombine.low %v869_v29, %v877_v30  ;;  %v964_v27 = vld [vmem:[%s16694_s28 + $0x1120] sm:$0xff]  ;;  %v965_v29 = vld [vmem:[%s16694_s28 + $0x1128] sm:$0xff] }
 0x482   : > { %12483 = vmatprep.subr.bf16.mxu0 %v14432_v45  ;;  %12770 = vmatprep.subr.bf16.mxu1 %v14434_v48  ;;  %v14528_v45 = vcombine.high %v884_v37, %v892_v38  ;;  %v14530_v48 = vcombine.high %v885_v40, %v893_v42  ;;  %v972_v28 = vld [vmem:[%s16694_s28 + $0x1160] sm:$0xff]  ;;  %v973_v30 = vld [vmem:[%s16694_s28 + $0x1168] sm:$0xff] }
 0x485   : > { %12484 = vmatpush1.bf16.msra.mxu0 %v14431_v55  ;;  %12771 = vmatpush1.bf16.msra.mxu1 %v14433_v56  ;;  %v14527_v55 = vcombine.low %v884_v37, %v892_v38  ;;  %v14529_v56 = vcombine.low %v885_v40, %v893_v42  ;;  %v980_v37 = vld [vmem:[%s16694_s28 + $0x11a0] sm:$0xff]  ;;  %v981_v40 = vld [vmem:[%s16694_s28 + $0x11a8] sm:$0xff] }
 0x486   : > { %12485 = vmatprep.subr.bf16.mxu0 %v14448_v17  ;;  %12772 = vmatprep.subr.bf16.mxu1 %v14450_v58  ;;  %v14544_v17 = vcombine.high %v900_v49, %v908_v50  ;;  %v14546_v58 = vcombine.high %v901_v60, %v909_v54  ;;  %v988_v38 = vld [vmem:[%s16694_s28 + $0x11e0] sm:$0xff]  ;;  %v989_v42 = vld [vmem:[%s16694_s28 + $0x11e8] sm:$0xff] }
 0x489   : > { %12486 = vmatpush1.bf16.msra.mxu0 %v14447_v3  ;;  %12773 = vmatpush1.bf16.msra.mxu1 %v14449_v53  ;;  %v14543_v3 = vcombine.low %v900_v49, %v908_v50  ;;  %v14545_v53 = vcombine.low %v901_v60, %v909_v54  ;;  %v996_v49 = vld [vmem:[%s16694_s28 + $0x1220] sm:$0xff]  ;;  %v997_v60 = vld [vmem:[%s16694_s28 + $0x1228] sm:$0xff] }
 0x48a   : > { %12487 = vmatprep.subr.bf16.mxu0 %v14464_v5  ;;  %12774 = vmatprep.subr.bf16.mxu1 %v14466_v4  ;;  %v14560_v5 = vcombine.high %v916_v62, %v924_v0  ;;  %v14562_v4 = vcombine.high %v917_v1, %v925_v2  ;;  %v1004_v50 = vld [vmem:[%s16694_s28 + $0x1260] sm:$0xff]  ;;  %v1005_v54 = vld [vmem:[%s16694_s28 + $0x1268] sm:$0xff] }
 0x48d   : > { %12488 = vmatpush1.bf16.msra.mxu0 %v14463_v12  ;;  %12775 = vmatpush1.bf16.msra.mxu1 %v14465_v32  ;;  %v14559_v12 = vcombine.low %v916_v62, %v924_v0  ;;  %v14561_v32 = vcombine.low %v917_v1, %v925_v2  ;;  %v1012_v62 = vld [vmem:[%s16694_s28 + $0x12a0] sm:$0xff]  ;;  %v1013_v1 = vld [vmem:[%s16694_s28 + $0x12a8] sm:$0xff] }
 0x48e   : > { %12489 = vmatprep.subr.bf16.mxu0 %v14480_v13  ;;  %12776 = vmatprep.subr.bf16.mxu1 %v14482_v14  ;;  %v14576_v13 = vcombine.high %v932_v6, %v940_v8  ;;  %v14578_v14 = vcombine.high %v933_v9, %v941_v10  ;;  %v1020_v0 = vld [vmem:[%s16694_s28 + $0x12e0] sm:$0xff]  ;;  %v1021_v2 = vld [vmem:[%s16694_s28 + $0x12e8] sm:$0xff] }
 0x491   : > { %12490 = vmatpush1.bf16.msra.mxu0 %v14479_v21  ;;  %12777 = vmatpush1.bf16.msra.mxu1 %v14481_v22  ;;  %v14575_v21 = vcombine.low %v932_v6, %v940_v8  ;;  %v14577_v22 = vcombine.low %v933_v9, %v941_v10  ;;  %v1028_v6 = vld [vmem:[%s16694_s28 + $0x1320] sm:$0xff]  ;;  %v1029_v9 = vld [vmem:[%s16694_s28 + $0x1328] sm:$0xff] }
 0x492   : > { %12491 = vmatprep.subr.bf16.mxu0 %v14496_v23  ;;  %12778 = vmatprep.subr.bf16.mxu1 %v14498_v24  ;;  %v14592_v23 = vcombine.high %v948_v16, %v956_v18  ;;  %v14594_v24 = vcombine.high %v949_v19, %v957_v51  ;;  %v1036_v8 = vld [vmem:[%s16694_s28 + $0x1360] sm:$0xff]  ;;  %v1037_v10 = vld [vmem:[%s16694_s28 + $0x1368] sm:$0xff] }
 0x495   : > { %12492 = vmatpush1.bf16.msra.mxu0 %v14495_v31  ;;  %12779 = vmatpush1.bf16.msra.mxu1 %v14497_v33  ;;  %v14591_v31 = vcombine.low %v948_v16, %v956_v18  ;;  %v14593_v33 = vcombine.low %v949_v19, %v957_v51  ;;  %v1044_v16 = vld [vmem:[%s16694_s28 + $0x13a0] sm:$0xff]  ;;  %v1045_v19 = vld [vmem:[%s16694_s28 + $0x13a8] sm:$0xff] }
 0x496   : > { %12493 = vmatprep.subr.bf16.mxu0 %v14512_v34  ;;  %12780 = vmatprep.subr.bf16.mxu1 %v14514_v35  ;;  %v14608_v34 = vcombine.high %v964_v27, %v972_v28  ;;  %v14610_v35 = vcombine.high %v965_v29, %v973_v30  ;;  %v1052_v18 = vld [vmem:[%s16694_s28 + $0x13e0] sm:$0xff]  ;;  %v1053_v51 = vld [vmem:[%s16694_s28 + $0x13e8] sm:$0xff] }
 0x499   : > { %12494 = vmatpush1.bf16.msra.mxu0 %v14511_v43  ;;  %12781 = vmatpush1.bf16.msra.mxu1 %v14513_v44  ;;  %v14607_v43 = vcombine.low %v964_v27, %v972_v28  ;;  %v14609_v44 = vcombine.low %v965_v29, %v973_v30  ;;  %v1060_v27 = vld [vmem:[%s16694_s28 + $0x1420] sm:$0xff]  ;;  %v1061_v29 = vld [vmem:[%s16694_s28 + $0x1428] sm:$0xff] }
 0x49a   : > { %12495 = vmatprep.subr.bf16.mxu0 %v14528_v45  ;;  %12782 = vmatprep.subr.bf16.mxu1 %v14530_v48  ;;  %v14624_v45 = vcombine.high %v980_v37, %v988_v38  ;;  %v14626_v48 = vcombine.high %v981_v40, %v989_v42  ;;  %v1068_v28 = vld [vmem:[%s16694_s28 + $0x1460] sm:$0xff]  ;;  %v1069_v30 = vld [vmem:[%s16694_s28 + $0x1468] sm:$0xff] }
 0x49d   : > { %12496 = vmatpush1.bf16.msra.mxu0 %v14527_v55  ;;  %12783 = vmatpush1.bf16.msra.mxu1 %v14529_v56  ;;  %v14623_v55 = vcombine.low %v980_v37, %v988_v38  ;;  %v14625_v56 = vcombine.low %v981_v40, %v989_v42  ;;  %v1076_v37 = vld [vmem:[%s16694_s28 + $0x14a0] sm:$0xff]  ;;  %v1077_v40 = vld [vmem:[%s16694_s28 + $0x14a8] sm:$0xff] }
 0x49e   : > { %12497 = vmatprep.subr.bf16.mxu0 %v14544_v17  ;;  %12784 = vmatprep.subr.bf16.mxu1 %v14546_v58  ;;  %v14640_v17 = vcombine.high %v996_v49, %v1004_v50  ;;  %v14642_v58 = vcombine.high %v997_v60, %v1005_v54  ;;  %v1084_v38 = vld [vmem:[%s16694_s28 + $0x14e0] sm:$0xff]  ;;  %v1085_v42 = vld [vmem:[%s16694_s28 + $0x14e8] sm:$0xff] }
 0x4a1   : > { %12498 = vmatpush1.bf16.msra.mxu0 %v14543_v3  ;;  %12785 = vmatpush1.bf16.msra.mxu1 %v14545_v53  ;;  %v14639_v3 = vcombine.low %v996_v49, %v1004_v50  ;;  %v14641_v53 = vcombine.low %v997_v60, %v1005_v54  ;;  %v1092_v49 = vld [vmem:[%s16694_s28 + $0x1520] sm:$0xff]  ;;  %v1093_v60 = vld [vmem:[%s16694_s28 + $0x1528] sm:$0xff] }
 0x4a2   : > { %12499 = vmatprep.subr.bf16.mxu0 %v14560_v5  ;;  %12786 = vmatprep.subr.bf16.mxu1 %v14562_v4  ;;  %v14656_v5 = vcombine.high %v1012_v62, %v1020_v0  ;;  %v14658_v4 = vcombine.high %v1013_v1, %v1021_v2  ;;  %v1100_v50 = vld [vmem:[%s16694_s28 + $0x1560] sm:$0xff]  ;;  %v1101_v54 = vld [vmem:[%s16694_s28 + $0x1568] sm:$0xff] }
 0x4a5   : > { %12500 = vmatpush1.bf16.msra.mxu0 %v14559_v12  ;;  %12787 = vmatpush1.bf16.msra.mxu1 %v14561_v32  ;;  %v14655_v12 = vcombine.low %v1012_v62, %v1020_v0  ;;  %v14657_v32 = vcombine.low %v1013_v1, %v1021_v2  ;;  %v1108_v62 = vld [vmem:[%s16694_s28 + $0x15a0] sm:$0xff]  ;;  %v1109_v1 = vld [vmem:[%s16694_s28 + $0x15a8] sm:$0xff] }
 0x4a6   : > { %12510 = vmatprep.subr.bf16.mxu0 %v14576_v13  ;;  %12797 = vmatprep.subr.bf16.mxu1 %v14578_v14  ;;  %v14672_v13 = vcombine.high %v1028_v6, %v1036_v8  ;;  %v14674_v14 = vcombine.high %v1029_v9, %v1037_v10  ;;  %v1116_v0 = vld [vmem:[%s16694_s28 + $0x15e0] sm:$0xff]  ;;  %v1117_v2 = vld [vmem:[%s16694_s28 + $0x15e8] sm:$0xff] }
 0x4a8   : > { %12502 = vmatmul.mubr.bf16.vlgmr.msra.gmra.mrb[8].mxu0 %v16887_v26  ;;  %12789 = vmatmul.mubr.bf16.vlgmr.msra.gmra.mrb[8].mxu1 %v16887_v26 }
 0x4a9   : > { %12511 = vmatpush1.bf16.msra.mxu0 %v14575_v21  ;;  %12798 = vmatpush1.bf16.msra.mxu1 %v14577_v22  ;;  %v14671_v21 = vcombine.low %v1028_v6, %v1036_v8  ;;  %v14673_v22 = vcombine.low %v1029_v9, %v1037_v10  ;;  %v1124_v6 = vld [vmem:[%s16694_s28 + $0x1620] sm:$0xff]  ;;  %v1125_v9 = vld [vmem:[%s16694_s28 + $0x1628] sm:$0xff] }
 0x4aa   : > { %12512 = vmatprep.subr.bf16.mxu0 %v14592_v23  ;;  %12799 = vmatprep.subr.bf16.mxu1 %v14594_v24  ;;  %v14688_v23 = vcombine.high %v1044_v16, %v1052_v18  ;;  %v14690_v24 = vcombine.high %v1045_v19, %v1053_v51  ;;  %v1132_v8 = vld [vmem:[%s16694_s28 + $0x1660] sm:$0xff]  ;;  %v1133_v10 = vld [vmem:[%s16694_s28 + $0x1668] sm:$0xff] }
 0x4ab   : > { %12542 = vmatprep.mubr.bf16.mxu0 %v16894_v36  ;;  %12829 = vmatprep.mubr.bf16.mxu1 %v16894_v36 }
 0x4ad   : > { %12513 = vmatpush1.bf16.msra.mxu0 %v14591_v31  ;;  %12800 = vmatpush1.bf16.msra.mxu1 %v14593_v33  ;;  %v14687_v31 = vcombine.low %v1044_v16, %v1052_v18  ;;  %v14689_v33 = vcombine.low %v1045_v19, %v1053_v51  ;;  %v1140_v16 = vld [vmem:[%s16694_s28 + $0x16a0] sm:$0xff]  ;;  %v1141_v19 = vld [vmem:[%s16694_s28 + $0x16a8] sm:$0xff] }
 0x4ae   : > { %12514 = vmatprep.subr.bf16.mxu0 %v14608_v34  ;;  %12801 = vmatprep.subr.bf16.mxu1 %v14610_v35  ;;  %v14704_v34 = vcombine.high %v1060_v27, %v1068_v28  ;;  %v14706_v35 = vcombine.high %v1061_v29, %v1069_v30  ;;  %v1148_v18 = vld [vmem:[%s16694_s28 + $0x16e0] sm:$0xff]  ;;  %v1149_v51 = vld [vmem:[%s16694_s28 + $0x16e8] sm:$0xff] }
 0x4b1   : > { %12515 = vmatpush1.bf16.msra.mxu0 %v14607_v43  ;;  %12802 = vmatpush1.bf16.msra.mxu1 %v14609_v44  ;;  %v14703_v43 = vcombine.low %v1060_v27, %v1068_v28  ;;  %v14705_v44 = vcombine.low %v1061_v29, %v1069_v30  ;;  %v1156_v27 = vld [vmem:[%s16694_s28 + $0x1720] sm:$0xff]  ;;  %v1157_v29 = vld [vmem:[%s16694_s28 + $0x1728] sm:$0xff] }
 0x4b2   : > { %12516 = vmatprep.subr.bf16.mxu0 %v14624_v45  ;;  %12803 = vmatprep.subr.bf16.mxu1 %v14626_v48  ;;  %v14720_v45 = vcombine.high %v1076_v37, %v1084_v38  ;;  %v14722_v48 = vcombine.high %v1077_v40, %v1085_v42  ;;  %v1164_v28 = vld [vmem:[%s16694_s28 + $0x1760] sm:$0xff]  ;;  %v1165_v30 = vld [vmem:[%s16694_s28 + $0x1768] sm:$0xff] }
 0x4b5   : > { %12517 = vmatpush1.bf16.msra.mxu0 %v14623_v55  ;;  %12804 = vmatpush1.bf16.msra.mxu1 %v14625_v56  ;;  %v14719_v55 = vcombine.low %v1076_v37, %v1084_v38  ;;  %v14721_v56 = vcombine.low %v1077_v40, %v1085_v42  ;;  %v1172_v37 = vld [vmem:[%s16694_s28 + $0x17a0] sm:$0xff]  ;;  %v1173_v40 = vld [vmem:[%s16694_s28 + $0x17a8] sm:$0xff] }
 0x4b6   : > { %12518 = vmatprep.subr.bf16.mxu0 %v14640_v17  ;;  %12805 = vmatprep.subr.bf16.mxu1 %v14642_v58  ;;  %v14736_v17 = vcombine.high %v1092_v49, %v1100_v50  ;;  %v14738_v58 = vcombine.high %v1093_v60, %v1101_v54  ;;  %v1180_v38 = vld [vmem:[%s16694_s28 + $0x17e0] sm:$0xff]  ;;  %v1181_v42 = vld [vmem:[%s16694_s28 + $0x17e8] sm:$0xff] }
 0x4b9   : > { %12519 = vmatpush1.bf16.msra.mxu0 %v14639_v3  ;;  %12806 = vmatpush1.bf16.msra.mxu1 %v14641_v53  ;;  %v14735_v3 = vcombine.low %v1092_v49, %v1100_v50  ;;  %v14737_v53 = vcombine.low %v1093_v60, %v1101_v54  ;;  %v1188_v49 = vld [vmem:[%s16694_s28 + $0x1820] sm:$0xff]  ;;  %v1189_v60 = vld [vmem:[%s16694_s28 + $0x1828] sm:$0xff] }
 0x4ba   : > { %12520 = vmatprep.subr.bf16.mxu0 %v14656_v5  ;;  %12807 = vmatprep.subr.bf16.mxu1 %v14658_v4  ;;  %v14752_v5 = vcombine.high %v1108_v62, %v1116_v0  ;;  %v14754_v4 = vcombine.high %v1109_v1, %v1117_v2  ;;  %v1196_v50 = vld [vmem:[%s16694_s28 + $0x1860] sm:$0xff]  ;;  %v1197_v54 = vld [vmem:[%s16694_s28 + $0x1868] sm:$0xff] }
 0x4bd   : > { %12521 = vmatpush1.bf16.msra.mxu0 %v14655_v12  ;;  %12808 = vmatpush1.bf16.msra.mxu1 %v14657_v32  ;;  %v14751_v12 = vcombine.low %v1108_v62, %v1116_v0  ;;  %v14753_v32 = vcombine.low %v1109_v1, %v1117_v2  ;;  %v1204_v62 = vld [vmem:[%s16694_s28 + $0x18a0] sm:$0xff]  ;;  %v1205_v1 = vld [vmem:[%s16694_s28 + $0x18a8] sm:$0xff] }
 0x4be   : > { %12522 = vmatprep.subr.bf16.mxu0 %v14672_v13  ;;  %12809 = vmatprep.subr.bf16.mxu1 %v14674_v14  ;;  %v14768_v13 = vcombine.high %v1124_v6, %v1132_v8  ;;  %v14770_v14 = vcombine.high %v1125_v9, %v1133_v10  ;;  %v1212_v0 = vld [vmem:[%s16694_s28 + $0x18e0] sm:$0xff]  ;;  %v1213_v2 = vld [vmem:[%s16694_s28 + $0x18e8] sm:$0xff] }
 0x4c1   : > { %12523 = vmatpush1.bf16.msra.mxu0 %v14671_v21  ;;  %12810 = vmatpush1.bf16.msra.mxu1 %v14673_v22  ;;  %v14767_v21 = vcombine.low %v1124_v6, %v1132_v8  ;;  %v14769_v22 = vcombine.low %v1125_v9, %v1133_v10  ;;  %v1220_v6 = vld [vmem:[%s16694_s28 + $0x1920] sm:$0xff]  ;;  %v1221_v9 = vld [vmem:[%s16694_s28 + $0x1928] sm:$0xff] }
 0x4c2   : > { %12524 = vmatprep.subr.bf16.mxu0 %v14688_v23  ;;  %12811 = vmatprep.subr.bf16.mxu1 %v14690_v24  ;;  %v14784_v23 = vcombine.high %v1140_v16, %v1148_v18  ;;  %v14786_v24 = vcombine.high %v1141_v19, %v1149_v51  ;;  %v1228_v8 = vld [vmem:[%s16694_s28 + $0x1960] sm:$0xff]  ;;  %v1229_v10 = vld [vmem:[%s16694_s28 + $0x1968] sm:$0xff] }
 0x4c5   : > { %12525 = vmatpush1.bf16.msra.mxu0 %v14687_v31  ;;  %12812 = vmatpush1.bf16.msra.mxu1 %v14689_v33  ;;  %v14783_v31 = vcombine.low %v1140_v16, %v1148_v18  ;;  %v14785_v33 = vcombine.low %v1141_v19, %v1149_v51  ;;  %v1236_v16 = vld [vmem:[%s16694_s28 + $0x19a0] sm:$0xff]  ;;  %v1237_v19 = vld [vmem:[%s16694_s28 + $0x19a8] sm:$0xff] }
 0x4c6   : > { %12526 = vmatprep.subr.bf16.mxu0 %v14704_v34  ;;  %12813 = vmatprep.subr.bf16.mxu1 %v14706_v35  ;;  %v14800_v34 = vcombine.high %v1156_v27, %v1164_v28  ;;  %v14802_v35 = vcombine.high %v1157_v29, %v1165_v30  ;;  %v1244_v18 = vld [vmem:[%s16694_s28 + $0x19e0] sm:$0xff]  ;;  %v1245_v51 = vld [vmem:[%s16694_s28 + $0x19e8] sm:$0xff] }
 0x4c9   : > { %12527 = vmatpush1.bf16.msra.mxu0 %v14703_v43  ;;  %12814 = vmatpush1.bf16.msra.mxu1 %v14705_v44  ;;  %v14799_v43 = vcombine.low %v1156_v27, %v1164_v28  ;;  %v14801_v44 = vcombine.low %v1157_v29, %v1165_v30  ;;  %v1252_v27 = vld [vmem:[%s16694_s28 + $0x1a20] sm:$0xff]  ;;  %v1253_v29 = vld [vmem:[%s16694_s28 + $0x1a28] sm:$0xff] }
 0x4ca   : > { %12528 = vmatprep.subr.bf16.mxu0 %v14720_v45  ;;  %12815 = vmatprep.subr.bf16.mxu1 %v14722_v48  ;;  %v14816_v45 = vcombine.high %v1172_v37, %v1180_v38  ;;  %v14818_v48 = vcombine.high %v1173_v40, %v1181_v42  ;;  %v1260_v28 = vld [vmem:[%s16694_s28 + $0x1a60] sm:$0xff]  ;;  %v1261_v30 = vld [vmem:[%s16694_s28 + $0x1a68] sm:$0xff] }
 0x4cd   : > { %12529 = vmatpush1.bf16.msra.mxu0 %v14719_v55  ;;  %12816 = vmatpush1.bf16.msra.mxu1 %v14721_v56  ;;  %v14815_v55 = vcombine.low %v1172_v37, %v1180_v38  ;;  %v14817_v56 = vcombine.low %v1173_v40, %v1181_v42  ;;  %v1268_v37 = vld [vmem:[%s16694_s28 + $0x1aa0] sm:$0xff]  ;;  %v1269_v40 = vld [vmem:[%s16694_s28 + $0x1aa8] sm:$0xff] }
 0x4ce   : > { %12530 = vmatprep.subr.bf16.mxu0 %v14736_v17  ;;  %12817 = vmatprep.subr.bf16.mxu1 %v14738_v58  ;;  %v14832_v17 = vcombine.high %v1188_v49, %v1196_v50  ;;  %v14834_v58 = vcombine.high %v1189_v60, %v1197_v54  ;;  %v1276_v38 = vld [vmem:[%s16694_s28 + $0x1ae0] sm:$0xff]  ;;  %v1277_v42 = vld [vmem:[%s16694_s28 + $0x1ae8] sm:$0xff] }
 0x4d1   : > { %12531 = vmatpush1.bf16.msra.mxu0 %v14735_v3  ;;  %12818 = vmatpush1.bf16.msra.mxu1 %v14737_v53  ;;  %v14831_v3 = vcombine.low %v1188_v49, %v1196_v50  ;;  %v14833_v53 = vcombine.low %v1189_v60, %v1197_v54  ;;  %v1284_v49 = vld [vmem:[%s16694_s28 + $0x1b20] sm:$0xff]  ;;  %v1285_v60 = vld [vmem:[%s16694_s28 + $0x1b28] sm:$0xff] }
 0x4d2   : > { %12532 = vmatprep.subr.bf16.mxu0 %v14752_v5  ;;  %12819 = vmatprep.subr.bf16.mxu1 %v14754_v4  ;;  %v14848_v5 = vcombine.high %v1204_v62, %v1212_v0  ;;  %v14850_v4 = vcombine.high %v1205_v1, %v1213_v2  ;;  %v1292_v50 = vld [vmem:[%s16694_s28 + $0x1b60] sm:$0xff]  ;;  %v1293_v54 = vld [vmem:[%s16694_s28 + $0x1b68] sm:$0xff] }
 0x4d5   : > { %12533 = vmatpush1.bf16.msra.mxu0 %v14751_v12  ;;  %12820 = vmatpush1.bf16.msra.mxu1 %v14753_v32  ;;  %v14847_v12 = vcombine.low %v1204_v62, %v1212_v0  ;;  %v14849_v32 = vcombine.low %v1205_v1, %v1213_v2  ;;  %v14930_v62 = vcombine.high %v1285_v60, %v1293_v54  ;;  %v1300_v0 = vld [vmem:[%s16694_s28 + $0x1ba0] sm:$0xff] }
 0x4d6   : > { %12534 = vmatprep.subr.bf16.mxu0 %v14768_v13  ;;  %12821 = vmatprep.subr.bf16.mxu1 %v14770_v14  ;;  %v14864_v13 = vcombine.high %v1220_v6, %v1228_v8  ;;  %v14866_v14 = vcombine.high %v1221_v9, %v1229_v10  ;;  %v1308_v1 = vld [vmem:[%s16694_s28 + $0x1be0] sm:$0xff] }
 0x4d9   : > { %12535 = vmatpush1.bf16.msra.mxu0 %v14767_v21  ;;  %12822 = vmatpush1.bf16.msra.mxu1 %v14769_v22  ;;  %v14863_v21 = vcombine.low %v1220_v6, %v1228_v8  ;;  %v14865_v22 = vcombine.low %v1221_v9, %v1229_v10  ;;  %v14927_v9 = vcombine.low %v1284_v49, %v1292_v50 }
 0x4da   : > { %12536 = vmatprep.subr.bf16.mxu0 %v14784_v23  ;;  %12823 = vmatprep.subr.bf16.mxu1 %v14786_v24  ;;  %v14880_v23 = vcombine.high %v1236_v16, %v1244_v18  ;;  %v14882_v24 = vcombine.high %v1237_v19, %v1245_v51 }
 0x4dd   : > { %12537 = vmatpush1.bf16.msra.mxu0 %v14783_v31  ;;  %12824 = vmatpush1.bf16.msra.mxu1 %v14785_v33  ;;  %v14879_v31 = vcombine.low %v1236_v16, %v1244_v18  ;;  %v14881_v33 = vcombine.low %v1237_v19, %v1245_v51  ;;  %v1316_v51 = vld [vmem:[%s16694_s28 + $0x1c20] sm:$0xff] }
 0x4de   : > { %12538 = vmatprep.subr.bf16.mxu0 %v14800_v34  ;;  %12825 = vmatprep.subr.bf16.mxu1 %v14802_v35  ;;  %v14896_v34 = vcombine.high %v1252_v27, %v1260_v28  ;;  %v14898_v35 = vcombine.high %v1253_v29, %v1261_v30 }
 0x4e1   : > { %12539 = vmatpush1.bf16.msra.mxu0 %v14799_v43  ;;  %12826 = vmatpush1.bf16.msra.mxu1 %v14801_v44  ;;  %v14895_v43 = vcombine.low %v1252_v27, %v1260_v28  ;;  %v14897_v44 = vcombine.low %v1253_v29, %v1261_v30  ;;  %v409_v27 = vld [vmem:[#allocation2 + $0x8] sm:$0xff]  ;;  %v14943_v28 = vcombine.low %v1300_v0, %v1308_v1 }
 0x4e2   : > { %12540 = vmatprep.subr.bf16.mxu0 %v14816_v45  ;;  %12827 = vmatprep.subr.bf16.mxu1 %v14818_v48  ;;  %v14912_v45 = vcombine.high %v1268_v37, %v1276_v38  ;;  %v14914_v48 = vcombine.high %v1269_v40, %v1277_v42 }
 0x4e5   : > { %12541 = vmatpush1.bf16.msra.mxu0 %v14815_v55  ;;  %12828 = vmatpush1.bf16.msra.mxu1 %v14817_v56  ;;  %v14911_v55 = vcombine.low %v1268_v37, %v1276_v38  ;;  %v14913_v56 = vcombine.low %v1269_v40, %v1277_v42  ;;  %v1333_v38 = vld [vmem:[%s16694_s28 + $0x1ca8] sm:$0xff] }
 0x4e6   : > { %12551 = vmatprep.subr.bf16.mxu0 %v14832_v17  ;;  %12838 = vmatprep.subr.bf16.mxu1 %v14834_v58  ;;  %v14928_v17 = vcombine.high %v1284_v49, %v1292_v50  ;;  %v1341_v40 = vld [vmem:[%s16694_s28 + $0x1ce8] sm:$0xff]  ;;  %v1356_v49 = vld [vmem:[%s16694_s28 + $0x1d60] sm:$0xff] }
 0x4e7   : > { %v1349_v50 = vld [vmem:[%s16694_s28 + $0x1d28] sm:$0xff] }
 0x4e8   : > { %12543 = vmatmul.mubr.bf16.vlgmr.msra.gmra.mrb[8].mxu0 %v16962_v46  ;;  %12830 = vmatmul.mubr.bf16.vlgmr.msra.gmra.mrb[8].mxu1 %v16962_v46 }
 0x4e9   : > { %12552 = vmatpush1.bf16.msra.mxu0 %v14831_v3  ;;  %12839 = vmatpush1.bf16.msra.mxu1 %v14833_v53  ;;  %v1301_v53 = vld [vmem:[%s16694_s28 + $0x1ba8] sm:$0xff] }
 0x4ea   : > { %12553 = vmatprep.subr.bf16.mxu0 %v14848_v5  ;;  %12840 = vmatprep.subr.bf16.mxu1 %v14850_v4  ;;  %v1309_v5 = vld [vmem:[%s16694_s28 + $0x1be8] sm:$0xff] }
 0x4eb   : > { %12583 = vmatprep.mubr.bf16.mxu0 %v16970_v57  ;;  %12870 = vmatprep.mubr.bf16.mxu1 %v16970_v57  ;;  %v14946_v19 = vcombine.high %v1301_v53, %v1309_v5  ;;  %v14945_v30 = vcombine.low %v1301_v53, %v1309_v5 }
 0x4ed   : > { %12554 = vmatpush1.bf16.msra.mxu0 %v14847_v12  ;;  %12841 = vmatpush1.bf16.msra.mxu1 %v14849_v32 }
 0x4ee   : > { %12555 = vmatprep.subr.bf16.mxu0 %v14864_v13  ;;  %12842 = vmatprep.subr.bf16.mxu1 %v14866_v14  ;;  %v14929_v13 = vcombine.low %v1285_v60, %v1293_v54  ;;  %v14944_v14 = vcombine.high %v1300_v0, %v1308_v1  ;;  %v1357_v60 = vld [vmem:[%s16694_s28 + $0x1d68] sm:$0xff] }
 0x4ef   : > { %v1365_v0 = vld [vmem:[%s16694_s28 + $0x1da8] sm:$0xff] }
 0x4f0   : > { %v1373_v1 = vld [vmem:[%s16694_s28 + $0x1de8] sm:$0xff] }
 0x4f1   : > { %12556 = vmatpush1.bf16.msra.mxu0 %v14863_v21  ;;  %12843 = vmatpush1.bf16.msra.mxu1 %v14865_v22  ;;  %v1324_v21 = vld [vmem:[%s16694_s28 + $0x1c60] sm:$0xff]  ;;  %v15010_v5 = vcombine.high %v1365_v0, %v1373_v1 }
 0x4f2   : > { %12557 = vmatprep.subr.bf16.mxu0 %v14880_v23  ;;  %12844 = vmatprep.subr.bf16.mxu1 %v14882_v24  ;;  %v1317_v23 = vld [vmem:[%s16694_s28 + $0x1c28] sm:$0xff]  ;;  %v14959_v42 = vcombine.low %v1316_v51, %v1324_v21 }
 0x4f3   : > { %v1325_v24 = vld [vmem:[%s16694_s28 + $0x1c68] sm:$0xff] }
 0x4f5   : > { %12558 = vmatpush1.bf16.msra.mxu0 %v14879_v31  ;;  %12845 = vmatpush1.bf16.msra.mxu1 %v14881_v33  ;;  %v14960_v31 = vcombine.high %v1316_v51, %v1324_v21  ;;  %v14962_v33 = vcombine.high %v1317_v23, %v1325_v24 }
 0x4f6   : > { %12559 = vmatprep.subr.bf16.mxu0 %v14896_v34  ;;  %12846 = vmatprep.subr.bf16.mxu1 %v14898_v35  ;;  %v1332_v34 = vld [vmem:[%s16694_s28 + $0x1ca0] sm:$0xff] }
 0x4f7   : > { %v1340_v35 = vld [vmem:[%s16694_s28 + $0x1ce0] sm:$0xff] }
 0x4f8   : > { %v14975_v54 = vcombine.low %v1332_v34, %v1340_v35 }
 0x4f9   : > { %12560 = vmatpush1.bf16.msra.mxu0 %v14895_v43  ;;  %12847 = vmatpush1.bf16.msra.mxu1 %v14897_v44  ;;  %v14961_v43 = vcombine.low %v1317_v23, %v1325_v24  ;;  %v14976_v44 = vcombine.high %v1332_v34, %v1340_v35  ;;  %v1412_v24 = vld [vmem:[%s16694_s28 + $0x1f20] sm:$0xff] }
 0x4fa   : > { %12561 = vmatprep.subr.bf16.mxu0 %v14912_v45  ;;  %12848 = vmatprep.subr.bf16.mxu1 %v14914_v48  ;;  %v14978_v45 = vcombine.high %v1333_v38, %v1341_v40  ;;  %v1348_v48 = vld [vmem:[%s16694_s28 + $0x1d20] sm:$0xff] }
 0x4fb   : > { %v12134_v58 = vpop.f32.mrb[4].mxu0  ;;  %v12421_v2 = vpop.f32.mrb[4].mxu1  ;;  %v1428_v35 = vld [vmem:[%s16694_s28 + $0x1fa0] sm:$0xff] }
 0x4fc   : > { %v12136_v3 = vpop.f32.mrb[5].mxu0  ;;  %v12423_v6 = vpop.f32.mrb[5].mxu1 }
 0x4fd   : > { %v13609_v4 = vcombine.low %v12134_v58, %v12136_v3  ;;  %v12138_v8 = vpop.f32.mrb[6].mxu0  ;;  %12562 = vmatpush1.bf16.msra.mxu0 %v14911_v55  ;;  %v13610_v10 = vcombine.low %v12421_v2, %v12423_v6  ;;  %v12425_v12 = vpop.f32.mrb[6].mxu1  ;;  %12849 = vmatpush1.bf16.msra.mxu1 %v14913_v56  ;;  %v14977_v55 = vcombine.low %v1333_v38, %v1341_v40  ;;  %v1364_v58 = vld [vmem:[%s16694_s28 + $0x1da0] sm:$0xff]  ;;  %v1429_v38 = vld [vmem:[%s16694_s28 + $0x1fa8] sm:$0xff] }
 0x4fe   : > { %v12139_v32 = vpop.f32.mrb[7].mxu0  ;;  %12563 = vmatprep.subr.bf16.mxu0 %v14928_v17  ;;  %v12426_v18 = vpop.f32.mrb[7].mxu1  ;;  %12850 = vmatprep.subr.bf16.mxu1 %v14930_v62  ;;  %v14992_v56 = vcombine.high %v1348_v48, %v1356_v49  ;;  %v14994_v17 = vcombine.high %v1349_v50, %v1357_v60  ;;  %v1372_v62 = vld [vmem:[%s16694_s28 + $0x1de0] sm:$0xff]  ;;  %v14991_v2 = vcombine.low %v1348_v48, %v1356_v49  ;;  %v1381_v8 = vld [vmem:[%s16694_s28 + $0x1e28] sm:$0xff] }
 0x4ff   : > { %v13617_v16 = vrot.slane %v13609_v4, %v17513_v63  ;;  %v13624_v22 = vrot.slane %v13610_v10, %v17513_v63  ;;  %v14993_v3 = vcombine.low %v1349_v50, %v1357_v60  ;;  %v15008_v53 = vcombine.high %v1364_v58, %v1372_v62  ;;  %v1380_v4 = vld [vmem:[%s16694_s28 + $0x1e20] sm:$0xff]  ;;  %v1397_v18 = vld [vmem:[%s16694_s28 + $0x1ea8] sm:$0xff] }
 0x500   : > { %v1388_v6 = vld [vmem:[%s16694_s28 + $0x1e60] sm:$0xff]  ;;  %v15007_v10 = vcombine.low %v1364_v58, %v1372_v62  ;;  %v15009_v12 = vcombine.low %v1365_v0, %v1373_v1  ;;  %v1437_v40 = vld [vmem:[%s16694_s28 + $0x1fe8] sm:$0xff] }
 0x501   : > { %12564 = vmatpush1.bf16.msra.mxu0 %v14927_v9  ;;  %v13625_v29 = vcombine.low %v13617_v16, %v13624_v22  ;;  %12851 = vmatpush1.bf16.msra.mxu1 %v14929_v13  ;;  %v1389_v9 = vld [vmem:[%s16694_s28 + $0x1e68] sm:$0xff]  ;;  %v15024_v32 = vcombine.high %v1380_v4, %v1388_v6  ;;  %v1404_v16 = vld [vmem:[%s16694_s28 + $0x1ee0] sm:$0xff]  ;;  %v15023_v51 = vcombine.low %v1380_v4, %v1388_v6 }
 0x502   : > { %12565 = vmatprep.subr.bf16.mxu0 %v14944_v14  ;;  %12852 = vmatprep.subr.bf16.mxu1 %v14946_v19  ;;  %v15026_v13 = vcombine.high %v1381_v8, %v1389_v9  ;;  %v1396_v14 = vld [vmem:[%s16694_s28 + $0x1ea0] sm:$0xff]  ;;  %v1405_v19 = vld [vmem:[%s16694_s28 + $0x1ee8] sm:$0xff]  ;;  %v15025_v21 = vcombine.low %v1381_v8, %v1389_v9 }
 0x503   : > { %v13665_v37 = vadd.f32 %v13625_v29, %v409_v27  ;;  %v15040_v22 = vcombine.high %v1396_v14, %v1404_v16  ;;  %v15042_v23 = vcombine.high %v1397_v18, %v1405_v19  ;;  %v1420_v27 = vld [vmem:[%s16694_s28 + $0x1f60] sm:$0xff]  ;;  %v1421_v29 = vld [vmem:[%s16694_s28 + $0x1f68] sm:$0xff] }
 0x504   : > { %v1444_v48 = vld [vmem:[%s16694_s28 + $0x2020] sm:$0xff]  ;;  %v1445_v50 = vld [vmem:[%s16694_s28 + $0x2028] sm:$0xff] }
 0x505   : > { %12566 = vmatpush1.bf16.msra.mxu0 %v14943_v28  ;;  %13669 = vst [vmem:[#allocation2 + $0x8] sm:$0xff] %v13665_v37  ;;  %12853 = vmatpush1.bf16.msra.mxu1 %v14945_v30  ;;  %v1413_v28 = vld [vmem:[%s16694_s28 + $0x1f28] sm:$0xff]  ;;  %v15039_v30 = vcombine.low %v1396_v14, %v1404_v16  ;;  %v1436_v37 = vld [vmem:[%s16694_s28 + $0x1fe0] sm:$0xff] }
 0x506   : > { %12567 = vmatprep.subr.bf16.mxu0 %v14960_v31  ;;  %12854 = vmatprep.subr.bf16.mxu1 %v14962_v33  ;;  %v15041_v31 = vcombine.low %v1397_v18, %v1405_v19  ;;  %v15056_v33 = vcombine.high %v1412_v24, %v1420_v27  ;;  %v15058_v34 = vcombine.high %v1413_v28, %v1421_v29  ;;  %v1452_v49 = vld [vmem:[%s16694_s28 + $0x2060] sm:$0xff]  ;;  %v1453_v60 = vld [vmem:[%s16694_s28 + $0x2068] sm:$0xff] }
 0x507   : > { %v1460_v58 = vld [vmem:[%s16694_s28 + $0x20a0] sm:$0xff]  ;;  %v1461_v0 = vld [vmem:[%s16694_s28 + $0x20a8] sm:$0xff] }
 0x508   : > { %v1468_v62 = vld [vmem:[%s16694_s28 + $0x20e0] sm:$0xff]  ;;  %v1469_v1 = vld [vmem:[%s16694_s28 + $0x20e8] sm:$0xff] }
 0x509   : > { %12568 = vmatpush1.bf16.msra.mxu0 %v14959_v42  ;;  %12855 = vmatpush1.bf16.msra.mxu1 %v14961_v43  ;;  %v15055_v42 = vcombine.low %v1412_v24, %v1420_v27  ;;  %v15057_v43 = vcombine.low %v1413_v28, %v1421_v29  ;;  %v1476_v4 = vld [vmem:[%s16694_s28 + $0x2120] sm:$0xff]  ;;  %v1477_v8 = vld [vmem:[%s16694_s28 + $0x2128] sm:$0xff] }
 0x50a   : > { %12569 = vmatprep.subr.bf16.mxu0 %v14976_v44  ;;  %12856 = vmatprep.subr.bf16.mxu1 %v14978_v45  ;;  %v15072_v44 = vcombine.high %v1428_v35, %v1436_v37  ;;  %v15074_v45 = vcombine.high %v1429_v38, %v1437_v40  ;;  %v1484_v6 = vld [vmem:[%s16694_s28 + $0x2160] sm:$0xff]  ;;  %v1485_v9 = vld [vmem:[%s16694_s28 + $0x2168] sm:$0xff] }
 0x50b   : > { %v1492_v14 = vld [vmem:[%s16694_s28 + $0x21a0] sm:$0xff]  ;;  %v1493_v18 = vld [vmem:[%s16694_s28 + $0x21a8] sm:$0xff] }
 0x50c   : > { %v1500_v16 = vld [vmem:[%s16694_s28 + $0x21e0] sm:$0xff]  ;;  %v1501_v19 = vld [vmem:[%s16694_s28 + $0x21e8] sm:$0xff] }
 0x50d   : > { %12570 = vmatpush1.bf16.msra.mxu0 %v14975_v54  ;;  %12857 = vmatpush1.bf16.msra.mxu1 %v14977_v55  ;;  %v15071_v54 = vcombine.low %v1428_v35, %v1436_v37  ;;  %v15073_v55 = vcombine.low %v1429_v38, %v1437_v40  ;;  %v1508_v24 = vld [vmem:[%s16694_s28 + $0x2220] sm:$0xff]  ;;  %v1509_v28 = vld [vmem:[%s16694_s28 + $0x2228] sm:$0xff] }
 0x50e   : > { %12571 = vmatprep.subr.bf16.mxu0 %v14992_v56  ;;  %12858 = vmatprep.subr.bf16.mxu1 %v14994_v17  ;;  %v15088_v56 = vcombine.high %v1444_v48, %v1452_v49  ;;  %v15090_v17 = vcombine.high %v1445_v50, %v1453_v60  ;;  %v1516_v27 = vld [vmem:[%s16694_s28 + $0x2260] sm:$0xff]  ;;  %v1517_v29 = vld [vmem:[%s16694_s28 + $0x2268] sm:$0xff] }
 0x50f   : > { %v1524_v35 = vld [vmem:[%s16694_s28 + $0x22a0] sm:$0xff]  ;;  %v1525_v38 = vld [vmem:[%s16694_s28 + $0x22a8] sm:$0xff] }
 0x510   : > { %v1532_v37 = vld [vmem:[%s16694_s28 + $0x22e0] sm:$0xff]  ;;  %v1533_v40 = vld [vmem:[%s16694_s28 + $0x22e8] sm:$0xff] }
 0x511   : > { %12572 = vmatpush1.bf16.msra.mxu0 %v14991_v2  ;;  %12859 = vmatpush1.bf16.msra.mxu1 %v14993_v3  ;;  %v15087_v2 = vcombine.low %v1444_v48, %v1452_v49  ;;  %v15089_v3 = vcombine.low %v1445_v50, %v1453_v60  ;;  %v1540_v48 = vld [vmem:[%s16694_s28 + $0x2320] sm:$0xff]  ;;  %v1541_v50 = vld [vmem:[%s16694_s28 + $0x2328] sm:$0xff] }
 0x512   : > { %12573 = vmatprep.subr.bf16.mxu0 %v15008_v53  ;;  %12860 = vmatprep.subr.bf16.mxu1 %v15010_v5  ;;  %v15104_v53 = vcombine.high %v1460_v58, %v1468_v62  ;;  %v15106_v5 = vcombine.high %v1461_v0, %v1469_v1  ;;  %v1548_v49 = vld [vmem:[%s16694_s28 + $0x2360] sm:$0xff]  ;;  %v1549_v60 = vld [vmem:[%s16694_s28 + $0x2368] sm:$0xff] }
 0x515   : > { %12574 = vmatpush1.bf16.msra.mxu0 %v15007_v10  ;;  %12861 = vmatpush1.bf16.msra.mxu1 %v15009_v12  ;;  %v15103_v10 = vcombine.low %v1460_v58, %v1468_v62  ;;  %v15105_v12 = vcombine.low %v1461_v0, %v1469_v1  ;;  %v1556_v58 = vld [vmem:[%s16694_s28 + $0x23a0] sm:$0xff]  ;;  %v1557_v0 = vld [vmem:[%s16694_s28 + $0x23a8] sm:$0xff] }
 0x516   : > { %12575 = vmatprep.subr.bf16.mxu0 %v15024_v32  ;;  %12862 = vmatprep.subr.bf16.mxu1 %v15026_v13  ;;  %v15120_v32 = vcombine.high %v1476_v4, %v1484_v6  ;;  %v15122_v13 = vcombine.high %v1477_v8, %v1485_v9  ;;  %v1564_v62 = vld [vmem:[%s16694_s28 + $0x23e0] sm:$0xff]  ;;  %v1565_v1 = vld [vmem:[%s16694_s28 + $0x23e8] sm:$0xff] }
 0x519   : > { %12576 = vmatpush1.bf16.msra.mxu0 %v15023_v51  ;;  %12863 = vmatpush1.bf16.msra.mxu1 %v15025_v21  ;;  %v15119_v51 = vcombine.low %v1476_v4, %v1484_v6  ;;  %v15121_v21 = vcombine.low %v1477_v8, %v1485_v9  ;;  %v1572_v4 = vld [vmem:[%s16694_s28 + $0x2420] sm:$0xff]  ;;  %v1573_v8 = vld [vmem:[%s16694_s28 + $0x2428] sm:$0xff] }
 0x51a   : > { %12577 = vmatprep.subr.bf16.mxu0 %v15040_v22  ;;  %12864 = vmatprep.subr.bf16.mxu1 %v15042_v23  ;;  %v15136_v22 = vcombine.high %v1492_v14, %v1500_v16  ;;  %v15138_v23 = vcombine.high %v1493_v18, %v1501_v19  ;;  %v1580_v6 = vld [vmem:[%s16694_s28 + $0x2460] sm:$0xff]  ;;  %v1581_v9 = vld [vmem:[%s16694_s28 + $0x2468] sm:$0xff] }
 0x51d   : > { %12578 = vmatpush1.bf16.msra.mxu0 %v15039_v30  ;;  %12865 = vmatpush1.bf16.msra.mxu1 %v15041_v31  ;;  %v15135_v30 = vcombine.low %v1492_v14, %v1500_v16  ;;  %v15137_v31 = vcombine.low %v1493_v18, %v1501_v19  ;;  %v1588_v14 = vld [vmem:[%s16694_s28 + $0x24a0] sm:$0xff]  ;;  %v1589_v18 = vld [vmem:[%s16694_s28 + $0x24a8] sm:$0xff] }
 0x51e   : > { %12579 = vmatprep.subr.bf16.mxu0 %v15056_v33  ;;  %12866 = vmatprep.subr.bf16.mxu1 %v15058_v34  ;;  %v15152_v33 = vcombine.high %v1508_v24, %v1516_v27  ;;  %v15154_v34 = vcombine.high %v1509_v28, %v1517_v29  ;;  %v1596_v16 = vld [vmem:[%s16694_s28 + $0x24e0] sm:$0xff]  ;;  %v1597_v19 = vld [vmem:[%s16694_s28 + $0x24e8] sm:$0xff] }
 0x521   : > { %12580 = vmatpush1.bf16.msra.mxu0 %v15055_v42  ;;  %12867 = vmatpush1.bf16.msra.mxu1 %v15057_v43  ;;  %v15151_v42 = vcombine.low %v1508_v24, %v1516_v27  ;;  %v15153_v43 = vcombine.low %v1509_v28, %v1517_v29  ;;  %v1604_v24 = vld [vmem:[%s16694_s28 + $0x2520] sm:$0xff]  ;;  %v1605_v28 = vld [vmem:[%s16694_s28 + $0x2528] sm:$0xff] }
 0x522   : > { %12581 = vmatprep.subr.bf16.mxu0 %v15072_v44  ;;  %12868 = vmatprep.subr.bf16.mxu1 %v15074_v45  ;;  %v15168_v44 = vcombine.high %v1524_v35, %v1532_v37  ;;  %v15170_v45 = vcombine.high %v1525_v38, %v1533_v40  ;;  %v1612_v27 = vld [vmem:[%s16694_s28 + $0x2560] sm:$0xff]  ;;  %v1613_v29 = vld [vmem:[%s16694_s28 + $0x2568] sm:$0xff] }
 0x525   : > { %12582 = vmatpush1.bf16.msra.mxu0 %v15071_v54  ;;  %12869 = vmatpush1.bf16.msra.mxu1 %v15073_v55  ;;  %v15167_v54 = vcombine.low %v1524_v35, %v1532_v37  ;;  %v15169_v55 = vcombine.low %v1525_v38, %v1533_v40  ;;  %v1620_v35 = vld [vmem:[%s16694_s28 + $0x25a0] sm:$0xff]  ;;  %v1621_v38 = vld [vmem:[%s16694_s28 + $0x25a8] sm:$0xff] }
 0x526   : > { %12592 = vmatprep.subr.bf16.mxu0 %v15088_v56  ;;  %12879 = vmatprep.subr.bf16.mxu1 %v15090_v17  ;;  %v15184_v56 = vcombine.high %v1540_v48, %v1548_v49  ;;  %v15186_v17 = vcombine.high %v1541_v50, %v1549_v60  ;;  %v1628_v37 = vld [vmem:[%s16694_s28 + $0x25e0] sm:$0xff]  ;;  %v1629_v40 = vld [vmem:[%s16694_s28 + $0x25e8] sm:$0xff] }
 0x528   : > { %12584 = vmatmul.mubr.bf16.vlgmr.msra.gmra.mrb[8].mxu0 %v17047_v7  ;;  %12871 = vmatmul.mubr.bf16.vlgmr.msra.gmra.mrb[8].mxu1 %v17047_v7 }
 0x529   : > { %12593 = vmatpush1.bf16.msra.mxu0 %v15087_v2  ;;  %12880 = vmatpush1.bf16.msra.mxu1 %v15089_v3  ;;  %v15183_v2 = vcombine.low %v1540_v48, %v1548_v49  ;;  %v15185_v3 = vcombine.low %v1541_v50, %v1549_v60  ;;  %v1636_v48 = vld [vmem:[%s16694_s28 + $0x2620] sm:$0xff]  ;;  %v1637_v50 = vld [vmem:[%s16694_s28 + $0x2628] sm:$0xff] }
 0x52a   : > { %12594 = vmatprep.subr.bf16.mxu0 %v15104_v53  ;;  %12881 = vmatprep.subr.bf16.mxu1 %v15106_v5  ;;  %v15200_v53 = vcombine.high %v1556_v58, %v1564_v62  ;;  %v15202_v5 = vcombine.high %v1557_v0, %v1565_v1  ;;  %v1644_v49 = vld [vmem:[%s16694_s28 + $0x2660] sm:$0xff]  ;;  %v1645_v60 = vld [vmem:[%s16694_s28 + $0x2668] sm:$0xff] }
 0x52b   : > { %12624 = vmatprep.mubr.bf16.mxu0 %v17054_v47  ;;  %12911 = vmatprep.mubr.bf16.mxu1 %v17054_v47 }
 0x52d   : > { %12595 = vmatpush1.bf16.msra.mxu0 %v15103_v10  ;;  %12882 = vmatpush1.bf16.msra.mxu1 %v15105_v12  ;;  %v15199_v10 = vcombine.low %v1556_v58, %v1564_v62  ;;  %v15201_v12 = vcombine.low %v1557_v0, %v1565_v1  ;;  %v1652_v58 = vld [vmem:[%s16694_s28 + $0x26a0] sm:$0xff]  ;;  %v1653_v0 = vld [vmem:[%s16694_s28 + $0x26a8] sm:$0xff] }
 0x52e   : > { %12596 = vmatprep.subr.bf16.mxu0 %v15120_v32  ;;  %12883 = vmatprep.subr.bf16.mxu1 %v15122_v13  ;;  %v15216_v32 = vcombine.high %v1572_v4, %v1580_v6  ;;  %v15218_v13 = vcombine.high %v1573_v8, %v1581_v9  ;;  %v1660_v62 = vld [vmem:[%s16694_s28 + $0x26e0] sm:$0xff]  ;;  %v1661_v1 = vld [vmem:[%s16694_s28 + $0x26e8] sm:$0xff] }
 0x531   : > { %12597 = vmatpush1.bf16.msra.mxu0 %v15119_v51  ;;  %12884 = vmatpush1.bf16.msra.mxu1 %v15121_v21  ;;  %v15215_v51 = vcombine.low %v1572_v4, %v1580_v6  ;;  %v15217_v21 = vcombine.low %v1573_v8, %v1581_v9  ;;  %v1668_v4 = vld [vmem:[%s16694_s28 + $0x2720] sm:$0xff]  ;;  %v1669_v8 = vld [vmem:[%s16694_s28 + $0x2728] sm:$0xff] }
 0x532   : > { %12598 = vmatprep.subr.bf16.mxu0 %v15136_v22  ;;  %12885 = vmatprep.subr.bf16.mxu1 %v15138_v23  ;;  %v15232_v22 = vcombine.high %v1588_v14, %v1596_v16  ;;  %v15234_v23 = vcombine.high %v1589_v18, %v1597_v19  ;;  %v1676_v6 = vld [vmem:[%s16694_s28 + $0x2760] sm:$0xff]  ;;  %v1677_v9 = vld [vmem:[%s16694_s28 + $0x2768] sm:$0xff] }
 0x535   : > { %12599 = vmatpush1.bf16.msra.mxu0 %v15135_v30  ;;  %12886 = vmatpush1.bf16.msra.mxu1 %v15137_v31  ;;  %v15231_v30 = vcombine.low %v1588_v14, %v1596_v16  ;;  %v15233_v31 = vcombine.low %v1589_v18, %v1597_v19  ;;  %v1684_v14 = vld [vmem:[%s16694_s28 + $0x27a0] sm:$0xff]  ;;  %v1685_v18 = vld [vmem:[%s16694_s28 + $0x27a8] sm:$0xff] }
 0x536   : > { %12600 = vmatprep.subr.bf16.mxu0 %v15152_v33  ;;  %12887 = vmatprep.subr.bf16.mxu1 %v15154_v34  ;;  %v15248_v33 = vcombine.high %v1604_v24, %v1612_v27  ;;  %v15250_v34 = vcombine.high %v1605_v28, %v1613_v29  ;;  %v1692_v16 = vld [vmem:[%s16694_s28 + $0x27e0] sm:$0xff]  ;;  %v1693_v19 = vld [vmem:[%s16694_s28 + $0x27e8] sm:$0xff] }
 0x539   : > { %12601 = vmatpush1.bf16.msra.mxu0 %v15151_v42  ;;  %12888 = vmatpush1.bf16.msra.mxu1 %v15153_v43  ;;  %v15247_v42 = vcombine.low %v1604_v24, %v1612_v27  ;;  %v15249_v43 = vcombine.low %v1605_v28, %v1613_v29  ;;  %v1700_v24 = vld [vmem:[%s16694_s28 + $0x2820] sm:$0xff]  ;;  %v1701_v28 = vld [vmem:[%s16694_s28 + $0x2828] sm:$0xff] }
 0x53a   : > { %12602 = vmatprep.subr.bf16.mxu0 %v15168_v44  ;;  %12889 = vmatprep.subr.bf16.mxu1 %v15170_v45  ;;  %v15264_v44 = vcombine.high %v1620_v35, %v1628_v37  ;;  %v15266_v45 = vcombine.high %v1621_v38, %v1629_v40  ;;  %v1708_v27 = vld [vmem:[%s16694_s28 + $0x2860] sm:$0xff]  ;;  %v1709_v29 = vld [vmem:[%s16694_s28 + $0x2868] sm:$0xff] }
 0x53d   : > { %12603 = vmatpush1.bf16.msra.mxu0 %v15167_v54  ;;  %12890 = vmatpush1.bf16.msra.mxu1 %v15169_v55  ;;  %v15263_v54 = vcombine.low %v1620_v35, %v1628_v37  ;;  %v15265_v55 = vcombine.low %v1621_v38, %v1629_v40  ;;  %v1716_v35 = vld [vmem:[%s16694_s28 + $0x28a0] sm:$0xff]  ;;  %v1717_v38 = vld [vmem:[%s16694_s28 + $0x28a8] sm:$0xff] }
 0x53e   : > { %12604 = vmatprep.subr.bf16.mxu0 %v15184_v56  ;;  %12891 = vmatprep.subr.bf16.mxu1 %v15186_v17  ;;  %v15280_v56 = vcombine.high %v1636_v48, %v1644_v49  ;;  %v15282_v17 = vcombine.high %v1637_v50, %v1645_v60  ;;  %v1724_v37 = vld [vmem:[%s16694_s28 + $0x28e0] sm:$0xff]  ;;  %v1725_v40 = vld [vmem:[%s16694_s28 + $0x28e8] sm:$0xff] }
 0x541   : > { %12605 = vmatpush1.bf16.msra.mxu0 %v15183_v2  ;;  %12892 = vmatpush1.bf16.msra.mxu1 %v15185_v3  ;;  %v15279_v2 = vcombine.low %v1636_v48, %v1644_v49  ;;  %v15281_v3 = vcombine.low %v1637_v50, %v1645_v60  ;;  %v1732_v48 = vld [vmem:[%s16694_s28 + $0x2920] sm:$0xff]  ;;  %v1733_v50 = vld [vmem:[%s16694_s28 + $0x2928] sm:$0xff] }
 0x542   : > { %12606 = vmatprep.subr.bf16.mxu0 %v15200_v53  ;;  %12893 = vmatprep.subr.bf16.mxu1 %v15202_v5  ;;  %v15296_v53 = vcombine.high %v1652_v58, %v1660_v62  ;;  %v15298_v5 = vcombine.high %v1653_v0, %v1661_v1  ;;  %v1740_v49 = vld [vmem:[%s16694_s28 + $0x2960] sm:$0xff]  ;;  %v1741_v60 = vld [vmem:[%s16694_s28 + $0x2968] sm:$0xff] }
 0x545   : > { %12607 = vmatpush1.bf16.msra.mxu0 %v15199_v10  ;;  %12894 = vmatpush1.bf16.msra.mxu1 %v15201_v12  ;;  %v15295_v10 = vcombine.low %v1652_v58, %v1660_v62  ;;  %v15297_v12 = vcombine.low %v1653_v0, %v1661_v1  ;;  %v1748_v58 = vld [vmem:[%s16694_s28 + $0x29a0] sm:$0xff]  ;;  %v1749_v0 = vld [vmem:[%s16694_s28 + $0x29a8] sm:$0xff] }
 0x546   : > { %12608 = vmatprep.subr.bf16.mxu0 %v15216_v32  ;;  %12895 = vmatprep.subr.bf16.mxu1 %v15218_v13  ;;  %v15312_v32 = vcombine.high %v1668_v4, %v1676_v6  ;;  %v15314_v13 = vcombine.high %v1669_v8, %v1677_v9  ;;  %v1756_v62 = vld [vmem:[%s16694_s28 + $0x29e0] sm:$0xff]  ;;  %v1757_v1 = vld [vmem:[%s16694_s28 + $0x29e8] sm:$0xff] }
 0x549   : > { %12609 = vmatpush1.bf16.msra.mxu0 %v15215_v51  ;;  %12896 = vmatpush1.bf16.msra.mxu1 %v15217_v21  ;;  %v15311_v51 = vcombine.low %v1668_v4, %v1676_v6  ;;  %v15313_v21 = vcombine.low %v1669_v8, %v1677_v9  ;;  %v1764_v4 = vld [vmem:[%s16694_s28 + $0x2a20] sm:$0xff]  ;;  %v1765_v8 = vld [vmem:[%s16694_s28 + $0x2a28] sm:$0xff] }
 0x54a   : > { %12610 = vmatprep.subr.bf16.mxu0 %v15232_v22  ;;  %12897 = vmatprep.subr.bf16.mxu1 %v15234_v23  ;;  %v15328_v22 = vcombine.high %v1684_v14, %v1692_v16  ;;  %v15330_v23 = vcombine.high %v1685_v18, %v1693_v19  ;;  %v1772_v6 = vld [vmem:[%s16694_s28 + $0x2a60] sm:$0xff]  ;;  %v1773_v9 = vld [vmem:[%s16694_s28 + $0x2a68] sm:$0xff] }
 0x54d   : > { %12611 = vmatpush1.bf16.msra.mxu0 %v15231_v30  ;;  %12898 = vmatpush1.bf16.msra.mxu1 %v15233_v31  ;;  %v15327_v30 = vcombine.low %v1684_v14, %v1692_v16  ;;  %v15329_v31 = vcombine.low %v1685_v18, %v1693_v19  ;;  %v1780_v14 = vld [vmem:[%s16694_s28 + $0x2aa0] sm:$0xff]  ;;  %v1781_v18 = vld [vmem:[%s16694_s28 + $0x2aa8] sm:$0xff] }
 0x54e   : > { %12612 = vmatprep.subr.bf16.mxu0 %v15248_v33  ;;  %12899 = vmatprep.subr.bf16.mxu1 %v15250_v34  ;;  %v15344_v33 = vcombine.high %v1700_v24, %v1708_v27  ;;  %v15346_v34 = vcombine.high %v1701_v28, %v1709_v29  ;;  %v1788_v16 = vld [vmem:[%s16694_s28 + $0x2ae0] sm:$0xff]  ;;  %v1789_v19 = vld [vmem:[%s16694_s28 + $0x2ae8] sm:$0xff] }
 0x551   : > { %12613 = vmatpush1.bf16.msra.mxu0 %v15247_v42  ;;  %12900 = vmatpush1.bf16.msra.mxu1 %v15249_v43  ;;  %v15343_v42 = vcombine.low %v1700_v24, %v1708_v27  ;;  %v15345_v43 = vcombine.low %v1701_v28, %v1709_v29  ;;  %v1796_v24 = vld [vmem:[%s16694_s28 + $0x2b20] sm:$0xff]  ;;  %v1797_v28 = vld [vmem:[%s16694_s28 + $0x2b28] sm:$0xff] }
 0x552   : > { %12614 = vmatprep.subr.bf16.mxu0 %v15264_v44  ;;  %12901 = vmatprep.subr.bf16.mxu1 %v15266_v45  ;;  %v15360_v44 = vcombine.high %v1716_v35, %v1724_v37  ;;  %v15362_v45 = vcombine.high %v1717_v38, %v1725_v40  ;;  %v1804_v27 = vld [vmem:[%s16694_s28 + $0x2b60] sm:$0xff]  ;;  %v1805_v29 = vld [vmem:[%s16694_s28 + $0x2b68] sm:$0xff] }
 0x555   : > { %12615 = vmatpush1.bf16.msra.mxu0 %v15263_v54  ;;  %12902 = vmatpush1.bf16.msra.mxu1 %v15265_v55  ;;  %v15359_v54 = vcombine.low %v1716_v35, %v1724_v37  ;;  %v15361_v55 = vcombine.low %v1717_v38, %v1725_v40  ;;  %v1812_v35 = vld [vmem:[%s16694_s28 + $0x2ba0] sm:$0xff]  ;;  %v1813_v38 = vld [vmem:[%s16694_s28 + $0x2ba8] sm:$0xff] }
 0x556   : > { %12616 = vmatprep.subr.bf16.mxu0 %v15280_v56  ;;  %12903 = vmatprep.subr.bf16.mxu1 %v15282_v17  ;;  %v15376_v56 = vcombine.high %v1732_v48, %v1740_v49  ;;  %v15378_v17 = vcombine.high %v1733_v50, %v1741_v60  ;;  %v1820_v37 = vld [vmem:[%s16694_s28 + $0x2be0] sm:$0xff]  ;;  %v1821_v40 = vld [vmem:[%s16694_s28 + $0x2be8] sm:$0xff] }
 0x559   : > { %12617 = vmatpush1.bf16.msra.mxu0 %v15279_v2  ;;  %12904 = vmatpush1.bf16.msra.mxu1 %v15281_v3  ;;  %v15375_v2 = vcombine.low %v1732_v48, %v1740_v49  ;;  %v15377_v3 = vcombine.low %v1733_v50, %v1741_v60  ;;  %v1828_v48 = vld [vmem:[%s16694_s28 + $0x2c20] sm:$0xff]  ;;  %v1829_v50 = vld [vmem:[%s16694_s28 + $0x2c28] sm:$0xff] }
 0x55a   : > { %12618 = vmatprep.subr.bf16.mxu0 %v15296_v53  ;;  %12905 = vmatprep.subr.bf16.mxu1 %v15298_v5  ;;  %v15392_v53 = vcombine.high %v1748_v58, %v1756_v62  ;;  %v15394_v5 = vcombine.high %v1749_v0, %v1757_v1  ;;  %v1836_v49 = vld [vmem:[%s16694_s28 + $0x2c60] sm:$0xff]  ;;  %v1837_v60 = vld [vmem:[%s16694_s28 + $0x2c68] sm:$0xff] }
 0x55d   : > { %12619 = vmatpush1.bf16.msra.mxu0 %v15295_v10  ;;  %12906 = vmatpush1.bf16.msra.mxu1 %v15297_v12  ;;  %v15391_v10 = vcombine.low %v1748_v58, %v1756_v62  ;;  %v15393_v12 = vcombine.low %v1749_v0, %v1757_v1  ;;  %v1844_v58 = vld [vmem:[%s16694_s28 + $0x2ca0] sm:$0xff]  ;;  %v1845_v0 = vld [vmem:[%s16694_s28 + $0x2ca8] sm:$0xff] }
 0x55e   : > { %12620 = vmatprep.subr.bf16.mxu0 %v15312_v32  ;;  %12907 = vmatprep.subr.bf16.mxu1 %v15314_v13  ;;  %v15408_v32 = vcombine.high %v1764_v4, %v1772_v6  ;;  %v15410_v13 = vcombine.high %v1765_v8, %v1773_v9  ;;  %v1852_v62 = vld [vmem:[%s16694_s28 + $0x2ce0] sm:$0xff]  ;;  %v1853_v1 = vld [vmem:[%s16694_s28 + $0x2ce8] sm:$0xff] }
 0x561   : > { %12621 = vmatpush1.bf16.msra.mxu0 %v15311_v51  ;;  %12908 = vmatpush1.bf16.msra.mxu1 %v15313_v21  ;;  %v15407_v51 = vcombine.low %v1764_v4, %v1772_v6  ;;  %v15409_v21 = vcombine.low %v1765_v8, %v1773_v9  ;;  %v1860_v4 = vld [vmem:[%s16694_s28 + $0x2d20] sm:$0xff]  ;;  %v1861_v8 = vld [vmem:[%s16694_s28 + $0x2d28] sm:$0xff] }
 0x562   : > { %12622 = vmatprep.subr.bf16.mxu0 %v15328_v22  ;;  %12909 = vmatprep.subr.bf16.mxu1 %v15330_v23  ;;  %v15424_v22 = vcombine.high %v1780_v14, %v1788_v16  ;;  %v15426_v23 = vcombine.high %v1781_v18, %v1789_v19  ;;  %v1868_v6 = vld [vmem:[%s16694_s28 + $0x2d60] sm:$0xff]  ;;  %v1869_v9 = vld [vmem:[%s16694_s28 + $0x2d68] sm:$0xff] }
 0x565   : > { %12623 = vmatpush1.bf16.msra.mxu0 %v15327_v30  ;;  %12910 = vmatpush1.bf16.msra.mxu1 %v15329_v31  ;;  %v15423_v30 = vcombine.low %v1780_v14, %v1788_v16  ;;  %v15425_v31 = vcombine.low %v1781_v18, %v1789_v19  ;;  %v1876_v14 = vld [vmem:[%s16694_s28 + $0x2da0] sm:$0xff]  ;;  %v1877_v18 = vld [vmem:[%s16694_s28 + $0x2da8] sm:$0xff] }
 0x566   : > { %12633 = vmatprep.subr.bf16.mxu0 %v15344_v33  ;;  %12920 = vmatprep.subr.bf16.mxu1 %v15346_v34  ;;  %v15440_v33 = vcombine.high %v1796_v24, %v1804_v27  ;;  %v15442_v34 = vcombine.high %v1797_v28, %v1805_v29  ;;  %v1884_v16 = vld [vmem:[%s16694_s28 + $0x2de0] sm:$0xff]  ;;  %v1885_v19 = vld [vmem:[%s16694_s28 + $0x2de8] sm:$0xff] }
 0x568   : > { %12625 = vmatmul.mubr.bf16.vlgmr.msra.gmra.mrb[8].mxu0 %v17122_v39  ;;  %12912 = vmatmul.mubr.bf16.vlgmr.msra.gmra.mrb[8].mxu1 %v17122_v39 }
 0x569   : > { %12634 = vmatpush1.bf16.msra.mxu0 %v15343_v42  ;;  %12921 = vmatpush1.bf16.msra.mxu1 %v15345_v43  ;;  %v15439_v42 = vcombine.low %v1796_v24, %v1804_v27  ;;  %v15441_v43 = vcombine.low %v1797_v28, %v1805_v29  ;;  %v1892_v24 = vld [vmem:[%s16694_s28 + $0x2e20] sm:$0xff]  ;;  %v1893_v28 = vld [vmem:[%s16694_s28 + $0x2e28] sm:$0xff] }
 0x56a   : > { %12635 = vmatprep.subr.bf16.mxu0 %v15360_v44  ;;  %12922 = vmatprep.subr.bf16.mxu1 %v15362_v45  ;;  %v15456_v44 = vcombine.high %v1812_v35, %v1820_v37  ;;  %v15458_v45 = vcombine.high %v1813_v38, %v1821_v40  ;;  %v1900_v27 = vld [vmem:[%s16694_s28 + $0x2e60] sm:$0xff]  ;;  %v1901_v29 = vld [vmem:[%s16694_s28 + $0x2e68] sm:$0xff] }
 0x56b   : > { %12665 = vmatprep.mubr.bf16.mxu0 %v17130_v52  ;;  %12952 = vmatprep.mubr.bf16.mxu1 %v17130_v52 }
 0x56d   : > { %12636 = vmatpush1.bf16.msra.mxu0 %v15359_v54  ;;  %12923 = vmatpush1.bf16.msra.mxu1 %v15361_v55  ;;  %v15455_v54 = vcombine.low %v1812_v35, %v1820_v37  ;;  %v15457_v55 = vcombine.low %v1813_v38, %v1821_v40  ;;  %v1908_v35 = vld [vmem:[%s16694_s28 + $0x2ea0] sm:$0xff]  ;;  %v1909_v38 = vld [vmem:[%s16694_s28 + $0x2ea8] sm:$0xff] }
 0x56e   : > { %12637 = vmatprep.subr.bf16.mxu0 %v15376_v56  ;;  %12924 = vmatprep.subr.bf16.mxu1 %v15378_v17  ;;  %v15472_v56 = vcombine.high %v1828_v48, %v1836_v49  ;;  %v15474_v17 = vcombine.high %v1829_v50, %v1837_v60  ;;  %v1916_v37 = vld [vmem:[%s16694_s28 + $0x2ee0] sm:$0xff]  ;;  %v1917_v40 = vld [vmem:[%s16694_s28 + $0x2ee8] sm:$0xff] }
 0x571   : > { %12638 = vmatpush1.bf16.msra.mxu0 %v15375_v2  ;;  %12925 = vmatpush1.bf16.msra.mxu1 %v15377_v3  ;;  %v15471_v2 = vcombine.low %v1828_v48, %v1836_v49  ;;  %v15473_v3 = vcombine.low %v1829_v50, %v1837_v60  ;;  %v1924_v48 = vld [vmem:[%s16694_s28 + $0x2f20] sm:$0xff]  ;;  %v1925_v50 = vld [vmem:[%s16694_s28 + $0x2f28] sm:$0xff] }
 0x572   : > { %12639 = vmatprep.subr.bf16.mxu0 %v15392_v53  ;;  %12926 = vmatprep.subr.bf16.mxu1 %v15394_v5  ;;  %v15488_v53 = vcombine.high %v1844_v58, %v1852_v62  ;;  %v15490_v5 = vcombine.high %v1845_v0, %v1853_v1  ;;  %v1932_v49 = vld [vmem:[%s16694_s28 + $0x2f60] sm:$0xff]  ;;  %v1933_v60 = vld [vmem:[%s16694_s28 + $0x2f68] sm:$0xff] }
 0x575   : > { %12640 = vmatpush1.bf16.msra.mxu0 %v15391_v10  ;;  %12927 = vmatpush1.bf16.msra.mxu1 %v15393_v12  ;;  %v15487_v10 = vcombine.low %v1844_v58, %v1852_v62  ;;  %v15489_v12 = vcombine.low %v1845_v0, %v1853_v1  ;;  %v1940_v58 = vld [vmem:[%s16694_s28 + $0x2fa0] sm:$0xff]  ;;  %v1941_v0 = vld [vmem:[%s16694_s28 + $0x2fa8] sm:$0xff] }
 0x576   : > { %12641 = vmatprep.subr.bf16.mxu0 %v15408_v32  ;;  %12928 = vmatprep.subr.bf16.mxu1 %v15410_v13  ;;  %v15504_v32 = vcombine.high %v1860_v4, %v1868_v6  ;;  %v15506_v13 = vcombine.high %v1861_v8, %v1869_v9  ;;  %v1948_v62 = vld [vmem:[%s16694_s28 + $0x2fe0] sm:$0xff]  ;;  %v1949_v1 = vld [vmem:[%s16694_s28 + $0x2fe8] sm:$0xff] }
 0x579   : > { %12642 = vmatpush1.bf16.msra.mxu0 %v15407_v51  ;;  %12929 = vmatpush1.bf16.msra.mxu1 %v15409_v21  ;;  %v15503_v51 = vcombine.low %v1860_v4, %v1868_v6  ;;  %v15505_v21 = vcombine.low %v1861_v8, %v1869_v9  ;;  %v1956_v4 = vld [vmem:[%s16694_s28 + $0x3020] sm:$0xff]  ;;  %v1957_v8 = vld [vmem:[%s16694_s28 + $0x3028] sm:$0xff] }
 0x57a   : > { %12643 = vmatprep.subr.bf16.mxu0 %v15424_v22  ;;  %12930 = vmatprep.subr.bf16.mxu1 %v15426_v23  ;;  %v15520_v22 = vcombine.high %v1876_v14, %v1884_v16  ;;  %v15522_v23 = vcombine.high %v1877_v18, %v1885_v19  ;;  %v1964_v6 = vld [vmem:[%s16694_s28 + $0x3060] sm:$0xff]  ;;  %v1965_v9 = vld [vmem:[%s16694_s28 + $0x3068] sm:$0xff] }
 0x57d   : > { %12644 = vmatpush1.bf16.msra.mxu0 %v15423_v30  ;;  %12931 = vmatpush1.bf16.msra.mxu1 %v15425_v31  ;;  %v15519_v30 = vcombine.low %v1876_v14, %v1884_v16  ;;  %v15521_v31 = vcombine.low %v1877_v18, %v1885_v19  ;;  %v1972_v14 = vld [vmem:[%s16694_s28 + $0x30a0] sm:$0xff]  ;;  %v1973_v18 = vld [vmem:[%s16694_s28 + $0x30a8] sm:$0xff] }
 0x57e   : > { %12645 = vmatprep.subr.bf16.mxu0 %v15440_v33  ;;  %12932 = vmatprep.subr.bf16.mxu1 %v15442_v34  ;;  %v15536_v33 = vcombine.high %v1892_v24, %v1900_v27  ;;  %v15538_v34 = vcombine.high %v1893_v28, %v1901_v29  ;;  %v1980_v16 = vld [vmem:[%s16694_s28 + $0x30e0] sm:$0xff]  ;;  %v1981_v19 = vld [vmem:[%s16694_s28 + $0x30e8] sm:$0xff] }
 0x581   : > { %12646 = vmatpush1.bf16.msra.mxu0 %v15439_v42  ;;  %12933 = vmatpush1.bf16.msra.mxu1 %v15441_v43  ;;  %v15535_v42 = vcombine.low %v1892_v24, %v1900_v27  ;;  %v15537_v43 = vcombine.low %v1893_v28, %v1901_v29  ;;  %v1988_v24 = vld [vmem:[%s16694_s28 + $0x3120] sm:$0xff]  ;;  %v1989_v28 = vld [vmem:[%s16694_s28 + $0x3128] sm:$0xff] }
 0x582   : > { %12647 = vmatprep.subr.bf16.mxu0 %v15456_v44  ;;  %12934 = vmatprep.subr.bf16.mxu1 %v15458_v45  ;;  %v15552_v44 = vcombine.high %v1908_v35, %v1916_v37  ;;  %v15554_v45 = vcombine.high %v1909_v38, %v1917_v40  ;;  %v1996_v27 = vld [vmem:[%s16694_s28 + $0x3160] sm:$0xff]  ;;  %v1997_v29 = vld [vmem:[%s16694_s28 + $0x3168] sm:$0xff] }
 0x585   : > { %12648 = vmatpush1.bf16.msra.mxu0 %v15455_v54  ;;  %12935 = vmatpush1.bf16.msra.mxu1 %v15457_v55  ;;  %v15551_v54 = vcombine.low %v1908_v35, %v1916_v37  ;;  %v15553_v55 = vcombine.low %v1909_v38, %v1917_v40  ;;  %v2004_v35 = vld [vmem:[%s16694_s28 + $0x31a0] sm:$0xff]  ;;  %v2005_v38 = vld [vmem:[%s16694_s28 + $0x31a8] sm:$0xff] }
 0x586   : > { %12649 = vmatprep.subr.bf16.mxu0 %v15472_v56  ;;  %12936 = vmatprep.subr.bf16.mxu1 %v15474_v17  ;;  %v15568_v56 = vcombine.high %v1924_v48, %v1932_v49  ;;  %v15570_v17 = vcombine.high %v1925_v50, %v1933_v60  ;;  %v2012_v37 = vld [vmem:[%s16694_s28 + $0x31e0] sm:$0xff]  ;;  %v2013_v40 = vld [vmem:[%s16694_s28 + $0x31e8] sm:$0xff] }
 0x589   : > { %12650 = vmatpush1.bf16.msra.mxu0 %v15471_v2  ;;  %12937 = vmatpush1.bf16.msra.mxu1 %v15473_v3  ;;  %v15567_v2 = vcombine.low %v1924_v48, %v1932_v49  ;;  %v15569_v3 = vcombine.low %v1925_v50, %v1933_v60  ;;  %v2020_v48 = vld [vmem:[%s16694_s28 + $0x3220] sm:$0xff]  ;;  %v2021_v50 = vld [vmem:[%s16694_s28 + $0x3228] sm:$0xff] }
 0x58a   : > { %12651 = vmatprep.subr.bf16.mxu0 %v15488_v53  ;;  %12938 = vmatprep.subr.bf16.mxu1 %v15490_v5  ;;  %v15584_v53 = vcombine.high %v1940_v58, %v1948_v62  ;;  %v15586_v5 = vcombine.high %v1941_v0, %v1949_v1  ;;  %v2028_v49 = vld [vmem:[%s16694_s28 + $0x3260] sm:$0xff]  ;;  %v2029_v60 = vld [vmem:[%s16694_s28 + $0x3268] sm:$0xff] }
 0x58d   : > { %12652 = vmatpush1.bf16.msra.mxu0 %v15487_v10  ;;  %12939 = vmatpush1.bf16.msra.mxu1 %v15489_v12  ;;  %v15583_v10 = vcombine.low %v1940_v58, %v1948_v62  ;;  %v15585_v12 = vcombine.low %v1941_v0, %v1949_v1  ;;  %v2036_v58 = vld [vmem:[%s16694_s28 + $0x32a0] sm:$0xff]  ;;  %v2037_v0 = vld [vmem:[%s16694_s28 + $0x32a8] sm:$0xff] }
 0x58e   : > { %12653 = vmatprep.subr.bf16.mxu0 %v15504_v32  ;;  %12940 = vmatprep.subr.bf16.mxu1 %v15506_v13  ;;  %v15600_v32 = vcombine.high %v1956_v4, %v1964_v6  ;;  %v15602_v13 = vcombine.high %v1957_v8, %v1965_v9  ;;  %v2044_v62 = vld [vmem:[%s16694_s28 + $0x32e0] sm:$0xff]  ;;  %v2045_v1 = vld [vmem:[%s16694_s28 + $0x32e8] sm:$0xff] }
 0x591   : > { %12654 = vmatpush1.bf16.msra.mxu0 %v15503_v51  ;;  %12941 = vmatpush1.bf16.msra.mxu1 %v15505_v21  ;;  %v15599_v51 = vcombine.low %v1956_v4, %v1964_v6  ;;  %v15601_v21 = vcombine.low %v1957_v8, %v1965_v9  ;;  %v2052_v4 = vld [vmem:[%s16694_s28 + $0x3320] sm:$0xff]  ;;  %v2053_v8 = vld [vmem:[%s16694_s28 + $0x3328] sm:$0xff] }
 0x592   : > { %12655 = vmatprep.subr.bf16.mxu0 %v15520_v22  ;;  %12942 = vmatprep.subr.bf16.mxu1 %v15522_v23  ;;  %v15616_v22 = vcombine.high %v1972_v14, %v1980_v16  ;;  %v15618_v23 = vcombine.high %v1973_v18, %v1981_v19  ;;  %v2060_v6 = vld [vmem:[%s16694_s28 + $0x3360] sm:$0xff]  ;;  %v2061_v9 = vld [vmem:[%s16694_s28 + $0x3368] sm:$0xff] }
 0x595   : > { %12656 = vmatpush1.bf16.msra.mxu0 %v15519_v30  ;;  %12943 = vmatpush1.bf16.msra.mxu1 %v15521_v31  ;;  %v15615_v30 = vcombine.low %v1972_v14, %v1980_v16  ;;  %v15617_v31 = vcombine.low %v1973_v18, %v1981_v19  ;;  %v2068_v14 = vld [vmem:[%s16694_s28 + $0x33a0] sm:$0xff]  ;;  %v2069_v18 = vld [vmem:[%s16694_s28 + $0x33a8] sm:$0xff] }
 0x596   : > { %12657 = vmatprep.subr.bf16.mxu0 %v15536_v33  ;;  %12944 = vmatprep.subr.bf16.mxu1 %v15538_v34  ;;  %v15632_v33 = vcombine.high %v1988_v24, %v1996_v27  ;;  %v15634_v34 = vcombine.high %v1989_v28, %v1997_v29  ;;  %v2076_v16 = vld [vmem:[%s16694_s28 + $0x33e0] sm:$0xff]  ;;  %v2077_v19 = vld [vmem:[%s16694_s28 + $0x33e8] sm:$0xff] }
 0x599   : > { %12658 = vmatpush1.bf16.msra.mxu0 %v15535_v42  ;;  %12945 = vmatpush1.bf16.msra.mxu1 %v15537_v43  ;;  %v15631_v42 = vcombine.low %v1988_v24, %v1996_v27  ;;  %v15633_v43 = vcombine.low %v1989_v28, %v1997_v29  ;;  %v2084_v24 = vld [vmem:[%s16694_s28 + $0x3420] sm:$0xff]  ;;  %v2085_v28 = vld [vmem:[%s16694_s28 + $0x3428] sm:$0xff] }
 0x59a   : > { %12659 = vmatprep.subr.bf16.mxu0 %v15552_v44  ;;  %12946 = vmatprep.subr.bf16.mxu1 %v15554_v45  ;;  %v15648_v44 = vcombine.high %v2004_v35, %v2012_v37  ;;  %v15650_v45 = vcombine.high %v2005_v38, %v2013_v40  ;;  %v2092_v27 = vld [vmem:[%s16694_s28 + $0x3460] sm:$0xff]  ;;  %v2093_v29 = vld [vmem:[%s16694_s28 + $0x3468] sm:$0xff] }
 0x59d   : > { %12660 = vmatpush1.bf16.msra.mxu0 %v15551_v54  ;;  %12947 = vmatpush1.bf16.msra.mxu1 %v15553_v55  ;;  %v15647_v54 = vcombine.low %v2004_v35, %v2012_v37  ;;  %v15649_v55 = vcombine.low %v2005_v38, %v2013_v40  ;;  %v2100_v35 = vld [vmem:[%s16694_s28 + $0x34a0] sm:$0xff]  ;;  %v2101_v38 = vld [vmem:[%s16694_s28 + $0x34a8] sm:$0xff] }
 0x59e   : > { %12661 = vmatprep.subr.bf16.mxu0 %v15568_v56  ;;  %12948 = vmatprep.subr.bf16.mxu1 %v15570_v17  ;;  %v15664_v56 = vcombine.high %v2020_v48, %v2028_v49  ;;  %v15666_v17 = vcombine.high %v2021_v50, %v2029_v60  ;;  %v2108_v37 = vld [vmem:[%s16694_s28 + $0x34e0] sm:$0xff]  ;;  %v2109_v40 = vld [vmem:[%s16694_s28 + $0x34e8] sm:$0xff] }
 0x5a1   : > { %12662 = vmatpush1.bf16.msra.mxu0 %v15567_v2  ;;  %12949 = vmatpush1.bf16.msra.mxu1 %v15569_v3  ;;  %v15663_v2 = vcombine.low %v2020_v48, %v2028_v49  ;;  %v15665_v3 = vcombine.low %v2021_v50, %v2029_v60  ;;  %v2116_v48 = vld [vmem:[%s16694_s28 + $0x3520] sm:$0xff]  ;;  %v2117_v50 = vld [vmem:[%s16694_s28 + $0x3528] sm:$0xff] }
 0x5a2   : > { %12663 = vmatprep.subr.bf16.mxu0 %v15584_v53  ;;  %12950 = vmatprep.subr.bf16.mxu1 %v15586_v5  ;;  %v15680_v53 = vcombine.high %v2036_v58, %v2044_v62  ;;  %v15682_v5 = vcombine.high %v2037_v0, %v2045_v1  ;;  %v2124_v49 = vld [vmem:[%s16694_s28 + $0x3560] sm:$0xff]  ;;  %v2125_v60 = vld [vmem:[%s16694_s28 + $0x3568] sm:$0xff] }
 0x5a5   : > { %12664 = vmatpush1.bf16.msra.mxu0 %v15583_v10  ;;  %12951 = vmatpush1.bf16.msra.mxu1 %v15585_v12  ;;  %v15679_v10 = vcombine.low %v2036_v58, %v2044_v62  ;;  %v15681_v12 = vcombine.low %v2037_v0, %v2045_v1  ;;  %v2132_v58 = vld [vmem:[%s16694_s28 + $0x35a0] sm:$0xff]  ;;  %v2133_v0 = vld [vmem:[%s16694_s28 + $0x35a8] sm:$0xff] }
 0x5a6   : > { %12674 = vmatprep.subr.bf16.mxu0 %v15600_v32  ;;  %12961 = vmatprep.subr.bf16.mxu1 %v15602_v13  ;;  %v15696_v32 = vcombine.high %v2052_v4, %v2060_v6  ;;  %v15698_v13 = vcombine.high %v2053_v8, %v2061_v9  ;;  %v2140_v62 = vld [vmem:[%s16694_s28 + $0x35e0] sm:$0xff]  ;;  %v2141_v1 = vld [vmem:[%s16694_s28 + $0x35e8] sm:$0xff] }
 0x5a8   : > { %12666 = vmatmul.mubr.bf16.vlgmr.msra.gmra.mrb[8].mxu0 %v17205_v15  ;;  %12953 = vmatmul.mubr.bf16.vlgmr.msra.gmra.mrb[8].mxu1 %v17205_v15 }
 0x5a9   : > { %12675 = vmatpush1.bf16.msra.mxu0 %v15599_v51  ;;  %12962 = vmatpush1.bf16.msra.mxu1 %v15601_v21  ;;  %v15695_v51 = vcombine.low %v2052_v4, %v2060_v6  ;;  %v15697_v21 = vcombine.low %v2053_v8, %v2061_v9  ;;  %v2148_v4 = vld [vmem:[%s16694_s28 + $0x3620] sm:$0xff]  ;;  %v2149_v8 = vld [vmem:[%s16694_s28 + $0x3628] sm:$0xff] }
 0x5aa   : > { %12676 = vmatprep.subr.bf16.mxu0 %v15616_v22  ;;  %12963 = vmatprep.subr.bf16.mxu1 %v15618_v23  ;;  %v15712_v22 = vcombine.high %v2068_v14, %v2076_v16  ;;  %v15714_v23 = vcombine.high %v2069_v18, %v2077_v19  ;;  %v2156_v6 = vld [vmem:[%s16694_s28 + $0x3660] sm:$0xff]  ;;  %v2157_v9 = vld [vmem:[%s16694_s28 + $0x3668] sm:$0xff] }
 0x5ab   : > { %12706 = vmatprep.mubr.bf16.mxu0 %v17212_v25  ;;  %12993 = vmatprep.mubr.bf16.mxu1 %v17212_v25 }
 0x5ad   : > { %12677 = vmatpush1.bf16.msra.mxu0 %v15615_v30  ;;  %12964 = vmatpush1.bf16.msra.mxu1 %v15617_v31  ;;  %v15711_v30 = vcombine.low %v2068_v14, %v2076_v16  ;;  %v15713_v31 = vcombine.low %v2069_v18, %v2077_v19  ;;  %v2164_v14 = vld [vmem:[%s16694_s28 + $0x36a0] sm:$0xff]  ;;  %v2165_v18 = vld [vmem:[%s16694_s28 + $0x36a8] sm:$0xff] }
 0x5ae   : > { %12678 = vmatprep.subr.bf16.mxu0 %v15632_v33  ;;  %12965 = vmatprep.subr.bf16.mxu1 %v15634_v34  ;;  %v15728_v33 = vcombine.high %v2084_v24, %v2092_v27  ;;  %v15730_v34 = vcombine.high %v2085_v28, %v2093_v29  ;;  %v2172_v16 = vld [vmem:[%s16694_s28 + $0x36e0] sm:$0xff]  ;;  %v2173_v19 = vld [vmem:[%s16694_s28 + $0x36e8] sm:$0xff] }
 0x5b1   : > { %12679 = vmatpush1.bf16.msra.mxu0 %v15631_v42  ;;  %12966 = vmatpush1.bf16.msra.mxu1 %v15633_v43  ;;  %v15727_v42 = vcombine.low %v2084_v24, %v2092_v27  ;;  %v15729_v43 = vcombine.low %v2085_v28, %v2093_v29  ;;  %v2180_v24 = vld [vmem:[%s16694_s28 + $0x3720] sm:$0xff]  ;;  %v2181_v28 = vld [vmem:[%s16694_s28 + $0x3728] sm:$0xff] }
 0x5b2   : > { %12680 = vmatprep.subr.bf16.mxu0 %v15648_v44  ;;  %12967 = vmatprep.subr.bf16.mxu1 %v15650_v45  ;;  %v15744_v44 = vcombine.high %v2100_v35, %v2108_v37  ;;  %v15746_v45 = vcombine.high %v2101_v38, %v2109_v40  ;;  %v2188_v27 = vld [vmem:[%s16694_s28 + $0x3760] sm:$0xff]  ;;  %v2189_v29 = vld [vmem:[%s16694_s28 + $0x3768] sm:$0xff] }
 0x5b5   : > { %12681 = vmatpush1.bf16.msra.mxu0 %v15647_v54  ;;  %12968 = vmatpush1.bf16.msra.mxu1 %v15649_v55  ;;  %v15743_v54 = vcombine.low %v2100_v35, %v2108_v37  ;;  %v15745_v55 = vcombine.low %v2101_v38, %v2109_v40  ;;  %v2196_v35 = vld [vmem:[%s16694_s28 + $0x37a0] sm:$0xff]  ;;  %v2197_v38 = vld [vmem:[%s16694_s28 + $0x37a8] sm:$0xff] }
 0x5b6   : > { %12682 = vmatprep.subr.bf16.mxu0 %v15664_v56  ;;  %12969 = vmatprep.subr.bf16.mxu1 %v15666_v17  ;;  %v15760_v56 = vcombine.high %v2116_v48, %v2124_v49  ;;  %v15762_v17 = vcombine.high %v2117_v50, %v2125_v60  ;;  %v2204_v37 = vld [vmem:[%s16694_s28 + $0x37e0] sm:$0xff]  ;;  %v2205_v40 = vld [vmem:[%s16694_s28 + $0x37e8] sm:$0xff] }
 0x5b9   : > { %12683 = vmatpush1.bf16.msra.mxu0 %v15663_v2  ;;  %12970 = vmatpush1.bf16.msra.mxu1 %v15665_v3  ;;  %v15759_v2 = vcombine.low %v2116_v48, %v2124_v49  ;;  %v15761_v3 = vcombine.low %v2117_v50, %v2125_v60  ;;  %v422_v48 = vld [vmem:[%s16694_s28 + $0x30] sm:$0xff]  ;;  %v423_v50 = vld [vmem:[%s16694_s28 + $0x38] sm:$0xff] }
 0x5ba   : > { %12684 = vmatprep.subr.bf16.mxu0 %v15680_v53  ;;  %12971 = vmatprep.subr.bf16.mxu1 %v15682_v5  ;;  %v15776_v53 = vcombine.high %v2132_v58, %v2140_v62  ;;  %v15778_v5 = vcombine.high %v2133_v0, %v2141_v1  ;;  %v430_v49 = vld [vmem:[%s16694_s28 + $0x70] sm:$0xff]  ;;  %v431_v60 = vld [vmem:[%s16694_s28 + $0x78] sm:$0xff] }
 0x5bd   : > { %12685 = vmatpush1.bf16.msra.mxu0 %v15679_v10  ;;  %12972 = vmatpush1.bf16.msra.mxu1 %v15681_v12  ;;  %v15775_v10 = vcombine.low %v2132_v58, %v2140_v62  ;;  %v15777_v12 = vcombine.low %v2133_v0, %v2141_v1  ;;  %v438_v58 = vld [vmem:[%s16694_s28 + $0xb0] sm:$0xff]  ;;  %v439_v0 = vld [vmem:[%s16694_s28 + $0xb8] sm:$0xff] }
 0x5be   : > { %12686 = vmatprep.subr.bf16.mxu0 %v15696_v32  ;;  %12973 = vmatprep.subr.bf16.mxu1 %v15698_v13  ;;  %v15792_v32 = vcombine.high %v2148_v4, %v2156_v6  ;;  %v15794_v13 = vcombine.high %v2149_v8, %v2157_v9  ;;  %v446_v62 = vld [vmem:[%s16694_s28 + $0xf0] sm:$0xff]  ;;  %v447_v1 = vld [vmem:[%s16694_s28 + $0xf8] sm:$0xff] }
 0x5c1   : > { %12687 = vmatpush1.bf16.msra.mxu0 %v15695_v51  ;;  %12974 = vmatpush1.bf16.msra.mxu1 %v15697_v21  ;;  %v15791_v51 = vcombine.low %v2148_v4, %v2156_v6  ;;  %v15793_v21 = vcombine.low %v2149_v8, %v2157_v9  ;;  %v454_v4 = vld [vmem:[%s16694_s28 + $0x130] sm:$0xff]  ;;  %v455_v8 = vld [vmem:[%s16694_s28 + $0x138] sm:$0xff] }
 0x5c2   : > { %12688 = vmatprep.subr.bf16.mxu0 %v15712_v22  ;;  %12975 = vmatprep.subr.bf16.mxu1 %v15714_v23  ;;  %v15808_v22 = vcombine.high %v2164_v14, %v2172_v16  ;;  %v15810_v23 = vcombine.high %v2165_v18, %v2173_v19  ;;  %v462_v6 = vld [vmem:[%s16694_s28 + $0x170] sm:$0xff]  ;;  %v463_v9 = vld [vmem:[%s16694_s28 + $0x178] sm:$0xff] }
 0x5c5   : > { %12689 = vmatpush1.bf16.msra.mxu0 %v15711_v30  ;;  %12976 = vmatpush1.bf16.msra.mxu1 %v15713_v31  ;;  %v15807_v30 = vcombine.low %v2164_v14, %v2172_v16  ;;  %v15809_v31 = vcombine.low %v2165_v18, %v2173_v19  ;;  %v470_v14 = vld [vmem:[%s16694_s28 + $0x1b0] sm:$0xff]  ;;  %v471_v18 = vld [vmem:[%s16694_s28 + $0x1b8] sm:$0xff] }
 0x5c6   : > { %12690 = vmatprep.subr.bf16.mxu0 %v15728_v33  ;;  %12977 = vmatprep.subr.bf16.mxu1 %v15730_v34  ;;  %v15824_v33 = vcombine.high %v2180_v24, %v2188_v27  ;;  %v15826_v34 = vcombine.high %v2181_v28, %v2189_v29  ;;  %v478_v16 = vld [vmem:[%s16694_s28 + $0x1f0] sm:$0xff]  ;;  %v479_v19 = vld [vmem:[%s16694_s28 + $0x1f8] sm:$0xff] }
 0x5c9   : > { %12691 = vmatpush1.bf16.msra.mxu0 %v15727_v42  ;;  %12978 = vmatpush1.bf16.msra.mxu1 %v15729_v43  ;;  %v15823_v42 = vcombine.low %v2180_v24, %v2188_v27  ;;  %v15825_v43 = vcombine.low %v2181_v28, %v2189_v29  ;;  %v486_v24 = vld [vmem:[%s16694_s28 + $0x230] sm:$0xff]  ;;  %v487_v28 = vld [vmem:[%s16694_s28 + $0x238] sm:$0xff] }
 0x5ca   : > { %12692 = vmatprep.subr.bf16.mxu0 %v15744_v44  ;;  %12979 = vmatprep.subr.bf16.mxu1 %v15746_v45  ;;  %v15840_v44 = vcombine.high %v2196_v35, %v2204_v37  ;;  %v15842_v45 = vcombine.high %v2197_v38, %v2205_v40  ;;  %v494_v27 = vld [vmem:[%s16694_s28 + $0x270] sm:$0xff]  ;;  %v495_v29 = vld [vmem:[%s16694_s28 + $0x278] sm:$0xff] }
 0x5cd   : > { %12693 = vmatpush1.bf16.msra.mxu0 %v15743_v54  ;;  %12980 = vmatpush1.bf16.msra.mxu1 %v15745_v55  ;;  %v15839_v54 = vcombine.low %v2196_v35, %v2204_v37  ;;  %v15841_v55 = vcombine.low %v2197_v38, %v2205_v40  ;;  %v510_v35 = vld [vmem:[%s16694_s28 + $0x2f0] sm:$0xff]  ;;  %v503_v37 = vld [vmem:[%s16694_s28 + $0x2b8] sm:$0xff]  ;;  %v14131_v40 = vcombine.low %v486_v24, %v494_v27 }
 0x5ce   : > { %12694 = vmatprep.subr.bf16.mxu0 %v15760_v56  ;;  %12981 = vmatprep.subr.bf16.mxu1 %v15762_v17  ;;  %v14068_v56 = vcombine.high %v422_v48, %v430_v49  ;;  %v14070_v17 = vcombine.high %v423_v50, %v431_v60  ;;  %v511_v38 = vld [vmem:[%s16694_s28 + $0x2f8] sm:$0xff] }
 0x5d1   : > { %12695 = vmatpush1.bf16.msra.mxu0 %v15759_v2  ;;  %12982 = vmatpush1.bf16.msra.mxu1 %v15761_v3  ;;  %v14067_v2 = vcombine.low %v422_v48, %v430_v49  ;;  %v14069_v3 = vcombine.low %v423_v50, %v431_v60  ;;  %v526_v48 = vld [vmem:[%s16694_s28 + $0x370] sm:$0xff]  ;;  %v519_v49 = vld [vmem:[%s16694_s28 + $0x338] sm:$0xff] }
 0x5d2   : > { %12696 = vmatprep.subr.bf16.mxu0 %v15776_v53  ;;  %12983 = vmatprep.subr.bf16.mxu1 %v15778_v5  ;;  %v14084_v53 = vcombine.high %v438_v58, %v446_v62  ;;  %v14086_v5 = vcombine.high %v439_v0, %v447_v1  ;;  %v527_v50 = vld [vmem:[%s16694_s28 + $0x378] sm:$0xff] }
 0x5d5   : > { %12697 = vmatpush1.bf16.msra.mxu0 %v15775_v10  ;;  %12984 = vmatpush1.bf16.msra.mxu1 %v15777_v12  ;;  %v14083_v10 = vcombine.low %v438_v58, %v446_v62  ;;  %v14085_v12 = vcombine.low %v439_v0, %v447_v1  ;;  %v542_v58 = vld [vmem:[%s16694_s28 + $0x3f0] sm:$0xff]  ;;  %v535_v62 = vld [vmem:[%s16694_s28 + $0x3b8] sm:$0xff] }
 0x5d6   : > { %12698 = vmatprep.subr.bf16.mxu0 %v15792_v32  ;;  %12985 = vmatprep.subr.bf16.mxu1 %v15794_v13  ;;  %v14100_v32 = vcombine.high %v454_v4, %v462_v6  ;;  %v14102_v13 = vcombine.high %v455_v8, %v463_v9  ;;  %v543_v0 = vld [vmem:[%s16694_s28 + $0x3f8] sm:$0xff] }
 0x5d9   : > { %12699 = vmatpush1.bf16.msra.mxu0 %v15791_v51  ;;  %12986 = vmatpush1.bf16.msra.mxu1 %v15793_v21  ;;  %v14099_v51 = vcombine.low %v454_v4, %v462_v6  ;;  %v14101_v21 = vcombine.low %v455_v8, %v463_v9  ;;  %v558_v4 = vld [vmem:[%s16694_s28 + $0x470] sm:$0xff]  ;;  %v551_v6 = vld [vmem:[%s16694_s28 + $0x438] sm:$0xff] }
 0x5da   : > { %12700 = vmatprep.subr.bf16.mxu0 %v15808_v22  ;;  %12987 = vmatprep.subr.bf16.mxu1 %v15810_v23  ;;  %v14116_v22 = vcombine.high %v470_v14, %v478_v16  ;;  %v14118_v23 = vcombine.high %v471_v18, %v479_v19  ;;  %v559_v8 = vld [vmem:[%s16694_s28 + $0x478] sm:$0xff] }
 0x5dd   : > { %12701 = vmatpush1.bf16.msra.mxu0 %v15807_v30  ;;  %12988 = vmatpush1.bf16.msra.mxu1 %v15809_v31  ;;  %v14115_v30 = vcombine.low %v470_v14, %v478_v16  ;;  %v14132_v31 = vcombine.high %v486_v24, %v494_v27  ;;  %v574_v14 = vld [vmem:[%s16694_s28 + $0x4f0] sm:$0xff]  ;;  %v567_v16 = vld [vmem:[%s16694_s28 + $0x4b8] sm:$0xff] }
 0x5de   : > { %12702 = vmatprep.subr.bf16.mxu0 %v15824_v33  ;;  %12989 = vmatprep.subr.bf16.mxu1 %v15826_v34  ;;  %v14134_v33 = vcombine.high %v487_v28, %v495_v29  ;;  %v502_v34 = vld [vmem:[%s16694_s28 + $0x2b0] sm:$0xff]  ;;  %v583_v27 = vld [vmem:[%s16694_s28 + $0x538] sm:$0xff] }
 0x5df   : > { %v14147_v60 = vcombine.low %v502_v34, %v510_v35  ;;  %v590_v24 = vld [vmem:[%s16694_s28 + $0x570] sm:$0xff] }
 0x5e1   : > { %12703 = vmatpush1.bf16.msra.mxu0 %v15823_v42  ;;  %12990 = vmatpush1.bf16.msra.mxu1 %v15825_v43  ;;  %v14133_v42 = vcombine.low %v487_v28, %v495_v29  ;;  %v14148_v43 = vcombine.high %v502_v34, %v510_v35  ;;  %v591_v28 = vld [vmem:[%s16694_s28 + $0x578] sm:$0xff]  ;;  %v606_v34 = vld [vmem:[%s16694_s28 + $0x5f0] sm:$0xff] }
 0x5e2   : > { %12704 = vmatprep.subr.bf16.mxu0 %v15840_v44  ;;  %12991 = vmatprep.subr.bf16.mxu1 %v15842_v45  ;;  %v14150_v44 = vcombine.high %v503_v37, %v511_v38  ;;  %v518_v45 = vld [vmem:[%s16694_s28 + $0x330] sm:$0xff]  ;;  %v599_v35 = vld [vmem:[%s16694_s28 + $0x5b8] sm:$0xff] }
 0x5e3   : > { %v14163_v1 = vcombine.low %v518_v45, %v526_v48 }
 0x5e5   : > { %12705 = vmatpush1.bf16.msra.mxu0 %v15839_v54  ;;  %12992 = vmatpush1.bf16.msra.mxu1 %v15841_v55  ;;  %v14149_v54 = vcombine.low %v503_v37, %v511_v38  ;;  %v14164_v55 = vcombine.high %v518_v45, %v526_v48  ;;  %v607_v37 = vld [vmem:[%s16694_s28 + $0x5f8] sm:$0xff]  ;;  %v622_v45 = vld [vmem:[%s16694_s28 + $0x670] sm:$0xff] }
 0x5e6   : > { %13002 = vmatprep.subr.bf16.mxu0 %v14068_v56  ;;  %13289 = vmatprep.subr.bf16.mxu1 %v14070_v17  ;;  %v14166_v56 = vcombine.high %v519_v49, %v527_v50  ;;  %v534_v17 = vld [vmem:[%s16694_s28 + $0x3b0] sm:$0xff]  ;;  %v615_v48 = vld [vmem:[%s16694_s28 + $0x638] sm:$0xff] }
 0x5e7   : > { %v14179_v9 = vcombine.low %v534_v17, %v542_v58 }
 0x5e8   : > { %12707 = vmatmul.mubr.bf16.vlgmr.msra.gmra.mrb[8].mxu0 %v17280_v59  ;;  %12994 = vmatmul.mubr.bf16.vlgmr.msra.gmra.mrb[8].mxu1 %v17280_v59 }
 0x5e9   : > { %13003 = vmatpush1.bf16.msra.mxu0 %v14067_v2  ;;  %13290 = vmatpush1.bf16.msra.mxu1 %v14069_v3  ;;  %v14165_v2 = vcombine.low %v519_v49, %v527_v50  ;;  %v14180_v3 = vcombine.high %v534_v17, %v542_v58  ;;  %v623_v49 = vld [vmem:[%s16694_s28 + $0x678] sm:$0xff]  ;;  %v638_v17 = vld [vmem:[%s16694_s28 + $0x6f0] sm:$0xff] }
 0x5ea   : > { %13004 = vmatprep.subr.bf16.mxu0 %v14084_v53  ;;  %13291 = vmatprep.subr.bf16.mxu1 %v14086_v5  ;;  %v14182_v53 = vcombine.high %v535_v62, %v543_v0  ;;  %v550_v5 = vld [vmem:[%s16694_s28 + $0x430] sm:$0xff]  ;;  %v631_v58 = vld [vmem:[%s16694_s28 + $0x6b8] sm:$0xff] }
 0x5eb   : > { %13034 = vmatprep.mubr.bf16.mxu0 %v16762_v61  ;;  %13321 = vmatprep.mubr.bf16.mxu1 %v16762_v61  ;;  %v14117_v61 = vcombine.low %v471_v18, %v479_v19  ;;  %v575_v18 = vld [vmem:[%s16694_s28 + $0x4f8] sm:$0xff]  ;;  %v14195_v19 = vcombine.low %v550_v5, %v558_v4 }
 0x5ed   : > { %13005 = vmatpush1.bf16.msra.mxu0 %v14083_v10  ;;  %13292 = vmatpush1.bf16.msra.mxu1 %v14085_v12  ;;  %v14181_v10 = vcombine.low %v535_v62, %v543_v0  ;;  %v14196_v12 = vcombine.high %v550_v5, %v558_v4  ;;  %v639_v62 = vld [vmem:[%s16694_s28 + $0x6f8] sm:$0xff]  ;;  %v654_v5 = vld [vmem:[%s16694_s28 + $0x770] sm:$0xff] }
 0x5ee   : > { %13006 = vmatprep.subr.bf16.mxu0 %v14100_v32  ;;  %13293 = vmatprep.subr.bf16.mxu1 %v14102_v13  ;;  %v14198_v32 = vcombine.high %v551_v6, %v559_v8  ;;  %v566_v13 = vld [vmem:[%s16694_s28 + $0x4b0] sm:$0xff]  ;;  %v647_v4 = vld [vmem:[%s16694_s28 + $0x738] sm:$0xff] }
 0x5ef   : > { %v14211_v29 = vcombine.low %v566_v13, %v574_v14 }
 0x5f1   : > { %13007 = vmatpush1.bf16.msra.mxu0 %v14099_v51  ;;  %13294 = vmatpush1.bf16.msra.mxu1 %v14101_v21  ;;  %v14197_v51 = vcombine.low %v551_v6, %v559_v8  ;;  %v14212_v21 = vcombine.high %v566_v13, %v574_v14  ;;  %v655_v6 = vld [vmem:[%s16694_s28 + $0x778] sm:$0xff]  ;;  %v670_v13 = vld [vmem:[%s16694_s28 + $0x7f0] sm:$0xff] }
 0x5f2   : > { %13008 = vmatprep.subr.bf16.mxu0 %v14116_v22  ;;  %13295 = vmatprep.subr.bf16.mxu1 %v14118_v23  ;;  %v14214_v22 = vcombine.high %v567_v16, %v575_v18  ;;  %v582_v23 = vld [vmem:[%s16694_s28 + $0x530] sm:$0xff]  ;;  %v663_v14 = vld [vmem:[%s16694_s28 + $0x7b8] sm:$0xff] }
 0x5f3   : > { %v14227_v38 = vcombine.low %v582_v23, %v590_v24 }
 0x5f5   : > { %13009 = vmatpush1.bf16.msra.mxu0 %v14115_v30  ;;  %13296 = vmatpush1.bf16.msra.mxu1 %v14117_v61  ;;  %v14213_v30 = vcombine.low %v567_v16, %v575_v18  ;;  %v14228_v61 = vcombine.high %v582_v23, %v590_v24  ;;  %v671_v16 = vld [vmem:[%s16694_s28 + $0x7f8] sm:$0xff]  ;;  %v686_v23 = vld [vmem:[%s16694_s28 + $0x870] sm:$0xff] }
 0x5f6   : > { %13010 = vmatprep.subr.bf16.mxu0 %v14132_v31  ;;  %13297 = vmatprep.subr.bf16.mxu1 %v14134_v33  ;;  %v14230_v31 = vcombine.high %v583_v27, %v591_v28  ;;  %v598_v33 = vld [vmem:[%s16694_s28 + $0x5b0] sm:$0xff]  ;;  %v679_v24 = vld [vmem:[%s16694_s28 + $0x838] sm:$0xff] }
 0x5f7   : > { %v14243_v50 = vcombine.low %v598_v33, %v606_v34 }
 0x5f9   : > { %13011 = vmatpush1.bf16.msra.mxu0 %v14131_v40  ;;  %13298 = vmatpush1.bf16.msra.mxu1 %v14133_v42  ;;  %v14229_v40 = vcombine.low %v583_v27, %v591_v28  ;;  %v14244_v42 = vcombine.high %v598_v33, %v606_v34  ;;  %v687_v27 = vld [vmem:[%s16694_s28 + $0x878] sm:$0xff]  ;;  %v702_v33 = vld [vmem:[%s16694_s28 + $0x8f0] sm:$0xff] }
 0x5fa   : > { %13012 = vmatprep.subr.bf16.mxu0 %v14148_v43  ;;  %13299 = vmatprep.subr.bf16.mxu1 %v14150_v44  ;;  %v14246_v43 = vcombine.high %v599_v35, %v607_v37  ;;  %v614_v44 = vld [vmem:[%s16694_s28 + $0x630] sm:$0xff]  ;;  %v695_v34 = vld [vmem:[%s16694_s28 + $0x8b8] sm:$0xff] }
 0x5fb   : > { %v14259_v0 = vcombine.low %v614_v44, %v622_v45 }
 0x5fd   : > { %13013 = vmatpush1.bf16.msra.mxu0 %v14147_v60  ;;  %13300 = vmatpush1.bf16.msra.mxu1 %v14149_v54  ;;  %v14245_v60 = vcombine.low %v599_v35, %v607_v37  ;;  %v14260_v54 = vcombine.high %v614_v44, %v622_v45  ;;  %v703_v35 = vld [vmem:[%s16694_s28 + $0x8f8] sm:$0xff]  ;;  %v718_v44 = vld [vmem:[%s16694_s28 + $0x970] sm:$0xff] }
 0x5fe   : > { %13014 = vmatprep.subr.bf16.mxu0 %v14164_v55  ;;  %13301 = vmatprep.subr.bf16.mxu1 %v14166_v56  ;;  %v14262_v55 = vcombine.high %v615_v48, %v623_v49  ;;  %v630_v56 = vld [vmem:[%s16694_s28 + $0x6b0] sm:$0xff]  ;;  %v711_v45 = vld [vmem:[%s16694_s28 + $0x938] sm:$0xff] }
 0x5ff   : > { %v14275_v8 = vcombine.low %v630_v56, %v638_v17 }
 0x601   : > { %13015 = vmatpush1.bf16.msra.mxu0 %v14163_v1  ;;  %13302 = vmatpush1.bf16.msra.mxu1 %v14165_v2  ;;  %v14261_v1 = vcombine.low %v615_v48, %v623_v49  ;;  %v14276_v2 = vcombine.high %v630_v56, %v638_v17  ;;  %v719_v48 = vld [vmem:[%s16694_s28 + $0x978] sm:$0xff]  ;;  %v734_v56 = vld [vmem:[%s16694_s28 + $0x9f0] sm:$0xff] }
 0x602   : > { %13016 = vmatprep.subr.bf16.mxu0 %v14180_v3  ;;  %13303 = vmatprep.subr.bf16.mxu1 %v14182_v53  ;;  %v14278_v3 = vcombine.high %v631_v58, %v639_v62  ;;  %v646_v53 = vld [vmem:[%s16694_s28 + $0x730] sm:$0xff]  ;;  %v727_v17 = vld [vmem:[%s16694_s28 + $0x9b8] sm:$0xff] }
 0x603   : > { %v14291_v18 = vcombine.low %v646_v53, %v654_v5 }
 0x605   : > { %13017 = vmatpush1.bf16.msra.mxu0 %v14179_v9  ;;  %13304 = vmatpush1.bf16.msra.mxu1 %v14181_v10  ;;  %v14277_v9 = vcombine.low %v631_v58, %v639_v62  ;;  %v14292_v10 = vcombine.high %v646_v53, %v654_v5  ;;  %v735_v58 = vld [vmem:[%s16694_s28 + $0x9f8] sm:$0xff]  ;;  %v14357_v62 = vcombine.low %v711_v45, %v719_v48 }
 0x606   : > { %13018 = vmatprep.subr.bf16.mxu0 %v14196_v12  ;;  %13305 = vmatprep.subr.bf16.mxu1 %v14198_v32  ;;  %v14294_v12 = vcombine.high %v647_v4, %v655_v6  ;;  %v662_v32 = vld [vmem:[%s16694_s28 + $0x7b0] sm:$0xff]  ;;  %v743_v53 = vld [vmem:[%s16694_s28 + $0xa38] sm:$0xff] }
 0x607   : > { %v14307_v28 = vcombine.low %v662_v32, %v670_v13  ;;  %v751_v5 = vld [vmem:[%s16694_s28 + $0xa78] sm:$0xff] }
 0x609   : > { %13019 = vmatpush1.bf16.msra.mxu0 %v14195_v19  ;;  %13306 = vmatpush1.bf16.msra.mxu1 %v14197_v51  ;;  %v14293_v19 = vcombine.low %v647_v4, %v655_v6  ;;  %v14308_v51 = vcombine.high %v662_v32, %v670_v13  ;;  %v767_v32 = vld [vmem:[%s16694_s28 + $0xaf8] sm:$0xff] }
 0x60a   : > { %13020 = vmatprep.subr.bf16.mxu0 %v14212_v21  ;;  %13307 = vmatprep.subr.bf16.mxu1 %v14214_v22  ;;  %v14310_v21 = vcombine.high %v663_v14, %v671_v16  ;;  %v678_v22 = vld [vmem:[%s16694_s28 + $0x830] sm:$0xff] }
 0x60b   : > { %v14323_v37 = vcombine.low %v678_v22, %v686_v23 }
 0x60d   : > { %13021 = vmatpush1.bf16.msra.mxu0 %v14211_v29  ;;  %13308 = vmatpush1.bf16.msra.mxu1 %v14213_v30  ;;  %v14309_v29 = vcombine.low %v663_v14, %v671_v16  ;;  %v14324_v30 = vcombine.high %v678_v22, %v686_v23  ;;  %v14389_v14 = vcombine.low %v743_v53, %v751_v5  ;;  %v783_v22 = vld [vmem:[%s16694_s28 + $0xb78] sm:$0xff] }
 0x60e   : > { %13022 = vmatprep.subr.bf16.mxu0 %v14228_v61  ;;  %13309 = vmatprep.subr.bf16.mxu1 %v14230_v31  ;;  %v14326_v61 = vcombine.high %v679_v24, %v687_v27  ;;  %v694_v31 = vld [vmem:[%s16694_s28 + $0x8b0] sm:$0xff] }
 0x60f   : > { %v14339_v49 = vcombine.low %v694_v31, %v702_v33 }
 0x611   : > { %13023 = vmatpush1.bf16.msra.mxu0 %v14227_v38  ;;  %13310 = vmatpush1.bf16.msra.mxu1 %v14229_v40  ;;  %v14325_v38 = vcombine.low %v679_v24, %v687_v27  ;;  %v14340_v40 = vcombine.high %v694_v31, %v702_v33  ;;  %v799_v31 = vld [vmem:[%s16694_s28 + $0xbf8] sm:$0xff] }
 0x612   : > { %13024 = vmatprep.subr.bf16.mxu0 %v14244_v42  ;;  %13311 = vmatprep.subr.bf16.mxu1 %v14246_v43  ;;  %v14342_v42 = vcombine.high %v695_v34, %v703_v35  ;;  %v710_v43 = vld [vmem:[%s16694_s28 + $0x930] sm:$0xff] }
 0x615   : > { %13025 = vmatpush1.bf16.msra.mxu0 %v14243_v50  ;;  %13312 = vmatpush1.bf16.msra.mxu1 %v14245_v60  ;;  %v14341_v50 = vcombine.low %v695_v34, %v703_v35  ;;  %v14356_v60 = vcombine.high %v710_v43, %v718_v44 }
 0x616   : > { %13026 = vmatprep.subr.bf16.mxu0 %v14260_v54  ;;  %13313 = vmatprep.subr.bf16.mxu1 %v14262_v55  ;;  %v14358_v54 = vcombine.high %v711_v45, %v719_v48  ;;  %v726_v55 = vld [vmem:[%s16694_s28 + $0x9b0] sm:$0xff] }
 0x617   : > { %v14371_v4 = vcombine.low %v726_v55, %v734_v56 }
 0x619   : > { %13027 = vmatpush1.bf16.msra.mxu0 %v14259_v0  ;;  %13314 = vmatpush1.bf16.msra.mxu1 %v14261_v1  ;;  %v14372_v0 = vcombine.high %v726_v55, %v734_v56  ;;  %v14374_v1 = vcombine.high %v727_v17, %v735_v58  ;;  %v831_v55 = vld [vmem:[%s16694_s28 + $0xcf8] sm:$0xff] }
 0x61a   : > { %13028 = vmatprep.subr.bf16.mxu0 %v14276_v2  ;;  %13315 = vmatprep.subr.bf16.mxu1 %v14278_v3  ;;  %v742_v2 = vld [vmem:[%s16694_s28 + $0xa30] sm:$0xff] }
 0x61b   : > { %v750_v3 = vld [vmem:[%s16694_s28 + $0xa70] sm:$0xff] }
 0x61c   : > { %v14388_v6 = vcombine.high %v742_v2, %v750_v3  ;;  %v14387_v13 = vcombine.low %v742_v2, %v750_v3  ;;  %v847_v2 = vld [vmem:[%s16694_s28 + $0xd78] sm:$0xff] }
 0x61d   : > { %13029 = vmatpush1.bf16.msra.mxu0 %v14275_v8  ;;  %13316 = vmatpush1.bf16.msra.mxu1 %v14277_v9  ;;  %v14390_v8 = vcombine.high %v743_v53, %v751_v5  ;;  %v758_v9 = vld [vmem:[%s16694_s28 + $0xab0] sm:$0xff] }
 0x61e   : > { %13030 = vmatprep.subr.bf16.mxu0 %v14292_v10  ;;  %13317 = vmatprep.subr.bf16.mxu1 %v14294_v12  ;;  %v766_v10 = vld [vmem:[%s16694_s28 + $0xaf0] sm:$0xff]  ;;  %v759_v12 = vld [vmem:[%s16694_s28 + $0xab8] sm:$0xff] }
 0x61f   : > { %v14404_v16 = vcombine.high %v758_v9, %v766_v10  ;;  %v14403_v23 = vcombine.low %v758_v9, %v766_v10  ;;  %v14405_v24 = vcombine.low %v759_v12, %v767_v32  ;;  %v863_v9 = vld [vmem:[%s16694_s28 + $0xdf8] sm:$0xff] }
 0x621   : > { %13031 = vmatpush1.bf16.msra.mxu0 %v14291_v18  ;;  %13318 = vmatpush1.bf16.msra.mxu1 %v14293_v19  ;;  %v14406_v18 = vcombine.high %v759_v12, %v767_v32  ;;  %v774_v19 = vld [vmem:[%s16694_s28 + $0xb30] sm:$0xff] }
 0x622   : > { %13032 = vmatprep.subr.bf16.mxu0 %v14308_v51  ;;  %13319 = vmatprep.subr.bf16.mxu1 %v14310_v21  ;;  %v782_v51 = vld [vmem:[%s16694_s28 + $0xb70] sm:$0xff]  ;;  %v775_v21 = vld [vmem:[%s16694_s28 + $0xb38] sm:$0xff] }
 0x623   : > { %v14420_v27 = vcombine.high %v774_v19, %v782_v51  ;;  %v14419_v33 = vcombine.low %v774_v19, %v782_v51  ;;  %v14421_v34 = vcombine.low %v775_v21, %v783_v22  ;;  %v879_v19 = vld [vmem:[%s16694_s28 + $0xe78] sm:$0xff] }
 0x625   : > { %13033 = vmatpush1.bf16.msra.mxu0 %v14307_v28  ;;  %13320 = vmatpush1.bf16.msra.mxu1 %v14309_v29  ;;  %v14422_v28 = vcombine.high %v775_v21, %v783_v22  ;;  %v790_v29 = vld [vmem:[%s16694_s28 + $0xbb0] sm:$0xff] }
 0x626   : > { %13043 = vmatprep.subr.bf16.mxu0 %v14324_v30  ;;  %13330 = vmatprep.subr.bf16.mxu1 %v14326_v61  ;;  %v798_v30 = vld [vmem:[%s16694_s28 + $0xbf0] sm:$0xff]  ;;  %v791_v61 = vld [vmem:[%s16694_s28 + $0xbb8] sm:$0xff] }
 0x627   : > { %v14436_v35 = vcombine.high %v790_v29, %v798_v30  ;;  %v14437_v45 = vcombine.low %v791_v61, %v799_v31 }
 0x628   : > { %13035 = vmatmul.mubr.bf16.vlgmr.msra.gmra.mrb[12].mxu0 %v16804_v11  ;;  %13322 = vmatmul.mubr.bf16.vlgmr.msra.gmra.mrb[12].mxu1 %v16804_v11  ;;  %v14355_v11 = vcombine.low %v710_v43, %v718_v44  ;;  %v815_v43 = vld [vmem:[%s16694_s28 + $0xc78] sm:$0xff]  ;;  %v14435_v44 = vcombine.low %v790_v29, %v798_v30 }
 0x629   : > { %13044 = vmatpush1.bf16.msra.mxu0 %v14323_v37  ;;  %13331 = vmatpush1.bf16.msra.mxu1 %v14325_v38  ;;  %v14438_v37 = vcombine.high %v791_v61, %v799_v31  ;;  %v806_v38 = vld [vmem:[%s16694_s28 + $0xc30] sm:$0xff]  ;;  %v895_v29 = vld [vmem:[%s16694_s28 + $0xef8] sm:$0xff] }
 0x62a   : > { %13045 = vmatprep.subr.bf16.mxu0 %v14340_v40  ;;  %13332 = vmatprep.subr.bf16.mxu1 %v14342_v42  ;;  %v814_v40 = vld [vmem:[%s16694_s28 + $0xc70] sm:$0xff]  ;;  %v807_v42 = vld [vmem:[%s16694_s28 + $0xc38] sm:$0xff] }
 0x62b   : > { %13075 = vmatprep.mubr.bf16.mxu0 %v16812_v20  ;;  %13362 = vmatprep.mubr.bf16.mxu1 %v16812_v20  ;;  %v14373_v20 = vcombine.low %v727_v17, %v735_v58  ;;  %v14452_v48 = vcombine.high %v806_v38, %v814_v40  ;;  %v14451_v56 = vcombine.low %v806_v38, %v814_v40  ;;  %v911_v38 = vld [vmem:[%s16694_s28 + $0xf78] sm:$0xff] }
 0x62c   : > { %v14453_v17 = vcombine.low %v807_v42, %v815_v43 }
 0x62d   : > { %13046 = vmatpush1.bf16.msra.mxu0 %v14339_v49  ;;  %13333 = vmatpush1.bf16.msra.mxu1 %v14341_v50  ;;  %v14454_v49 = vcombine.high %v807_v42, %v815_v43  ;;  %v822_v50 = vld [vmem:[%s16694_s28 + $0xcb0] sm:$0xff] }
 0x62e   : > { %13047 = vmatprep.subr.bf16.mxu0 %v14356_v60  ;;  %13334 = vmatprep.subr.bf16.mxu1 %v14358_v54  ;;  %v830_v60 = vld [vmem:[%s16694_s28 + $0xcf0] sm:$0xff]  ;;  %v823_v54 = vld [vmem:[%s16694_s28 + $0xcb8] sm:$0xff] }
 0x62f   : > { %v14468_v58 = vcombine.high %v822_v50, %v830_v60  ;;  %v14467_v3 = vcombine.low %v822_v50, %v830_v60  ;;  %v14469_v53 = vcombine.low %v823_v54, %v831_v55  ;;  %v927_v50 = vld [vmem:[%s16694_s28 + $0xff8] sm:$0xff] }
 0x631   : > { %13048 = vmatpush1.bf16.msra.mxu0 %v14355_v11  ;;  %13335 = vmatpush1.bf16.msra.mxu1 %v14357_v62  ;;  %v14470_v11 = vcombine.high %v823_v54, %v831_v55  ;;  %v838_v62 = vld [vmem:[%s16694_s28 + $0xd30] sm:$0xff] }
 0x632   : > { %13049 = vmatprep.subr.bf16.mxu0 %v14372_v0  ;;  %13336 = vmatprep.subr.bf16.mxu1 %v14374_v1  ;;  %v846_v0 = vld [vmem:[%s16694_s28 + $0xd70] sm:$0xff]  ;;  %v839_v1 = vld [vmem:[%s16694_s28 + $0xd38] sm:$0xff] }
 0x633   : > { %v14484_v5 = vcombine.high %v838_v62, %v846_v0  ;;  %v14483_v10 = vcombine.low %v838_v62, %v846_v0  ;;  %v14485_v12 = vcombine.low %v839_v1, %v847_v2  ;;  %v943_v62 = vld [vmem:[%s16694_s28 + $0x1078] sm:$0xff] }
 0x635   : > { %13050 = vmatpush1.bf16.msra.mxu0 %v14371_v4  ;;  %13337 = vmatpush1.bf16.msra.mxu1 %v14373_v20  ;;  %v14486_v4 = vcombine.high %v839_v1, %v847_v2  ;;  %v854_v20 = vld [vmem:[%s16694_s28 + $0xdb0] sm:$0xff] }
 0x636   : > { %13051 = vmatprep.subr.bf16.mxu0 %v14388_v6  ;;  %13338 = vmatprep.subr.bf16.mxu1 %v14390_v8  ;;  %v862_v6 = vld [vmem:[%s16694_s28 + $0xdf0] sm:$0xff]  ;;  %v855_v8 = vld [vmem:[%s16694_s28 + $0xdb8] sm:$0xff] }
 0x637   : > { %v14500_v32 = vcombine.high %v854_v20, %v862_v6  ;;  %v14499_v51 = vcombine.low %v854_v20, %v862_v6  ;;  %v14501_v21 = vcombine.low %v855_v8, %v863_v9  ;;  %v959_v20 = vld [vmem:[%s16694_s28 + $0x10f8] sm:$0xff] }
 0x639   : > { %13052 = vmatpush1.bf16.msra.mxu0 %v14387_v13  ;;  %13339 = vmatpush1.bf16.msra.mxu1 %v14389_v14  ;;  %v14502_v13 = vcombine.high %v855_v8, %v863_v9  ;;  %v870_v14 = vld [vmem:[%s16694_s28 + $0xe30] sm:$0xff] }
 0x63a   : > { %13053 = vmatprep.subr.bf16.mxu0 %v14404_v16  ;;  %13340 = vmatprep.subr.bf16.mxu1 %v14406_v18  ;;  %v878_v16 = vld [vmem:[%s16694_s28 + $0xe70] sm:$0xff]  ;;  %v871_v18 = vld [vmem:[%s16694_s28 + $0xe38] sm:$0xff] }
 0x63b   : > { %v14516_v22 = vcombine.high %v870_v14, %v878_v16  ;;  %v14515_v30 = vcombine.low %v870_v14, %v878_v16  ;;  %v14517_v61 = vcombine.low %v871_v18, %v879_v19  ;;  %v975_v14 = vld [vmem:[%s16694_s28 + $0x1178] sm:$0xff] }
 0x63d   : > { %13054 = vmatpush1.bf16.msra.mxu0 %v14403_v23  ;;  %13341 = vmatpush1.bf16.msra.mxu1 %v14405_v24  ;;  %v14518_v23 = vcombine.high %v871_v18, %v879_v19  ;;  %v886_v24 = vld [vmem:[%s16694_s28 + $0xeb0] sm:$0xff] }
 0x63e   : > { %13055 = vmatprep.subr.bf16.mxu0 %v14420_v27  ;;  %13342 = vmatprep.subr.bf16.mxu1 %v14422_v28  ;;  %v894_v27 = vld [vmem:[%s16694_s28 + $0xef0] sm:$0xff]  ;;  %v887_v28 = vld [vmem:[%s16694_s28 + $0xeb8] sm:$0xff] }
 0x63f   : > { %v14532_v31 = vcombine.high %v886_v24, %v894_v27  ;;  %v14531_v40 = vcombine.low %v886_v24, %v894_v27  ;;  %v14533_v42 = vcombine.low %v887_v28, %v895_v29  ;;  %v991_v24 = vld [vmem:[%s16694_s28 + $0x11f8] sm:$0xff] }
 0x641   : > { %13056 = vmatpush1.bf16.msra.mxu0 %v14419_v33  ;;  %13343 = vmatpush1.bf16.msra.mxu1 %v14421_v34  ;;  %v14534_v33 = vcombine.high %v887_v28, %v895_v29  ;;  %v902_v34 = vld [vmem:[%s16694_s28 + $0xf30] sm:$0xff] }
 0x642   : > { %13057 = vmatprep.subr.bf16.mxu0 %v14436_v35  ;;  %13344 = vmatprep.subr.bf16.mxu1 %v14438_v37  ;;  %v910_v35 = vld [vmem:[%s16694_s28 + $0xf70] sm:$0xff]  ;;  %v903_v37 = vld [vmem:[%s16694_s28 + $0xf38] sm:$0xff] }
 0x643   : > { %v14548_v43 = vcombine.high %v902_v34, %v910_v35  ;;  %v14547_v60 = vcombine.low %v902_v34, %v910_v35  ;;  %v14549_v54 = vcombine.low %v903_v37, %v911_v38 }
 0x645   : > { %13058 = vmatpush1.bf16.msra.mxu0 %v14435_v44  ;;  %13345 = vmatpush1.bf16.msra.mxu1 %v14437_v45  ;;  %v14550_v44 = vcombine.high %v903_v37, %v911_v38  ;;  %v918_v45 = vld [vmem:[%s16694_s28 + $0xfb0] sm:$0xff] }
 0x646   : > { %13059 = vmatprep.subr.bf16.mxu0 %v14452_v48  ;;  %13346 = vmatprep.subr.bf16.mxu1 %v14454_v49  ;;  %v926_v48 = vld [vmem:[%s16694_s28 + $0xff0] sm:$0xff]  ;;  %v919_v49 = vld [vmem:[%s16694_s28 + $0xfb8] sm:$0xff] }
 0x647   : > { %v14564_v55 = vcombine.high %v918_v45, %v926_v48  ;;  %v14563_v0 = vcombine.low %v918_v45, %v926_v48  ;;  %v14565_v1 = vcombine.low %v919_v49, %v927_v50  ;;  %v1014_v38 = vld [vmem:[%s16694_s28 + $0x12b0] sm:$0xff] }
 0x649   : > { %13060 = vmatpush1.bf16.msra.mxu0 %v14451_v56  ;;  %13347 = vmatpush1.bf16.msra.mxu1 %v14453_v17  ;;  %v14566_v56 = vcombine.high %v919_v49, %v927_v50  ;;  %v934_v17 = vld [vmem:[%s16694_s28 + $0x1030] sm:$0xff] }
 0x64a   : > { %13061 = vmatprep.subr.bf16.mxu0 %v14468_v58  ;;  %13348 = vmatprep.subr.bf16.mxu1 %v14470_v11  ;;  %v942_v58 = vld [vmem:[%s16694_s28 + $0x1070] sm:$0xff]  ;;  %v935_v11 = vld [vmem:[%s16694_s28 + $0x1038] sm:$0xff] }
 0x64b   : > { %v14580_v2 = vcombine.high %v934_v17, %v942_v58  ;;  %v14579_v6 = vcombine.low %v934_v17, %v942_v58  ;;  %v14581_v8 = vcombine.low %v935_v11, %v943_v62  ;;  %v1030_v50 = vld [vmem:[%s16694_s28 + $0x1330] sm:$0xff] }
 0x64d   : > { %13062 = vmatpush1.bf16.msra.mxu0 %v14467_v3  ;;  %13349 = vmatpush1.bf16.msra.mxu1 %v14469_v53  ;;  %v14582_v3 = vcombine.high %v935_v11, %v943_v62  ;;  %v950_v53 = vld [vmem:[%s16694_s28 + $0x10b0] sm:$0xff] }
 0x64e   : > { %13063 = vmatprep.subr.bf16.mxu0 %v14484_v5  ;;  %13350 = vmatprep.subr.bf16.mxu1 %v14486_v4  ;;  %v958_v5 = vld [vmem:[%s16694_s28 + $0x10f0] sm:$0xff]  ;;  %v951_v4 = vld [vmem:[%s16694_s28 + $0x10b8] sm:$0xff] }
 0x64f   : > { %v14596_v9 = vcombine.high %v950_v53, %v958_v5  ;;  %v14595_v16 = vcombine.low %v950_v53, %v958_v5  ;;  %v14597_v18 = vcombine.low %v951_v4, %v959_v20  ;;  %v1046_v62 = vld [vmem:[%s16694_s28 + $0x13b0] sm:$0xff] }
 0x651   : > { %13064 = vmatpush1.bf16.msra.mxu0 %v14483_v10  ;;  %13351 = vmatpush1.bf16.msra.mxu1 %v14485_v12  ;;  %v14598_v10 = vcombine.high %v951_v4, %v959_v20  ;;  %v966_v12 = vld [vmem:[%s16694_s28 + $0x1130] sm:$0xff] }
 0x652   : > { %13065 = vmatprep.subr.bf16.mxu0 %v14500_v32  ;;  %13352 = vmatprep.subr.bf16.mxu1 %v14502_v13  ;;  %v974_v32 = vld [vmem:[%s16694_s28 + $0x1170] sm:$0xff]  ;;  %v967_v13 = vld [vmem:[%s16694_s28 + $0x1138] sm:$0xff] }
 0x653   : > { %v14612_v19 = vcombine.high %v966_v12, %v974_v32  ;;  %v14613_v27 = vcombine.low %v967_v13, %v975_v14  ;;  %v1062_v20 = vld [vmem:[%s16694_s28 + $0x1430] sm:$0xff] }
 0x655   : > { %13066 = vmatpush1.bf16.msra.mxu0 %v14499_v51  ;;  %13353 = vmatpush1.bf16.msra.mxu1 %v14501_v21  ;;  %v14614_v51 = vcombine.high %v967_v13, %v975_v14  ;;  %v982_v21 = vld [vmem:[%s16694_s28 + $0x11b0] sm:$0xff] }
 0x656   : > { %13067 = vmatprep.subr.bf16.mxu0 %v14516_v22  ;;  %13354 = vmatprep.subr.bf16.mxu1 %v14518_v23  ;;  %v990_v22 = vld [vmem:[%s16694_s28 + $0x11f0] sm:$0xff]  ;;  %v983_v23 = vld [vmem:[%s16694_s28 + $0x11b8] sm:$0xff] }
 0x657   : > { %v14628_v28 = vcombine.high %v982_v21, %v990_v22  ;;  %v14630_v29 = vcombine.high %v983_v23, %v991_v24  ;;  %v14627_v34 = vcombine.low %v982_v21, %v990_v22  ;;  %v1078_v14 = vld [vmem:[%s16694_s28 + $0x14b0] sm:$0xff] }
 0x659   : > { %13068 = vmatpush1.bf16.msra.mxu0 %v14515_v30  ;;  %13355 = vmatpush1.bf16.msra.mxu1 %v14517_v61  ;;  %v998_v30 = vld [vmem:[%s16694_s28 + $0x1230] sm:$0xff] }
 0x65a   : > { %13069 = vmatprep.subr.bf16.mxu0 %v14532_v31  ;;  %13356 = vmatprep.subr.bf16.mxu1 %v14534_v33  ;;  %v1006_v61 = vld [vmem:[%s16694_s28 + $0x1270] sm:$0xff]  ;;  %v999_v31 = vld [vmem:[%s16694_s28 + $0x1238] sm:$0xff] }
 0x65b   : > { %v1007_v33 = vld [vmem:[%s16694_s28 + $0x1278] sm:$0xff]  ;;  %v14644_v35 = vcombine.high %v998_v30, %v1006_v61 }
 0x65c   : > { %v14646_v37 = vcombine.high %v999_v31, %v1007_v33  ;;  %v14645_v45 = vcombine.low %v999_v31, %v1007_v33  ;;  %v1110_v33 = vld [vmem:[%s16694_s28 + $0x15b0] sm:$0xff] }
 0x65d   : > { %13070 = vmatpush1.bf16.msra.mxu0 %v14531_v40  ;;  %13357 = vmatpush1.bf16.msra.mxu1 %v14533_v42  ;;  %v1022_v40 = vld [vmem:[%s16694_s28 + $0x12f0] sm:$0xff]  ;;  %v1015_v42 = vld [vmem:[%s16694_s28 + $0x12b8] sm:$0xff] }
 0x65e   : > { %13071 = vmatprep.subr.bf16.mxu0 %v14548_v43  ;;  %13358 = vmatprep.subr.bf16.mxu1 %v14550_v44  ;;  %v1023_v43 = vld [vmem:[%s16694_s28 + $0x12f8] sm:$0xff]  ;;  %v14643_v44 = vcombine.low %v998_v30, %v1006_v61  ;;  %v14660_v48 = vcombine.high %v1014_v38, %v1022_v40 }
 0x65f   : > { %v14662_v49 = vcombine.high %v1015_v42, %v1023_v43  ;;  %v14661_v17 = vcombine.low %v1015_v42, %v1023_v43  ;;  %v1126_v43 = vld [vmem:[%s16694_s28 + $0x1630] sm:$0xff] }
 0x661   : > { %13072 = vmatpush1.bf16.msra.mxu0 %v14547_v60  ;;  %13359 = vmatpush1.bf16.msra.mxu1 %v14549_v54  ;;  %v1038_v60 = vld [vmem:[%s16694_s28 + $0x1370] sm:$0xff]  ;;  %v1031_v54 = vld [vmem:[%s16694_s28 + $0x1338] sm:$0xff] }
 0x662   : > { %13073 = vmatprep.subr.bf16.mxu0 %v14564_v55  ;;  %13360 = vmatprep.subr.bf16.mxu1 %v14566_v56  ;;  %v1039_v55 = vld [vmem:[%s16694_s28 + $0x1378] sm:$0xff]  ;;  %v14659_v56 = vcombine.low %v1014_v38, %v1022_v40  ;;  %v14676_v58 = vcombine.high %v1030_v50, %v1038_v60 }
 0x663   : > { %v14678_v11 = vcombine.high %v1031_v54, %v1039_v55  ;;  %v14677_v53 = vcombine.low %v1031_v54, %v1039_v55  ;;  %v1142_v55 = vld [vmem:[%s16694_s28 + $0x16b0] sm:$0xff] }
 0x665   : > { %13074 = vmatpush1.bf16.msra.mxu0 %v14563_v0  ;;  %13361 = vmatpush1.bf16.msra.mxu1 %v14565_v1  ;;  %v1054_v0 = vld [vmem:[%s16694_s28 + $0x13f0] sm:$0xff]  ;;  %v1047_v1 = vld [vmem:[%s16694_s28 + $0x13b8] sm:$0xff] }
 0x666   : > { %13084 = vmatprep.subr.bf16.mxu0 %v14580_v2  ;;  %13371 = vmatprep.subr.bf16.mxu1 %v14582_v3  ;;  %v1055_v2 = vld [vmem:[%s16694_s28 + $0x13f8] sm:$0xff]  ;;  %v14675_v3 = vcombine.low %v1030_v50, %v1038_v60  ;;  %v14692_v5 = vcombine.high %v1046_v62, %v1054_v0 }
 0x667   : > { %v14694_v4 = vcombine.high %v1047_v1, %v1055_v2 }
 0x668   : > { %13076 = vmatmul.mubr.bf16.vlgmr.msra.gmra.mrb[12].mxu0 %v16887_v26  ;;  %13363 = vmatmul.mubr.bf16.vlgmr.msra.gmra.mrb[12].mxu1 %v16887_v26  ;;  %v14611_v26 = vcombine.low %v966_v12, %v974_v32  ;;  %v14693_v12 = vcombine.low %v1047_v1, %v1055_v2  ;;  %v1158_v2 = vld [vmem:[%s16694_s28 + $0x1730] sm:$0xff] }
 0x669   : > { %13085 = vmatpush1.bf16.msra.mxu0 %v14579_v6  ;;  %13372 = vmatpush1.bf16.msra.mxu1 %v14581_v8  ;;  %v1070_v6 = vld [vmem:[%s16694_s28 + $0x1470] sm:$0xff]  ;;  %v1063_v8 = vld [vmem:[%s16694_s28 + $0x1438] sm:$0xff] }
 0x66a   : > { %13086 = vmatprep.subr.bf16.mxu0 %v14596_v9  ;;  %13373 = vmatprep.subr.bf16.mxu1 %v14598_v10  ;;  %v1071_v9 = vld [vmem:[%s16694_s28 + $0x1478] sm:$0xff]  ;;  %v14691_v10 = vcombine.low %v1046_v62, %v1054_v0  ;;  %v14708_v32 = vcombine.high %v1062_v20, %v1070_v6 }
 0x66b   : > { %13116 = vmatprep.mubr.bf16.mxu0 %v16894_v36  ;;  %13403 = vmatprep.mubr.bf16.mxu1 %v16894_v36  ;;  %v14629_v36 = vcombine.low %v983_v23, %v991_v24  ;;  %v14710_v13 = vcombine.high %v1063_v8, %v1071_v9  ;;  %v14709_v21 = vcombine.low %v1063_v8, %v1071_v9  ;;  %v1094_v24 = vld [vmem:[%s16694_s28 + $0x1530] sm:$0xff] }
 0x66c   : > { %v1174_v9 = vld [vmem:[%s16694_s28 + $0x17b0] sm:$0xff] }
 0x66d   : > { %13087 = vmatpush1.bf16.msra.mxu0 %v14595_v16  ;;  %13374 = vmatpush1.bf16.msra.mxu1 %v14597_v18  ;;  %v1086_v16 = vld [vmem:[%s16694_s28 + $0x14f0] sm:$0xff]  ;;  %v1079_v18 = vld [vmem:[%s16694_s28 + $0x14b8] sm:$0xff] }
 0x66e   : > { %13088 = vmatprep.subr.bf16.mxu0 %v14612_v19  ;;  %13375 = vmatprep.subr.bf16.mxu1 %v14614_v51  ;;  %v1087_v19 = vld [vmem:[%s16694_s28 + $0x14f8] sm:$0xff]  ;;  %v14707_v51 = vcombine.low %v1062_v20, %v1070_v6  ;;  %v14724_v22 = vcombine.high %v1078_v14, %v1086_v16 }
 0x66f   : > { %v14726_v23 = vcombine.high %v1079_v18, %v1087_v19  ;;  %v14725_v30 = vcombine.low %v1079_v18, %v1087_v19  ;;  %v1190_v19 = vld [vmem:[%s16694_s28 + $0x1830] sm:$0xff] }
 0x671   : > { %13089 = vmatpush1.bf16.msra.mxu0 %v14611_v26  ;;  %13376 = vmatpush1.bf16.msra.mxu1 %v14613_v27  ;;  %v1102_v26 = vld [vmem:[%s16694_s28 + $0x1570] sm:$0xff]  ;;  %v1095_v27 = vld [vmem:[%s16694_s28 + $0x1538] sm:$0xff] }
 0x672   : > { %13090 = vmatprep.subr.bf16.mxu0 %v14628_v28  ;;  %13377 = vmatprep.subr.bf16.mxu1 %v14630_v29  ;;  %v1103_v28 = vld [vmem:[%s16694_s28 + $0x1578] sm:$0xff]  ;;  %v14723_v29 = vcombine.low %v1078_v14, %v1086_v16  ;;  %v14740_v61 = vcombine.high %v1094_v24, %v1102_v26 }
 0x673   : > { %v14742_v31 = vcombine.high %v1095_v27, %v1103_v28  ;;  %v14741_v38 = vcombine.low %v1095_v27, %v1103_v28  ;;  %v1206_v28 = vld [vmem:[%s16694_s28 + $0x18b0] sm:$0xff] }
 0x675   : > { %13091 = vmatpush1.bf16.msra.mxu0 %v14627_v34  ;;  %13378 = vmatpush1.bf16.msra.mxu1 %v14629_v36  ;;  %v1118_v34 = vld [vmem:[%s16694_s28 + $0x15f0] sm:$0xff]  ;;  %v1111_v36 = vld [vmem:[%s16694_s28 + $0x15b8] sm:$0xff] }
 0x676   : > { %13092 = vmatprep.subr.bf16.mxu0 %v14644_v35  ;;  %13379 = vmatprep.subr.bf16.mxu1 %v14646_v37  ;;  %v1119_v35 = vld [vmem:[%s16694_s28 + $0x15f8] sm:$0xff]  ;;  %v14739_v37 = vcombine.low %v1094_v24, %v1102_v26  ;;  %v14756_v40 = vcombine.high %v1110_v33, %v1118_v34 }
 0x677   : > { %v14758_v42 = vcombine.high %v1111_v36, %v1119_v35  ;;  %v14757_v50 = vcombine.low %v1111_v36, %v1119_v35  ;;  %v1222_v35 = vld [vmem:[%s16694_s28 + $0x1930] sm:$0xff] }
 0x679   : > { %13093 = vmatpush1.bf16.msra.mxu0 %v14643_v44  ;;  %13380 = vmatpush1.bf16.msra.mxu1 %v14645_v45  ;;  %v1134_v44 = vld [vmem:[%s16694_s28 + $0x1670] sm:$0xff]  ;;  %v1127_v45 = vld [vmem:[%s16694_s28 + $0x1638] sm:$0xff] }
 0x67a   : > { %13094 = vmatprep.subr.bf16.mxu0 %v14660_v48  ;;  %13381 = vmatprep.subr.bf16.mxu1 %v14662_v49  ;;  %v1135_v48 = vld [vmem:[%s16694_s28 + $0x1678] sm:$0xff]  ;;  %v14755_v49 = vcombine.low %v1110_v33, %v1118_v34  ;;  %v14772_v60 = vcombine.high %v1126_v43, %v1134_v44 }
 0x67b   : > { %v14774_v54 = vcombine.high %v1127_v45, %v1135_v48  ;;  %v14773_v62 = vcombine.low %v1127_v45, %v1135_v48  ;;  %v1238_v48 = vld [vmem:[%s16694_s28 + $0x19b0] sm:$0xff] }
 0x67d   : > { %13095 = vmatpush1.bf16.msra.mxu0 %v14659_v56  ;;  %13382 = vmatpush1.bf16.msra.mxu1 %v14661_v17  ;;  %v1150_v56 = vld [vmem:[%s16694_s28 + $0x16f0] sm:$0xff]  ;;  %v1143_v17 = vld [vmem:[%s16694_s28 + $0x16b8] sm:$0xff] }
 0x67e   : > { %13096 = vmatprep.subr.bf16.mxu0 %v14676_v58  ;;  %13383 = vmatprep.subr.bf16.mxu1 %v14678_v11  ;;  %v1151_v58 = vld [vmem:[%s16694_s28 + $0x16f8] sm:$0xff]  ;;  %v14771_v11 = vcombine.low %v1126_v43, %v1134_v44  ;;  %v14788_v0 = vcombine.high %v1142_v55, %v1150_v56 }
 0x67f   : > { %v14790_v1 = vcombine.high %v1143_v17, %v1151_v58  ;;  %v14789_v20 = vcombine.low %v1143_v17, %v1151_v58  ;;  %v1254_v17 = vld [vmem:[%s16694_s28 + $0x1a30] sm:$0xff] }
 0x680   : > { %v1262_v58 = vld [vmem:[%s16694_s28 + $0x1a70] sm:$0xff] }
 0x681   : > { %13097 = vmatpush1.bf16.msra.mxu0 %v14675_v3  ;;  %13384 = vmatpush1.bf16.msra.mxu1 %v14677_v53  ;;  %v1166_v3 = vld [vmem:[%s16694_s28 + $0x1770] sm:$0xff]  ;;  %v1159_v53 = vld [vmem:[%s16694_s28 + $0x1738] sm:$0xff] }
 0x682   : > { %13098 = vmatprep.subr.bf16.mxu0 %v14692_v5  ;;  %13385 = vmatprep.subr.bf16.mxu1 %v14694_v4  ;;  %v1167_v5 = vld [vmem:[%s16694_s28 + $0x1778] sm:$0xff]  ;;  %v14787_v4 = vcombine.low %v1142_v55, %v1150_v56  ;;  %v14804_v6 = vcombine.high %v1158_v2, %v1166_v3 }
 0x683   : > { %v14806_v8 = vcombine.high %v1159_v53, %v1167_v5  ;;  %v14805_v14 = vcombine.low %v1159_v53, %v1167_v5  ;;  %v1278_v53 = vld [vmem:[%s16694_s28 + $0x1af0] sm:$0xff]  ;;  %v1271_v5 = vld [vmem:[%s16694_s28 + $0x1ab8] sm:$0xff] }
 0x685   : > { %13099 = vmatpush1.bf16.msra.mxu0 %v14691_v10  ;;  %13386 = vmatpush1.bf16.msra.mxu1 %v14693_v12  ;;  %v1182_v10 = vld [vmem:[%s16694_s28 + $0x17f0] sm:$0xff]  ;;  %v1175_v12 = vld [vmem:[%s16694_s28 + $0x17b8] sm:$0xff] }
 0x686   : > { %13100 = vmatprep.subr.bf16.mxu0 %v14708_v32  ;;  %13387 = vmatprep.subr.bf16.mxu1 %v14710_v13  ;;  %v1183_v32 = vld [vmem:[%s16694_s28 + $0x17f8] sm:$0xff]  ;;  %v14803_v13 = vcombine.low %v1158_v2, %v1166_v3  ;;  %v14820_v16 = vcombine.high %v1174_v9, %v1182_v10  ;;  %v1270_v3 = vld [vmem:[%s16694_s28 + $0x1ab0] sm:$0xff] }
 0x687   : > { %v14822_v18 = vcombine.high %v1175_v12, %v1183_v32  ;;  %v14821_v24 = vcombine.low %v1175_v12, %v1183_v32  ;;  %v1294_v12 = vld [vmem:[%s16694_s28 + $0x1b70] sm:$0xff]  ;;  %v1287_v32 = vld [vmem:[%s16694_s28 + $0x1b38] sm:$0xff] }
 0x689   : > { %13101 = vmatpush1.bf16.msra.mxu0 %v14707_v51  ;;  %13388 = vmatpush1.bf16.msra.mxu1 %v14709_v21  ;;  %v1198_v51 = vld [vmem:[%s16694_s28 + $0x1870] sm:$0xff]  ;;  %v1191_v21 = vld [vmem:[%s16694_s28 + $0x1838] sm:$0xff] }
 0x68a   : > { %13102 = vmatprep.subr.bf16.mxu0 %v14724_v22  ;;  %13389 = vmatprep.subr.bf16.mxu1 %v14726_v23  ;;  %v1199_v22 = vld [vmem:[%s16694_s28 + $0x1878] sm:$0xff]  ;;  %v14819_v23 = vcombine.low %v1174_v9, %v1182_v10  ;;  %v14836_v26 = vcombine.high %v1190_v19, %v1198_v51  ;;  %v1286_v10 = vld [vmem:[%s16694_s28 + $0x1b30] sm:$0xff] }
 0x68b   : > { %v14838_v27 = vcombine.high %v1191_v21, %v1199_v22  ;;  %v14837_v33 = vcombine.low %v1191_v21, %v1199_v22  ;;  %v1302_v21 = vld [vmem:[%s16694_s28 + $0x1bb0] sm:$0xff] }
 0x68c   : > { %v1310_v22 = vld [vmem:[%s16694_s28 + $0x1bf0] sm:$0xff] }
 0x68d   : > { %13103 = vmatpush1.bf16.msra.mxu0 %v14723_v29  ;;  %13390 = vmatpush1.bf16.msra.mxu1 %v14725_v30  ;;  %v1214_v29 = vld [vmem:[%s16694_s28 + $0x18f0] sm:$0xff]  ;;  %v1207_v30 = vld [vmem:[%s16694_s28 + $0x18b8] sm:$0xff] }
 0x68e   : > { %13104 = vmatprep.subr.bf16.mxu0 %v14740_v61  ;;  %13391 = vmatprep.subr.bf16.mxu1 %v14742_v31  ;;  %v1215_v61 = vld [vmem:[%s16694_s28 + $0x18f8] sm:$0xff]  ;;  %v14835_v31 = vcombine.low %v1190_v19, %v1198_v51  ;;  %v14852_v34 = vcombine.high %v1206_v28, %v1214_v29 }
 0x68f   : > { %v14854_v36 = vcombine.high %v1207_v30, %v1215_v61  ;;  %v14853_v43 = vcombine.low %v1207_v30, %v1215_v61  ;;  %v14931_v61 = vcombine.low %v1286_v10, %v1294_v12 }
 0x691   : > { %13105 = vmatpush1.bf16.msra.mxu0 %v14739_v37  ;;  %13392 = vmatpush1.bf16.msra.mxu1 %v14741_v38  ;;  %v1230_v37 = vld [vmem:[%s16694_s28 + $0x1970] sm:$0xff]  ;;  %v1223_v38 = vld [vmem:[%s16694_s28 + $0x1938] sm:$0xff] }
 0x692   : > { %13106 = vmatprep.subr.bf16.mxu0 %v14756_v40  ;;  %13393 = vmatprep.subr.bf16.mxu1 %v14758_v42  ;;  %v1231_v40 = vld [vmem:[%s16694_s28 + $0x1978] sm:$0xff]  ;;  %v14851_v42 = vcombine.low %v1206_v28, %v1214_v29  ;;  %v14868_v44 = vcombine.high %v1222_v35, %v1230_v37 }
 0x693   : > { %v14870_v45 = vcombine.high %v1223_v38, %v1231_v40 }
 0x695   : > { %13107 = vmatpush1.bf16.msra.mxu0 %v14755_v49  ;;  %13394 = vmatpush1.bf16.msra.mxu1 %v14757_v50  ;;  %v1246_v49 = vld [vmem:[%s16694_s28 + $0x19f0] sm:$0xff]  ;;  %v1239_v50 = vld [vmem:[%s16694_s28 + $0x19b8] sm:$0xff] }
 0x696   : > { %13108 = vmatprep.subr.bf16.mxu0 %v14772_v60  ;;  %13395 = vmatprep.subr.bf16.mxu1 %v14774_v54  ;;  %v1247_v60 = vld [vmem:[%s16694_s28 + $0x19f8] sm:$0xff]  ;;  %v14869_v54 = vcombine.low %v1223_v38, %v1231_v40  ;;  %v14884_v55 = vcombine.high %v1238_v48, %v1246_v49 }
 0x697   : > { %v14886_v56 = vcombine.high %v1239_v50, %v1247_v60 }
 0x699   : > { %13109 = vmatpush1.bf16.msra.mxu0 %v14771_v11  ;;  %13396 = vmatpush1.bf16.msra.mxu1 %v14773_v62  ;;  %v1255_v11 = vld [vmem:[%s16694_s28 + $0x1a38] sm:$0xff] }
 0x69a   : > { %13110 = vmatprep.subr.bf16.mxu0 %v14788_v0  ;;  %13397 = vmatprep.subr.bf16.mxu1 %v14790_v1  ;;  %v1263_v62 = vld [vmem:[%s16694_s28 + $0x1a78] sm:$0xff]  ;;  %v14883_v0 = vcombine.low %v1238_v48, %v1246_v49  ;;  %v14900_v1 = vcombine.high %v1254_v17, %v1262_v58  ;;  %v410_v49 = vld [vmem:[#allocation2 + $0x10] sm:$0xff] }
 0x69b   : > { %v14902_v2 = vcombine.high %v1255_v11, %v1263_v62  ;;  %v1327_v48 = vld [vmem:[%s16694_s28 + $0x1c78] sm:$0xff] }
 0x69d   : > { %13111 = vmatpush1.bf16.msra.mxu0 %v14787_v4  ;;  %13398 = vmatpush1.bf16.msra.mxu1 %v14789_v20  ;;  %v1279_v4 = vld [vmem:[%s16694_s28 + $0x1af8] sm:$0xff]  ;;  %v14899_v20 = vcombine.low %v1254_v17, %v1262_v58  ;;  %v1342_v17 = vld [vmem:[%s16694_s28 + $0x1cf0] sm:$0xff] }
 0x69e   : > { %13112 = vmatprep.subr.bf16.mxu0 %v14804_v6  ;;  %13399 = vmatprep.subr.bf16.mxu1 %v14806_v8  ;;  %v14901_v6 = vcombine.low %v1255_v11, %v1263_v62  ;;  %v14916_v8 = vcombine.high %v1270_v3, %v1278_v53  ;;  %v14918_v9 = vcombine.high %v1271_v5, %v1279_v4  ;;  %v1335_v11 = vld [vmem:[%s16694_s28 + $0x1cb8] sm:$0xff] }
 0x69f   : > { %v1343_v62 = vld [vmem:[%s16694_s28 + $0x1cf8] sm:$0xff] }
 0x6a1   : > { %13113 = vmatpush1.bf16.msra.mxu0 %v14803_v13  ;;  %13400 = vmatpush1.bf16.msra.mxu1 %v14805_v14  ;;  %v1295_v13 = vld [vmem:[%s16694_s28 + $0x1b78] sm:$0xff]  ;;  %v14915_v14 = vcombine.low %v1270_v3, %v1278_v53  ;;  %v1350_v3 = vld [vmem:[%s16694_s28 + $0x1d30] sm:$0xff] }
 0x6a2   : > { %13114 = vmatprep.subr.bf16.mxu0 %v14820_v16  ;;  %13401 = vmatprep.subr.bf16.mxu1 %v14822_v18  ;;  %v14917_v16 = vcombine.low %v1271_v5, %v1279_v4  ;;  %v14932_v18 = vcombine.high %v1286_v10, %v1294_v12  ;;  %v14934_v51 = vcombine.high %v1287_v32, %v1295_v13  ;;  %v1358_v53 = vld [vmem:[%s16694_s28 + $0x1d70] sm:$0xff]  ;;  %v1351_v5 = vld [vmem:[%s16694_s28 + $0x1d38] sm:$0xff] }
 0x6a3   : > { %v1359_v4 = vld [vmem:[%s16694_s28 + $0x1d78] sm:$0xff]  ;;  %v1366_v10 = vld [vmem:[%s16694_s28 + $0x1db0] sm:$0xff] }
 0x6a4   : > { %v1374_v12 = vld [vmem:[%s16694_s28 + $0x1df0] sm:$0xff] }
 0x6a5   : > { %13115 = vmatpush1.bf16.msra.mxu0 %v14819_v23  ;;  %13402 = vmatpush1.bf16.msra.mxu1 %v14821_v24 }
 0x6a6   : > { %13125 = vmatprep.subr.bf16.mxu0 %v14836_v26  ;;  %13412 = vmatprep.subr.bf16.mxu1 %v14838_v27  ;;  %v1303_v26 = vld [vmem:[%s16694_s28 + $0x1bb8] sm:$0xff] }
 0x6a7   : > { %v1311_v27 = vld [vmem:[%s16694_s28 + $0x1bf8] sm:$0xff] }
 0x6a8   : > { %13117 = vmatmul.mubr.bf16.vlgmr.msra.gmra.mrb[12].mxu0 %v16962_v46  ;;  %13404 = vmatmul.mubr.bf16.vlgmr.msra.gmra.mrb[12].mxu1 %v16962_v46  ;;  %v14867_v46 = vcombine.low %v1222_v35, %v1230_v37  ;;  %v14948_v35 = vcombine.high %v1302_v21, %v1310_v22  ;;  %v14950_v40 = vcombine.high %v1303_v26, %v1311_v27 }
 0x6a9   : > { %13126 = vmatpush1.bf16.msra.mxu0 %v14835_v31  ;;  %13413 = vmatpush1.bf16.msra.mxu1 %v14837_v33 }
 0x6aa   : > { %13127 = vmatprep.subr.bf16.mxu0 %v14852_v34  ;;  %13414 = vmatprep.subr.bf16.mxu1 %v14854_v36  ;;  %v14933_v36 = vcombine.low %v1287_v32, %v1295_v13  ;;  %v1367_v32 = vld [vmem:[%s16694_s28 + $0x1db8] sm:$0xff] }
 0x6ab   : > { %13157 = vmatprep.mubr.bf16.mxu0 %v16970_v57  ;;  %13444 = vmatprep.mubr.bf16.mxu1 %v16970_v57  ;;  %v14885_v57 = vcombine.low %v1239_v50, %v1247_v60  ;;  %v14947_v50 = vcombine.low %v1302_v21, %v1310_v22  ;;  %v1375_v13 = vld [vmem:[%s16694_s28 + $0x1df8] sm:$0xff]  ;;  %v1390_v21 = vld [vmem:[%s16694_s28 + $0x1e70] sm:$0xff] }
 0x6ac   : > { %v1383_v22 = vld [vmem:[%s16694_s28 + $0x1e38] sm:$0xff] }
 0x6ad   : > { %13128 = vmatpush1.bf16.msra.mxu0 %v14851_v42  ;;  %13415 = vmatpush1.bf16.msra.mxu1 %v14853_v43  ;;  %v1318_v42 = vld [vmem:[%s16694_s28 + $0x1c30] sm:$0xff] }
 0x6ae   : > { %13129 = vmatprep.subr.bf16.mxu0 %v14868_v44  ;;  %13416 = vmatprep.subr.bf16.mxu1 %v14870_v45  ;;  %v1326_v43 = vld [vmem:[%s16694_s28 + $0x1c70] sm:$0xff]  ;;  %v1319_v45 = vld [vmem:[%s16694_s28 + $0x1c38] sm:$0xff] }
 0x6b1   : > { %13130 = vmatpush1.bf16.msra.mxu0 %v14867_v46  ;;  %13417 = vmatpush1.bf16.msra.mxu1 %v14869_v54  ;;  %v14949_v46 = vcombine.low %v1303_v26, %v1311_v27  ;;  %v14964_v54 = vcombine.high %v1318_v42, %v1326_v43  ;;  %v15013_v26 = vcombine.low %v1367_v32, %v1375_v13 }
 0x6b2   : > { %13131 = vmatprep.subr.bf16.mxu0 %v14884_v55  ;;  %13418 = vmatprep.subr.bf16.mxu1 %v14886_v56  ;;  %v14966_v55 = vcombine.high %v1319_v45, %v1327_v48  ;;  %v1334_v56 = vld [vmem:[%s16694_s28 + $0x1cb0] sm:$0xff] }
 0x6b5   : > { %13132 = vmatpush1.bf16.msra.mxu0 %v14883_v0  ;;  %13419 = vmatpush1.bf16.msra.mxu1 %v14885_v57  ;;  %v14963_v0 = vcombine.low %v1318_v42, %v1326_v43  ;;  %v14965_v57 = vcombine.low %v1319_v45, %v1327_v48  ;;  %v1423_v42 = vld [vmem:[%s16694_s28 + $0x1f78] sm:$0xff] }
 0x6b6   : > { %13133 = vmatprep.subr.bf16.mxu0 %v14900_v1  ;;  %13420 = vmatprep.subr.bf16.mxu1 %v14902_v2  ;;  %v14980_v1 = vcombine.high %v1334_v56, %v1342_v17  ;;  %v14982_v2 = vcombine.high %v1335_v11, %v1343_v62 }
 0x6b9   : > { %13134 = vmatpush1.bf16.msra.mxu0 %v14899_v20  ;;  %13421 = vmatpush1.bf16.msra.mxu1 %v14901_v6  ;;  %v14979_v20 = vcombine.low %v1334_v56, %v1342_v17  ;;  %v14981_v6 = vcombine.low %v1335_v11, %v1343_v62  ;;  %v1454_v11 = vld [vmem:[%s16694_s28 + $0x2070] sm:$0xff]  ;;  %v1447_v62 = vld [vmem:[%s16694_s28 + $0x2038] sm:$0xff] }
 0x6ba   : > { %13135 = vmatprep.subr.bf16.mxu0 %v14916_v8  ;;  %13422 = vmatprep.subr.bf16.mxu1 %v14918_v9  ;;  %v14996_v8 = vcombine.high %v1350_v3, %v1358_v53  ;;  %v14998_v9 = vcombine.high %v1351_v5, %v1359_v4 }
 0x6bb   : > { %v12708_v19 = vpop.f32.mrb[8].mxu0  ;;  %v12995_v23 = vpop.f32.mrb[8].mxu1 }
 0x6bc   : > { %v12710_v24 = vpop.f32.mrb[9].mxu0  ;;  %v12997_v29 = vpop.f32.mrb[9].mxu1 }
 0x6bd   : > { %v13626_v28 = vcombine.low %v12708_v19, %v12710_v24  ;;  %v12712_v30 = vpop.f32.mrb[10].mxu0  ;;  %13136 = vmatpush1.bf16.msra.mxu0 %v14915_v14  ;;  %v13627_v31 = vcombine.low %v12995_v23, %v12997_v29  ;;  %v12999_v33 = vpop.f32.mrb[10].mxu1  ;;  %13423 = vmatpush1.bf16.msra.mxu1 %v14917_v16  ;;  %v14995_v14 = vcombine.low %v1350_v3, %v1358_v53  ;;  %v1391_v23 = vld [vmem:[%s16694_s28 + $0x1e78] sm:$0xff]  ;;  %v1398_v29 = vld [vmem:[%s16694_s28 + $0x1eb0] sm:$0xff] }
 0x6be   : > { %v12713_v34 = vpop.f32.mrb[11].mxu0  ;;  %13137 = vmatprep.subr.bf16.mxu0 %v14932_v18  ;;  %v13000_v38 = vpop.f32.mrb[11].mxu1  ;;  %13424 = vmatprep.subr.bf16.mxu1 %v14934_v51  ;;  %v14997_v16 = vcombine.low %v1351_v5, %v1359_v4  ;;  %v15012_v18 = vcombine.high %v1366_v10, %v1374_v12  ;;  %v15014_v19 = vcombine.high %v1367_v32, %v1375_v13  ;;  %v1382_v51 = vld [vmem:[%s16694_s28 + $0x1e30] sm:$0xff]  ;;  %v1463_v4 = vld [vmem:[%s16694_s28 + $0x20b8] sm:$0xff] }
 0x6bf   : > { %v13634_v37 = vrot.slane %v13626_v28, %v17513_v63  ;;  %v13641_v44 = vrot.slane %v13627_v31, %v17513_v63  ;;  %v15011_v24 = vcombine.low %v1366_v10, %v1374_v12  ;;  %v15028_v27 = vcombine.high %v1382_v51, %v1390_v21  ;;  %v1406_v30 = vld [vmem:[%s16694_s28 + $0x1ef0] sm:$0xff]  ;;  %v1407_v31 = vld [vmem:[%s16694_s28 + $0x1ef8] sm:$0xff] }
 0x6c0   : > { %v15030_v28 = vcombine.high %v1383_v22, %v1391_v23  ;;  %v15027_v33 = vcombine.low %v1382_v51, %v1390_v21  ;;  %v15029_v34 = vcombine.low %v1383_v22, %v1391_v23  ;;  %v1422_v38 = vld [vmem:[%s16694_s28 + $0x1f70] sm:$0xff]  ;;  %v15043_v43 = vcombine.low %v1398_v29, %v1406_v30  ;;  %v1479_v13 = vld [vmem:[%s16694_s28 + $0x2138] sm:$0xff] }
 0x6c1   : > { %13138 = vmatpush1.bf16.msra.mxu0 %v14931_v61  ;;  %v13642_v60 = vcombine.low %v13634_v37, %v13641_v44  ;;  %13425 = vmatpush1.bf16.msra.mxu1 %v14933_v36  ;;  %v1399_v61 = vld [vmem:[%s16694_s28 + $0x1eb8] sm:$0xff]  ;;  %v15044_v36 = vcombine.high %v1398_v29, %v1406_v30  ;;  %v1414_v37 = vld [vmem:[%s16694_s28 + $0x1f30] sm:$0xff] }
 0x6c2   : > { %13139 = vmatprep.subr.bf16.mxu0 %v14948_v35  ;;  %13426 = vmatprep.subr.bf16.mxu1 %v14950_v40  ;;  %v15046_v35 = vcombine.high %v1399_v61, %v1407_v31  ;;  %v1415_v40 = vld [vmem:[%s16694_s28 + $0x1f38] sm:$0xff]  ;;  %v15045_v44 = vcombine.low %v1399_v61, %v1407_v31  ;;  %v15060_v45 = vcombine.high %v1414_v37, %v1422_v38  ;;  %v1462_v53 = vld [vmem:[%s16694_s28 + $0x20b0] sm:$0xff] }
 0x6c3   : > { %v13666_v58 = vadd.f32 %v13642_v60, %v410_v49  ;;  %v15062_v48 = vcombine.high %v1415_v40, %v1423_v42  ;;  %v1430_v49 = vld [vmem:[%s16694_s28 + $0x1fb0] sm:$0xff]  ;;  %v1431_v60 = vld [vmem:[%s16694_s28 + $0x1fb8] sm:$0xff] }
 0x6c4   : > { %v1470_v5 = vld [vmem:[%s16694_s28 + $0x20f0] sm:$0xff]  ;;  %v1495_v23 = vld [vmem:[%s16694_s28 + $0x21b8] sm:$0xff] }
 0x6c5   : > { %13140 = vmatpush1.bf16.msra.mxu0 %v14947_v50  ;;  %13670 = vst [vmem:[#allocation2 + $0x10] sm:$0xff] %v13666_v58  ;;  %13427 = vmatpush1.bf16.msra.mxu1 %v14949_v46  ;;  %v1438_v50 = vld [vmem:[%s16694_s28 + $0x1ff0] sm:$0xff]  ;;  %v1439_v46 = vld [vmem:[%s16694_s28 + $0x1ff8] sm:$0xff] }
 0x6c6   : > { %13141 = vmatprep.subr.bf16.mxu0 %v14964_v54  ;;  %13428 = vmatprep.subr.bf16.mxu1 %v14966_v55  ;;  %v15059_v54 = vcombine.low %v1414_v37, %v1422_v38  ;;  %v15061_v55 = vcombine.low %v1415_v40, %v1423_v42  ;;  %v15076_v56 = vcombine.high %v1430_v49, %v1438_v50  ;;  %v1446_v58 = vld [vmem:[%s16694_s28 + $0x2030] sm:$0xff]  ;;  %v1511_v61 = vld [vmem:[%s16694_s28 + $0x2238] sm:$0xff] }
 0x6c7   : > { %v15078_v17 = vcombine.high %v1431_v60, %v1439_v46  ;;  %v1478_v12 = vld [vmem:[%s16694_s28 + $0x2130] sm:$0xff]  ;;  %v1519_v31 = vld [vmem:[%s16694_s28 + $0x2278] sm:$0xff] }
 0x6c8   : > { %v1486_v32 = vld [vmem:[%s16694_s28 + $0x2170] sm:$0xff]  ;;  %v1527_v38 = vld [vmem:[%s16694_s28 + $0x22b8] sm:$0xff] }
 0x6c9   : > { %13142 = vmatpush1.bf16.msra.mxu0 %v14963_v0  ;;  %13429 = vmatpush1.bf16.msra.mxu1 %v14965_v57  ;;  %v1455_v0 = vld [vmem:[%s16694_s28 + $0x2078] sm:$0xff]  ;;  %v15075_v57 = vcombine.low %v1430_v49, %v1438_v50  ;;  %v1494_v21 = vld [vmem:[%s16694_s28 + $0x21b0] sm:$0xff] }
 0x6ca   : > { %13143 = vmatprep.subr.bf16.mxu0 %v14980_v1  ;;  %13430 = vmatprep.subr.bf16.mxu1 %v14982_v2  ;;  %v15077_v1 = vcombine.low %v1431_v60, %v1439_v46  ;;  %v15092_v2 = vcombine.high %v1446_v58, %v1454_v11  ;;  %v15094_v3 = vcombine.high %v1447_v62, %v1455_v0  ;;  %v1502_v22 = vld [vmem:[%s16694_s28 + $0x21f0] sm:$0xff]  ;;  %v1535_v40 = vld [vmem:[%s16694_s28 + $0x22f8] sm:$0xff] }
 0x6cb   : > { %v1510_v29 = vld [vmem:[%s16694_s28 + $0x2230] sm:$0xff]  ;;  %v1543_v50 = vld [vmem:[%s16694_s28 + $0x2338] sm:$0xff] }
 0x6cc   : > { %v1518_v30 = vld [vmem:[%s16694_s28 + $0x2270] sm:$0xff]  ;;  %v1551_v60 = vld [vmem:[%s16694_s28 + $0x2378] sm:$0xff] }
 0x6cd   : > { %13144 = vmatpush1.bf16.msra.mxu0 %v14979_v20  ;;  %13431 = vmatpush1.bf16.msra.mxu1 %v14981_v6  ;;  %v1471_v20 = vld [vmem:[%s16694_s28 + $0x20f8] sm:$0xff]  ;;  %v15091_v6 = vcombine.low %v1446_v58, %v1454_v11  ;;  %v1534_v37 = vld [vmem:[%s16694_s28 + $0x22f0] sm:$0xff]  ;;  %v15155_v42 = vcombine.low %v1510_v29, %v1518_v30 }
 0x6ce   : > { %13145 = vmatprep.subr.bf16.mxu0 %v14996_v8  ;;  %13432 = vmatprep.subr.bf16.mxu1 %v14998_v9  ;;  %v15093_v8 = vcombine.low %v1447_v62, %v1455_v0  ;;  %v15108_v9 = vcombine.high %v1462_v53, %v1470_v5  ;;  %v15110_v10 = vcombine.high %v1463_v4, %v1471_v20  ;;  %v1550_v49 = vld [vmem:[%s16694_s28 + $0x2370] sm:$0xff]  ;;  %v1559_v11 = vld [vmem:[%s16694_s28 + $0x23b8] sm:$0xff] }
 0x6cf   : > { %v1566_v58 = vld [vmem:[%s16694_s28 + $0x23f0] sm:$0xff]  ;;  %v1567_v62 = vld [vmem:[%s16694_s28 + $0x23f8] sm:$0xff] }
 0x6d1   : > { %13146 = vmatpush1.bf16.msra.mxu0 %v14995_v14  ;;  %13433 = vmatpush1.bf16.msra.mxu1 %v14997_v16  ;;  %v1487_v14 = vld [vmem:[%s16694_s28 + $0x2178] sm:$0xff]  ;;  %v15107_v16 = vcombine.low %v1462_v53, %v1470_v5  ;;  %v1582_v53 = vld [vmem:[%s16694_s28 + $0x2470] sm:$0xff] }
 0x6d2   : > { %13147 = vmatprep.subr.bf16.mxu0 %v15012_v18  ;;  %13434 = vmatprep.subr.bf16.mxu1 %v15014_v19  ;;  %v15109_v18 = vcombine.low %v1463_v4, %v1471_v20  ;;  %v15124_v19 = vcombine.high %v1478_v12, %v1486_v32  ;;  %v15126_v51 = vcombine.high %v1479_v13, %v1487_v14  ;;  %v1575_v5 = vld [vmem:[%s16694_s28 + $0x2438] sm:$0xff] }
 0x6d3   : > { %v1583_v4 = vld [vmem:[%s16694_s28 + $0x2478] sm:$0xff] }
 0x6d5   : > { %13148 = vmatpush1.bf16.msra.mxu0 %v15011_v24  ;;  %13435 = vmatpush1.bf16.msra.mxu1 %v15013_v26  ;;  %v1503_v24 = vld [vmem:[%s16694_s28 + $0x21f8] sm:$0xff]  ;;  %v15125_v26 = vcombine.low %v1479_v13, %v1487_v14 }
 0x6d6   : > { %13149 = vmatprep.subr.bf16.mxu0 %v15028_v27  ;;  %13436 = vmatprep.subr.bf16.mxu1 %v15030_v28  ;;  %v15140_v27 = vcombine.high %v1494_v21, %v1502_v22  ;;  %v15142_v28 = vcombine.high %v1495_v23, %v1503_v24  ;;  %v1599_v13 = vld [vmem:[%s16694_s28 + $0x24f8] sm:$0xff] }
 0x6d9   : > { %13150 = vmatpush1.bf16.msra.mxu0 %v15027_v33  ;;  %13437 = vmatpush1.bf16.msra.mxu1 %v15029_v34  ;;  %v15139_v33 = vcombine.low %v1494_v21, %v1502_v22  ;;  %v15156_v34 = vcombine.high %v1510_v29, %v1518_v30  ;;  %v1614_v21 = vld [vmem:[%s16694_s28 + $0x2570] sm:$0xff]  ;;  %v1607_v22 = vld [vmem:[%s16694_s28 + $0x2538] sm:$0xff] }
 0x6da   : > { %13151 = vmatprep.subr.bf16.mxu0 %v15044_v36  ;;  %13438 = vmatprep.subr.bf16.mxu1 %v15046_v35  ;;  %v15158_v36 = vcombine.high %v1511_v61, %v1519_v31  ;;  %v1526_v35 = vld [vmem:[%s16694_s28 + $0x22b0] sm:$0xff]  ;;  %v1623_v30 = vld [vmem:[%s16694_s28 + $0x25b8] sm:$0xff] }
 0x6db   : > { %v15171_v46 = vcombine.low %v1526_v35, %v1534_v37  ;;  %v1630_v29 = vld [vmem:[%s16694_s28 + $0x25f0] sm:$0xff] }
 0x6dd   : > { %13152 = vmatpush1.bf16.msra.mxu0 %v15043_v43  ;;  %13439 = vmatpush1.bf16.msra.mxu1 %v15045_v44  ;;  %v15157_v43 = vcombine.low %v1511_v61, %v1519_v31  ;;  %v15172_v44 = vcombine.high %v1526_v35, %v1534_v37  ;;  %v1631_v61 = vld [vmem:[%s16694_s28 + $0x25f8] sm:$0xff]  ;;  %v1646_v35 = vld [vmem:[%s16694_s28 + $0x2670] sm:$0xff] }
 0x6de   : > { %13153 = vmatprep.subr.bf16.mxu0 %v15060_v45  ;;  %13440 = vmatprep.subr.bf16.mxu1 %v15062_v48  ;;  %v15174_v45 = vcombine.high %v1527_v38, %v1535_v40  ;;  %v1542_v48 = vld [vmem:[%s16694_s28 + $0x2330] sm:$0xff]  ;;  %v1639_v37 = vld [vmem:[%s16694_s28 + $0x2638] sm:$0xff] }
 0x6df   : > { %v15187_v0 = vcombine.low %v1542_v48, %v1550_v49 }
 0x6e1   : > { %13154 = vmatpush1.bf16.msra.mxu0 %v15059_v54  ;;  %13441 = vmatpush1.bf16.msra.mxu1 %v15061_v55  ;;  %v15173_v54 = vcombine.low %v1527_v38, %v1535_v40  ;;  %v15188_v55 = vcombine.high %v1542_v48, %v1550_v49  ;;  %v1647_v38 = vld [vmem:[%s16694_s28 + $0x2678] sm:$0xff]  ;;  %v1662_v48 = vld [vmem:[%s16694_s28 + $0x26f0] sm:$0xff] }
 0x6e2   : > { %13155 = vmatprep.subr.bf16.mxu0 %v15076_v56  ;;  %13442 = vmatprep.subr.bf16.mxu1 %v15078_v17  ;;  %v15190_v56 = vcombine.high %v1543_v50, %v1551_v60  ;;  %v1558_v17 = vld [vmem:[%s16694_s28 + $0x23b0] sm:$0xff]  ;;  %v1655_v49 = vld [vmem:[%s16694_s28 + $0x26b8] sm:$0xff] }
 0x6e3   : > { %v15203_v20 = vcombine.low %v1558_v17, %v1566_v58 }
 0x6e5   : > { %13156 = vmatpush1.bf16.msra.mxu0 %v15075_v57  ;;  %13443 = vmatpush1.bf16.msra.mxu1 %v15077_v1  ;;  %v15189_v57 = vcombine.low %v1543_v50, %v1551_v60  ;;  %v15204_v1 = vcombine.high %v1558_v17, %v1566_v58  ;;  %v1663_v50 = vld [vmem:[%s16694_s28 + $0x26f8] sm:$0xff]  ;;  %v1678_v17 = vld [vmem:[%s16694_s28 + $0x2770] sm:$0xff] }
 0x6e6   : > { %13166 = vmatprep.subr.bf16.mxu0 %v15092_v2  ;;  %13453 = vmatprep.subr.bf16.mxu1 %v15094_v3  ;;  %v15206_v2 = vcombine.high %v1559_v11, %v1567_v62  ;;  %v1574_v3 = vld [vmem:[%s16694_s28 + $0x2430] sm:$0xff]  ;;  %v1671_v58 = vld [vmem:[%s16694_s28 + $0x2738] sm:$0xff] }
 0x6e7   : > { %v15219_v14 = vcombine.low %v1574_v3, %v1582_v53 }
 0x6e8   : > { %13158 = vmatmul.mubr.bf16.vlgmr.msra.gmra.mrb[12].mxu0 %v17047_v7  ;;  %13445 = vmatmul.mubr.bf16.vlgmr.msra.gmra.mrb[12].mxu1 %v17047_v7  ;;  %v15123_v7 = vcombine.low %v1478_v12, %v1486_v32  ;;  %v1598_v12 = vld [vmem:[%s16694_s28 + $0x24f0] sm:$0xff]  ;;  %v1591_v32 = vld [vmem:[%s16694_s28 + $0x24b8] sm:$0xff] }
 0x6e9   : > { %13167 = vmatpush1.bf16.msra.mxu0 %v15091_v6  ;;  %13454 = vmatpush1.bf16.msra.mxu1 %v15093_v8  ;;  %v15205_v6 = vcombine.low %v1559_v11, %v1567_v62  ;;  %v15220_v8 = vcombine.high %v1574_v3, %v1582_v53  ;;  %v1679_v11 = vld [vmem:[%s16694_s28 + $0x2778] sm:$0xff]  ;;  %v1694_v3 = vld [vmem:[%s16694_s28 + $0x27f0] sm:$0xff] }
 0x6ea   : > { %13168 = vmatprep.subr.bf16.mxu0 %v15108_v9  ;;  %13455 = vmatprep.subr.bf16.mxu1 %v15110_v10  ;;  %v15222_v9 = vcombine.high %v1575_v5, %v1583_v4  ;;  %v1590_v10 = vld [vmem:[%s16694_s28 + $0x24b0] sm:$0xff]  ;;  %v1687_v53 = vld [vmem:[%s16694_s28 + $0x27b8] sm:$0xff] }
 0x6eb   : > { %13198 = vmatprep.mubr.bf16.mxu0 %v17054_v47  ;;  %13485 = vmatprep.mubr.bf16.mxu1 %v17054_v47  ;;  %v15141_v47 = vcombine.low %v1495_v23, %v1503_v24  ;;  %v1615_v23 = vld [vmem:[%s16694_s28 + $0x2578] sm:$0xff]  ;;  %v15235_v24 = vcombine.low %v1590_v10, %v1598_v12 }
 0x6ed   : > { %13169 = vmatpush1.bf16.msra.mxu0 %v15107_v16  ;;  %13456 = vmatpush1.bf16.msra.mxu1 %v15109_v18  ;;  %v15221_v16 = vcombine.low %v1575_v5, %v1583_v4  ;;  %v15236_v18 = vcombine.high %v1590_v10, %v1598_v12  ;;  %v1695_v5 = vld [vmem:[%s16694_s28 + $0x27f8] sm:$0xff]  ;;  %v1710_v10 = vld [vmem:[%s16694_s28 + $0x2870] sm:$0xff] }
 0x6ee   : > { %13170 = vmatprep.subr.bf16.mxu0 %v15124_v19  ;;  %13457 = vmatprep.subr.bf16.mxu1 %v15126_v51  ;;  %v15238_v19 = vcombine.high %v1591_v32, %v1599_v13  ;;  %v1606_v51 = vld [vmem:[%s16694_s28 + $0x2530] sm:$0xff]  ;;  %v1703_v12 = vld [vmem:[%s16694_s28 + $0x2838] sm:$0xff] }
 0x6ef   : > { %v15251_v31 = vcombine.low %v1606_v51, %v1614_v21 }
 0x6f1   : > { %13171 = vmatpush1.bf16.msra.mxu0 %v15123_v7  ;;  %13458 = vmatpush1.bf16.msra.mxu1 %v15125_v26  ;;  %v15237_v7 = vcombine.low %v1591_v32, %v1599_v13  ;;  %v15252_v26 = vcombine.high %v1606_v51, %v1614_v21  ;;  %v1711_v32 = vld [vmem:[%s16694_s28 + $0x2878] sm:$0xff]  ;;  %v1726_v51 = vld [vmem:[%s16694_s28 + $0x28f0] sm:$0xff] }
 0x6f2   : > { %13172 = vmatprep.subr.bf16.mxu0 %v15140_v27  ;;  %13459 = vmatprep.subr.bf16.mxu1 %v15142_v28  ;;  %v15254_v27 = vcombine.high %v1607_v22, %v1615_v23  ;;  %v1622_v28 = vld [vmem:[%s16694_s28 + $0x25b0] sm:$0xff]  ;;  %v1719_v21 = vld [vmem:[%s16694_s28 + $0x28b8] sm:$0xff] }
 0x6f3   : > { %v15267_v40 = vcombine.low %v1622_v28, %v1630_v29 }
 0x6f5   : > { %13173 = vmatpush1.bf16.msra.mxu0 %v15139_v33  ;;  %13460 = vmatpush1.bf16.msra.mxu1 %v15141_v47  ;;  %v15253_v33 = vcombine.low %v1607_v22, %v1615_v23  ;;  %v15268_v47 = vcombine.high %v1622_v28, %v1630_v29  ;;  %v1727_v22 = vld [vmem:[%s16694_s28 + $0x28f8] sm:$0xff]  ;;  %v1742_v28 = vld [vmem:[%s16694_s28 + $0x2970] sm:$0xff] }
 0x6f6   : > { %13174 = vmatprep.subr.bf16.mxu0 %v15156_v34  ;;  %13461 = vmatprep.subr.bf16.mxu1 %v15158_v36  ;;  %v15270_v34 = vcombine.high %v1623_v30, %v1631_v61  ;;  %v1638_v36 = vld [vmem:[%s16694_s28 + $0x2630] sm:$0xff]  ;;  %v1735_v29 = vld [vmem:[%s16694_s28 + $0x2938] sm:$0xff] }
 0x6f7   : > { %v15283_v60 = vcombine.low %v1638_v36, %v1646_v35 }
 0x6f9   : > { %13175 = vmatpush1.bf16.msra.mxu0 %v15155_v42  ;;  %13462 = vmatpush1.bf16.msra.mxu1 %v15157_v43  ;;  %v15269_v42 = vcombine.low %v1623_v30, %v1631_v61  ;;  %v15284_v43 = vcombine.high %v1638_v36, %v1646_v35  ;;  %v1743_v30 = vld [vmem:[%s16694_s28 + $0x2978] sm:$0xff]  ;;  %v1758_v36 = vld [vmem:[%s16694_s28 + $0x29f0] sm:$0xff] }
 0x6fa   : > { %13176 = vmatprep.subr.bf16.mxu0 %v15172_v44  ;;  %13463 = vmatprep.subr.bf16.mxu1 %v15174_v45  ;;  %v15286_v44 = vcombine.high %v1639_v37, %v1647_v38  ;;  %v1654_v45 = vld [vmem:[%s16694_s28 + $0x26b0] sm:$0xff]  ;;  %v1751_v35 = vld [vmem:[%s16694_s28 + $0x29b8] sm:$0xff] }
 0x6fb   : > { %v15299_v62 = vcombine.low %v1654_v45, %v1662_v48 }
 0x6fd   : > { %13177 = vmatpush1.bf16.msra.mxu0 %v15171_v46  ;;  %13464 = vmatpush1.bf16.msra.mxu1 %v15173_v54  ;;  %v15285_v46 = vcombine.low %v1639_v37, %v1647_v38  ;;  %v15300_v54 = vcombine.high %v1654_v45, %v1662_v48  ;;  %v1759_v37 = vld [vmem:[%s16694_s28 + $0x29f8] sm:$0xff]  ;;  %v15381_v38 = vcombine.low %v1735_v29, %v1743_v30 }
 0x6fe   : > { %13178 = vmatprep.subr.bf16.mxu0 %v15188_v55  ;;  %13465 = vmatprep.subr.bf16.mxu1 %v15190_v56  ;;  %v15302_v55 = vcombine.high %v1655_v49, %v1663_v50  ;;  %v1670_v56 = vld [vmem:[%s16694_s28 + $0x2730] sm:$0xff]  ;;  %v1767_v45 = vld [vmem:[%s16694_s28 + $0x2a38] sm:$0xff] }
 0x6ff   : > { %v15315_v4 = vcombine.low %v1670_v56, %v1678_v17  ;;  %v1775_v48 = vld [vmem:[%s16694_s28 + $0x2a78] sm:$0xff] }
 0x701   : > { %13179 = vmatpush1.bf16.msra.mxu0 %v15187_v0  ;;  %13466 = vmatpush1.bf16.msra.mxu1 %v15189_v57  ;;  %v15301_v0 = vcombine.low %v1655_v49, %v1663_v50  ;;  %v15316_v57 = vcombine.high %v1670_v56, %v1678_v17  ;;  %v1791_v56 = vld [vmem:[%s16694_s28 + $0x2af8] sm:$0xff] }
 0x702   : > { %13180 = vmatprep.subr.bf16.mxu0 %v15204_v1  ;;  %13467 = vmatprep.subr.bf16.mxu1 %v15206_v2  ;;  %v15318_v1 = vcombine.high %v1671_v58, %v1679_v11  ;;  %v1686_v2 = vld [vmem:[%s16694_s28 + $0x27b0] sm:$0xff] }
 0x703   : > { %v15331_v13 = vcombine.low %v1686_v2, %v1694_v3 }
 0x705   : > { %13181 = vmatpush1.bf16.msra.mxu0 %v15203_v20  ;;  %13468 = vmatpush1.bf16.msra.mxu1 %v15205_v6  ;;  %v15317_v20 = vcombine.low %v1671_v58, %v1679_v11  ;;  %v15332_v6 = vcombine.high %v1686_v2, %v1694_v3  ;;  %v15413_v58 = vcombine.low %v1767_v45, %v1775_v48  ;;  %v1807_v2 = vld [vmem:[%s16694_s28 + $0x2b78] sm:$0xff] }
 0x706   : > { %13182 = vmatprep.subr.bf16.mxu0 %v15220_v8  ;;  %13469 = vmatprep.subr.bf16.mxu1 %v15222_v9  ;;  %v15334_v8 = vcombine.high %v1687_v53, %v1695_v5  ;;  %v1702_v9 = vld [vmem:[%s16694_s28 + $0x2830] sm:$0xff] }
 0x707   : > { %v15347_v23 = vcombine.low %v1702_v9, %v1710_v10 }
 0x709   : > { %13183 = vmatpush1.bf16.msra.mxu0 %v15219_v14  ;;  %13470 = vmatpush1.bf16.msra.mxu1 %v15221_v16  ;;  %v15333_v14 = vcombine.low %v1687_v53, %v1695_v5  ;;  %v15348_v16 = vcombine.high %v1702_v9, %v1710_v10  ;;  %v1823_v9 = vld [vmem:[%s16694_s28 + $0x2bf8] sm:$0xff] }
 0x70a   : > { %13184 = vmatprep.subr.bf16.mxu0 %v15236_v18  ;;  %13471 = vmatprep.subr.bf16.mxu1 %v15238_v19  ;;  %v15350_v18 = vcombine.high %v1703_v12, %v1711_v32  ;;  %v1718_v19 = vld [vmem:[%s16694_s28 + $0x28b0] sm:$0xff] }
 0x70b   : > { %v15363_v61 = vcombine.low %v1718_v19, %v1726_v51 }
 0x70d   : > { %13185 = vmatpush1.bf16.msra.mxu0 %v15235_v24  ;;  %13472 = vmatpush1.bf16.msra.mxu1 %v15237_v7  ;;  %v15349_v24 = vcombine.low %v1703_v12, %v1711_v32  ;;  %v15364_v7 = vcombine.high %v1718_v19, %v1726_v51  ;;  %v1839_v19 = vld [vmem:[%s16694_s28 + $0x2c78] sm:$0xff] }
 0x70e   : > { %13186 = vmatprep.subr.bf16.mxu0 %v15252_v26  ;;  %13473 = vmatprep.subr.bf16.mxu1 %v15254_v27  ;;  %v15366_v26 = vcombine.high %v1719_v21, %v1727_v22  ;;  %v1734_v27 = vld [vmem:[%s16694_s28 + $0x2930] sm:$0xff] }
 0x711   : > { %13187 = vmatpush1.bf16.msra.mxu0 %v15251_v31  ;;  %13474 = vmatpush1.bf16.msra.mxu1 %v15253_v33  ;;  %v15365_v31 = vcombine.low %v1719_v21, %v1727_v22  ;;  %v15380_v33 = vcombine.high %v1734_v27, %v1742_v28 }
 0x712   : > { %13188 = vmatprep.subr.bf16.mxu0 %v15268_v47  ;;  %13475 = vmatprep.subr.bf16.mxu1 %v15270_v34  ;;  %v15382_v47 = vcombine.high %v1735_v29, %v1743_v30  ;;  %v1750_v34 = vld [vmem:[%s16694_s28 + $0x29b0] sm:$0xff] }
 0x713   : > { %v15395_v49 = vcombine.low %v1750_v34, %v1758_v36 }
 0x715   : > { %13189 = vmatpush1.bf16.msra.mxu0 %v15267_v40  ;;  %13476 = vmatpush1.bf16.msra.mxu1 %v15269_v42  ;;  %v15396_v40 = vcombine.high %v1750_v34, %v1758_v36  ;;  %v15398_v42 = vcombine.high %v1751_v35, %v1759_v37  ;;  %v1871_v34 = vld [vmem:[%s16694_s28 + $0x2d78] sm:$0xff] }
 0x716   : > { %13190 = vmatprep.subr.bf16.mxu0 %v15284_v43  ;;  %13477 = vmatprep.subr.bf16.mxu1 %v15286_v44  ;;  %v1766_v43 = vld [vmem:[%s16694_s28 + $0x2a30] sm:$0xff] }
 0x717   : > { %v1774_v44 = vld [vmem:[%s16694_s28 + $0x2a70] sm:$0xff] }
 0x718   : > { %v15412_v50 = vcombine.high %v1766_v43, %v1774_v44  ;;  %v15411_v17 = vcombine.low %v1766_v43, %v1774_v44  ;;  %v1887_v43 = vld [vmem:[%s16694_s28 + $0x2df8] sm:$0xff] }
 0x719   : > { %13191 = vmatpush1.bf16.msra.mxu0 %v15283_v60  ;;  %13478 = vmatpush1.bf16.msra.mxu1 %v15285_v46  ;;  %v15414_v60 = vcombine.high %v1767_v45, %v1775_v48  ;;  %v1782_v46 = vld [vmem:[%s16694_s28 + $0x2ab0] sm:$0xff] }
 0x71a   : > { %13192 = vmatprep.subr.bf16.mxu0 %v15300_v54  ;;  %13479 = vmatprep.subr.bf16.mxu1 %v15302_v55  ;;  %v1790_v54 = vld [vmem:[%s16694_s28 + $0x2af0] sm:$0xff]  ;;  %v1783_v55 = vld [vmem:[%s16694_s28 + $0x2ab8] sm:$0xff] }
 0x71b   : > { %v15428_v11 = vcombine.high %v1782_v46, %v1790_v54  ;;  %v15427_v3 = vcombine.low %v1782_v46, %v1790_v54  ;;  %v15429_v53 = vcombine.low %v1783_v55, %v1791_v56  ;;  %v1903_v46 = vld [vmem:[%s16694_s28 + $0x2e78] sm:$0xff] }
 0x71d   : > { %13193 = vmatpush1.bf16.msra.mxu0 %v15299_v62  ;;  %13480 = vmatpush1.bf16.msra.mxu1 %v15301_v0  ;;  %v15430_v62 = vcombine.high %v1783_v55, %v1791_v56  ;;  %v1798_v0 = vld [vmem:[%s16694_s28 + $0x2b30] sm:$0xff] }
 0x71e   : > { %13194 = vmatprep.subr.bf16.mxu0 %v15316_v57  ;;  %13481 = vmatprep.subr.bf16.mxu1 %v15318_v1  ;;  %v1806_v57 = vld [vmem:[%s16694_s28 + $0x2b70] sm:$0xff]  ;;  %v1799_v1 = vld [vmem:[%s16694_s28 + $0x2b38] sm:$0xff] }
 0x71f   : > { %v15444_v5 = vcombine.high %v1798_v0, %v1806_v57  ;;  %v15443_v10 = vcombine.low %v1798_v0, %v1806_v57  ;;  %v15445_v12 = vcombine.low %v1799_v1, %v1807_v2  ;;  %v1919_v0 = vld [vmem:[%s16694_s28 + $0x2ef8] sm:$0xff] }
 0x721   : > { %13195 = vmatpush1.bf16.msra.mxu0 %v15315_v4  ;;  %13482 = vmatpush1.bf16.msra.mxu1 %v15317_v20  ;;  %v15446_v4 = vcombine.high %v1799_v1, %v1807_v2  ;;  %v1814_v20 = vld [vmem:[%s16694_s28 + $0x2bb0] sm:$0xff] }
 0x722   : > { %13196 = vmatprep.subr.bf16.mxu0 %v15332_v6  ;;  %13483 = vmatprep.subr.bf16.mxu1 %v15334_v8  ;;  %v1822_v6 = vld [vmem:[%s16694_s28 + $0x2bf0] sm:$0xff]  ;;  %v1815_v8 = vld [vmem:[%s16694_s28 + $0x2bb8] sm:$0xff] }
 0x723   : > { %v15460_v32 = vcombine.high %v1814_v20, %v1822_v6  ;;  %v15459_v51 = vcombine.low %v1814_v20, %v1822_v6  ;;  %v15461_v21 = vcombine.low %v1815_v8, %v1823_v9  ;;  %v1935_v20 = vld [vmem:[%s16694_s28 + $0x2f78] sm:$0xff] }
 0x725   : > { %13197 = vmatpush1.bf16.msra.mxu0 %v15331_v13  ;;  %13484 = vmatpush1.bf16.msra.mxu1 %v15333_v14  ;;  %v15462_v13 = vcombine.high %v1815_v8, %v1823_v9  ;;  %v1830_v14 = vld [vmem:[%s16694_s28 + $0x2c30] sm:$0xff] }
 0x726   : > { %13207 = vmatprep.subr.bf16.mxu0 %v15348_v16  ;;  %13494 = vmatprep.subr.bf16.mxu1 %v15350_v18  ;;  %v1838_v16 = vld [vmem:[%s16694_s28 + $0x2c70] sm:$0xff]  ;;  %v1831_v18 = vld [vmem:[%s16694_s28 + $0x2c38] sm:$0xff] }
 0x727   : > { %v15476_v22 = vcombine.high %v1830_v14, %v1838_v16  ;;  %v15477_v29 = vcombine.low %v1831_v18, %v1839_v19 }
 0x728   : > { %13199 = vmatmul.mubr.bf16.vlgmr.msra.gmra.mrb[12].mxu0 %v17122_v39  ;;  %13486 = vmatmul.mubr.bf16.vlgmr.msra.gmra.mrb[12].mxu1 %v17122_v39  ;;  %v15379_v39 = vcombine.low %v1734_v27, %v1742_v28  ;;  %v1855_v27 = vld [vmem:[%s16694_s28 + $0x2cf8] sm:$0xff]  ;;  %v15475_v28 = vcombine.low %v1830_v14, %v1838_v16 }
 0x729   : > { %13208 = vmatpush1.bf16.msra.mxu0 %v15347_v23  ;;  %13495 = vmatpush1.bf16.msra.mxu1 %v15349_v24  ;;  %v15478_v23 = vcombine.high %v1831_v18, %v1839_v19  ;;  %v1846_v24 = vld [vmem:[%s16694_s28 + $0x2cb0] sm:$0xff]  ;;  %v1951_v14 = vld [vmem:[%s16694_s28 + $0x2ff8] sm:$0xff] }
 0x72a   : > { %13209 = vmatprep.subr.bf16.mxu0 %v15364_v7  ;;  %13496 = vmatprep.subr.bf16.mxu1 %v15366_v26  ;;  %v1854_v7 = vld [vmem:[%s16694_s28 + $0x2cf0] sm:$0xff]  ;;  %v1847_v26 = vld [vmem:[%s16694_s28 + $0x2cb8] sm:$0xff] }
 0x72b   : > { %13239 = vmatprep.mubr.bf16.mxu0 %v17130_v52  ;;  %13526 = vmatprep.mubr.bf16.mxu1 %v17130_v52  ;;  %v15397_v52 = vcombine.low %v1751_v35, %v1759_v37  ;;  %v15492_v30 = vcombine.high %v1846_v24, %v1854_v7  ;;  %v15491_v36 = vcombine.low %v1846_v24, %v1854_v7  ;;  %v1967_v24 = vld [vmem:[%s16694_s28 + $0x3078] sm:$0xff] }
 0x72c   : > { %v15493_v35 = vcombine.low %v1847_v26, %v1855_v27 }
 0x72d   : > { %13210 = vmatpush1.bf16.msra.mxu0 %v15363_v61  ;;  %13497 = vmatpush1.bf16.msra.mxu1 %v15365_v31  ;;  %v15494_v61 = vcombine.high %v1847_v26, %v1855_v27  ;;  %v1862_v31 = vld [vmem:[%s16694_s28 + $0x2d30] sm:$0xff] }
 0x72e   : > { %13211 = vmatprep.subr.bf16.mxu0 %v15380_v33  ;;  %13498 = vmatprep.subr.bf16.mxu1 %v15382_v47  ;;  %v1870_v33 = vld [vmem:[%s16694_s28 + $0x2d70] sm:$0xff]  ;;  %v1863_v47 = vld [vmem:[%s16694_s28 + $0x2d38] sm:$0xff] }
 0x72f   : > { %v15508_v37 = vcombine.high %v1862_v31, %v1870_v33  ;;  %v15507_v44 = vcombine.low %v1862_v31, %v1870_v33  ;;  %v15509_v45 = vcombine.low %v1863_v47, %v1871_v34  ;;  %v1983_v31 = vld [vmem:[%s16694_s28 + $0x30f8] sm:$0xff] }
 0x731   : > { %13212 = vmatpush1.bf16.msra.mxu0 %v15379_v39  ;;  %13499 = vmatpush1.bf16.msra.mxu1 %v15381_v38  ;;  %v15510_v39 = vcombine.high %v1863_v47, %v1871_v34  ;;  %v1878_v38 = vld [vmem:[%s16694_s28 + $0x2db0] sm:$0xff] }
 0x732   : > { %13213 = vmatprep.subr.bf16.mxu0 %v15396_v40  ;;  %13500 = vmatprep.subr.bf16.mxu1 %v15398_v42  ;;  %v1886_v40 = vld [vmem:[%s16694_s28 + $0x2df0] sm:$0xff]  ;;  %v1879_v42 = vld [vmem:[%s16694_s28 + $0x2db8] sm:$0xff] }
 0x733   : > { %v15524_v48 = vcombine.high %v1878_v38, %v1886_v40  ;;  %v15523_v54 = vcombine.low %v1878_v38, %v1886_v40  ;;  %v15525_v55 = vcombine.low %v1879_v42, %v1887_v43  ;;  %v1999_v38 = vld [vmem:[%s16694_s28 + $0x3178] sm:$0xff] }
 0x735   : > { %13214 = vmatpush1.bf16.msra.mxu0 %v15395_v49  ;;  %13501 = vmatpush1.bf16.msra.mxu1 %v15397_v52  ;;  %v15526_v49 = vcombine.high %v1879_v42, %v1887_v43  ;;  %v1894_v52 = vld [vmem:[%s16694_s28 + $0x2e30] sm:$0xff] }
 0x736   : > { %13215 = vmatprep.subr.bf16.mxu0 %v15412_v50  ;;  %13502 = vmatprep.subr.bf16.mxu1 %v15414_v60  ;;  %v1902_v50 = vld [vmem:[%s16694_s28 + $0x2e70] sm:$0xff]  ;;  %v1895_v60 = vld [vmem:[%s16694_s28 + $0x2e38] sm:$0xff] }
 0x737   : > { %v15540_v56 = vcombine.high %v1894_v52, %v1902_v50  ;;  %v15539_v57 = vcombine.low %v1894_v52, %v1902_v50  ;;  %v15541_v1 = vcombine.low %v1895_v60, %v1903_v46  ;;  %v2015_v52 = vld [vmem:[%s16694_s28 + $0x31f8] sm:$0xff] }
 0x739   : > { %13216 = vmatpush1.bf16.msra.mxu0 %v15411_v17  ;;  %13503 = vmatpush1.bf16.msra.mxu1 %v15413_v58  ;;  %v15542_v17 = vcombine.high %v1895_v60, %v1903_v46  ;;  %v1910_v58 = vld [vmem:[%s16694_s28 + $0x2eb0] sm:$0xff] }
 0x73a   : > { %13217 = vmatprep.subr.bf16.mxu0 %v15428_v11  ;;  %13504 = vmatprep.subr.bf16.mxu1 %v15430_v62  ;;  %v1918_v11 = vld [vmem:[%s16694_s28 + $0x2ef0] sm:$0xff]  ;;  %v1911_v62 = vld [vmem:[%s16694_s28 + $0x2eb8] sm:$0xff] }
 0x73b   : > { %v15556_v2 = vcombine.high %v1910_v58, %v1918_v11  ;;  %v15555_v6 = vcombine.low %v1910_v58, %v1918_v11  ;;  %v15557_v8 = vcombine.low %v1911_v62, %v1919_v0 }
 0x73d   : > { %13218 = vmatpush1.bf16.msra.mxu0 %v15427_v3  ;;  %13505 = vmatpush1.bf16.msra.mxu1 %v15429_v53  ;;  %v15558_v3 = vcombine.high %v1911_v62, %v1919_v0  ;;  %v1926_v53 = vld [vmem:[%s16694_s28 + $0x2f30] sm:$0xff] }
 0x73e   : > { %13219 = vmatprep.subr.bf16.mxu0 %v15444_v5  ;;  %13506 = vmatprep.subr.bf16.mxu1 %v15446_v4  ;;  %v1934_v5 = vld [vmem:[%s16694_s28 + $0x2f70] sm:$0xff]  ;;  %v1927_v4 = vld [vmem:[%s16694_s28 + $0x2f38] sm:$0xff] }
 0x73f   : > { %v15572_v9 = vcombine.high %v1926_v53, %v1934_v5  ;;  %v15571_v16 = vcombine.low %v1926_v53, %v1934_v5  ;;  %v15573_v18 = vcombine.low %v1927_v4, %v1935_v20  ;;  %v2038_v0 = vld [vmem:[%s16694_s28 + $0x32b0] sm:$0xff] }
 0x741   : > { %13220 = vmatpush1.bf16.msra.mxu0 %v15443_v10  ;;  %13507 = vmatpush1.bf16.msra.mxu1 %v15445_v12  ;;  %v15574_v10 = vcombine.high %v1927_v4, %v1935_v20  ;;  %v1942_v12 = vld [vmem:[%s16694_s28 + $0x2fb0] sm:$0xff] }
 0x742   : > { %13221 = vmatprep.subr.bf16.mxu0 %v15460_v32  ;;  %13508 = vmatprep.subr.bf16.mxu1 %v15462_v13  ;;  %v1950_v32 = vld [vmem:[%s16694_s28 + $0x2ff0] sm:$0xff]  ;;  %v1943_v13 = vld [vmem:[%s16694_s28 + $0x2fb8] sm:$0xff] }
 0x743   : > { %v15588_v19 = vcombine.high %v1942_v12, %v1950_v32  ;;  %v15587_v7 = vcombine.low %v1942_v12, %v1950_v32  ;;  %v15589_v26 = vcombine.low %v1943_v13, %v1951_v14  ;;  %v2054_v20 = vld [vmem:[%s16694_s28 + $0x3330] sm:$0xff] }
 0x745   : > { %13222 = vmatpush1.bf16.msra.mxu0 %v15459_v51  ;;  %13509 = vmatpush1.bf16.msra.mxu1 %v15461_v21  ;;  %v15590_v51 = vcombine.high %v1943_v13, %v1951_v14  ;;  %v1958_v21 = vld [vmem:[%s16694_s28 + $0x3030] sm:$0xff] }
 0x746   : > { %13223 = vmatprep.subr.bf16.mxu0 %v15476_v22  ;;  %13510 = vmatprep.subr.bf16.mxu1 %v15478_v23  ;;  %v1966_v22 = vld [vmem:[%s16694_s28 + $0x3070] sm:$0xff]  ;;  %v1959_v23 = vld [vmem:[%s16694_s28 + $0x3038] sm:$0xff] }
 0x747   : > { %v15604_v27 = vcombine.high %v1958_v21, %v1966_v22  ;;  %v15603_v33 = vcombine.low %v1958_v21, %v1966_v22  ;;  %v15605_v47 = vcombine.low %v1959_v23, %v1967_v24  ;;  %v2070_v14 = vld [vmem:[%s16694_s28 + $0x33b0] sm:$0xff] }
 0x749   : > { %13224 = vmatpush1.bf16.msra.mxu0 %v15475_v28  ;;  %13511 = vmatpush1.bf16.msra.mxu1 %v15477_v29  ;;  %v15606_v28 = vcombine.high %v1959_v23, %v1967_v24  ;;  %v1974_v29 = vld [vmem:[%s16694_s28 + $0x30b0] sm:$0xff] }
 0x74a   : > { %13225 = vmatprep.subr.bf16.mxu0 %v15492_v30  ;;  %13512 = vmatprep.subr.bf16.mxu1 %v15494_v61  ;;  %v1982_v30 = vld [vmem:[%s16694_s28 + $0x30f0] sm:$0xff]  ;;  %v1975_v61 = vld [vmem:[%s16694_s28 + $0x30b8] sm:$0xff] }
 0x74b   : > { %v15620_v34 = vcombine.high %v1974_v29, %v1982_v30  ;;  %v15619_v40 = vcombine.low %v1974_v29, %v1982_v30  ;;  %v15621_v42 = vcombine.low %v1975_v61, %v1983_v31  ;;  %v2086_v24 = vld [vmem:[%s16694_s28 + $0x3430] sm:$0xff] }
 0x74d   : > { %13226 = vmatpush1.bf16.msra.mxu0 %v15491_v36  ;;  %13513 = vmatpush1.bf16.msra.mxu1 %v15493_v35  ;;  %v15622_v36 = vcombine.high %v1975_v61, %v1983_v31  ;;  %v1990_v35 = vld [vmem:[%s16694_s28 + $0x3130] sm:$0xff] }
 0x74e   : > { %13227 = vmatprep.subr.bf16.mxu0 %v15508_v37  ;;  %13514 = vmatprep.subr.bf16.mxu1 %v15510_v39  ;;  %v1998_v37 = vld [vmem:[%s16694_s28 + $0x3170] sm:$0xff]  ;;  %v1991_v39 = vld [vmem:[%s16694_s28 + $0x3138] sm:$0xff] }
 0x74f   : > { %v15636_v43 = vcombine.high %v1990_v35, %v1998_v37  ;;  %v15637_v50 = vcombine.low %v1991_v39, %v1999_v38  ;;  %v2102_v31 = vld [vmem:[%s16694_s28 + $0x34b0] sm:$0xff] }
 0x751   : > { %13228 = vmatpush1.bf16.msra.mxu0 %v15507_v44  ;;  %13515 = vmatpush1.bf16.msra.mxu1 %v15509_v45  ;;  %v15638_v44 = vcombine.high %v1991_v39, %v1999_v38  ;;  %v2006_v45 = vld [vmem:[%s16694_s28 + $0x31b0] sm:$0xff] }
 0x752   : > { %13229 = vmatprep.subr.bf16.mxu0 %v15524_v48  ;;  %13516 = vmatprep.subr.bf16.mxu1 %v15526_v49  ;;  %v2014_v48 = vld [vmem:[%s16694_s28 + $0x31f0] sm:$0xff]  ;;  %v2007_v49 = vld [vmem:[%s16694_s28 + $0x31b8] sm:$0xff] }
 0x753   : > { %v15652_v60 = vcombine.high %v2006_v45, %v2014_v48  ;;  %v15654_v46 = vcombine.high %v2007_v49, %v2015_v52  ;;  %v15651_v58 = vcombine.low %v2006_v45, %v2014_v48  ;;  %v2118_v38 = vld [vmem:[%s16694_s28 + $0x3530] sm:$0xff] }
 0x755   : > { %13230 = vmatpush1.bf16.msra.mxu0 %v15523_v54  ;;  %13517 = vmatpush1.bf16.msra.mxu1 %v15525_v55  ;;  %v2022_v54 = vld [vmem:[%s16694_s28 + $0x3230] sm:$0xff] }
 0x756   : > { %13231 = vmatprep.subr.bf16.mxu0 %v15540_v56  ;;  %13518 = vmatprep.subr.bf16.mxu1 %v15542_v17  ;;  %v2030_v55 = vld [vmem:[%s16694_s28 + $0x3270] sm:$0xff]  ;;  %v2023_v56 = vld [vmem:[%s16694_s28 + $0x3238] sm:$0xff] }
 0x757   : > { %v2031_v17 = vld [vmem:[%s16694_s28 + $0x3278] sm:$0xff]  ;;  %v15668_v11 = vcombine.high %v2022_v54, %v2030_v55 }
 0x758   : > { %v15670_v62 = vcombine.high %v2023_v56, %v2031_v17  ;;  %v15669_v53 = vcombine.low %v2023_v56, %v2031_v17  ;;  %v2150_v17 = vld [vmem:[%s16694_s28 + $0x3630] sm:$0xff] }
 0x759   : > { %13232 = vmatpush1.bf16.msra.mxu0 %v15539_v57  ;;  %13519 = vmatpush1.bf16.msra.mxu1 %v15541_v1  ;;  %v2046_v57 = vld [vmem:[%s16694_s28 + $0x32f0] sm:$0xff]  ;;  %v2039_v1 = vld [vmem:[%s16694_s28 + $0x32b8] sm:$0xff] }
 0x75a   : > { %13233 = vmatprep.subr.bf16.mxu0 %v15556_v2  ;;  %13520 = vmatprep.subr.bf16.mxu1 %v15558_v3  ;;  %v2047_v2 = vld [vmem:[%s16694_s28 + $0x32f8] sm:$0xff]  ;;  %v15667_v3 = vcombine.low %v2022_v54, %v2030_v55  ;;  %v15684_v5 = vcombine.high %v2038_v0, %v2046_v57 }
 0x75b   : > { %v15686_v4 = vcombine.high %v2039_v1, %v2047_v2  ;;  %v15685_v12 = vcombine.low %v2039_v1, %v2047_v2  ;;  %v2166_v2 = vld [vmem:[%s16694_s28 + $0x36b0] sm:$0xff] }
 0x75d   : > { %13234 = vmatpush1.bf16.msra.mxu0 %v15555_v6  ;;  %13521 = vmatpush1.bf16.msra.mxu1 %v15557_v8  ;;  %v2062_v6 = vld [vmem:[%s16694_s28 + $0x3370] sm:$0xff]  ;;  %v2055_v8 = vld [vmem:[%s16694_s28 + $0x3338] sm:$0xff] }
 0x75e   : > { %13235 = vmatprep.subr.bf16.mxu0 %v15572_v9  ;;  %13522 = vmatprep.subr.bf16.mxu1 %v15574_v10  ;;  %v2063_v9 = vld [vmem:[%s16694_s28 + $0x3378] sm:$0xff]  ;;  %v15683_v10 = vcombine.low %v2038_v0, %v2046_v57  ;;  %v15700_v32 = vcombine.high %v2054_v20, %v2062_v6 }
 0x75f   : > { %v15702_v13 = vcombine.high %v2055_v8, %v2063_v9  ;;  %v15701_v21 = vcombine.low %v2055_v8, %v2063_v9  ;;  %v2182_v9 = vld [vmem:[%s16694_s28 + $0x3730] sm:$0xff] }
 0x761   : > { %13236 = vmatpush1.bf16.msra.mxu0 %v15571_v16  ;;  %13523 = vmatpush1.bf16.msra.mxu1 %v15573_v18  ;;  %v2078_v16 = vld [vmem:[%s16694_s28 + $0x33f0] sm:$0xff]  ;;  %v2071_v18 = vld [vmem:[%s16694_s28 + $0x33b8] sm:$0xff] }
 0x762   : > { %13237 = vmatprep.subr.bf16.mxu0 %v15588_v19  ;;  %13524 = vmatprep.subr.bf16.mxu1 %v15590_v51  ;;  %v2079_v19 = vld [vmem:[%s16694_s28 + $0x33f8] sm:$0xff]  ;;  %v15699_v51 = vcombine.low %v2054_v20, %v2062_v6  ;;  %v15716_v22 = vcombine.high %v2070_v14, %v2078_v16 }
 0x763   : > { %v15718_v23 = vcombine.high %v2071_v18, %v2079_v19  ;;  %v15717_v29 = vcombine.low %v2071_v18, %v2079_v19  ;;  %v2198_v19 = vld [vmem:[%s16694_s28 + $0x37b0] sm:$0xff] }
 0x765   : > { %13238 = vmatpush1.bf16.msra.mxu0 %v15587_v7  ;;  %13525 = vmatpush1.bf16.msra.mxu1 %v15589_v26  ;;  %v2094_v7 = vld [vmem:[%s16694_s28 + $0x3470] sm:$0xff]  ;;  %v2087_v26 = vld [vmem:[%s16694_s28 + $0x3438] sm:$0xff] }
 0x766   : > { %13248 = vmatprep.subr.bf16.mxu0 %v15604_v27  ;;  %13535 = vmatprep.subr.bf16.mxu1 %v15606_v28  ;;  %v2095_v27 = vld [vmem:[%s16694_s28 + $0x3478] sm:$0xff]  ;;  %v15715_v28 = vcombine.low %v2070_v14, %v2078_v16  ;;  %v15732_v30 = vcombine.high %v2086_v24, %v2094_v7 }
 0x767   : > { %v15734_v61 = vcombine.high %v2087_v26, %v2095_v27 }
 0x768   : > { %13240 = vmatmul.mubr.bf16.vlgmr.msra.gmra.mrb[12].mxu0 %v17205_v15  ;;  %13527 = vmatmul.mubr.bf16.vlgmr.msra.gmra.mrb[12].mxu1 %v17205_v15  ;;  %v15635_v15 = vcombine.low %v1990_v35, %v1998_v37  ;;  %v15733_v35 = vcombine.low %v2087_v26, %v2095_v27 }
 0x769   : > { %13249 = vmatpush1.bf16.msra.mxu0 %v15603_v33  ;;  %13536 = vmatpush1.bf16.msra.mxu1 %v15605_v47  ;;  %v2110_v33 = vld [vmem:[%s16694_s28 + $0x34f0] sm:$0xff]  ;;  %v2103_v47 = vld [vmem:[%s16694_s28 + $0x34b8] sm:$0xff] }
 0x76a   : > { %13250 = vmatprep.subr.bf16.mxu0 %v15620_v34  ;;  %13537 = vmatprep.subr.bf16.mxu1 %v15622_v36  ;;  %v2111_v34 = vld [vmem:[%s16694_s28 + $0x34f8] sm:$0xff]  ;;  %v15731_v36 = vcombine.low %v2086_v24, %v2094_v7  ;;  %v15748_v37 = vcombine.high %v2102_v31, %v2110_v33 }
 0x76b   : > { %13280 = vmatprep.mubr.bf16.mxu0 %v17212_v25  ;;  %13567 = vmatprep.mubr.bf16.mxu1 %v17212_v25  ;;  %v15653_v25 = vcombine.low %v2007_v49, %v2015_v52  ;;  %v15750_v39 = vcombine.high %v2103_v47, %v2111_v34  ;;  %v15749_v45 = vcombine.low %v2103_v47, %v2111_v34  ;;  %v2134_v52 = vld [vmem:[%s16694_s28 + $0x35b0] sm:$0xff] }
 0x76d   : > { %13251 = vmatpush1.bf16.msra.mxu0 %v15619_v40  ;;  %13538 = vmatpush1.bf16.msra.mxu1 %v15621_v42  ;;  %v2126_v40 = vld [vmem:[%s16694_s28 + $0x3570] sm:$0xff]  ;;  %v2119_v42 = vld [vmem:[%s16694_s28 + $0x3538] sm:$0xff] }
 0x76e   : > { %13252 = vmatprep.subr.bf16.mxu0 %v15636_v43  ;;  %13539 = vmatprep.subr.bf16.mxu1 %v15638_v44  ;;  %v2127_v43 = vld [vmem:[%s16694_s28 + $0x3578] sm:$0xff]  ;;  %v15747_v44 = vcombine.low %v2102_v31, %v2110_v33  ;;  %v15764_v48 = vcombine.high %v2118_v38, %v2126_v40 }
 0x76f   : > { %v15766_v49 = vcombine.high %v2119_v42, %v2127_v43  ;;  %v15765_v54 = vcombine.low %v2119_v42, %v2127_v43 }
 0x771   : > { %13253 = vmatpush1.bf16.msra.mxu0 %v15635_v15  ;;  %13540 = vmatpush1.bf16.msra.mxu1 %v15637_v50  ;;  %v2142_v15 = vld [vmem:[%s16694_s28 + $0x35f0] sm:$0xff]  ;;  %v2135_v50 = vld [vmem:[%s16694_s28 + $0x35b8] sm:$0xff] }
 0x772   : > { %13254 = vmatprep.subr.bf16.mxu0 %v15652_v60  ;;  %13541 = vmatprep.subr.bf16.mxu1 %v15654_v46  ;;  %v2143_v60 = vld [vmem:[%s16694_s28 + $0x35f8] sm:$0xff]  ;;  %v15763_v46 = vcombine.low %v2118_v38, %v2126_v40  ;;  %v15780_v55 = vcombine.high %v2134_v52, %v2142_v15 }
 0x773   : > { %v15782_v56 = vcombine.high %v2135_v50, %v2143_v60  ;;  %v15781_v0 = vcombine.low %v2135_v50, %v2143_v60  ;;  %v411_v40 = vld [vmem:[#allocation2 + $0x18] sm:$0xff] }
 0x775   : > { %13255 = vmatpush1.bf16.msra.mxu0 %v15651_v58  ;;  %13542 = vmatpush1.bf16.msra.mxu1 %v15653_v25  ;;  %v2158_v58 = vld [vmem:[%s16694_s28 + $0x3670] sm:$0xff]  ;;  %v2151_v25 = vld [vmem:[%s16694_s28 + $0x3638] sm:$0xff] }
 0x776   : > { %13256 = vmatprep.subr.bf16.mxu0 %v15668_v11  ;;  %13543 = vmatprep.subr.bf16.mxu1 %v15670_v62  ;;  %v2159_v11 = vld [vmem:[%s16694_s28 + $0x3678] sm:$0xff]  ;;  %v15779_v62 = vcombine.low %v2134_v52, %v2142_v15  ;;  %v15796_v57 = vcombine.high %v2150_v17, %v2158_v58 }
 0x777   : > { %v15798_v1 = vcombine.high %v2151_v25, %v2159_v11  ;;  %v15797_v20 = vcombine.low %v2151_v25, %v2159_v11 }
 0x779   : > { %13257 = vmatpush1.bf16.msra.mxu0 %v15667_v3  ;;  %13544 = vmatpush1.bf16.msra.mxu1 %v15669_v53  ;;  %v2174_v3 = vld [vmem:[%s16694_s28 + $0x36f0] sm:$0xff]  ;;  %v2167_v53 = vld [vmem:[%s16694_s28 + $0x36b8] sm:$0xff] }
 0x77a   : > { %13258 = vmatprep.subr.bf16.mxu0 %v15684_v5  ;;  %13545 = vmatprep.subr.bf16.mxu1 %v15686_v4  ;;  %v2175_v5 = vld [vmem:[%s16694_s28 + $0x36f8] sm:$0xff]  ;;  %v15795_v4 = vcombine.low %v2150_v17, %v2158_v58  ;;  %v15812_v6 = vcombine.high %v2166_v2, %v2174_v3 }
 0x77b   : > { %v15814_v8 = vcombine.high %v2167_v53, %v2175_v5  ;;  %v15813_v14 = vcombine.low %v2167_v53, %v2175_v5 }
 0x77d   : > { %13259 = vmatpush1.bf16.msra.mxu0 %v15683_v10  ;;  %13546 = vmatpush1.bf16.msra.mxu1 %v15685_v12  ;;  %v2190_v10 = vld [vmem:[%s16694_s28 + $0x3770] sm:$0xff]  ;;  %v2183_v12 = vld [vmem:[%s16694_s28 + $0x3738] sm:$0xff] }
 0x77e   : > { %13260 = vmatprep.subr.bf16.mxu0 %v15700_v32  ;;  %13547 = vmatprep.subr.bf16.mxu1 %v15702_v13  ;;  %v2191_v32 = vld [vmem:[%s16694_s28 + $0x3778] sm:$0xff]  ;;  %v15811_v13 = vcombine.low %v2166_v2, %v2174_v3  ;;  %v15828_v16 = vcombine.high %v2182_v9, %v2190_v10 }
 0x77f   : > { %v15830_v18 = vcombine.high %v2183_v12, %v2191_v32  ;;  %v15829_v24 = vcombine.low %v2183_v12, %v2191_v32 }
 0x781   : > { %13261 = vmatpush1.bf16.msra.mxu0 %v15699_v51  ;;  %13548 = vmatpush1.bf16.msra.mxu1 %v15701_v21  ;;  %v2206_v51 = vld [vmem:[%s16694_s28 + $0x37f0] sm:$0xff]  ;;  %v2199_v21 = vld [vmem:[%s16694_s28 + $0x37b8] sm:$0xff] }
 0x782   : > { %13262 = vmatprep.subr.bf16.mxu0 %v15716_v22  ;;  %13549 = vmatprep.subr.bf16.mxu1 %v15718_v23  ;;  %v2207_v22 = vld [vmem:[%s16694_s28 + $0x37f8] sm:$0xff]  ;;  %v15827_v23 = vcombine.low %v2182_v9, %v2190_v10  ;;  %v15844_v7 = vcombine.high %v2198_v19, %v2206_v51  ;;  %v15843_v27 = vcombine.low %v2198_v19, %v2206_v51 }
 0x783   : > { %v15846_v26 = vcombine.high %v2199_v21, %v2207_v22 }
 0x785   : > { %13263 = vmatpush1.bf16.msra.mxu0 %v15715_v28  ;;  %13550 = vmatpush1.bf16.msra.mxu1 %v15717_v29  ;;  %v15845_v28 = vcombine.low %v2199_v21, %v2207_v22 }
 0x786   : > { %13264 = vmatprep.subr.bf16.mxu0 %v15732_v30  ;;  %13551 = vmatprep.subr.bf16.mxu1 %v15734_v61 }
 0x789   : > { %13265 = vmatpush1.bf16.msra.mxu0 %v15731_v36  ;;  %13552 = vmatpush1.bf16.msra.mxu1 %v15733_v35 }
 0x78a   : > { %13266 = vmatprep.subr.bf16.mxu0 %v15748_v37  ;;  %13553 = vmatprep.subr.bf16.mxu1 %v15750_v39 }
 0x78d   : > { %13267 = vmatpush1.bf16.msra.mxu0 %v15747_v44  ;;  %13554 = vmatpush1.bf16.msra.mxu1 %v15749_v45  ;;  %v13677_v44 = vld [vmem:[#allocation2 + $0x8] sm:$0xff] (!%p15847_p0)  ;;  %v13678_v45 = vld [vmem:[#allocation2 + $0x10] sm:$0xff] (!%p15847_p0) }
 0x78e   : > { %13268 = vmatprep.subr.bf16.mxu0 %v15764_v48  ;;  %13555 = vmatprep.subr.bf16.mxu1 %v15766_v49  ;;  %v13681_v49 = vmax.f32 (!%p15847_p0), %v13677_v44, 0.0  ;;  %v13682_v15 = vmax.f32 (!%p15847_p0), %v13678_v45, 0.0 }
 0x790   : > { %v13729_v17 = vrot.slane (!%p15847_p0), %v13682_v15, %v17513_v63 }
 0x791   : > { %13269 = vmatpush1.bf16.msra.mxu0 %v15763_v46  ;;  %13556 = vmatpush1.bf16.msra.mxu1 %v15765_v54  ;;  %v13705_v54 = vcombine.high (!%p15847_p0), %v13681_v49, %v13681_v49 }
 0x792   : > { %13270 = vmatprep.subr.bf16.mxu0 %v15780_v55  ;;  %13557 = vmatprep.subr.bf16.mxu1 %v15782_v56  ;;  %v13712_v55 = vrot.slane (!%p15847_p0), %v13681_v49, %v17513_v63  ;;  %v13722_v56 = vcombine.high (!%p15847_p0), %v13682_v15, %v13682_v15  ;;  %v13737_v2 = vcombine.high (!%p15847_p0), %v13729_v17, %v13729_v17 }
 0x794   : > { %v15852_v10 = vpack.c.bf16 (!%p15847_p0), %v13737_v2, %v13729_v17 }
 0x795   : > { %13271 = vmatpush1.bf16.msra.mxu0 %v15779_v62  ;;  %13558 = vmatpush1.bf16.msra.mxu1 %v15781_v0  ;;  %v13719_v0 = vrot.slane (!%p15847_p0), %v13705_v54, %v17513_v63 }
 0x796   : > { %13272 = vmatprep.subr.bf16.mxu0 %v15796_v57  ;;  %13559 = vmatprep.subr.bf16.mxu1 %v15798_v1  ;;  %v13720_v57 = vcombine.high (!%p15847_p0), %v13712_v55, %v13712_v55  ;;  %v13736_v1 = vrot.slane (!%p15847_p0), %v13722_v56, %v17513_v63  ;;  %v13863_v51 = vrot.slane (!%p15847_p0), %v15852_v10, %v16740_v41 }
 0x799   : > { %13273 = vmatpush1.bf16.msra.mxu0 %v15795_v4  ;;  %13560 = vmatpush1.bf16.msra.mxu1 %v15797_v20  ;;  %v13721_v4 = vcombine.high (!%p15847_p0), %v13719_v0, %v13719_v0 }
 0x79a   : > { %13274 = vmatprep.subr.bf16.mxu0 %v15812_v6  ;;  %13561 = vmatprep.subr.bf16.mxu1 %v15814_v8  ;;  %v15850_v6 = vpack.c.bf16 (!%p15847_p0), %v13720_v57, %v13712_v55  ;;  %v13738_v8 = vcombine.high (!%p15847_p0), %v13736_v1, %v13736_v1 }
 0x79d   : > { %13275 = vmatpush1.bf16.msra.mxu0 %v15811_v13  ;;  %13562 = vmatpush1.bf16.msra.mxu1 %v15813_v14  ;;  %v15851_v13 = vpack.c.bf16 (!%p15847_p0), %v13721_v4, %v13719_v0 }
 0x79e   : > { %13276 = vmatprep.subr.bf16.mxu0 %v15828_v16  ;;  %13563 = vmatprep.subr.bf16.mxu1 %v15830_v18  ;;  %v13828_v16 = vrot.slane (!%p15847_p0), %v15850_v6, %v16740_v41  ;;  %v15853_v18 = vpack.c.bf16 (!%p15847_p0), %v13738_v8, %v13736_v1 }
 0x79f   : > { %v13835_v22 = vrot.slane (!%p15847_p0), %v15851_v13, %v16740_v41 }
 0x7a1   : > { %13277 = vmatpush1.bf16.msra.mxu0 %v15827_v23  ;;  %13564 = vmatpush1.bf16.msra.mxu1 %v15829_v24  ;;  %v13870_v23 = vrot.slane (!%p15847_p0), %v15853_v18, %v16740_v41 }
 0x7a2   : > { %13278 = vmatprep.subr.bf16.mxu0 %v15844_v7  ;;  %13565 = vmatprep.subr.bf16.mxu1 %v15846_v26  ;;  %v13837_v26 = vcombine.low (!%p15847_p0), %v13828_v16, %v13835_v22 }
 0x7a5   : > { %13279 = vmatpush1.bf16.msra.mxu0 %v15843_v27  ;;  %13566 = vmatpush1.bf16.msra.mxu1 %v15845_v28  ;;  %v13885_v27 = vcombine.low (!%p15847_p0), %v13863_v51, %v13870_v23 }
 0x7a8   : > { %13281 = vmatmul.mubr.bf16.vlgmr.msra.gmra.mrb[12].mxu0 %v17280_v59  ;;  %13568 = vmatmul.mubr.bf16.vlgmr.msra.gmra.mrb[12].mxu1 %v17280_v59  ;;  %v13676_v59 = vld [vmem:[#allocation2] sm:$0xff] (!%p15847_p0) }
 0x7a9   : > { %v13680_v48 = vmax.f32 (!%p15847_p0), %v13676_v59, 0.0 }
 0x7ab   : > { %v13688_v60 = vcombine.high (!%p15847_p0), %v13680_v48, %v13680_v48  ;;  %v13695_v46 = vrot.slane (!%p15847_p0), %v13680_v48, %v17513_v63 }
 0x7ad   : > { %v13702_v11 = vrot.slane (!%p15847_p0), %v13688_v60, %v17513_v63  ;;  %v13703_v62 = vcombine.high (!%p15847_p0), %v13695_v46, %v13695_v46 }
 0x7af   : > { %v13704_v5 = vcombine.high (!%p15847_p0), %v13702_v11, %v13702_v11  ;;  %v15848_v20 = vpack.c.bf16 (!%p15847_p0), %v13703_v62, %v13695_v46 }
 0x7b1   : > { %v15849_v32 = vpack.c.bf16 (!%p15847_p0), %v13704_v5, %v13702_v11  ;;  %v13814_v14 = vrot.slane (!%p15847_p0), %v15848_v20, %v16740_v41 }
 0x7b3   : > { %v13821_v21 = vrot.slane (!%p15847_p0), %v15849_v32, %v16740_v41 }
 0x7b5   : > { %v13836_v7 = vcombine.low (!%p15847_p0), %v13814_v14, %v13821_v21 }
 0x87b   : > { %v13282_v29 = vpop.f32.mrb[12].mxu0  ;;  %v13569_v30 = vpop.f32.mrb[12].mxu1 }
 0x87c   : > { %v13284_v61 = vpop.f32.mrb[13].mxu0  ;;  %v13571_v33 = vpop.f32.mrb[13].mxu1 }
 0x87d   : > { %v13643_v31 = vcombine.low %v13282_v29, %v13284_v61  ;;  %v13286_v47 = vpop.f32.mrb[14].mxu0  ;;  %v13644_v34 = vcombine.low %v13569_v30, %v13571_v33  ;;  %v13573_v36 = vpop.f32.mrb[14].mxu1  ;;  %v13844_v29 = vrot.slane (!%p15847_p0), %v13836_v7, %v16740_v41  ;;  %v13851_v30 = vrot.slane (!%p15847_p0), %v13837_v26, %v16740_v41 }
 0x87e   : > { %v13287_v35 = vpop.f32.mrb[15].mxu0  ;;  %v13574_v39 = vpop.f32.mrb[15].mxu1  ;;  %v13893_v61 = vrot.slane (!%p15847_p0), %v13885_v27, %v16740_v41 }
 0x87f   : > { %v13651_v37 = vrot.slane %v13643_v31, %v17513_v63  ;;  %v13658_v38 = vrot.slane %v13644_v34, %v17513_v63  ;;  %13675 = sbr.rel (%p15847_p0) target bundleno = 2208 (0x8a0), region = 52  ;;  %v13852_v33 = vcombine.low (!%p15847_p0), %v13844_v29, %v13851_v30 }
 0x881   : > { %v13659_v42 = vcombine.low %v13651_v37, %v13658_v38  ;;  %13904 = vst [vmem:[%s16707_s24] sm:$0xff] (!%p15847_p0), %v13852_v33 }
 0x883   : > { %v13667_v43 = vadd.f32 %v13659_v42, %v411_v40 }
 0x885   : > { %13671 = vst [vmem:[#allocation2 + $0x18] sm:$0xff] %v13667_v43 }
 0x88c   : > { %v13679_v52 = vld [vmem:[#allocation2 + $0x18] sm:$0xff] }
 0x88d   : > { %v13683_v50 = vmax.f32 %v13679_v52, 0.0 }
 0x88f   : > { %v13739_v58 = vcombine.high %v13683_v50, %v13683_v50  ;;  %v13746_v25 = vrot.slane %v13683_v50, %v17513_v63 }
 0x891   : > { %v13753_v3 = vrot.slane %v13739_v58, %v17513_v63  ;;  %v13754_v53 = vcombine.high %v13746_v25, %v13746_v25 }
 0x893   : > { %v13755_v9 = vcombine.high %v13753_v3, %v13753_v3  ;;  %v15854_v12 = vpack.c.bf16 %v13754_v53, %v13746_v25 }
 0x895   : > { %v15855_v19 = vpack.c.bf16 %v13755_v9, %v13753_v3  ;;  %v13877_v63 = vrot.slane %v15854_v12, %v16740_v41 }
 0x897   : > { %v13884_v24 = vrot.slane %v15855_v19, %v16740_v41 }
 0x899   : > { %v13886_v28 = vcombine.low %v13877_v63, %v13884_v24 }
 0x89b   : > { %v13900_v31 = vrot.slane %v13886_v28, %v16740_v41 }
 0x89d   : > { %v13901_v47 = vcombine.low %v13893_v61, %v13900_v31 }
 0x89f   : > { %13905 = vst [vmem:[%s16707_s24 + $0x8] sm:$0xff] %v13901_v47 }
 0x8a0 PF: > { %s15863_s18 = sshll.u32 %s16392_s19, 8  ;;  %s18839_s27 = sld [smem:[#allocation17_spill]] }
 0x8a1   : > { %s13921_s9 = sshll.u32 %s16707_s24, 4  ;;  %s13907_s3 = scalar_lea.sflag [#allocation5], %s226_s25  ;;  %s13922_s9 = int_to_ptr.vmem [resolvable:$true] %s13921_s9 }
 0x8a2   : > { %s16274_s26 = scalar_lea.vmem %s13922_s9, 256  ;;  %p18840_p13 = scmp.ne.s32.totalorder %s18829_s15, 0 }
 0x8a3   : > { %p16275_p4 = scmp.ne.s32.totalorder %s13922_s9, %s16274_s26  ;;  %s16417_s0 = smov [#allocation9]  }
 0x8a4   : > { %s16278_s28 = sshll.u32 %s16417_s0, 4  ;;  %s16279_s28 = int_to_ptr.vmem [resolvable:$false] %s16278_s28 }
 0x8a5   : > { %p16276_p1 = pnand %p16275_p4, %p18840_p13  ;;  %s16280_s23 = scalar_lea.vmem %s16279_s28, 512 }
 0x8a6   : > { %s18744_s11 = scalar_lea.hbm %s18839_s27, %s15863_s18  ;;  %p16281_p9 = scmp.lt.s32.totalorder %s13922_s9, %s16279_s28 }
 0x8a7   : > { %p16277_p7 = pneg %p16276_p1  ;;  %p16282_p3 = scmp.lt.s32.totalorder %s16280_s23, %s16274_s26 }
 0x8a9   : > { %p16283_p6 = por %p16282_p3, %p16281_p9 }
 0x8ab   : > { %p16284_p10 = pnand %p16283_p6, %p16277_p7 }
 0x8ad   : > { %16287 = shalt.err (!%p16284_p10)
}
 0x8ae   : > { %s16288_s19 = scalar_lea.hbm %s18744_s11, 256  ;;  %s16292_s24 = scalar_lea.hbm %s18839_s27, 512 }
 0x8af   : > { %p16289_p11 = scmp.ne.s32.totalorder %s18744_s11, %s16288_s19  ;;  %p16293_p12 = scmp.lt.u32.totalorder %s18744_s11, %s18839_s27 }
 0x8b0   : > { %p16294_p5 = scmp.lt.u32.totalorder %s16292_s24, %s16288_s19  ;;  %p16296_p4 = scmp.lt.u32.totalorder %s16288_s19, %s18744_s11 }
 0x8b1   : > { %p16290_p2 = pnand %p16289_p11, %p18840_p13 }
 0x8b2   : > { %p16295_p0 = por %p16294_p5, %p16293_p12 }
 0x8b3   : > { %p16291_p8 = pneg %p16290_p2 }
 0x8b4   : > { %p16297_p1 = por %p16296_p4, %p16295_p0 }
 0x8b6   : > { %p16298_p7 = pnand %p16297_p1, %p16291_p8 }
 0x8b8   : > { %16301 = shalt.err (!%p16298_p7)
}
 0x8b9   : > { %16066 = dma.vmem_to_hbm [thread:$0]  (%p18840_p13), %s13922_s9, 256, %s18744_s11, %s13907_s3  }
 0x8ba PF: > { %p16086_p9 = scmp.ge.s32.totalorder %s16404_s22, 2  ;;  %s13933_s18 = sand.u32 1, %s16364_s12  }
 0x8bb   : > { %p18841_p3 = scmp.ne.s32.totalorder %s18832_s29, 0  ;;  %s13934_s7 = scalar_lea.sflag [#allocation5], %s13933_s18 }
 0x8bd   : > { %p16080_p6 = pnand %p16086_p9, %p18841_p3 }
 0x8bf   : > { %16359 = dma.done.wait (!%p16080_p6), %s13934_s7, 256  }
 0x8c0   : > { %16361 = vsyncadd (!%p16080_p6), %s13934_s7, 4294967040  ;;  %s20_s22 = sadd.s32 1, %s16404_s22   ;;  %s18842_s4 = sld [smem:[#allocation14_spill]] }
 0x8c1   : > { %p17_p10 = scmp.ge.s32.totalorder %s20_s22, 30   ;;  %s18843_s11 = sld [smem:[#allocation15_spill]] }
 0x8c2   : > { %s18844_s12 = smov %s16368_s13  ;;  %s18845_s13 = smov %s16372_s14 }
 0x8c3   : > { %s18846_s14 = smov %s16617_s8  ;;  %s18847_s15 = smov %s16380_s16 }
 0x8c4   : > { %s18848_s16 = smov %s16384_s17  ;;  %s18849_s17 = smov %s16523_s10 }
 0x8c5   : > { %s18850_s18 = smov %s16396_s20  ;;  %s18851_s19 = smov %s16400_s21 }
 0x8c6   : > { %s18852_s20 = smov %s18842_s4  ;;  %19 = sbr.rel (!%p17_p10) target bundleno = 13 (0xd), region = 102 }
 0x8c7   : > { %s18853_s21 = smov %s18843_s11 }
 0x8cd   :  { %13939 = vsyncpa [#allocation4], 1 }
 0x8ce   :  { %13941 = vsyncpa [#allocation4 + $0x1], 1 }
 0x8cf   :  { %13942 = vsyncpa [#allocation7], 1 }
 0x8d0   :  { %13944 = vsyncpa [#allocation7 + $0x1], 1 }
 0x8d1   :  { %13945 = vsyncpa [#allocation5], 1 }
 0x8d2   :  { %13947 = vsyncpa [#allocation5 + $0x1], 1 }

</bundles_post_ra>
